<compile_context>
chip_gen: v7x
topology: tpu7x:2x2x1
jax: 0.10.0
libtpu: 0.0.40
codegen_flags: <defaults>
</compile_context>

<pallas_src>
import functools

import jax
import jax.numpy as jnp
import numpy as np
from jax import lax
from jax.experimental import pallas as pl
from jax.experimental.pallas import tpu as pltpu

EPS = 1e-5     # nn.InstanceNorm2d default eps (affine=False, no running stats)
SLOPE = 0.2    # LeakyReLU negative slope


# ----------------------------------------------------------------------------
# Fused Pallas kernel: all conv layers for ONE batch element (grid over batch)
# ----------------------------------------------------------------------------
def _fused_disc_kernel(*refs, cfgs, Hp, Wp):
    """refs layout:
      refs[0]            : (P, 9*Cin0)  layer-0 im2col patches, flat padded coords
      refs[1]            : (P, 1)       interior mask (1 inside, 0 on the border)
      refs[2 : 2+L]      : per-layer weights
                           layer 0: (9*Cin0, Cout0)       (single matmul)
                           layer l: (9, Cin_l, Cout_l)    (one (Cin,Cout) slab / tap)
      refs[2+L : 2+2L]   : per-layer biases, shape (1, Cout_l)
      refs[2+2L]         : output (P, Cout_last)
      refs[2+2L+1]       : VMEM accumulator scratch (P, max Cout)
    """
    n_layers = len(cfgs)
    p0_ref, mask_ref = refs[0], refs[1]
    w_refs = refs[2:2 + n_layers]
    b_refs = refs[2 + n_layers:2 + 2 * n_layers]
    o_ref = refs[2 + 2 * n_layers]
    acc_ref = refs[2 + 2 * n_layers + 1]

    P = Hp * Wp
    S = (Hp - 2) * (Wp - 2)          # number of valid (interior) spatial positions
    inv_s = 1.0 / float(S)
    mask = mask_ref[...]             # (P, 1)

    x = p0_ref[...]                  # (P, K0), f32
    for l, (cin, cout, norm, act) in enumerate(cfgs):
        if l == 0:
            # Stride-2 layer: patches were pre-gathered by the wrapper -> one matmul.
            y = jnp.dot(x, w_refs[0][...], preferred_element_type=jnp.float32)
        else:
            # Stride-1 3x3 conv as 9 shifted, accumulated dots.  `x` is the previous
            # activation in flat padded coordinates with a zero border, so the flat
            # row shift (di-1)*Wp + (dj-1) realises the spatial tap and the zero
            # border realises the conv padding.  Border rows of the accumulator are
            # garbage and get masked away below.
            acc_ref[...] = jnp.zeros_like(acc_ref)
            for di in range(3):
                for dj in range(3):
                    contrib = jnp.dot(x, w_refs[l][di * 3 + dj],
                                      preferred_element_type=jnp.float32)   # (P, cout)
                    off = (di - 1) * Wp + (dj - 1)
                    src0 = max(0, off)
                    dst0 = max(0, -off)
                    length = P - abs(off)
                    acc_ref[dst0:dst0 + length, :cout] += contrib[src0:src0 + length, :]
            y = acc_ref[:, :cout]

        y = (y + b_refs[l][...]) * mask          # bias; zero the padded border rows
        if norm:
            # InstanceNorm2d: single-pass stats over the S interior positions only
            # (border rows are zero and are excluded by dividing by S, not P).
            mu = jnp.sum(y, axis=0, keepdims=True) * inv_s
            ms = jnp.sum(y * y, axis=0, keepdims=True) * inv_s
            var = jnp.maximum(ms - mu * mu, 0.0)
            y = (y - mu) * lax.rsqrt(var + EPS)
        if act:
            y = jnp.where(y >= 0.0, y, SLOPE * y)
        x = y * mask                              # keep the border zero for next layer
    o_ref[...] = x.astype(o_ref.dtype)


# ----------------------------------------------------------------------------
# Wrapper glue
# ----------------------------------------------------------------------------
def _layer0_patches_padded(x_nhwc, stride):
    """(N,H,W,C) -> (N, P, 9C) im2col patches of the stride-`stride` 3x3/pad-1 conv,
    laid out in flat *padded* output coordinates (P=(Ho+2)*(Wo+2), zero border)."""
    N, H, W, C = x_nhwc.shape
    xp = jnp.pad(x_nhwc, ((0, 0), (1, 1), (1, 1), (0, 0)))
    Ho = (H + 2 - 3) // stride + 1
    Wo = (W + 2 - 3) // stride + 1
    cols = []
    for i in range(3):
        for j in range(3):
            cols.append(xp[:, i:i + stride * (Ho - 1) + 1:stride,
                           j:j + stride * (Wo - 1) + 1:stride, :])
    p = jnp.concatenate(cols, axis=-1)                      # (N, Ho, Wo, 9C)
    p = jnp.pad(p, ((0, 0), (1, 1), (1, 1), (0, 0)))        # (N, Ho+2, Wo+2, 9C)
    return p.reshape(N, (Ho + 2) * (Wo + 2), 9 * C), Ho, Wo


def nlayer_discriminator(params, x_nchw):
    # PyTorch forward: self.model(input.squeeze(0)); torch only squeezes dim0==1.
    if x_nchw.shape[0] == 1:
        x_nchw = jnp.squeeze(x_nchw, axis=0)
    unbatched = x_nchw.ndim == 3          # Conv2d accepts unbatched 3-D input
    if unbatched:
        x_nchw = x_nchw[None]

    x = jnp.transpose(x_nchw, (0, 2, 3, 1))                 # NCHW -> NHWC
    N, H, W, cin0 = x.shape

    p0, Ho, Wo = _layer0_patches_padded(x, params[0]["stride"])
    Hp, Wp = Ho + 2, Wo + 2
    P = Hp * Wp
    K0 = 9 * cin0

    # Interior mask in flat padded coordinates.
    mh = ((jnp.arange(Hp) >= 1) & (jnp.arange(Hp) <= Ho)).astype(jnp.float32)
    mw = ((jnp.arange(Wp) >= 1) & (jnp.arange(Wp) <= Wo)).astype(jnp.float32)
    mask = (mh[:, None] * mw[None, :]).reshape(P, 1)

    cfgs, w_in, b_in = [], [], []
    for l, prm in enumerate(params):
        w, b = prm["w"], prm["b"]
        cin, cout = w.shape[2], w.shape[3]
        if l == 0:
            w_in.append(w.reshape(K0, cout))                # (kh,kw,Cin) == im2col order
        else:
            assert prm["stride"] == 1, "only the first conv may be strided"
            w_in.append(w.reshape(9, cin, cout))            # one (Cin,Cout) slab per tap
        b_in.append(b.reshape(1, cout))
        cfgs.append((cin, cout, prm["norm"], prm["act"]))
    cfgs = tuple(cfgs)
    c_last = cfgs[-1][1]
    c_max = max(c[1] for c in cfgs)

    in_specs = [
        pl.BlockSpec((None, P, K0), lambda n: (n, 0, 0)),   # layer-0 patches (per batch)
        pl.BlockSpec((P, 1), lambda n: (0, 0)),             # interior mask (resident)
    ]
    for l, (cin, cout, _, _) in enumerate(cfgs):
        if l == 0:
            in_specs.append(pl.BlockSpec((K0, cout), lambda n: (0, 0)))
        else:
            in_specs.append(pl.BlockSpec((9, cin, cout), lambda n: (0, 0, 0)))
    for (_, cout, _, _) in cfgs:
        in_specs.append(pl.BlockSpec((1, cout), lambda n: (0, 0)))

    flops = 2 * N * P * sum(9 * c[0] * c[1] for c in cfgs)
    transcendentals = N * sum(c[1] for c in cfgs if c[2])
    bytes_accessed = 4 * (N * P * K0 + P
                          + sum(int(np.prod(w.shape)) for w in w_in)
                          + sum(int(np.prod(b.shape)) for b in b_in)
                          + N * P * c_last)

    kernel = functools.partial(_fused_disc_kernel, cfgs=cfgs, Hp=Hp, Wp=Wp)

    out = pl.pallas_call(
        kernel,
        out_shape=jax.ShapeDtypeStruct((N, P, c_last), jnp.float32),
        grid=(N,),
        in_specs=in_specs,
        out_specs=pl.BlockSpec((None, P, c_last), lambda n: (n, 0, 0)),
        scratch_shapes=[pltpu.VMEM((P, c_max), jnp.float32)],
        compiler_params=pltpu.CompilerParams(dimension_semantics=("parallel",)),
        cost_estimate=pl.CostEstimate(flops=flops, transcendentals=transcendentals,
                                      bytes_accessed=bytes_accessed),
    )(p0, mask, *w_in, *b_in)

    out = out.reshape(N, Hp, Wp, c_last)[:, 1:1 + Ho, 1:1 + Wo, :]
    out = jnp.transpose(out, (0, 3, 1, 2))                  # NHWC -> NCHW
    if unbatched:
        out = out[0]
    return out


# ----------------------------------------------------------------------------
# Parameters (same layer schedule / shapes as the PyTorch module)
# ----------------------------------------------------------------------------
def init_params(key, input_nc, ndf=8, n_layers=3):
    cfgs = [(input_nc, ndf, 2, True, True)]                 # (cin, cout, stride, norm, act)
    nf_mult = 1
    for n in range(1, n_layers):
        nf_prev, nf_mult = nf_mult, min(2 ** n, 8)
        cfgs.append((ndf * nf_prev, ndf * nf_mult, 1, True, True))
    nf_prev, nf_mult = nf_mult, min(2 ** n_layers, 8)
    cfgs.append((ndf * nf_prev, ndf * nf_mult, 1, True, True))
    cfgs.append((ndf * nf_mult, 1, 1, False, False))        # final conv: no norm/act

    params = []
    for (cin, cout, stride, norm, act) in cfgs:
        key, kw_, kb_ = jax.random.split(key, 3)
        w = 0.05 * jax.random.normal(kw_, (3, 3, cin, cout), jnp.float32)   # HWIO
        b = 0.05 * jax.random.normal(kb_, (cout,), jnp.float32)
        params.append(dict(w=w, b=b, stride=stride, norm=norm, act=act))
    return params


# ----------------------------------------------------------------------------
# Pure-JAX reference (correctness check only)
# ----------------------------------------------------------------------------
def reference_forward(params, x_nchw):
    if x_nchw.shape[0] == 1:
        x_nchw = jnp.squeeze(x_nchw, axis=0)
    x = x_nchw
    for p in params:
        w_oihw = jnp.transpose(p["w"], (3, 2, 0, 1))        # HWIO -> OIHW
        x = lax.conv_general_dilated(
            x, w_oihw, window_strides=(p["stride"], p["stride"]),
            padding=((1, 1), (1, 1)),
            dimension_numbers=("NCHW", "OIHW", "NCHW"))
        x = x + p["b"][None, :, None, None]
        if p["norm"]:
            mu = jnp.mean(x, axis=(2, 3), keepdims=True)
            var = jnp.mean((x - mu) ** 2, axis=(2, 3), keepdims=True)
            x = (x - mu) / jnp.sqrt(var + EPS)
        if p["act"]:
            x = jnp.where(x >= 0, x, SLOPE * x)
    return x


if __name__ == "__main__":
    key = jax.random.PRNGKey(0)
    k_in, k_par = jax.random.split(key)

    # Input: NCHW (2, 4, 16, 16); `.squeeze(0)` is a no-op here, as in torch.
    x = jax.random.normal(k_in, (2, 4, 16, 16), jnp.float32)
    params = init_params(k_par, input_nc=4, ndf=8, n_layers=3)

    out = jax.block_until_ready(nlayer_discriminator(params, x))
    assert out.shape == (2, 1, 8, 8), out.shape

    ref = jax.block_until_ready(reference_forward(params, x))
    np.testing.assert_allclose(np.asarray(out), np.asarray(ref), rtol=1e-2, atol=1e-2)

    print("KERNEL_OK")
</pallas_src>

<mosaic_0001>
module attributes {stable_mosaic.version = 11 : i64} {
  func.func @_fused_disc_kernel(%arg0: i32, %arg1: memref<1x100x36xf32, #tpu.memory_space<vmem>>, %arg2: memref<100x1xf32, #tpu.memory_space<vmem>>, %arg3: memref<36x8xf32, #tpu.memory_space<vmem>>, %arg4: memref<9x8x16xf32, #tpu.memory_space<vmem>>, %arg5: memref<9x16x32xf32, #tpu.memory_space<vmem>>, %arg6: memref<9x32x64xf32, #tpu.memory_space<vmem>>, %arg7: memref<9x64x1xf32, #tpu.memory_space<vmem>>, %arg8: memref<1x8xf32, #tpu.memory_space<vmem>>, %arg9: memref<1x16xf32, #tpu.memory_space<vmem>>, %arg10: memref<1x32xf32, #tpu.memory_space<vmem>>, %arg11: memref<1x64xf32, #tpu.memory_space<vmem>>, %arg12: memref<1x1xf32, #tpu.memory_space<vmem>>, %arg13: memref<1x100x1xf32, #tpu.memory_space<vmem>>, %arg14: memref<100x64xf32, #tpu.memory_space<vmem>>) attributes {dimension_semantics = [#tpu.dimension_semantics<parallel>], iteration_bounds = array<i64: 2>, scalar_prefetch = 0 : i64, scratch_operands = 1 : i64, tpu.core_type = #tpu.core_type<tc>, window_params = [{transform_indices = @transform_0, window_bounds = array<i64: 1, 100, 36>}, {pipeline_mode = #tpu.pipeline_mode<synchronous>, transform_indices = @transform_1, window_bounds = array<i64: 100, 1>}, {pipeline_mode = #tpu.pipeline_mode<synchronous>, transform_indices = @transform_2, window_bounds = array<i64: 36, 8>}, {pipeline_mode = #tpu.pipeline_mode<synchronous>, transform_indices = @transform_3, window_bounds = array<i64: 9, 8, 16>}, {pipeline_mode = #tpu.pipeline_mode<synchronous>, transform_indices = @transform_4, window_bounds = array<i64: 9, 16, 32>}, {pipeline_mode = #tpu.pipeline_mode<synchronous>, transform_indices = @transform_5, window_bounds = array<i64: 9, 32, 64>}, {pipeline_mode = #tpu.pipeline_mode<synchronous>, transform_indices = @transform_6, window_bounds = array<i64: 9, 64, 1>}, {pipeline_mode = #tpu.pipeline_mode<synchronous>, transform_indices = @transform_7, window_bounds = array<i64: 1, 8>}, {pipeline_mode = #tpu.pipeline_mode<synchronous>, transform_indices = @transform_8, window_bounds = array<i64: 1, 16>}, {pipeline_mode = #tpu.pipeline_mode<synchronous>, transform_indices = @transform_9, window_bounds = array<i64: 1, 32>}, {pipeline_mode = #tpu.pipeline_mode<synchronous>, transform_indices = @transform_10, window_bounds = array<i64: 1, 64>}, {pipeline_mode = #tpu.pipeline_mode<synchronous>, transform_indices = @transform_11, window_bounds = array<i64: 1, 1>}, {transform_indices = @transform_12, window_bounds = array<i64: 1, 100, 1>}]} {
    %c0 = arith.constant 0 : index
    %c0_0 = arith.constant 0 : index
    %0 = vector.load %arg2[%c0, %c0_0] : memref<100x1xf32, #tpu.memory_space<vmem>>, vector<100x1xf32>
    %c0_1 = arith.constant 0 : index
    %c0_2 = arith.constant 0 : index
    %c0_3 = arith.constant 0 : index
    %1 = vector.load %arg1[%c0_1, %c0_2, %c0_3] : memref<1x100x36xf32, #tpu.memory_space<vmem>>, vector<1x100x36xf32>
    %2 = vector.shape_cast %1 : vector<1x100x36xf32> to vector<100x36xf32>
    %c0_4 = arith.constant 0 : index
    %c0_5 = arith.constant 0 : index
    %3 = vector.load %arg3[%c0_4, %c0_5] : memref<36x8xf32, #tpu.memory_space<vmem>>, vector<36x8xf32>
    %cst = arith.constant dense<0.000000e+00> : vector<100x8xf32>
    %4 = tpu.matmul %2, %3, %cst {dimension_numbers = #tpu.dot_dimension_numbers<[1], [0], [0], [1], [0, 0, 1, 1], [], []>} : vector<100x36xf32>, vector<36x8xf32>, vector<100x8xf32> -> vector<100x8xf32>
    %c0_6 = arith.constant 0 : index
    %c0_7 = arith.constant 0 : index
    %5 = vector.load %arg8[%c0_6, %c0_7] : memref<1x8xf32, #tpu.memory_space<vmem>>, vector<1x8xf32>
    %6 = vector.broadcast %5 : vector<1x8xf32> to vector<100x8xf32>
    %7 = arith.addf %4, %6 : vector<100x8xf32>
    %8 = vector.broadcast %0 : vector<100x1xf32> to vector<100x8xf32>
    %9 = arith.mulf %7, %8 : vector<100x8xf32>
    %cst_8 = arith.constant dense<0.000000e+00> : vector<8xf32>
    %10 = vector.multi_reduction <add>, %9, %cst_8 [0] : vector<100x8xf32> to vector<8xf32>
    %11 = vector.shape_cast %10 : vector<8xf32> to vector<1x8xf32>
    %cst_9 = arith.constant 1.562500e-02 : f32
    %12 = vector.broadcast %cst_9 : f32 to vector<1x8xf32>
    %13 = arith.mulf %11, %12 : vector<1x8xf32>
    %14 = arith.mulf %9, %9 : vector<100x8xf32>
    %cst_10 = arith.constant dense<0.000000e+00> : vector<8xf32>
    %15 = vector.multi_reduction <add>, %14, %cst_10 [0] : vector<100x8xf32> to vector<8xf32>
    %16 = vector.shape_cast %15 : vector<8xf32> to vector<1x8xf32>
    %cst_11 = arith.constant 1.562500e-02 : f32
    %17 = vector.broadcast %cst_11 : f32 to vector<1x8xf32>
    %18 = arith.mulf %16, %17 : vector<1x8xf32>
    %19 = arith.mulf %13, %13 : vector<1x8xf32>
    %20 = arith.subf %18, %19 : vector<1x8xf32>
    %cst_12 = arith.constant 0.000000e+00 : f32
    %21 = vector.broadcast %cst_12 : f32 to vector<1x8xf32>
    %22 = arith.maximumf %20, %21 : vector<1x8xf32>
    %23 = vector.broadcast %13 : vector<1x8xf32> to vector<100x8xf32>
    %24 = arith.subf %9, %23 : vector<100x8xf32>
    %cst_13 = arith.constant 9.99999974E-6 : f32
    %25 = vector.broadcast %cst_13 : f32 to vector<1x8xf32>
    %26 = arith.addf %22, %25 : vector<1x8xf32>
    %27 = math.rsqrt %26 : vector<1x8xf32>
    %28 = vector.broadcast %27 : vector<1x8xf32> to vector<100x8xf32>
    %29 = arith.mulf %24, %28 : vector<100x8xf32>
    %cst_14 = arith.constant 0.000000e+00 : f32
    %30 = vector.broadcast %cst_14 : f32 to vector<100x8xf32>
    %31 = arith.cmpf oge, %29, %30 : vector<100x8xf32>
    %cst_15 = arith.constant 2.000000e-01 : f32
    %32 = vector.broadcast %cst_15 : f32 to vector<100x8xf32>
    %33 = arith.mulf %32, %29 : vector<100x8xf32>
    %34 = arith.select %31, %29, %33 : vector<100x8xi1>, vector<100x8xf32>
    %35 = vector.broadcast %0 : vector<100x1xf32> to vector<100x8xf32>
    %36 = arith.mulf %34, %35 : vector<100x8xf32>
    %cst_16 = arith.constant 0.000000e+00 : f32
    %37 = vector.broadcast %cst_16 : f32 to vector<100x64xf32>
    %c0_17 = arith.constant 0 : index
    %c0_18 = arith.constant 0 : index
    %38 = vector.load %arg14[%c0_17, %c0_18] : memref<100x64xf32, #tpu.memory_space<vmem>>, vector<100x64xf32>
    tpu.vector_store %arg14[%c0_17, %c0_18], %37 {strides = array<i32>} : memref<100x64xf32, #tpu.memory_space<vmem>>, vector<100x64xf32>,
    %c0_19 = arith.constant 0 : index
    %c0_20 = arith.constant 0 : index
    %c0_21 = arith.constant 0 : index
    %39 = vector.load %arg4[%c0_19, %c0_20, %c0_21] : memref<9x8x16xf32, #tpu.memory_space<vmem>>, vector<1x8x16xf32>
    %40 = vector.shape_cast %39 : vector<1x8x16xf32> to vector<8x16xf32>
    %cst_22 = arith.constant dense<0.000000e+00> : vector<100x16xf32>
    %41 = tpu.matmul %36, %40, %cst_22 {dimension_numbers = #tpu.dot_dimension_numbers<[1], [0], [0], [1], [0, 0, 1, 1], [], []>} : vector<100x8xf32>, vector<8x16xf32>, vector<100x16xf32> -> vector<100x16xf32>
    %c11 = arith.constant 11 : index
    %c0_23 = arith.constant 0 : index
    %42 = vector.load %arg14[%c11, %c0_23] : memref<100x64xf32, #tpu.memory_space<vmem>>, vector<89x16xf32>
    %43 = vector.extract_strided_slice %41 {offsets = [0, 0], sizes = [89, 16], strides = [1, 1]} : vector<100x16xf32> to vector<89x16xf32>
    %44 = arith.addf %42, %43 : vector<89x16xf32>
    %c11_24 = arith.constant 11 : index
    %c0_25 = arith.constant 0 : index
    %45 = vector.load %arg14[%c11_24, %c0_25] : memref<100x64xf32, #tpu.memory_space<vmem>>, vector<89x16xf32>
    tpu.vector_store %arg14[%c11_24, %c0_25], %44 {strides = array<i32>} : memref<100x64xf32, #tpu.memory_space<vmem>>, vector<89x16xf32>,
    %c1 = arith.constant 1 : index
    %c0_26 = arith.constant 0 : index
    %c0_27 = arith.constant 0 : index
    %46 = vector.load %arg4[%c1, %c0_26, %c0_27] : memref<9x8x16xf32, #tpu.memory_space<vmem>>, vector<1x8x16xf32>
    %47 = vector.shape_cast %46 : vector<1x8x16xf32> to vector<8x16xf32>
    %cst_28 = arith.constant dense<0.000000e+00> : vector<100x16xf32>
    %48 = tpu.matmul %36, %47, %cst_28 {dimension_numbers = #tpu.dot_dimension_numbers<[1], [0], [0], [1], [0, 0, 1, 1], [], []>} : vector<100x8xf32>, vector<8x16xf32>, vector<100x16xf32> -> vector<100x16xf32>
    %c10 = arith.constant 10 : index
    %c0_29 = arith.constant 0 : index
    %49 = vector.load %arg14[%c10, %c0_29] : memref<100x64xf32, #tpu.memory_space<vmem>>, vector<90x16xf32>
    %50 = vector.extract_strided_slice %48 {offsets = [0, 0], sizes = [90, 16], strides = [1, 1]} : vector<100x16xf32> to vector<90x16xf32>
    %51 = arith.addf %49, %50 : vector<90x16xf32>
    %c10_30 = arith.constant 10 : index
    %c0_31 = arith.constant 0 : index
    %52 = vector.load %arg14[%c10_30, %c0_31] : memref<100x64xf32, #tpu.memory_space<vmem>>, vector<90x16xf32>
    tpu.vector_store %arg14[%c10_30, %c0_31], %51 {strides = array<i32>} : memref<100x64xf32, #tpu.memory_space<vmem>>, vector<90x16xf32>,
    %c2 = arith.constant 2 : index
    %c0_32 = arith.constant 0 : index
    %c0_33 = arith.constant 0 : index
    %53 = vector.load %arg4[%c2, %c0_32, %c0_33] : memref<9x8x16xf32, #tpu.memory_space<vmem>>, vector<1x8x16xf32>
    %54 = vector.shape_cast %53 : vector<1x8x16xf32> to vector<8x16xf32>
    %cst_34 = arith.constant dense<0.000000e+00> : vector<100x16xf32>
    %55 = tpu.matmul %36, %54, %cst_34 {dimension_numbers = #tpu.dot_dimension_numbers<[1], [0], [0], [1], [0, 0, 1, 1], [], []>} : vector<100x8xf32>, vector<8x16xf32>, vector<100x16xf32> -> vector<100x16xf32>
    %c9 = arith.constant 9 : index
    %c0_35 = arith.constant 0 : index
    %56 = vector.load %arg14[%c9, %c0_35] : memref<100x64xf32, #tpu.memory_space<vmem>>, vector<91x16xf32>
    %57 = vector.extract_strided_slice %55 {offsets = [0, 0], sizes = [91, 16], strides = [1, 1]} : vector<100x16xf32> to vector<91x16xf32>
    %58 = arith.addf %56, %57 : vector<91x16xf32>
    %c9_36 = arith.constant 9 : index
    %c0_37 = arith.constant 0 : index
    %59 = vector.load %arg14[%c9_36, %c0_37] : memref<100x64xf32, #tpu.memory_space<vmem>>, vector<91x16xf32>
    tpu.vector_store %arg14[%c9_36, %c0_37], %58 {strides = array<i32>} : memref<100x64xf32, #tpu.memory_space<vmem>>, vector<91x16xf32>,
    %c3 = arith.constant 3 : index
    %c0_38 = arith.constant 0 : index
    %c0_39 = arith.constant 0 : index
    %60 = vector.load %arg4[%c3, %c0_38, %c0_39] : memref<9x8x16xf32, #tpu.memory_space<vmem>>, vector<1x8x16xf32>
    %61 = vector.shape_cast %60 : vector<1x8x16xf32> to vector<8x16xf32>
    %cst_40 = arith.constant dense<0.000000e+00> : vector<100x16xf32>
    %62 = tpu.matmul %36, %61, %cst_40 {dimension_numbers = #tpu.dot_dimension_numbers<[1], [0], [0], [1], [0, 0, 1, 1], [], []>} : vector<100x8xf32>, vector<8x16xf32>, vector<100x16xf32> -> vector<100x16xf32>
    %c1_41 = arith.constant 1 : index
    %c0_42 = arith.constant 0 : index
    %63 = vector.load %arg14[%c1_41, %c0_42] : memref<100x64xf32, #tpu.memory_space<vmem>>, vector<99x16xf32>
    %64 = vector.extract_strided_slice %62 {offsets = [0, 0], sizes = [99, 16], strides = [1, 1]} : vector<100x16xf32> to vector<99x16xf32>
    %65 = arith.addf %63, %64 : vector<99x16xf32>
    %c1_43 = arith.constant 1 : index
    %c0_44 = arith.constant 0 : index
    %66 = vector.load %arg14[%c1_43, %c0_44] : memref<100x64xf32, #tpu.memory_space<vmem>>, vector<99x16xf32>
    tpu.vector_store %arg14[%c1_43, %c0_44], %65 {strides = array<i32>} : memref<100x64xf32, #tpu.memory_space<vmem>>, vector<99x16xf32>,
    %c4 = arith.constant 4 : index
    %c0_45 = arith.constant 0 : index
    %c0_46 = arith.constant 0 : index
    %67 = vector.load %arg4[%c4, %c0_45, %c0_46] : memref<9x8x16xf32, #tpu.memory_space<vmem>>, vector<1x8x16xf32>
    %68 = vector.shape_cast %67 : vector<1x8x16xf32> to vector<8x16xf32>
    %cst_47 = arith.constant dense<0.000000e+00> : vector<100x16xf32>
    %69 = tpu.matmul %36, %68, %cst_47 {dimension_numbers = #tpu.dot_dimension_numbers<[1], [0], [0], [1], [0, 0, 1, 1], [], []>} : vector<100x8xf32>, vector<8x16xf32>, vector<100x16xf32> -> vector<100x16xf32>
    %c0_48 = arith.constant 0 : index
    %c0_49 = arith.constant 0 : index
    %70 = vector.load %arg14[%c0_48, %c0_49] : memref<100x64xf32, #tpu.memory_space<vmem>>, vector<100x16xf32>
    %71 = arith.addf %70, %69 : vector<100x16xf32>
    %c0_50 = arith.constant 0 : index
    %c0_51 = arith.constant 0 : index
    %72 = vector.load %arg14[%c0_50, %c0_51] : memref<100x64xf32, #tpu.memory_space<vmem>>, vector<100x16xf32>
    tpu.vector_store %arg14[%c0_50, %c0_51], %71 {strides = array<i32>} : memref<100x64xf32, #tpu.memory_space<vmem>>, vector<100x16xf32>,
    %c5 = arith.constant 5 : index
    %c0_52 = arith.constant 0 : index
    %c0_53 = arith.constant 0 : index
    %73 = vector.load %arg4[%c5, %c0_52, %c0_53] : memref<9x8x16xf32, #tpu.memory_space<vmem>>, vector<1x8x16xf32>
    %74 = vector.shape_cast %73 : vector<1x8x16xf32> to vector<8x16xf32>
    %cst_54 = arith.constant dense<0.000000e+00> : vector<100x16xf32>
    %75 = tpu.matmul %36, %74, %cst_54 {dimension_numbers = #tpu.dot_dimension_numbers<[1], [0], [0], [1], [0, 0, 1, 1], [], []>} : vector<100x8xf32>, vector<8x16xf32>, vector<100x16xf32> -> vector<100x16xf32>
    %c0_55 = arith.constant 0 : index
    %c0_56 = arith.constant 0 : index
    %76 = vector.load %arg14[%c0_55, %c0_56] : memref<100x64xf32, #tpu.memory_space<vmem>>, vector<99x16xf32>
    %77 = vector.extract_strided_slice %75 {offsets = [1, 0], sizes = [99, 16], strides = [1, 1]} : vector<100x16xf32> to vector<99x16xf32>
    %78 = arith.addf %76, %77 : vector<99x16xf32>
    %c0_57 = arith.constant 0 : index
    %c0_58 = arith.constant 0 : index
    %79 = vector.load %arg14[%c0_57, %c0_58] : memref<100x64xf32, #tpu.memory_space<vmem>>, vector<99x16xf32>
    tpu.vector_store %arg14[%c0_57, %c0_58], %78 {strides = array<i32>} : memref<100x64xf32, #tpu.memory_space<vmem>>, vector<99x16xf32>,
    %c6 = arith.constant 6 : index
    %c0_59 = arith.constant 0 : index
    %c0_60 = arith.constant 0 : index
    %80 = vector.load %arg4[%c6, %c0_59, %c0_60] : memref<9x8x16xf32, #tpu.memory_space<vmem>>, vector<1x8x16xf32>
    %81 = vector.shape_cast %80 : vector<1x8x16xf32> to vector<8x16xf32>
    %cst_61 = arith.constant dense<0.000000e+00> : vector<100x16xf32>
    %82 = tpu.matmul %36, %81, %cst_61 {dimension_numbers = #tpu.dot_dimension_numbers<[1], [0], [0], [1], [0, 0, 1, 1], [], []>} : vector<100x8xf32>, vector<8x16xf32>, vector<100x16xf32> -> vector<100x16xf32>
    %c0_62 = arith.constant 0 : index
    %c0_63 = arith.constant 0 : index
    %83 = vector.load %arg14[%c0_62, %c0_63] : memref<100x64xf32, #tpu.memory_space<vmem>>, vector<91x16xf32>
    %84 = vector.extract_strided_slice %82 {offsets = [9, 0], sizes = [91, 16], strides = [1, 1]} : vector<100x16xf32> to vector<91x16xf32>
    %85 = arith.addf %83, %84 : vector<91x16xf32>
    %c0_64 = arith.constant 0 : index
    %c0_65 = arith.constant 0 : index
    %86 = vector.load %arg14[%c0_64, %c0_65] : memref<100x64xf32, #tpu.memory_space<vmem>>, vector<91x16xf32>
    tpu.vector_store %arg14[%c0_64, %c0_65], %85 {strides = array<i32>} : memref<100x64xf32, #tpu.memory_space<vmem>>, vector<91x16xf32>,
    %c7 = arith.constant 7 : index
    %c0_66 = arith.constant 0 : index
    %c0_67 = arith.constant 0 : index
    %87 = vector.load %arg4[%c7, %c0_66, %c0_67] : memref<9x8x16xf32, #tpu.memory_space<vmem>>, vector<1x8x16xf32>
    %88 = vector.shape_cast %87 : vector<1x8x16xf32> to vector<8x16xf32>
    %cst_68 = arith.constant dense<0.000000e+00> : vector<100x16xf32>
    %89 = tpu.matmul %36, %88, %cst_68 {dimension_numbers = #tpu.dot_dimension_numbers<[1], [0], [0], [1], [0, 0, 1, 1], [], []>} : vector<100x8xf32>, vector<8x16xf32>, vector<100x16xf32> -> vector<100x16xf32>
    %c0_69 = arith.constant 0 : index
    %c0_70 = arith.constant 0 : index
    %90 = vector.load %arg14[%c0_69, %c0_70] : memref<100x64xf32, #tpu.memory_space<vmem>>, vector<90x16xf32>
    %91 = vector.extract_strided_slice %89 {offsets = [10, 0], sizes = [90, 16], strides = [1, 1]} : vector<100x16xf32> to vector<90x16xf32>
    %92 = arith.addf %90, %91 : vector<90x16xf32>
    %c0_71 = arith.constant 0 : index
    %c0_72 = arith.constant 0 : index
    %93 = vector.load %arg14[%c0_71, %c0_72] : memref<100x64xf32, #tpu.memory_space<vmem>>, vector<90x16xf32>
    tpu.vector_store %arg14[%c0_71, %c0_72], %92 {strides = array<i32>} : memref<100x64xf32, #tpu.memory_space<vmem>>, vector<90x16xf32>,
    %c8 = arith.constant 8 : index
    %c0_73 = arith.constant 0 : index
    %c0_74 = arith.constant 0 : index
    %94 = vector.load %arg4[%c8, %c0_73, %c0_74] : memref<9x8x16xf32, #tpu.memory_space<vmem>>, vector<1x8x16xf32>
    %95 = vector.shape_cast %94 : vector<1x8x16xf32> to vector<8x16xf32>
    %cst_75 = arith.constant dense<0.000000e+00> : vector<100x16xf32>
    %96 = tpu.matmul %36, %95, %cst_75 {dimension_numbers = #tpu.dot_dimension_numbers<[1], [0], [0], [1], [0, 0, 1, 1], [], []>} : vector<100x8xf32>, vector<8x16xf32>, vector<100x16xf32> -> vector<100x16xf32>
    %c0_76 = arith.constant 0 : index
    %c0_77 = arith.constant 0 : index
    %97 = vector.load %arg14[%c0_76, %c0_77] : memref<100x64xf32, #tpu.memory_space<vmem>>, vector<89x16xf32>
    %98 = vector.extract_strided_slice %96 {offsets = [11, 0], sizes = [89, 16], strides = [1, 1]} : vector<100x16xf32> to vector<89x16xf32>
    %99 = arith.addf %97, %98 : vector<89x16xf32>
    %c0_78 = arith.constant 0 : index
    %c0_79 = arith.constant 0 : index
    %100 = vector.load %arg14[%c0_78, %c0_79] : memref<100x64xf32, #tpu.memory_space<vmem>>, vector<89x16xf32>
    tpu.vector_store %arg14[%c0_78, %c0_79], %99 {strides = array<i32>} : memref<100x64xf32, #tpu.memory_space<vmem>>, vector<89x16xf32>,
    %c0_80 = arith.constant 0 : index
    %c0_81 = arith.constant 0 : index
    %101 = vector.load %arg14[%c0_80, %c0_81] : memref<100x64xf32, #tpu.memory_space<vmem>>, vector<100x16xf32>
    %c0_82 = arith.constant 0 : index
    %c0_83 = arith.constant 0 : index
    %102 = vector.load %arg9[%c0_82, %c0_83] : memref<1x16xf32, #tpu.memory_space<vmem>>, vector<1x16xf32>
    %103 = vector.broadcast %102 : vector<1x16xf32> to vector<100x16xf32>
    %104 = arith.addf %101, %103 : vector<100x16xf32>
    %105 = vector.broadcast %0 : vector<100x1xf32> to vector<100x16xf32>
    %106 = arith.mulf %104, %105 : vector<100x16xf32>
    %cst_84 = arith.constant dense<0.000000e+00> : vector<16xf32>
    %107 = vector.multi_reduction <add>, %106, %cst_84 [0] : vector<100x16xf32> to vector<16xf32>
    %108 = vector.shape_cast %107 : vector<16xf32> to vector<1x16xf32>
    %cst_85 = arith.constant 1.562500e-02 : f32
    %109 = vector.broadcast %cst_85 : f32 to vector<1x16xf32>
    %110 = arith.mulf %108, %109 : vector<1x16xf32>
    %111 = arith.mulf %106, %106 : vector<100x16xf32>
    %cst_86 = arith.constant dense<0.000000e+00> : vector<16xf32>
    %112 = vector.multi_reduction <add>, %111, %cst_86 [0] : vector<100x16xf32> to vector<16xf32>
    %113 = vector.shape_cast %112 : vector<16xf32> to vector<1x16xf32>
    %cst_87 = arith.constant 1.562500e-02 : f32
    %114 = vector.broadcast %cst_87 : f32 to vector<1x16xf32>
    %115 = arith.mulf %113, %114 : vector<1x16xf32>
    %116 = arith.mulf %110, %110 : vector<1x16xf32>
    %117 = arith.subf %115, %116 : vector<1x16xf32>
    %cst_88 = arith.constant 0.000000e+00 : f32
    %118 = vector.broadcast %cst_88 : f32 to vector<1x16xf32>
    %119 = arith.maximumf %117, %118 : vector<1x16xf32>
    %120 = vector.broadcast %110 : vector<1x16xf32> to vector<100x16xf32>
    %121 = arith.subf %106, %120 : vector<100x16xf32>
    %cst_89 = arith.constant 9.99999974E-6 : f32
    %122 = vector.broadcast %cst_89 : f32 to vector<1x16xf32>
    %123 = arith.addf %119, %122 : vector<1x16xf32>
    %124 = math.rsqrt %123 : vector<1x16xf32>
    %125 = vector.broadcast %124 : vector<1x16xf32> to vector<100x16xf32>
    %126 = arith.mulf %121, %125 : vector<100x16xf32>
    %cst_90 = arith.constant 0.000000e+00 : f32
    %127 = vector.broadcast %cst_90 : f32 to vector<100x16xf32>
    %128 = arith.cmpf oge, %126, %127 : vector<100x16xf32>
    %cst_91 = arith.constant 2.000000e-01 : f32
    %129 = vector.broadcast %cst_91 : f32 to vector<100x16xf32>
    %130 = arith.mulf %129, %126 : vector<100x16xf32>
    %131 = arith.select %128, %126, %130 : vector<100x16xi1>, vector<100x16xf32>
    %132 = vector.broadcast %0 : vector<100x1xf32> to vector<100x16xf32>
    %133 = arith.mulf %131, %132 : vector<100x16xf32>
    %cst_92 = arith.constant 0.000000e+00 : f32
    %134 = vector.broadcast %cst_92 : f32 to vector<100x64xf32>
    %c0_93 = arith.constant 0 : index
    %c0_94 = arith.constant 0 : index
    %135 = vector.load %arg14[%c0_93, %c0_94] : memref<100x64xf32, #tpu.memory_space<vmem>>, vector<100x64xf32>
    tpu.vector_store %arg14[%c0_93, %c0_94], %134 {strides = array<i32>} : memref<100x64xf32, #tpu.memory_space<vmem>>, vector<100x64xf32>,
    %c0_95 = arith.constant 0 : index
    %c0_96 = arith.constant 0 : index
    %c0_97 = arith.constant 0 : index
    %136 = vector.load %arg5[%c0_95, %c0_96, %c0_97] : memref<9x16x32xf32, #tpu.memory_space<vmem>>, vector<1x16x32xf32>
    %137 = vector.shape_cast %136 : vector<1x16x32xf32> to vector<16x32xf32>
    %cst_98 = arith.constant dense<0.000000e+00> : vector<100x32xf32>
    %138 = tpu.matmul %133, %137, %cst_98 {dimension_numbers = #tpu.dot_dimension_numbers<[1], [0], [0], [1], [0, 0, 1, 1], [], []>} : vector<100x16xf32>, vector<16x32xf32>, vector<100x32xf32> -> vector<100x32xf32>
    %c11_99 = arith.constant 11 : index
    %c0_100 = arith.constant 0 : index
    %139 = vector.load %arg14[%c11_99, %c0_100] : memref<100x64xf32, #tpu.memory_space<vmem>>, vector<89x32xf32>
    %140 = vector.extract_strided_slice %138 {offsets = [0, 0], sizes = [89, 32], strides = [1, 1]} : vector<100x32xf32> to vector<89x32xf32>
    %141 = arith.addf %139, %140 : vector<89x32xf32>
    %c11_101 = arith.constant 11 : index
    %c0_102 = arith.constant 0 : index
    %142 = vector.load %arg14[%c11_101, %c0_102] : memref<100x64xf32, #tpu.memory_space<vmem>>, vector<89x32xf32>
    tpu.vector_store %arg14[%c11_101, %c0_102], %141 {strides = array<i32>} : memref<100x64xf32, #tpu.memory_space<vmem>>, vector<89x32xf32>,
    %c1_103 = arith.constant 1 : index
    %c0_104 = arith.constant 0 : index
    %c0_105 = arith.constant 0 : index
    %143 = vector.load %arg5[%c1_103, %c0_104, %c0_105] : memref<9x16x32xf32, #tpu.memory_space<vmem>>, vector<1x16x32xf32>
    %144 = vector.shape_cast %143 : vector<1x16x32xf32> to vector<16x32xf32>
    %cst_106 = arith.constant dense<0.000000e+00> : vector<100x32xf32>
    %145 = tpu.matmul %133, %144, %cst_106 {dimension_numbers = #tpu.dot_dimension_numbers<[1], [0], [0], [1], [0, 0, 1, 1], [], []>} : vector<100x16xf32>, vector<16x32xf32>, vector<100x32xf32> -> vector<100x32xf32>
    %c10_107 = arith.constant 10 : index
    %c0_108 = arith.constant 0 : index
    %146 = vector.load %arg14[%c10_107, %c0_108] : memref<100x64xf32, #tpu.memory_space<vmem>>, vector<90x32xf32>
    %147 = vector.extract_strided_slice %145 {offsets = [0, 0], sizes = [90, 32], strides = [1, 1]} : vector<100x32xf32> to vector<90x32xf32>
    %148 = arith.addf %146, %147 : vector<90x32xf32>
    %c10_109 = arith.constant 10 : index
    %c0_110 = arith.constant 0 : index
    %149 = vector.load %arg14[%c10_109, %c0_110] : memref<100x64xf32, #tpu.memory_space<vmem>>, vector<90x32xf32>
    tpu.vector_store %arg14[%c10_109, %c0_110], %148 {strides = array<i32>} : memref<100x64xf32, #tpu.memory_space<vmem>>, vector<90x32xf32>,
    %c2_111 = arith.constant 2 : index
    %c0_112 = arith.constant 0 : index
    %c0_113 = arith.constant 0 : index
    %150 = vector.load %arg5[%c2_111, %c0_112, %c0_113] : memref<9x16x32xf32, #tpu.memory_space<vmem>>, vector<1x16x32xf32>
    %151 = vector.shape_cast %150 : vector<1x16x32xf32> to vector<16x32xf32>
    %cst_114 = arith.constant dense<0.000000e+00> : vector<100x32xf32>
    %152 = tpu.matmul %133, %151, %cst_114 {dimension_numbers = #tpu.dot_dimension_numbers<[1], [0], [0], [1], [0, 0, 1, 1], [], []>} : vector<100x16xf32>, vector<16x32xf32>, vector<100x32xf32> -> vector<100x32xf32>
    %c9_115 = arith.constant 9 : index
    %c0_116 = arith.constant 0 : index
    %153 = vector.load %arg14[%c9_115, %c0_116] : memref<100x64xf32, #tpu.memory_space<vmem>>, vector<91x32xf32>
    %154 = vector.extract_strided_slice %152 {offsets = [0, 0], sizes = [91, 32], strides = [1, 1]} : vector<100x32xf32> to vector<91x32xf32>
    %155 = arith.addf %153, %154 : vector<91x32xf32>
    %c9_117 = arith.constant 9 : index
    %c0_118 = arith.constant 0 : index
    %156 = vector.load %arg14[%c9_117, %c0_118] : memref<100x64xf32, #tpu.memory_space<vmem>>, vector<91x32xf32>
    tpu.vector_store %arg14[%c9_117, %c0_118], %155 {strides = array<i32>} : memref<100x64xf32, #tpu.memory_space<vmem>>, vector<91x32xf32>,
    %c3_119 = arith.constant 3 : index
    %c0_120 = arith.constant 0 : index
    %c0_121 = arith.constant 0 : index
    %157 = vector.load %arg5[%c3_119, %c0_120, %c0_121] : memref<9x16x32xf32, #tpu.memory_space<vmem>>, vector<1x16x32xf32>
    %158 = vector.shape_cast %157 : vector<1x16x32xf32> to vector<16x32xf32>
    %cst_122 = arith.constant dense<0.000000e+00> : vector<100x32xf32>
    %159 = tpu.matmul %133, %158, %cst_122 {dimension_numbers = #tpu.dot_dimension_numbers<[1], [0], [0], [1], [0, 0, 1, 1], [], []>} : vector<100x16xf32>, vector<16x32xf32>, vector<100x32xf32> -> vector<100x32xf32>
    %c1_123 = arith.constant 1 : index
    %c0_124 = arith.constant 0 : index
    %160 = vector.load %arg14[%c1_123, %c0_124] : memref<100x64xf32, #tpu.memory_space<vmem>>, vector<99x32xf32>
    %161 = vector.extract_strided_slice %159 {offsets = [0, 0], sizes = [99, 32], strides = [1, 1]} : vector<100x32xf32> to vector<99x32xf32>
    %162 = arith.addf %160, %161 : vector<99x32xf32>
    %c1_125 = arith.constant 1 : index
    %c0_126 = arith.constant 0 : index
    %163 = vector.load %arg14[%c1_125, %c0_126] : memref<100x64xf32, #tpu.memory_space<vmem>>, vector<99x32xf32>
    tpu.vector_store %arg14[%c1_125, %c0_126], %162 {strides = array<i32>} : memref<100x64xf32, #tpu.memory_space<vmem>>, vector<99x32xf32>,
    %c4_127 = arith.constant 4 : index
    %c0_128 = arith.constant 0 : index
    %c0_129 = arith.constant 0 : index
    %164 = vector.load %arg5[%c4_127, %c0_128, %c0_129] : memref<9x16x32xf32, #tpu.memory_space<vmem>>, vector<1x16x32xf32>
    %165 = vector.shape_cast %164 : vector<1x16x32xf32> to vector<16x32xf32>
    %cst_130 = arith.constant dense<0.000000e+00> : vector<100x32xf32>
    %166 = tpu.matmul %133, %165, %cst_130 {dimension_numbers = #tpu.dot_dimension_numbers<[1], [0], [0], [1], [0, 0, 1, 1], [], []>} : vector<100x16xf32>, vector<16x32xf32>, vector<100x32xf32> -> vector<100x32xf32>
    %c0_131 = arith.constant 0 : index
    %c0_132 = arith.constant 0 : index
    %167 = vector.load %arg14[%c0_131, %c0_132] : memref<100x64xf32, #tpu.memory_space<vmem>>, vector<100x32xf32>
    %168 = arith.addf %167, %166 : vector<100x32xf32>
    %c0_133 = arith.constant 0 : index
    %c0_134 = arith.constant 0 : index
    %169 = vector.load %arg14[%c0_133, %c0_134] : memref<100x64xf32, #tpu.memory_space<vmem>>, vector<100x32xf32>
    tpu.vector_store %arg14[%c0_133, %c0_134], %168 {strides = array<i32>} : memref<100x64xf32, #tpu.memory_space<vmem>>, vector<100x32xf32>,
    %c5_135 = arith.constant 5 : index
    %c0_136 = arith.constant 0 : index
    %c0_137 = arith.constant 0 : index
    %170 = vector.load %arg5[%c5_135, %c0_136, %c0_137] : memref<9x16x32xf32, #tpu.memory_space<vmem>>, vector<1x16x32xf32>
    %171 = vector.shape_cast %170 : vector<1x16x32xf32> to vector<16x32xf32>
    %cst_138 = arith.constant dense<0.000000e+00> : vector<100x32xf32>
    %172 = tpu.matmul %133, %171, %cst_138 {dimension_numbers = #tpu.dot_dimension_numbers<[1], [0], [0], [1], [0, 0, 1, 1], [], []>} : vector<100x16xf32>, vector<16x32xf32>, vector<100x32xf32> -> vector<100x32xf32>
    %c0_139 = arith.constant 0 : index
    %c0_140 = arith.constant 0 : index
    %173 = vector.load %arg14[%c0_139, %c0_140] : memref<100x64xf32, #tpu.memory_space<vmem>>, vector<99x32xf32>
    %174 = vector.extract_strided_slice %172 {offsets = [1, 0], sizes = [99, 32], strides = [1, 1]} : vector<100x32xf32> to vector<99x32xf32>
    %175 = arith.addf %173, %174 : vector<99x32xf32>
    %c0_141 = arith.constant 0 : index
    %c0_142 = arith.constant 0 : index
    %176 = vector.load %arg14[%c0_141, %c0_142] : memref<100x64xf32, #tpu.memory_space<vmem>>, vector<99x32xf32>
    tpu.vector_store %arg14[%c0_141, %c0_142], %175 {strides = array<i32>} : memref<100x64xf32, #tpu.memory_space<vmem>>, vector<99x32xf32>,
    %c6_143 = arith.constant 6 : index
    %c0_144 = arith.constant 0 : index
    %c0_145 = arith.constant 0 : index
    %177 = vector.load %arg5[%c6_143, %c0_144, %c0_145] : memref<9x16x32xf32, #tpu.memory_space<vmem>>, vector<1x16x32xf32>
    %178 = vector.shape_cast %177 : vector<1x16x32xf32> to vector<16x32xf32>
    %cst_146 = arith.constant dense<0.000000e+00> : vector<100x32xf32>
    %179 = tpu.matmul %133, %178, %cst_146 {dimension_numbers = #tpu.dot_dimension_numbers<[1], [0], [0], [1], [0, 0, 1, 1], [], []>} : vector<100x16xf32>, vector<16x32xf32>, vector<100x32xf32> -> vector<100x32xf32>
    %c0_147 = arith.constant 0 : index
    %c0_148 = arith.constant 0 : index
    %180 = vector.load %arg14[%c0_147, %c0_148] : memref<100x64xf32, #tpu.memory_space<vmem>>, vector<91x32xf32>
    %181 = vector.extract_strided_slice %179 {offsets = [9, 0], sizes = [91, 32], strides = [1, 1]} : vector<100x32xf32> to vector<91x32xf32>
    %182 = arith.addf %180, %181 : vector<91x32xf32>
    %c0_149 = arith.constant 0 : index
    %c0_150 = arith.constant 0 : index
    %183 = vector.load %arg14[%c0_149, %c0_150] : memref<100x64xf32, #tpu.memory_space<vmem>>, vector<91x32xf32>
    tpu.vector_store %arg14[%c0_149, %c0_150], %182 {strides = array<i32>} : memref<100x64xf32, #tpu.memory_space<vmem>>, vector<91x32xf32>,
    %c7_151 = arith.constant 7 : index
    %c0_152 = arith.constant 0 : index
    %c0_153 = arith.constant 0 : index
    %184 = vector.load %arg5[%c7_151, %c0_152, %c0_153] : memref<9x16x32xf32, #tpu.memory_space<vmem>>, vector<1x16x32xf32>
    %185 = vector.shape_cast %184 : vector<1x16x32xf32> to vector<16x32xf32>
    %cst_154 = arith.constant dense<0.000000e+00> : vector<100x32xf32>
    %186 = tpu.matmul %133, %185, %cst_154 {dimension_numbers = #tpu.dot_dimension_numbers<[1], [0], [0], [1], [0, 0, 1, 1], [], []>} : vector<100x16xf32>, vector<16x32xf32>, vector<100x32xf32> -> vector<100x32xf32>
    %c0_155 = arith.constant 0 : index
    %c0_156 = arith.constant 0 : index
    %187 = vector.load %arg14[%c0_155, %c0_156] : memref<100x64xf32, #tpu.memory_space<vmem>>, vector<90x32xf32>
    %188 = vector.extract_strided_slice %186 {offsets = [10, 0], sizes = [90, 32], strides = [1, 1]} : vector<100x32xf32> to vector<90x32xf32>
    %189 = arith.addf %187, %188 : vector<90x32xf32>
    %c0_157 = arith.constant 0 : index
    %c0_158 = arith.constant 0 : index
    %190 = vector.load %arg14[%c0_157, %c0_158] : memref<100x64xf32, #tpu.memory_space<vmem>>, vector<90x32xf32>
    tpu.vector_store %arg14[%c0_157, %c0_158], %189 {strides = array<i32>} : memref<100x64xf32, #tpu.memory_space<vmem>>, vector<90x32xf32>,
    %c8_159 = arith.constant 8 : index
    %c0_160 = arith.constant 0 : index
    %c0_161 = arith.constant 0 : index
    %191 = vector.load %arg5[%c8_159, %c0_160, %c0_161] : memref<9x16x32xf32, #tpu.memory_space<vmem>>, vector<1x16x32xf32>
    %192 = vector.shape_cast %191 : vector<1x16x32xf32> to vector<16x32xf32>
    %cst_162 = arith.constant dense<0.000000e+00> : vector<100x32xf32>
    %193 = tpu.matmul %133, %192, %cst_162 {dimension_numbers = #tpu.dot_dimension_numbers<[1], [0], [0], [1], [0, 0, 1, 1], [], []>} : vector<100x16xf32>, vector<16x32xf32>, vector<100x32xf32> -> vector<100x32xf32>
    %c0_163 = arith.constant 0 : index
    %c0_164 = arith.constant 0 : index
    %194 = vector.load %arg14[%c0_163, %c0_164] : memref<100x64xf32, #tpu.memory_space<vmem>>, vector<89x32xf32>
    %195 = vector.extract_strided_slice %193 {offsets = [11, 0], sizes = [89, 32], strides = [1, 1]} : vector<100x32xf32> to vector<89x32xf32>
    %196 = arith.addf %194, %195 : vector<89x32xf32>
    %c0_165 = arith.constant 0 : index
    %c0_166 = arith.constant 0 : index
    %197 = vector.load %arg14[%c0_165, %c0_166] : memref<100x64xf32, #tpu.memory_space<vmem>>, vector<89x32xf32>
    tpu.vector_store %arg14[%c0_165, %c0_166], %196 {strides = array<i32>} : memref<100x64xf32, #tpu.memory_space<vmem>>, vector<89x32xf32>,
    %c0_167 = arith.constant 0 : index
    %c0_168 = arith.constant 0 : index
    %198 = vector.load %arg14[%c0_167, %c0_168] : memref<100x64xf32, #tpu.memory_space<vmem>>, vector<100x32xf32>
    %c0_169 = arith.constant 0 : index
    %c0_170 = arith.constant 0 : index
    %199 = vector.load %arg10[%c0_169, %c0_170] : memref<1x32xf32, #tpu.memory_space<vmem>>, vector<1x32xf32>
    %200 = vector.broadcast %199 : vector<1x32xf32> to vector<100x32xf32>
    %201 = arith.addf %198, %200 : vector<100x32xf32>
    %202 = vector.broadcast %0 : vector<100x1xf32> to vector<100x32xf32>
    %203 = arith.mulf %201, %202 : vector<100x32xf32>
    %cst_171 = arith.constant dense<0.000000e+00> : vector<32xf32>
    %204 = vector.multi_reduction <add>, %203, %cst_171 [0] : vector<100x32xf32> to vector<32xf32>
    %205 = vector.shape_cast %204 : vector<32xf32> to vector<1x32xf32>
    %cst_172 = arith.constant 1.562500e-02 : f32
    %206 = vector.broadcast %cst_172 : f32 to vector<1x32xf32>
    %207 = arith.mulf %205, %206 : vector<1x32xf32>
    %208 = arith.mulf %203, %203 : vector<100x32xf32>
    %cst_173 = arith.constant dense<0.000000e+00> : vector<32xf32>
    %209 = vector.multi_reduction <add>, %208, %cst_173 [0] : vector<100x32xf32> to vector<32xf32>
    %210 = vector.shape_cast %209 : vector<32xf32> to vector<1x32xf32>
    %cst_174 = arith.constant 1.562500e-02 : f32
    %211 = vector.broadcast %cst_174 : f32 to vector<1x32xf32>
    %212 = arith.mulf %210, %211 : vector<1x32xf32>
    %213 = arith.mulf %207, %207 : vector<1x32xf32>
    %214 = arith.subf %212, %213 : vector<1x32xf32>
    %cst_175 = arith.constant 0.000000e+00 : f32
    %215 = vector.broadcast %cst_175 : f32 to vector<1x32xf32>
    %216 = arith.maximumf %214, %215 : vector<1x32xf32>
    %217 = vector.broadcast %207 : vector<1x32xf32> to vector<100x32xf32>
    %218 = arith.subf %203, %217 : vector<100x32xf32>
    %cst_176 = arith.constant 9.99999974E-6 : f32
    %219 = vector.broadcast %cst_176 : f32 to vector<1x32xf32>
    %220 = arith.addf %216, %219 : vector<1x32xf32>
    %221 = math.rsqrt %220 : vector<1x32xf32>
    %222 = vector.broadcast %221 : vector<1x32xf32> to vector<100x32xf32>
    %223 = arith.mulf %218, %222 : vector<100x32xf32>
    %cst_177 = arith.constant 0.000000e+00 : f32
    %224 = vector.broadcast %cst_177 : f32 to vector<100x32xf32>
    %225 = arith.cmpf oge, %223, %224 : vector<100x32xf32>
    %cst_178 = arith.constant 2.000000e-01 : f32
    %226 = vector.broadcast %cst_178 : f32 to vector<100x32xf32>
    %227 = arith.mulf %226, %223 : vector<100x32xf32>
    %228 = arith.select %225, %223, %227 : vector<100x32xi1>, vector<100x32xf32>
    %229 = vector.broadcast %0 : vector<100x1xf32> to vector<100x32xf32>
    %230 = arith.mulf %228, %229 : vector<100x32xf32>
    %cst_179 = arith.constant 0.000000e+00 : f32
    %231 = vector.broadcast %cst_179 : f32 to vector<100x64xf32>
    %c0_180 = arith.constant 0 : index
    %c0_181 = arith.constant 0 : index
    %232 = vector.load %arg14[%c0_180, %c0_181] : memref<100x64xf32, #tpu.memory_space<vmem>>, vector<100x64xf32>
    tpu.vector_store %arg14[%c0_180, %c0_181], %231 {strides = array<i32>} : memref<100x64xf32, #tpu.memory_space<vmem>>, vector<100x64xf32>,
    %c0_182 = arith.constant 0 : index
    %c0_183 = arith.constant 0 : index
    %c0_184 = arith.constant 0 : index
    %233 = vector.load %arg6[%c0_182, %c0_183, %c0_184] : memref<9x32x64xf32, #tpu.memory_space<vmem>>, vector<1x32x64xf32>
    %234 = vector.shape_cast %233 : vector<1x32x64xf32> to vector<32x64xf32>
    %cst_185 = arith.constant dense<0.000000e+00> : vector<100x64xf32>
    %235 = tpu.matmul %230, %234, %cst_185 {dimension_numbers = #tpu.dot_dimension_numbers<[1], [0], [0], [1], [0, 0, 1, 1], [], []>} : vector<100x32xf32>, vector<32x64xf32>, vector<100x64xf32> -> vector<100x64xf32>
    %c11_186 = arith.constant 11 : index
    %c0_187 = arith.constant 0 : index
    %236 = vector.load %arg14[%c11_186, %c0_187] : memref<100x64xf32, #tpu.memory_space<vmem>>, vector<89x64xf32>
    %237 = vector.extract_strided_slice %235 {offsets = [0, 0], sizes = [89, 64], strides = [1, 1]} : vector<100x64xf32> to vector<89x64xf32>
    %238 = arith.addf %236, %237 : vector<89x64xf32>
    %c11_188 = arith.constant 11 : index
    %c0_189 = arith.constant 0 : index
    %239 = vector.load %arg14[%c11_188, %c0_189] : memref<100x64xf32, #tpu.memory_space<vmem>>, vector<89x64xf32>
    tpu.vector_store %arg14[%c11_188, %c0_189], %238 {strides = array<i32>} : memref<100x64xf32, #tpu.memory_space<vmem>>, vector<89x64xf32>,
    %c1_190 = arith.constant 1 : index
    %c0_191 = arith.constant 0 : index
    %c0_192 = arith.constant 0 : index
    %240 = vector.load %arg6[%c1_190, %c0_191, %c0_192] : memref<9x32x64xf32, #tpu.memory_space<vmem>>, vector<1x32x64xf32>
    %241 = vector.shape_cast %240 : vector<1x32x64xf32> to vector<32x64xf32>
    %cst_193 = arith.constant dense<0.000000e+00> : vector<100x64xf32>
    %242 = tpu.matmul %230, %241, %cst_193 {dimension_numbers = #tpu.dot_dimension_numbers<[1], [0], [0], [1], [0, 0, 1, 1], [], []>} : vector<100x32xf32>, vector<32x64xf32>, vector<100x64xf32> -> vector<100x64xf32>
    %c10_194 = arith.constant 10 : index
    %c0_195 = arith.constant 0 : index
    %243 = vector.load %arg14[%c10_194, %c0_195] : memref<100x64xf32, #tpu.memory_space<vmem>>, vector<90x64xf32>
    %244 = vector.extract_strided_slice %242 {offsets = [0, 0], sizes = [90, 64], strides = [1, 1]} : vector<100x64xf32> to vector<90x64xf32>
    %245 = arith.addf %243, %244 : vector<90x64xf32>
    %c10_196 = arith.constant 10 : index
    %c0_197 = arith.constant 0 : index
    %246 = vector.load %arg14[%c10_196, %c0_197] : memref<100x64xf32, #tpu.memory_space<vmem>>, vector<90x64xf32>
    tpu.vector_store %arg14[%c10_196, %c0_197], %245 {strides = array<i32>} : memref<100x64xf32, #tpu.memory_space<vmem>>, vector<90x64xf32>,
    %c2_198 = arith.constant 2 : index
    %c0_199 = arith.constant 0 : index
    %c0_200 = arith.constant 0 : index
    %247 = vector.load %arg6[%c2_198, %c0_199, %c0_200] : memref<9x32x64xf32, #tpu.memory_space<vmem>>, vector<1x32x64xf32>
    %248 = vector.shape_cast %247 : vector<1x32x64xf32> to vector<32x64xf32>
    %cst_201 = arith.constant dense<0.000000e+00> : vector<100x64xf32>
    %249 = tpu.matmul %230, %248, %cst_201 {dimension_numbers = #tpu.dot_dimension_numbers<[1], [0], [0], [1], [0, 0, 1, 1], [], []>} : vector<100x32xf32>, vector<32x64xf32>, vector<100x64xf32> -> vector<100x64xf32>
    %c9_202 = arith.constant 9 : index
    %c0_203 = arith.constant 0 : index
    %250 = vector.load %arg14[%c9_202, %c0_203] : memref<100x64xf32, #tpu.memory_space<vmem>>, vector<91x64xf32>
    %251 = vector.extract_strided_slice %249 {offsets = [0, 0], sizes = [91, 64], strides = [1, 1]} : vector<100x64xf32> to vector<91x64xf32>
    %252 = arith.addf %250, %251 : vector<91x64xf32>
    %c9_204 = arith.constant 9 : index
    %c0_205 = arith.constant 0 : index
    %253 = vector.load %arg14[%c9_204, %c0_205] : memref<100x64xf32, #tpu.memory_space<vmem>>, vector<91x64xf32>
    tpu.vector_store %arg14[%c9_204, %c0_205], %252 {strides = array<i32>} : memref<100x64xf32, #tpu.memory_space<vmem>>, vector<91x64xf32>,
    %c3_206 = arith.constant 3 : index
    %c0_207 = arith.constant 0 : index
    %c0_208 = arith.constant 0 : index
    %254 = vector.load %arg6[%c3_206, %c0_207, %c0_208] : memref<9x32x64xf32, #tpu.memory_space<vmem>>, vector<1x32x64xf32>
    %255 = vector.shape_cast %254 : vector<1x32x64xf32> to vector<32x64xf32>
    %cst_209 = arith.constant dense<0.000000e+00> : vector<100x64xf32>
    %256 = tpu.matmul %230, %255, %cst_209 {dimension_numbers = #tpu.dot_dimension_numbers<[1], [0], [0], [1], [0, 0, 1, 1], [], []>} : vector<100x32xf32>, vector<32x64xf32>, vector<100x64xf32> -> vector<100x64xf32>
    %c1_210 = arith.constant 1 : index
    %c0_211 = arith.constant 0 : index
    %257 = vector.load %arg14[%c1_210, %c0_211] : memref<100x64xf32, #tpu.memory_space<vmem>>, vector<99x64xf32>
    %258 = vector.extract_strided_slice %256 {offsets = [0, 0], sizes = [99, 64], strides = [1, 1]} : vector<100x64xf32> to vector<99x64xf32>
    %259 = arith.addf %257, %258 : vector<99x64xf32>
    %c1_212 = arith.constant 1 : index
    %c0_213 = arith.constant 0 : index
    %260 = vector.load %arg14[%c1_212, %c0_213] : memref<100x64xf32, #tpu.memory_space<vmem>>, vector<99x64xf32>
    tpu.vector_store %arg14[%c1_212, %c0_213], %259 {strides = array<i32>} : memref<100x64xf32, #tpu.memory_space<vmem>>, vector<99x64xf32>,
    %c4_214 = arith.constant 4 : index
    %c0_215 = arith.constant 0 : index
    %c0_216 = arith.constant 0 : index
    %261 = vector.load %arg6[%c4_214, %c0_215, %c0_216] : memref<9x32x64xf32, #tpu.memory_space<vmem>>, vector<1x32x64xf32>
    %262 = vector.shape_cast %261 : vector<1x32x64xf32> to vector<32x64xf32>
    %cst_217 = arith.constant dense<0.000000e+00> : vector<100x64xf32>
    %263 = tpu.matmul %230, %262, %cst_217 {dimension_numbers = #tpu.dot_dimension_numbers<[1], [0], [0], [1], [0, 0, 1, 1], [], []>} : vector<100x32xf32>, vector<32x64xf32>, vector<100x64xf32> -> vector<100x64xf32>
    %c0_218 = arith.constant 0 : index
    %c0_219 = arith.constant 0 : index
    %264 = vector.load %arg14[%c0_218, %c0_219] : memref<100x64xf32, #tpu.memory_space<vmem>>, vector<100x64xf32>
    %265 = arith.addf %264, %263 : vector<100x64xf32>
    %c0_220 = arith.constant 0 : index
    %c0_221 = arith.constant 0 : index
    %266 = vector.load %arg14[%c0_220, %c0_221] : memref<100x64xf32, #tpu.memory_space<vmem>>, vector<100x64xf32>
    tpu.vector_store %arg14[%c0_220, %c0_221], %265 {strides = array<i32>} : memref<100x64xf32, #tpu.memory_space<vmem>>, vector<100x64xf32>,
    %c5_222 = arith.constant 5 : index
    %c0_223 = arith.constant 0 : index
    %c0_224 = arith.constant 0 : index
    %267 = vector.load %arg6[%c5_222, %c0_223, %c0_224] : memref<9x32x64xf32, #tpu.memory_space<vmem>>, vector<1x32x64xf32>
    %268 = vector.shape_cast %267 : vector<1x32x64xf32> to vector<32x64xf32>
    %cst_225 = arith.constant dense<0.000000e+00> : vector<100x64xf32>
    %269 = tpu.matmul %230, %268, %cst_225 {dimension_numbers = #tpu.dot_dimension_numbers<[1], [0], [0], [1], [0, 0, 1, 1], [], []>} : vector<100x32xf32>, vector<32x64xf32>, vector<100x64xf32> -> vector<100x64xf32>
    %c0_226 = arith.constant 0 : index
    %c0_227 = arith.constant 0 : index
    %270 = vector.load %arg14[%c0_226, %c0_227] : memref<100x64xf32, #tpu.memory_space<vmem>>, vector<99x64xf32>
    %271 = vector.extract_strided_slice %269 {offsets = [1, 0], sizes = [99, 64], strides = [1, 1]} : vector<100x64xf32> to vector<99x64xf32>
    %272 = arith.addf %270, %271 : vector<99x64xf32>
    %c0_228 = arith.constant 0 : index
    %c0_229 = arith.constant 0 : index
    %273 = vector.load %arg14[%c0_228, %c0_229] : memref<100x64xf32, #tpu.memory_space<vmem>>, vector<99x64xf32>
    tpu.vector_store %arg14[%c0_228, %c0_229], %272 {strides = array<i32>} : memref<100x64xf32, #tpu.memory_space<vmem>>, vector<99x64xf32>,
    %c6_230 = arith.constant 6 : index
    %c0_231 = arith.constant 0 : index
    %c0_232 = arith.constant 0 : index
    %274 = vector.load %arg6[%c6_230, %c0_231, %c0_232] : memref<9x32x64xf32, #tpu.memory_space<vmem>>, vector<1x32x64xf32>
    %275 = vector.shape_cast %274 : vector<1x32x64xf32> to vector<32x64xf32>
    %cst_233 = arith.constant dense<0.000000e+00> : vector<100x64xf32>
    %276 = tpu.matmul %230, %275, %cst_233 {dimension_numbers = #tpu.dot_dimension_numbers<[1], [0], [0], [1], [0, 0, 1, 1], [], []>} : vector<100x32xf32>, vector<32x64xf32>, vector<100x64xf32> -> vector<100x64xf32>
    %c0_234 = arith.constant 0 : index
    %c0_235 = arith.constant 0 : index
    %277 = vector.load %arg14[%c0_234, %c0_235] : memref<100x64xf32, #tpu.memory_space<vmem>>, vector<91x64xf32>
    %278 = vector.extract_strided_slice %276 {offsets = [9, 0], sizes = [91, 64], strides = [1, 1]} : vector<100x64xf32> to vector<91x64xf32>
    %279 = arith.addf %277, %278 : vector<91x64xf32>
    %c0_236 = arith.constant 0 : index
    %c0_237 = arith.constant 0 : index
    %280 = vector.load %arg14[%c0_236, %c0_237] : memref<100x64xf32, #tpu.memory_space<vmem>>, vector<91x64xf32>
    tpu.vector_store %arg14[%c0_236, %c0_237], %279 {strides = array<i32>} : memref<100x64xf32, #tpu.memory_space<vmem>>, vector<91x64xf32>,
    %c7_238 = arith.constant 7 : index
    %c0_239 = arith.constant 0 : index
    %c0_240 = arith.constant 0 : index
    %281 = vector.load %arg6[%c7_238, %c0_239, %c0_240] : memref<9x32x64xf32, #tpu.memory_space<vmem>>, vector<1x32x64xf32>
    %282 = vector.shape_cast %281 : vector<1x32x64xf32> to vector<32x64xf32>
    %cst_241 = arith.constant dense<0.000000e+00> : vector<100x64xf32>
    %283 = tpu.matmul %230, %282, %cst_241 {dimension_numbers = #tpu.dot_dimension_numbers<[1], [0], [0], [1], [0, 0, 1, 1], [], []>} : vector<100x32xf32>, vector<32x64xf32>, vector<100x64xf32> -> vector<100x64xf32>
    %c0_242 = arith.constant 0 : index
    %c0_243 = arith.constant 0 : index
    %284 = vector.load %arg14[%c0_242, %c0_243] : memref<100x64xf32, #tpu.memory_space<vmem>>, vector<90x64xf32>
    %285 = vector.extract_strided_slice %283 {offsets = [10, 0], sizes = [90, 64], strides = [1, 1]} : vector<100x64xf32> to vector<90x64xf32>
    %286 = arith.addf %284, %285 : vector<90x64xf32>
    %c0_244 = arith.constant 0 : index
    %c0_245 = arith.constant 0 : index
    %287 = vector.load %arg14[%c0_244, %c0_245] : memref<100x64xf32, #tpu.memory_space<vmem>>, vector<90x64xf32>
    tpu.vector_store %arg14[%c0_244, %c0_245], %286 {strides = array<i32>} : memref<100x64xf32, #tpu.memory_space<vmem>>, vector<90x64xf32>,
    %c8_246 = arith.constant 8 : index
    %c0_247 = arith.constant 0 : index
    %c0_248 = arith.constant 0 : index
    %288 = vector.load %arg6[%c8_246, %c0_247, %c0_248] : memref<9x32x64xf32, #tpu.memory_space<vmem>>, vector<1x32x64xf32>
    %289 = vector.shape_cast %288 : vector<1x32x64xf32> to vector<32x64xf32>
    %cst_249 = arith.constant dense<0.000000e+00> : vector<100x64xf32>
    %290 = tpu.matmul %230, %289, %cst_249 {dimension_numbers = #tpu.dot_dimension_numbers<[1], [0], [0], [1], [0, 0, 1, 1], [], []>} : vector<100x32xf32>, vector<32x64xf32>, vector<100x64xf32> -> vector<100x64xf32>
    %c0_250 = arith.constant 0 : index
    %c0_251 = arith.constant 0 : index
    %291 = vector.load %arg14[%c0_250, %c0_251] : memref<100x64xf32, #tpu.memory_space<vmem>>, vector<89x64xf32>
    %292 = vector.extract_strided_slice %290 {offsets = [11, 0], sizes = [89, 64], strides = [1, 1]} : vector<100x64xf32> to vector<89x64xf32>
    %293 = arith.addf %291, %292 : vector<89x64xf32>
    %c0_252 = arith.constant 0 : index
    %c0_253 = arith.constant 0 : index
    %294 = vector.load %arg14[%c0_252, %c0_253] : memref<100x64xf32, #tpu.memory_space<vmem>>, vector<89x64xf32>
    tpu.vector_store %arg14[%c0_252, %c0_253], %293 {strides = array<i32>} : memref<100x64xf32, #tpu.memory_space<vmem>>, vector<89x64xf32>,
    %c0_254 = arith.constant 0 : index
    %c0_255 = arith.constant 0 : index
    %295 = vector.load %arg14[%c0_254, %c0_255] : memref<100x64xf32, #tpu.memory_space<vmem>>, vector<100x64xf32>
    %c0_256 = arith.constant 0 : index
    %c0_257 = arith.constant 0 : index
    %296 = vector.load %arg11[%c0_256, %c0_257] : memref<1x64xf32, #tpu.memory_space<vmem>>, vector<1x64xf32>
    %297 = vector.broadcast %296 : vector<1x64xf32> to vector<100x64xf32>
    %298 = arith.addf %295, %297 : vector<100x64xf32>
    %299 = vector.broadcast %0 : vector<100x1xf32> to vector<100x64xf32>
    %300 = arith.mulf %298, %299 : vector<100x64xf32>
    %cst_258 = arith.constant dense<0.000000e+00> : vector<64xf32>
    %301 = vector.multi_reduction <add>, %300, %cst_258 [0] : vector<100x64xf32> to vector<64xf32>
    %302 = vector.shape_cast %301 : vector<64xf32> to vector<1x64xf32>
    %cst_259 = arith.constant 1.562500e-02 : f32
    %303 = vector.broadcast %cst_259 : f32 to vector<1x64xf32>
    %304 = arith.mulf %302, %303 : vector<1x64xf32>
    %305 = arith.mulf %300, %300 : vector<100x64xf32>
    %cst_260 = arith.constant dense<0.000000e+00> : vector<64xf32>
    %306 = vector.multi_reduction <add>, %305, %cst_260 [0] : vector<100x64xf32> to vector<64xf32>
    %307 = vector.shape_cast %306 : vector<64xf32> to vector<1x64xf32>
    %cst_261 = arith.constant 1.562500e-02 : f32
    %308 = vector.broadcast %cst_261 : f32 to vector<1x64xf32>
    %309 = arith.mulf %307, %308 : vector<1x64xf32>
    %310 = arith.mulf %304, %304 : vector<1x64xf32>
    %311 = arith.subf %309, %310 : vector<1x64xf32>
    %cst_262 = arith.constant 0.000000e+00 : f32
    %312 = vector.broadcast %cst_262 : f32 to vector<1x64xf32>
    %313 = arith.maximumf %311, %312 : vector<1x64xf32>
    %314 = vector.broadcast %304 : vector<1x64xf32> to vector<100x64xf32>
    %315 = arith.subf %300, %314 : vector<100x64xf32>
    %cst_263 = arith.constant 9.99999974E-6 : f32
    %316 = vector.broadcast %cst_263 : f32 to vector<1x64xf32>
    %317 = arith.addf %313, %316 : vector<1x64xf32>
    %318 = math.rsqrt %317 : vector<1x64xf32>
    %319 = vector.broadcast %318 : vector<1x64xf32> to vector<100x64xf32>
    %320 = arith.mulf %315, %319 : vector<100x64xf32>
    %cst_264 = arith.constant 0.000000e+00 : f32
    %321 = vector.broadcast %cst_264 : f32 to vector<100x64xf32>
    %322 = arith.cmpf oge, %320, %321 : vector<100x64xf32>
    %cst_265 = arith.constant 2.000000e-01 : f32
    %323 = vector.broadcast %cst_265 : f32 to vector<100x64xf32>
    %324 = arith.mulf %323, %320 : vector<100x64xf32>
    %325 = arith.select %322, %320, %324 : vector<100x64xi1>, vector<100x64xf32>
    %326 = vector.broadcast %0 : vector<100x1xf32> to vector<100x64xf32>
    %327 = arith.mulf %325, %326 : vector<100x64xf32>
    %cst_266 = arith.constant 0.000000e+00 : f32
    %328 = vector.broadcast %cst_266 : f32 to vector<100x64xf32>
    %c0_267 = arith.constant 0 : index
    %c0_268 = arith.constant 0 : index
    %329 = vector.load %arg14[%c0_267, %c0_268] : memref<100x64xf32, #tpu.memory_space<vmem>>, vector<100x64xf32>
    tpu.vector_store %arg14[%c0_267, %c0_268], %328 {strides = array<i32>} : memref<100x64xf32, #tpu.memory_space<vmem>>, vector<100x64xf32>,
    %c0_269 = arith.constant 0 : index
    %c0_270 = arith.constant 0 : index
    %c0_271 = arith.constant 0 : index
    %330 = vector.load %arg7[%c0_269, %c0_270, %c0_271] : memref<9x64x1xf32, #tpu.memory_space<vmem>>, vector<1x64x1xf32>
    %331 = vector.shape_cast %330 : vector<1x64x1xf32> to vector<64x1xf32>
    %cst_272 = arith.constant dense<0.000000e+00> : vector<100x1xf32>
    %332 = tpu.matmul %327, %331, %cst_272 {dimension_numbers = #tpu.dot_dimension_numbers<[1], [0], [0], [1], [0, 0, 1, 1], [], []>} : vector<100x64xf32>, vector<64x1xf32>, vector<100x1xf32> -> vector<100x1xf32>
    %c11_273 = arith.constant 11 : index
    %c0_274 = arith.constant 0 : index
    %333 = vector.load %arg14[%c11_273, %c0_274] : memref<100x64xf32, #tpu.memory_space<vmem>>, vector<89x1xf32>
    %334 = vector.extract_strided_slice %332 {offsets = [0, 0], sizes = [89, 1], strides = [1, 1]} : vector<100x1xf32> to vector<89x1xf32>
    %335 = arith.addf %333, %334 : vector<89x1xf32>
    %c11_275 = arith.constant 11 : index
    %c0_276 = arith.constant 0 : index
    %336 = vector.load %arg14[%c11_275, %c0_276] : memref<100x64xf32, #tpu.memory_space<vmem>>, vector<89x1xf32>
    tpu.vector_store %arg14[%c11_275, %c0_276], %335 {strides = array<i32>} : memref<100x64xf32, #tpu.memory_space<vmem>>, vector<89x1xf32>,
    %c1_277 = arith.constant 1 : index
    %c0_278 = arith.constant 0 : index
    %c0_279 = arith.constant 0 : index
    %337 = vector.load %arg7[%c1_277, %c0_278, %c0_279] : memref<9x64x1xf32, #tpu.memory_space<vmem>>, vector<1x64x1xf32>
    %338 = vector.shape_cast %337 : vector<1x64x1xf32> to vector<64x1xf32>
    %cst_280 = arith.constant dense<0.000000e+00> : vector<100x1xf32>
    %339 = tpu.matmul %327, %338, %cst_280 {dimension_numbers = #tpu.dot_dimension_numbers<[1], [0], [0], [1], [0, 0, 1, 1], [], []>} : vector<100x64xf32>, vector<64x1xf32>, vector<100x1xf32> -> vector<100x1xf32>
    %c10_281 = arith.constant 10 : index
    %c0_282 = arith.constant 0 : index
    %340 = vector.load %arg14[%c10_281, %c0_282] : memref<100x64xf32, #tpu.memory_space<vmem>>, vector<90x1xf32>
    %341 = vector.extract_strided_slice %339 {offsets = [0, 0], sizes = [90, 1], strides = [1, 1]} : vector<100x1xf32> to vector<90x1xf32>
    %342 = arith.addf %340, %341 : vector<90x1xf32>
    %c10_283 = arith.constant 10 : index
    %c0_284 = arith.constant 0 : index
    %343 = vector.load %arg14[%c10_283, %c0_284] : memref<100x64xf32, #tpu.memory_space<vmem>>, vector<90x1xf32>
    tpu.vector_store %arg14[%c10_283, %c0_284], %342 {strides = array<i32>} : memref<100x64xf32, #tpu.memory_space<vmem>>, vector<90x1xf32>,
    %c2_285 = arith.constant 2 : index
    %c0_286 = arith.constant 0 : index
    %c0_287 = arith.constant 0 : index
    %344 = vector.load %arg7[%c2_285, %c0_286, %c0_287] : memref<9x64x1xf32, #tpu.memory_space<vmem>>, vector<1x64x1xf32>
    %345 = vector.shape_cast %344 : vector<1x64x1xf32> to vector<64x1xf32>
    %cst_288 = arith.constant dense<0.000000e+00> : vector<100x1xf32>
    %346 = tpu.matmul %327, %345, %cst_288 {dimension_numbers = #tpu.dot_dimension_numbers<[1], [0], [0], [1], [0, 0, 1, 1], [], []>} : vector<100x64xf32>, vector<64x1xf32>, vector<100x1xf32> -> vector<100x1xf32>
    %c9_289 = arith.constant 9 : index
    %c0_290 = arith.constant 0 : index
    %347 = vector.load %arg14[%c9_289, %c0_290] : memref<100x64xf32, #tpu.memory_space<vmem>>, vector<91x1xf32>
    %348 = vector.extract_strided_slice %346 {offsets = [0, 0], sizes = [91, 1], strides = [1, 1]} : vector<100x1xf32> to vector<91x1xf32>
    %349 = arith.addf %347, %348 : vector<91x1xf32>
    %c9_291 = arith.constant 9 : index
    %c0_292 = arith.constant 0 : index
    %350 = vector.load %arg14[%c9_291, %c0_292] : memref<100x64xf32, #tpu.memory_space<vmem>>, vector<91x1xf32>
    tpu.vector_store %arg14[%c9_291, %c0_292], %349 {strides = array<i32>} : memref<100x64xf32, #tpu.memory_space<vmem>>, vector<91x1xf32>,
    %c3_293 = arith.constant 3 : index
    %c0_294 = arith.constant 0 : index
    %c0_295 = arith.constant 0 : index
    %351 = vector.load %arg7[%c3_293, %c0_294, %c0_295] : memref<9x64x1xf32, #tpu.memory_space<vmem>>, vector<1x64x1xf32>
    %352 = vector.shape_cast %351 : vector<1x64x1xf32> to vector<64x1xf32>
    %cst_296 = arith.constant dense<0.000000e+00> : vector<100x1xf32>
    %353 = tpu.matmul %327, %352, %cst_296 {dimension_numbers = #tpu.dot_dimension_numbers<[1], [0], [0], [1], [0, 0, 1, 1], [], []>} : vector<100x64xf32>, vector<64x1xf32>, vector<100x1xf32> -> vector<100x1xf32>
    %c1_297 = arith.constant 1 : index
    %c0_298 = arith.constant 0 : index
    %354 = vector.load %arg14[%c1_297, %c0_298] : memref<100x64xf32, #tpu.memory_space<vmem>>, vector<99x1xf32>
    %355 = vector.extract_strided_slice %353 {offsets = [0, 0], sizes = [99, 1], strides = [1, 1]} : vector<100x1xf32> to vector<99x1xf32>
    %356 = arith.addf %354, %355 : vector<99x1xf32>
    %c1_299 = arith.constant 1 : index
    %c0_300 = arith.constant 0 : index
    %357 = vector.load %arg14[%c1_299, %c0_300] : memref<100x64xf32, #tpu.memory_space<vmem>>, vector<99x1xf32>
    tpu.vector_store %arg14[%c1_299, %c0_300], %356 {strides = array<i32>} : memref<100x64xf32, #tpu.memory_space<vmem>>, vector<99x1xf32>,
    %c4_301 = arith.constant 4 : index
    %c0_302 = arith.constant 0 : index
    %c0_303 = arith.constant 0 : index
    %358 = vector.load %arg7[%c4_301, %c0_302, %c0_303] : memref<9x64x1xf32, #tpu.memory_space<vmem>>, vector<1x64x1xf32>
    %359 = vector.shape_cast %358 : vector<1x64x1xf32> to vector<64x1xf32>
    %cst_304 = arith.constant dense<0.000000e+00> : vector<100x1xf32>
    %360 = tpu.matmul %327, %359, %cst_304 {dimension_numbers = #tpu.dot_dimension_numbers<[1], [0], [0], [1], [0, 0, 1, 1], [], []>} : vector<100x64xf32>, vector<64x1xf32>, vector<100x1xf32> -> vector<100x1xf32>
    %c0_305 = arith.constant 0 : index
    %c0_306 = arith.constant 0 : index
    %361 = vector.load %arg14[%c0_305, %c0_306] : memref<100x64xf32, #tpu.memory_space<vmem>>, vector<100x1xf32>
    %362 = arith.addf %361, %360 : vector<100x1xf32>
    %c0_307 = arith.constant 0 : index
    %c0_308 = arith.constant 0 : index
    %363 = vector.load %arg14[%c0_307, %c0_308] : memref<100x64xf32, #tpu.memory_space<vmem>>, vector<100x1xf32>
    tpu.vector_store %arg14[%c0_307, %c0_308], %362 {strides = array<i32>} : memref<100x64xf32, #tpu.memory_space<vmem>>, vector<100x1xf32>,
    %c5_309 = arith.constant 5 : index
    %c0_310 = arith.constant 0 : index
    %c0_311 = arith.constant 0 : index
    %364 = vector.load %arg7[%c5_309, %c0_310, %c0_311] : memref<9x64x1xf32, #tpu.memory_space<vmem>>, vector<1x64x1xf32>
    %365 = vector.shape_cast %364 : vector<1x64x1xf32> to vector<64x1xf32>
    %cst_312 = arith.constant dense<0.000000e+00> : vector<100x1xf32>
    %366 = tpu.matmul %327, %365, %cst_312 {dimension_numbers = #tpu.dot_dimension_numbers<[1], [0], [0], [1], [0, 0, 1, 1], [], []>} : vector<100x64xf32>, vector<64x1xf32>, vector<100x1xf32> -> vector<100x1xf32>
    %c0_313 = arith.constant 0 : index
    %c0_314 = arith.constant 0 : index
    %367 = vector.load %arg14[%c0_313, %c0_314] : memref<100x64xf32, #tpu.memory_space<vmem>>, vector<99x1xf32>
    %368 = vector.extract_strided_slice %366 {offsets = [1, 0], sizes = [99, 1], strides = [1, 1]} : vector<100x1xf32> to vector<99x1xf32>
    %369 = arith.addf %367, %368 : vector<99x1xf32>
    %c0_315 = arith.constant 0 : index
    %c0_316 = arith.constant 0 : index
    %370 = vector.load %arg14[%c0_315, %c0_316] : memref<100x64xf32, #tpu.memory_space<vmem>>, vector<99x1xf32>
    tpu.vector_store %arg14[%c0_315, %c0_316], %369 {strides = array<i32>} : memref<100x64xf32, #tpu.memory_space<vmem>>, vector<99x1xf32>,
    %c6_317 = arith.constant 6 : index
    %c0_318 = arith.constant 0 : index
    %c0_319 = arith.constant 0 : index
    %371 = vector.load %arg7[%c6_317, %c0_318, %c0_319] : memref<9x64x1xf32, #tpu.memory_space<vmem>>, vector<1x64x1xf32>
    %372 = vector.shape_cast %371 : vector<1x64x1xf32> to vector<64x1xf32>
    %cst_320 = arith.constant dense<0.000000e+00> : vector<100x1xf32>
    %373 = tpu.matmul %327, %372, %cst_320 {dimension_numbers = #tpu.dot_dimension_numbers<[1], [0], [0], [1], [0, 0, 1, 1], [], []>} : vector<100x64xf32>, vector<64x1xf32>, vector<100x1xf32> -> vector<100x1xf32>
    %c0_321 = arith.constant 0 : index
    %c0_322 = arith.constant 0 : index
    %374 = vector.load %arg14[%c0_321, %c0_322] : memref<100x64xf32, #tpu.memory_space<vmem>>, vector<91x1xf32>
    %375 = vector.extract_strided_slice %373 {offsets = [9, 0], sizes = [91, 1], strides = [1, 1]} : vector<100x1xf32> to vector<91x1xf32>
    %376 = arith.addf %374, %375 : vector<91x1xf32>
    %c0_323 = arith.constant 0 : index
    %c0_324 = arith.constant 0 : index
    %377 = vector.load %arg14[%c0_323, %c0_324] : memref<100x64xf32, #tpu.memory_space<vmem>>, vector<91x1xf32>
    tpu.vector_store %arg14[%c0_323, %c0_324], %376 {strides = array<i32>} : memref<100x64xf32, #tpu.memory_space<vmem>>, vector<91x1xf32>,
    %c7_325 = arith.constant 7 : index
    %c0_326 = arith.constant 0 : index
    %c0_327 = arith.constant 0 : index
    %378 = vector.load %arg7[%c7_325, %c0_326, %c0_327] : memref<9x64x1xf32, #tpu.memory_space<vmem>>, vector<1x64x1xf32>
    %379 = vector.shape_cast %378 : vector<1x64x1xf32> to vector<64x1xf32>
    %cst_328 = arith.constant dense<0.000000e+00> : vector<100x1xf32>
    %380 = tpu.matmul %327, %379, %cst_328 {dimension_numbers = #tpu.dot_dimension_numbers<[1], [0], [0], [1], [0, 0, 1, 1], [], []>} : vector<100x64xf32>, vector<64x1xf32>, vector<100x1xf32> -> vector<100x1xf32>
    %c0_329 = arith.constant 0 : index
    %c0_330 = arith.constant 0 : index
    %381 = vector.load %arg14[%c0_329, %c0_330] : memref<100x64xf32, #tpu.memory_space<vmem>>, vector<90x1xf32>
    %382 = vector.extract_strided_slice %380 {offsets = [10, 0], sizes = [90, 1], strides = [1, 1]} : vector<100x1xf32> to vector<90x1xf32>
    %383 = arith.addf %381, %382 : vector<90x1xf32>
    %c0_331 = arith.constant 0 : index
    %c0_332 = arith.constant 0 : index
    %384 = vector.load %arg14[%c0_331, %c0_332] : memref<100x64xf32, #tpu.memory_space<vmem>>, vector<90x1xf32>
    tpu.vector_store %arg14[%c0_331, %c0_332], %383 {strides = array<i32>} : memref<100x64xf32, #tpu.memory_space<vmem>>, vector<90x1xf32>,
    %c8_333 = arith.constant 8 : index
    %c0_334 = arith.constant 0 : index
    %c0_335 = arith.constant 0 : index
    %385 = vector.load %arg7[%c8_333, %c0_334, %c0_335] : memref<9x64x1xf32, #tpu.memory_space<vmem>>, vector<1x64x1xf32>
    %386 = vector.shape_cast %385 : vector<1x64x1xf32> to vector<64x1xf32>
    %cst_336 = arith.constant dense<0.000000e+00> : vector<100x1xf32>
    %387 = tpu.matmul %327, %386, %cst_336 {dimension_numbers = #tpu.dot_dimension_numbers<[1], [0], [0], [1], [0, 0, 1, 1], [], []>} : vector<100x64xf32>, vector<64x1xf32>, vector<100x1xf32> -> vector<100x1xf32>
    %c0_337 = arith.constant 0 : index
    %c0_338 = arith.constant 0 : index
    %388 = vector.load %arg14[%c0_337, %c0_338] : memref<100x64xf32, #tpu.memory_space<vmem>>, vector<89x1xf32>
    %389 = vector.extract_strided_slice %387 {offsets = [11, 0], sizes = [89, 1], strides = [1, 1]} : vector<100x1xf32> to vector<89x1xf32>
    %390 = arith.addf %388, %389 : vector<89x1xf32>
    %c0_339 = arith.constant 0 : index
    %c0_340 = arith.constant 0 : index
    %391 = vector.load %arg14[%c0_339, %c0_340] : memref<100x64xf32, #tpu.memory_space<vmem>>, vector<89x1xf32>
    tpu.vector_store %arg14[%c0_339, %c0_340], %390 {strides = array<i32>} : memref<100x64xf32, #tpu.memory_space<vmem>>, vector<89x1xf32>,
    %c0_341 = arith.constant 0 : index
    %c0_342 = arith.constant 0 : index
    %392 = vector.load %arg14[%c0_341, %c0_342] : memref<100x64xf32, #tpu.memory_space<vmem>>, vector<100x1xf32>
    %c0_343 = arith.constant 0 : index
    %c0_344 = arith.constant 0 : index
    %393 = vector.load %arg12[%c0_343, %c0_344] : memref<1x1xf32, #tpu.memory_space<vmem>>, vector<1x1xf32>
    %394 = vector.broadcast %393 : vector<1x1xf32> to vector<100x1xf32>
    %395 = arith.addf %392, %394 : vector<100x1xf32>
    %396 = arith.mulf %395, %0 : vector<100x1xf32>
    %397 = arith.mulf %396, %0 : vector<100x1xf32>
    %c0_345 = arith.constant 0 : index
    %c0_346 = arith.constant 0 : index
    %c0_347 = arith.constant 0 : index
    %398 = vector.load %arg13[%c0_345, %c0_346, %c0_347] : memref<1x100x1xf32, #tpu.memory_space<vmem>>, vector<1x100x1xf32>
    %399 = vector.shape_cast %398 : vector<1x100x1xf32> to vector<100x1xf32>
    %400 = vector.shape_cast %397 : vector<100x1xf32> to vector<1x100x1xf32>
    tpu.vector_store %arg13[%c0_345, %c0_346, %c0_347], %400 {strides = array<i32>} : memref<1x100x1xf32, #tpu.memory_space<vmem>>, vector<1x100x1xf32>,
    return
  }
  func.func @transform_0(%arg0: i32) -> (i32, i32, i32) {
    %c0_i32 = arith.constant 0 : i32
    %c0_i32_0 = arith.constant 0 : i32
    %c0_i32_1 = arith.constant 0 : i32
    return %arg0, %c0_i32, %c0_i32_0 : i32, i32, i32
  }
  func.func @transform_1(%arg0: i32) -> (i32, i32) {
    %c0_i32 = arith.constant 0 : i32
    %c0_i32_0 = arith.constant 0 : i32
    %c0_i32_1 = arith.constant 0 : i32
    return %c0_i32, %c0_i32_0 : i32, i32
  }
  func.func @transform_2(%arg0: i32) -> (i32, i32) {
    %c0_i32 = arith.constant 0 : i32
    %c0_i32_0 = arith.constant 0 : i32
    %c0_i32_1 = arith.constant 0 : i32
    return %c0_i32, %c0_i32_0 : i32, i32
  }
  func.func @transform_3(%arg0: i32) -> (i32, i32, i32) {
    %c0_i32 = arith.constant 0 : i32
    %c0_i32_0 = arith.constant 0 : i32
    %c0_i32_1 = arith.constant 0 : i32
    %c0_i32_2 = arith.constant 0 : i32
    return %c0_i32, %c0_i32_0, %c0_i32_1 : i32, i32, i32
  }
  func.func @transform_4(%arg0: i32) -> (i32, i32, i32) {
    %c0_i32 = arith.constant 0 : i32
    %c0_i32_0 = arith.constant 0 : i32
    %c0_i32_1 = arith.constant 0 : i32
    %c0_i32_2 = arith.constant 0 : i32
    return %c0_i32, %c0_i32_0, %c0_i32_1 : i32, i32, i32
  }
  func.func @transform_5(%arg0: i32) -> (i32, i32, i32) {
    %c0_i32 = arith.constant 0 : i32
    %c0_i32_0 = arith.constant 0 : i32
    %c0_i32_1 = arith.constant 0 : i32
    %c0_i32_2 = arith.constant 0 : i32
    return %c0_i32, %c0_i32_0, %c0_i32_1 : i32, i32, i32
  }
  func.func @transform_6(%arg0: i32) -> (i32, i32, i32) {
    %c0_i32 = arith.constant 0 : i32
    %c0_i32_0 = arith.constant 0 : i32
    %c0_i32_1 = arith.constant 0 : i32
    %c0_i32_2 = arith.constant 0 : i32
    return %c0_i32, %c0_i32_0, %c0_i32_1 : i32, i32, i32
  }
  func.func @transform_7(%arg0: i32) -> (i32, i32) {
    %c0_i32 = arith.constant 0 : i32
    %c0_i32_0 = arith.constant 0 : i32
    %c0_i32_1 = arith.constant 0 : i32
    return %c0_i32, %c0_i32_0 : i32, i32
  }
  func.func @transform_8(%arg0: i32) -> (i32, i32) {
    %c0_i32 = arith.constant 0 : i32
    %c0_i32_0 = arith.constant 0 : i32
    %c0_i32_1 = arith.constant 0 : i32
    return %c0_i32, %c0_i32_0 : i32, i32
  }
  func.func @transform_9(%arg0: i32) -> (i32, i32) {
    %c0_i32 = arith.constant 0 : i32
    %c0_i32_0 = arith.constant 0 : i32
    %c0_i32_1 = arith.constant 0 : i32
    return %c0_i32, %c0_i32_0 : i32, i32
  }
  func.func @transform_10(%arg0: i32) -> (i32, i32) {
    %c0_i32 = arith.constant 0 : i32
    %c0_i32_0 = arith.constant 0 : i32
    %c0_i32_1 = arith.constant 0 : i32
    return %c0_i32, %c0_i32_0 : i32, i32
  }
  func.func @transform_11(%arg0: i32) -> (i32, i32) {
    %c0_i32 = arith.constant 0 : i32
    %c0_i32_0 = arith.constant 0 : i32
    %c0_i32_1 = arith.constant 0 : i32
    return %c0_i32, %c0_i32_0 : i32, i32
  }
  func.func @transform_12(%arg0: i32) -> (i32, i32, i32) {
    %c0_i32 = arith.constant 0 : i32
    %c0_i32_0 = arith.constant 0 : i32
    %c0_i32_1 = arith.constant 0 : i32
    return %arg0, %c0_i32, %c0_i32_0 : i32, i32, i32
  }
}

</mosaic_0001>

<bundles_post_ra>
// kernel: tpu_custom_call.1
= control target key start
LH: loop header
LB: loop body
LE: loop exit
PB: predicated region body
PF: predicated region fallthrough
CT: control target
= control target key end

     0   :  { %s12040_s23 = smov 0   ;;  %s16311_s0 = inlined_call_operand.vmem [shape: f32[2,100,36], index: 0, kind: input, shape index: {}]   ;;  %s16312_s1 = inlined_call_operand.vmem [shape: f32[100,1], index: 1, kind: input, shape index: {}]   ;;  %s16313_s2 = inlined_call_operand.vmem [shape: f32[36,8], index: 2, kind: input, shape index: {}]   ;;  %s16314_s3 = inlined_call_operand.vmem [shape: f32[9,8,16], index: 3, kind: input, shape index: {}]   ;;  %s16315_s4 = inlined_call_operand.vmem [shape: f32[9,16,32], index: 4, kind: input, shape index: {}]   ;;  %s16316_s5 = inlined_call_operand.vmem [shape: f32[9,32,64], index: 5, kind: input, shape index: {}]   ;;  %s16317_s6 = inlined_call_operand.vmem [shape: f32[9,64,1], index: 6, kind: input, shape index: {}]   ;;  %s16318_s7 = inlined_call_operand.vmem [shape: f32[1,8], index: 7, kind: input, shape index: {}]   ;;  %s16319_s8 = inlined_call_operand.vmem [shape: f32[1,16], index: 8, kind: input, shape index: {}]   ;;  %s16320_s9 = inlined_call_operand.vmem [shape: f32[1,32], index: 9, kind: input, shape index: {}]   ;;  %s16321_s10 = inlined_call_operand.vmem [shape: f32[1,64], index: 10, kind: input, shape index: {}]   ;;  %s16322_s11 = inlined_call_operand.<no memory space> [shape: f32[1,1], index: 11, kind: input, shape index: {}]   ;;  %s16323_s12 = inlined_call_operand.vmem [shape: f32[2,100,1], index: 12, kind: output, shape index: {}]  }
   0x1   :  { %v17_v0 = vstv %s16322_s11 }
   0x2   :  { %18 = vst [vmem:[#allocation3] sm:$0x1] %v17_v0 }
   0x3 LB: > { %s8767_s24 = sadd.s32 4294967295, %s11966_s23   ;;  %p8771_p0 = scmp.ge.s32.totalorder %s11966_s23, 1  ;;  %s11966_s23 = sphi %s12040_s23, %s24_s23  }
   0x4   : > { %p364_p1 = scmp.lt.s32.totalorder %s11966_s23, 3 }
   0x6   : > { %p365_p2 = pnand %p8771_p0, %p364_p1 }
   0x7   : > { %v442_v1 = vld [vmem:[%s16313_s2] sm:$0xff] (!%p365_p2)  ;;  %v443_v2 = vld [vmem:[%s16313_s2 + $0x8] sm:$0xff] (!%p365_p2)  ;;  %v444_v3 = vld [vmem:[%s16313_s2 + $0x10] sm:$0xff] (!%p365_p2)  ;;  %v11968_v4 = vmov (!%p365_p2), 0.0|0.0   ;;  %p406_p3 = scmp.lt.s32.totalorder (!%p365_p2), %s8767_s24, 1  ;;  %v11969_v7 = vmov (!%p365_p2), 0.0  }
   0x8   : > { %368 = sbr.rel (%p365_p2) target bundleno = 2404 (0x964), region = 68  ;;  %11727 = vmatprep.subr.bf16.mxu0 (!%p365_p2), %v11968_v4  ;;  %v11728_v5 = vpack.c.bf16 (!%p365_p2), %v443_v2, %v442_v1  ;;  %v445_v6 = vld [vmem:[%s16313_s2 + $0x18] sm:$0xff] (!%p365_p2)  ;;  %11922 = vmatprep.subr.mxu1 (!%p365_p2), %v11969_v7  ;;  %vm11970_vm0 = vmmov (!%p365_p2), 0   ;;  %v416_v8 = vld [vmem:[%s16312_s1] sm:$0xff] (!%p365_p2)  ;;  %v11971_v10 = vmov (!%p365_p2), 0   ;;  %v418_v11 = vld [vmem:[%s16312_s1 + $0x10] sm:$0xff] (!%p365_p2) }
   0x9   : > { %10014 = vmatprep.mubr.msk.f32.mxu0 (!%p365_p2), %vm11970_vm0, %v11969_v7  ;;  %10070 = vmatprep.mubr.msk.f32.mxu1 (!%p365_p2), %vm11970_vm0, %v11969_v7  ;;  %v11731_v9 = vpack.c.bf16 (!%p365_p2), %v445_v6, %v444_v3  ;;  %v417_v12 = vld [vmem:[%s16312_s1 + $0x8] sm:$0xff] (!%p365_p2)  ;;  %v419_v13 = vld [vmem:[%s16312_s1 + $0x18] sm:$0xff] (!%p365_p2)  ;;  %v446_v14 = vld [vmem:[%s16313_s2 + $0x20] sm:$0xf] (!%p365_p2)  ;;  %vm494_vm1 = vcmask (!%p365_p2), 1043456   ;;  %vm454_vm2 = vcmask (!%p365_p2), 293888  }
   0xa   : > { %11729 = vmatpush3.bf16.msra.mxu0 (!%p365_p2), %v11728_v5  ;;  %11937 = vset.pattern.permute.xlu0 (!%p365_p2), %v11971_v10  ;;  %v420_v16 = vld [vmem:[%s16312_s1 + $0x20] sm:$0xff] (!%p365_p2)  ;;  %v421_v17 = vld [vmem:[%s16312_s1 + $0x28] sm:$0xff] (!%p365_p2)  ;;  %v422_v19 = vld [vmem:[%s16312_s1 + $0x30] sm:$0xff] (!%p365_p2)  ;;  %vm706_vm3 = vcmask (!%p365_p2), 64512   ;;  %vm730_vm4 = vcmask (!%p365_p2), 60416  }
   0xb   : > { %11730 = vmatprep.subr.bf16.mxu0 (!%p365_p2), %v11968_v4  ;;  %630 = vperm.xlu0 (!%p365_p2), %11937, %v416_v8   ;;  %v423_v20 = vld [vmem:[%s16312_s1 + $0x38] sm:$0xff] (!%p365_p2)  ;;  %v424_v22 = vld [vmem:[%s16312_s1 + $0x40] sm:$0xff] (!%p365_p2)  ;;  %v425_v23 = vld [vmem:[%s16312_s1 + $0x48] sm:$0xff] (!%p365_p2) }
   0xc   : > { %11938 = vset.pattern.permute.xlu1 (!%p365_p2), %v11971_v10  ;;  %v426_v25 = vld [vmem:[%s16312_s1 + $0x50] sm:$0xff] (!%p365_p2)  ;;  %v427_v26 = vld [vmem:[%s16312_s1 + $0x58] sm:$0xff] (!%p365_p2)  ;;  %v428_v28 = vld [vmem:[%s16312_s1 + $0x60] sm:$0xf] (!%p365_p2) }
   0xd   : > { %640 = vperm.xlu1 (!%p365_p2), %11938, %v418_v11   ;;  %v883_v37 = vld [vmem:[%s16314_s3] sm:$0xff] (!%p365_p2) }
   0xe   : > { %11732 = vmatpush3.bf16.msra.mxu0 (!%p365_p2), %v11731_v9  ;;  %11923 = vmatpush3.msra.mxu1 (!%p365_p2), %v883_v37  ;;  %v12181_v38 = vld [vmem:[%s16318_s7] ss:$0 sm:$0xff] (!%p365_p2) }
   0xf   : > { %s16325_s24 = smov (!%p406_p3, %s8767_s24), 1  ;;  %10012 = vmatprep.subr.mxu0 %v11969_v7  ;;  %635 = vperm.xlu0 %11937, %v417_v12  }
  0x10   : > { %s11924_s18 = smul.u32 104, %s16325_s24  ;;  %10094 = vmatprep.subr.mxu1 %v11969_v7 }
  0x11   : > { %645 = vperm.xlu1 %11938, %v419_v13  }
  0x12   : > { %s12084_s25 = scalar_lea.vmem %s16311_s0, %s11924_s18  ;;  %10013 = vmatpush3.msk.msra.mxu0 %vm494_vm1, %v446_v14  ;;  %s16171_s11 = scalar_lea.vmem %s16323_s12, %s11924_s18 }
  0x13   : > { %v429_v15 = vld [vmem:[%s12084_s25] sm:$0xff]  ;;  %650 = vperm.xlu0 %11937, %v420_v16   ;;  %v430_v18 = vld [vmem:[%s12084_s25 + $0x8] sm:$0xff]  ;;  %10053 = vmatprep.subr.mxu0 %v11969_v7  ;;  %v431_v21 = vld [vmem:[%s12084_s25 + $0x10] sm:$0xff] }
  0x14   : > { %10015 = vmatmul.mubr.msk.f32.vlgmr.msra.gmra.mrb[0].mxu0 %vm454_vm2, %v429_v15  ;;  %v432_v24 = vld [vmem:[%s12084_s25 + $0x18] sm:$0xff]  ;;  %v433_v27 = vld [vmem:[%s12084_s25 + $0x20] sm:$0xff]  ;;  %v434_v29 = vld [vmem:[%s12084_s25 + $0x28] sm:$0xff] }
  0x15   : > { %10017 = vmatprep.mubr.msk.f32.mxu0 %vm11970_vm0, %v11969_v7  ;;  %655 = vperm.xlu1 %11938, %v421_v17   ;;  %v435_v30 = vld [vmem:[%s12084_s25 + $0x30] sm:$0xff]  ;;  %v436_v31 = vld [vmem:[%s12084_s25 + $0x38] sm:$0xff]  ;;  %v437_v32 = vld [vmem:[%s12084_s25 + $0x40] sm:$0xff] }
  0x16   : > { %v438_v33 = vld [vmem:[%s12084_s25 + $0x48] sm:$0xff]  ;;  %v439_v34 = vld [vmem:[%s12084_s25 + $0x50] sm:$0xff]  ;;  %v440_v35 = vld [vmem:[%s12084_s25 + $0x58] sm:$0xff]  ;;  %10054 = vmatpush3.msra.mxu0 %v883_v37 }
  0x17   : > { %660 = vperm.xlu0 %11937, %v422_v19   ;;  %v441_v36 = vld [vmem:[%s12084_s25 + $0x60] sm:$0xf]  ;;  %10135 = vmatprep.subr.mxu0 %v11969_v7 }
  0x18   : > { %10018 = vmatmul.mubr.msk.f32.gmra.mrb[2].mxu0 %vm454_vm2, %v430_v18 }
  0x19   : > { %10020 = vmatprep.mubr.msk.f32.mxu0 %vm11970_vm0, %v11969_v7  ;;  %665 = vperm.xlu1 %11938, %v423_v20  }
  0x1b   : > { %670 = vperm.xlu0 %11937, %v424_v22  }
  0x1c   : > { %10021 = vmatmul.mubr.msk.f32.gmra.mrb[4].mxu0 %vm454_vm2, %v431_v21 }
  0x1d   : > { %10023 = vmatprep.mubr.msk.f32.mxu0 %vm11970_vm0, %v11969_v7  ;;  %675 = vperm.xlu1 %11938, %v425_v23  }
  0x1f   : > { %680 = vperm.xlu0 %11937, %v426_v25  }
  0x20   : > { %10024 = vmatmul.mubr.msk.f32.gmra.mrb[6].mxu0 %vm454_vm2, %v432_v24 }
  0x21   : > { %10026 = vmatprep.mubr.msk.f32.mxu0 %vm11970_vm0, %v11969_v7  ;;  %685 = vperm.xlu1 %11938, %v427_v26  }
  0x23   : > { %690 = vperm.xlu0 %11937, %v428_v28  }
  0x24   : > { %10027 = vmatmul.mubr.msk.f32.gmra.mrb[8].mxu0 %vm454_vm2, %v433_v27 }
  0x25   : > { %10029 = vmatprep.mubr.msk.f32.mxu0 %vm11970_vm0, %v11969_v7 }
  0x28   : > { %10030 = vmatmul.mubr.msk.f32.gmra.mrb[10].mxu0 %vm454_vm2, %v434_v29 }
  0x29   : > { %10032 = vmatprep.mubr.msk.f32.mxu0 %vm11970_vm0, %v11969_v7 }
  0x2c   : > { %10033 = vmatmul.mubr.msk.f32.gmra.mrb[12].mxu0 %vm454_vm2, %v435_v30 }
  0x2d   : > { %10035 = vmatprep.mubr.msk.f32.mxu0 %vm11970_vm0, %v11969_v7 }
  0x30   : > { %10036 = vmatmul.mubr.msk.f32.gmra.mrb[14].mxu0 %vm454_vm2, %v436_v31 }
  0x31   : > { %10038 = vmatprep.mubr.msk.f32.mxu0 %vm11970_vm0, %v11969_v7 }
  0x34   : > { %10039 = vmatmul.mubr.msk.f32.gmra.mrb[16].mxu0 %vm454_vm2, %v437_v32 }
  0x35   : > { %10041 = vmatprep.mubr.msk.f32.mxu0 %vm11970_vm0, %v11969_v7 }
  0x38   : > { %10042 = vmatmul.mubr.msk.f32.gmra.mrb[18].mxu0 %vm454_vm2, %v438_v33 }
  0x39   : > { %10044 = vmatprep.mubr.msk.f32.mxu0 %vm11970_vm0, %v11969_v7 }
  0x3c   : > { %10045 = vmatmul.mubr.msk.f32.gmra.mrb[20].mxu0 %vm454_vm2, %v439_v34 }
  0x3d   : > { %10047 = vmatprep.mubr.msk.f32.mxu0 %vm11970_vm0, %v11969_v7 }
  0x40   : > { %10048 = vmatmul.mubr.msk.f32.gmra.mrb[22].mxu0 %vm454_vm2, %v440_v35 }
  0x41   : > { %10050 = vmatprep.mubr.msk.f32.mxu0 %vm11970_vm0, %v11969_v7 }
  0x44   : > { %10051 = vmatmul.mubr.msk.f32.gmra.mrb[24].mxu0 %vm454_vm2, %v441_v36 }
  0x45   : > { %10055 = vmatprep.mubr.msk.f32.mxu0 %vm11970_vm0, %v11969_v7 }
  0x8a   : > { %v12183_v39 = vpop.permute.xlu0 %630 }
  0x8c   : > { %v12197_v50 = vpop.permute.xlu1 %640 }
  0x8e   : > { %v12190_v47 = vpop.permute.xlu0 %635 }
  0x90   : > { %v12216_v5 = vpop.permute.xlu1 %645 }
  0x92   : > { %v12227_v15 = vpop.permute.xlu0 %650 }
  0x94   : > { %v12238_v25 = vpop.permute.xlu1 %655 }
  0x96   : > { %v12249_v35 = vpop.permute.xlu0 %660 }
  0xe7   : > { %v564_v40 = vpop.f32.mrb[0].mxu0 }
  0xe8   : > { %v565_v41 = vadd.f32 %v12181_v38, %v564_v40  ;;  %v10016_v42 = vpop.f32.mrb[1].mxu0 }
  0xea   : > { %v12187_v43 = vmul.f32 %v12183_v39, %v565_v41 }
  0xeb   : > { %v569_v44 = vpop.f32.mrb[2].mxu0 }
  0xec   : > { %v570_v45 = vadd.f32 %v12181_v38, %v569_v44  ;;  %v10019_v46 = vpop.f32.mrb[3].mxu0  ;;  %v740_v48 = vmul.f32 %v12187_v43, %v12187_v43  ;;  %v707_v52 = vsel %vm706_vm3, %v12187_v43, 0.0 }
  0xee   : > { %v12195_v49 = vmul.f32 %v12190_v47, %v570_v45  ;;  %v753_v58 = vsel %vm706_vm3, %v740_v48, 0.0 }
  0xef   : > { %v574_v51 = vpop.f32.mrb[4].mxu0 }
  0xf0   : > { %v708_v53 = vsel %vm706_vm3, %v12195_v49, 0.0  ;;  %v741_v54 = vmul.f32 %v12195_v49, %v12195_v49  ;;  %v575_v55 = vadd.f32 %v12181_v38, %v574_v51  ;;  %v10022_v56 = vpop.f32.mrb[5].mxu0  ;;  %v12260_v51 = vpop.permute.xlu1 %665 }
  0xf1   : > { %v709_v57 = vadd.f32 %v708_v53, %v707_v52 }
  0xf2   : > { %v754_v59 = vsel %vm706_vm3, %v741_v54, 0.0  ;;  %v12209_v60 = vmul.f32 %v12197_v50, %v575_v55 }
  0xf3   : > { %v755_v61 = vadd.f32 %v754_v59, %v753_v58  ;;  %v579_v62 = vpop.f32.mrb[6].mxu0 }
  0xf4   : > { %v710_v63 = vsel %vm706_vm3, %v12209_v60, 0.0  ;;  %v742_v0 = vmul.f32 %v12209_v60, %v12209_v60  ;;  %v580_v1 = vadd.f32 %v12181_v38, %v579_v62  ;;  %v10025_v2 = vpop.f32.mrb[7].mxu0  ;;  %v12271_v62 = vpop.permute.xlu0 %670 }
  0xf5   : > { %v711_v3 = vadd.f32 %v710_v63, %v709_v57 }
  0xf6   : > { %v756_v6 = vsel %vm706_vm3, %v742_v0, 0.0  ;;  %v12220_v8 = vmul.f32 %v12216_v5, %v580_v1 }
  0xf7   : > { %v757_v9 = vadd.f32 %v756_v6, %v755_v61  ;;  %v584_v10 = vpop.f32.mrb[8].mxu0 }
  0xf8   : > { %v712_v11 = vsel %vm706_vm3, %v12220_v8, 0.0  ;;  %v743_v12 = vmul.f32 %v12220_v8, %v12220_v8  ;;  %v585_v13 = vadd.f32 %v12181_v38, %v584_v10  ;;  %v10028_v14 = vpop.f32.mrb[9].mxu0 }
  0xf9   : > { %v713_v16 = vadd.f32 %v712_v11, %v711_v3 }
  0xfa   : > { %v758_v17 = vsel %vm706_vm3, %v743_v12, 0.0  ;;  %v12231_v18 = vmul.f32 %v12227_v15, %v585_v13  ;;  %v12282_v12 = vpop.permute.xlu1 %675 }
  0xfb   : > { %v759_v19 = vadd.f32 %v758_v17, %v757_v9  ;;  %v589_v20 = vpop.f32.mrb[10].mxu0 }
  0xfc   : > { %v714_v21 = vsel %vm706_vm3, %v12231_v18, 0.0  ;;  %v744_v22 = vmul.f32 %v12231_v18, %v12231_v18  ;;  %v590_v23 = vadd.f32 %v12181_v38, %v589_v20  ;;  %v10031_v24 = vpop.f32.mrb[11].mxu0 }
  0xfd   : > { %v715_v26 = vadd.f32 %v714_v21, %v713_v16  ;;  %v12293_v24 = vpop.permute.xlu0 %680 }
  0xfe   : > { %v760_v27 = vsel %vm706_vm3, %v744_v22, 0.0  ;;  %v12242_v28 = vmul.f32 %v12238_v25, %v590_v23 }
  0xff   : > { %v761_v29 = vadd.f32 %v760_v27, %v759_v19  ;;  %v594_v30 = vpop.f32.mrb[12].mxu0 }
 0x100   : > { %v716_v31 = vsel %vm706_vm3, %v12242_v28, 0.0  ;;  %v745_v32 = vmul.f32 %v12242_v28, %v12242_v28  ;;  %v595_v33 = vadd.f32 %v12181_v38, %v594_v30  ;;  %v10034_v34 = vpop.f32.mrb[13].mxu0 }
 0x101   : > { %v717_v36 = vadd.f32 %v716_v31, %v715_v26 }
 0x102   : > { %v762_v37 = vsel %vm706_vm3, %v745_v32, 0.0  ;;  %v12253_v40 = vmul.f32 %v12249_v35, %v595_v33 }
 0x103   : > { %v763_v41 = vadd.f32 %v762_v37, %v761_v29  ;;  %v599_v42 = vpop.f32.mrb[14].mxu0  ;;  %v12304_v37 = vpop.permute.xlu1 %685 }
 0x104   : > { %v718_v44 = vsel %vm706_vm3, %v12253_v40, 0.0  ;;  %v746_v45 = vmul.f32 %v12253_v40, %v12253_v40  ;;  %v600_v46 = vadd.f32 %v12181_v38, %v599_v42  ;;  %v10037_v48 = vpop.f32.mrb[15].mxu0 }
 0x105   : > { %v719_v52 = vadd.f32 %v718_v44, %v717_v36 }
 0x106   : > { %v764_v53 = vsel %vm706_vm3, %v746_v45, 0.0  ;;  %v12264_v54 = vmul.f32 %v12260_v51, %v600_v46 }
 0x107   : > { %v765_v55 = vadd.f32 %v764_v53, %v763_v41  ;;  %v604_v56 = vpop.f32.mrb[16].mxu0 }
 0x108   : > { %v720_v57 = vsel %vm706_vm3, %v12264_v54, 0.0  ;;  %v747_v58 = vmul.f32 %v12264_v54, %v12264_v54  ;;  %v605_v59 = vadd.f32 %v12181_v38, %v604_v56  ;;  %v10040_v61 = vpop.f32.mrb[17].mxu0  ;;  %v12315_v56 = vpop.permute.xlu0 %690 }
 0x109   : > { %v721_v63 = vadd.f32 %v720_v57, %v719_v52 }
 0x10a   : > { %v766_v0 = vsel %vm706_vm3, %v747_v58, 0.0  ;;  %v12275_v1 = vmul.f32 %v12271_v62, %v605_v59 }
 0x10b   : > { %v767_v2 = vadd.f32 %v766_v0, %v765_v55  ;;  %v609_v3 = vpop.f32.mrb[18].mxu0 }
 0x10c   : > { %v722_v6 = vsel %vm706_vm3, %v12275_v1, 0.0  ;;  %v748_v9 = vmul.f32 %v12275_v1, %v12275_v1  ;;  %v610_v10 = vadd.f32 %v12181_v38, %v609_v3  ;;  %v10043_v11 = vpop.f32.mrb[19].mxu0 }
 0x10d   : > { %v723_v13 = vadd.f32 %v722_v6, %v721_v63 }
 0x10e   : > { %v768_v14 = vsel %vm706_vm3, %v748_v9, 0.0  ;;  %v12286_v16 = vmul.f32 %v12282_v12, %v610_v10 }
 0x10f   : > { %v769_v17 = vadd.f32 %v768_v14, %v767_v2  ;;  %v614_v19 = vpop.f32.mrb[20].mxu0 }
 0x110   : > { %v724_v20 = vsel %vm706_vm3, %v12286_v16, 0.0  ;;  %v749_v21 = vmul.f32 %v12286_v16, %v12286_v16  ;;  %v615_v22 = vadd.f32 %v12181_v38, %v614_v19  ;;  %v10046_v23 = vpop.f32.mrb[21].mxu0 }
 0x111   : > { %v725_v26 = vadd.f32 %v724_v20, %v723_v13 }
 0x112   : > { %v770_v27 = vsel %vm706_vm3, %v749_v21, 0.0  ;;  %v12297_v29 = vmul.f32 %v12293_v24, %v615_v22 }
 0x113   : > { %v771_v30 = vadd.f32 %v770_v27, %v769_v17  ;;  %v619_v31 = vpop.f32.mrb[22].mxu0 }
 0x114   : > { %v726_v32 = vsel %vm706_vm3, %v12297_v29, 0.0  ;;  %v750_v33 = vmul.f32 %v12297_v29, %v12297_v29  ;;  %v620_v34 = vadd.f32 %v12181_v38, %v619_v31  ;;  %v10049_v36 = vpop.f32.mrb[23].mxu0 }
 0x115   : > { %v727_v41 = vadd.f32 %v726_v32, %v725_v26 }
 0x116   : > { %v772_v42 = vsel %vm706_vm3, %v750_v33, 0.0  ;;  %v12308_v44 = vmul.f32 %v12304_v37, %v620_v34 }
 0x117   : > { %v773_v45 = vadd.f32 %v772_v42, %v771_v30  ;;  %v624_v46 = vpop.f32.mrb[24].mxu0 }
 0x118   : > { %v728_v48 = vsel %vm706_vm3, %v12308_v44, 0.0  ;;  %v751_v52 = vmul.f32 %v12308_v44, %v12308_v44  ;;  %v625_v53 = vadd.f32 %v12181_v38, %v624_v46  ;;  %v10052_v55 = vpop.f32.mrb[25].mxu0 }
 0x119   : > { %v729_v57 = vadd.f32 %v728_v48, %v727_v41 }
 0x11a   : > { %v774_v58 = vsel %vm706_vm3, %v751_v52, 0.0  ;;  %v705_v59 = vmul.f32 %v12315_v56, %v625_v53 }
 0x11b   : > { %v775_v61 = vadd.f32 %v774_v58, %v773_v45 }
 0x11c   : > { %v731_v63 = vsel %vm730_vm4, %v705_v59, 0.0  ;;  %v752_v0 = vmul.f32 %v705_v59, %v705_v59 }
 0x11d   : > { %v732_v2 = vadd.f32 %v731_v63, %v729_v57 }
 0x11e   : > { %v776_v3 = vsel %vm730_vm4, %v752_v0, 0.0  ;;  %vm868_vm4 = vcmask 523264  }
 0x11f   : > { %v733_v6 = vrot.slane %v732_v2, 4  ;;  %v777_v9 = vadd.f32 %v776_v3, %v775_v61  ;;  %870 = vst.msk [vmem:[#allocation2 + $0x8] sm:$0xff] %vm868_vm4, %v11969_v7  ;;  %871 = vst.msk [vmem:[#allocation2 + $0x10] sm:$0xff] %vm868_vm4, %v11969_v7 }
 0x120   : > { %869 = vst.msk [vmem:[#allocation2] sm:$0xff] %vm868_vm4, %v11969_v7  ;;  %872 = vst.msk [vmem:[#allocation2 + $0x18] sm:$0xff] %vm868_vm4, %v11969_v7 }
 0x121   : > { %v734_v10 = vadd.f32 %v733_v6, %v732_v2  ;;  %v778_v11 = vrot.slane %v777_v9, 4  ;;  %v8802_v6 = vld [vmem:[%s16314_s3 + $0x8] sm:$0xff]  ;;  %873 = vst.msk [vmem:[#allocation2 + $0x20] sm:$0xff] %vm868_vm4, %v11969_v7  ;;  %874 = vst.msk [vmem:[#allocation2 + $0x28] sm:$0xff] %vm868_vm4, %v11969_v7 }
 0x122   : > { %875 = vst.msk [vmem:[#allocation2 + $0x30] sm:$0xff] %vm868_vm4, %v11969_v7  ;;  %876 = vst.msk [vmem:[#allocation2 + $0x38] sm:$0xff] %vm868_vm4, %v11969_v7 }
 0x123   : > { %v735_v13 = vrot.slane %v734_v10, 2  ;;  %v779_v38 = vadd.f32 %v778_v11, %v777_v9  ;;  %877 = vst.msk [vmem:[#allocation2 + $0x40] sm:$0xff] %vm868_vm4, %v11969_v7  ;;  %878 = vst.msk [vmem:[#allocation2 + $0x48] sm:$0xff] %vm868_vm4, %v11969_v7 }
 0x124   : > { %879 = vst.msk [vmem:[#allocation2 + $0x50] sm:$0xff] %vm868_vm4, %v11969_v7  ;;  %880 = vst.msk [vmem:[#allocation2 + $0x58] sm:$0xff] %vm868_vm4, %v11969_v7 }
 0x125   : > { %v736_v14 = vadd.f32 %v735_v13, %v734_v10  ;;  %v780_v17 = vrot.slane %v779_v38, 2 }
 0x127   : > { %v737_v19 = vrot.slane %v736_v14, 1  ;;  %v781_v20 = vadd.f32 %v780_v17, %v779_v38  ;;  %v8816_v38 = vld [vmem:[%s16314_s3 + $0x10] sm:$0xff] }
 0x129   : > { %v738_v21 = vadd.f32 %v737_v19, %v736_v14  ;;  %v782_v22 = vrot.slane %v781_v20, 1 }
 0x12b   : > { %v12319_v23 = vmul.f32 0.015625, %v738_v21  ;;  %v783_v26 = vadd.f32 %v782_v22, %v781_v20 }
 0x12d   : > { %v784_v27 = vmul.f32 0.015625, %v783_v26  ;;  %v785_v30 = vmul.f32 %v12319_v23, %v12319_v23  ;;  %v800_v31 = vsub.f32 %v705_v59, %v12319_v23  ;;  %v788_v32 = vsub.f32 %v12187_v43, %v12319_v23 }
 0x12e   : > { %v793_v33 = vsub.f32 %v12242_v28, %v12319_v23  ;;  %v789_v34 = vsub.f32 %v12195_v49, %v12319_v23  ;;  %v794_v36 = vsub.f32 %v12253_v40, %v12319_v23  ;;  %v790_v41 = vsub.f32 %v12209_v60, %v12319_v23 }
 0x12f   : > { %v786_v42 = vsub.f32 %v784_v27, %v785_v30  ;;  %v795_v45 = vsub.f32 %v12264_v54, %v12319_v23  ;;  %v791_v46 = vsub.f32 %v12220_v8, %v12319_v23  ;;  %v796_v43 = vsub.f32 %v12275_v1, %v12319_v23 }
 0x130   : > { %v792_v28 = vsub.f32 %v12231_v18, %v12319_v23  ;;  %v797_v49 = vsub.f32 %v12286_v16, %v12319_v23  ;;  %v798_v40 = vsub.f32 %v12297_v29, %v12319_v23  ;;  %v799_v60 = vsub.f32 %v12308_v44, %v12319_v23 }
 0x131   : > { %v787_v48 = vmax.f32 %v786_v42, 0.0 }
 0x133   : > { %v801_v54 = vadd.f32 1e-05, %v787_v48 }
 0x135   : > { %11939 = vrsqrt.f32 %v801_v54 }
 0x13f   : > { %v11940_v52 = vpop.eup %11939 }
 0x140   : > { %v12348_v8 = vmul.f32 %v11940_v52, %v800_v31  ;;  %v803_v53 = vmul.f32 %v11940_v52, %v788_v32  ;;  %v808_v1 = vmul.f32 %v11940_v52, %v793_v33  ;;  %v804_v55 = vmul.f32 %v11940_v52, %v789_v34 }
 0x141   : > { %v809_v57 = vmul.f32 %v11940_v52, %v794_v36  ;;  %v805_v18 = vmul.f32 %v11940_v52, %v790_v41  ;;  %v810_v58 = vmul.f32 %v11940_v52, %v795_v45  ;;  %v806_v59 = vmul.f32 %v11940_v52, %v791_v46 }
 0x142   : > { %vm816_vm5 = vcmp.ge.f32.partialorder %v803_v53, 0.0  ;;  %v829_v16 = vmul.f32 0.2, %v803_v53  ;;  %vm821_vm6 = vcmp.ge.f32.partialorder %v808_v1, 0.0  ;;  %v834_v29 = vmul.f32 0.2, %v808_v1 }
 0x143   : > { %vm817_vm7 = vcmp.ge.f32.partialorder %v804_v55, 0.0  ;;  %v830_v61 = vmul.f32 0.2, %v804_v55  ;;  %vm822_vm8 = vcmp.ge.f32.partialorder %v809_v57, 0.0  ;;  %v835_v63 = vmul.f32 0.2, %v809_v57 }
 0x144   : > { %v842_v44 = vsel %vm816_vm5, %v803_v53, %v829_v16  ;;  %v847_v2 = vsel %vm821_vm6, %v808_v1, %v834_v29  ;;  %vm818_vm9 = vcmp.ge.f32.partialorder %v805_v18, 0.0  ;;  %v831_v11 = vmul.f32 0.2, %v805_v18  ;;  %v8844_v53 = vld [vmem:[%s16314_s3 + $0x20] sm:$0xff]  ;;  %v8858_v16 = vld [vmem:[%s16314_s3 + $0x28] sm:$0xff] }
 0x145   : > { %v12351_v0 = vmul.f32 %v842_v44, %v12183_v39  ;;  %v12354_v3 = vmul.f32 %v847_v2, %v12238_v25  ;;  %v843_v9 = vsel %vm817_vm7, %v804_v55, %v830_v61  ;;  %v848_v10 = vsel %vm822_vm8, %v809_v57, %v835_v63  ;;  %v8900_v29 = vld [vmem:[%s16314_s3 + $0x40] sm:$0xff]  ;;  %v8886_v61 = vld [vmem:[%s16314_s3 + $0x38] sm:$0xff]  ;;  %v1052_v44 = vld [vmem:[#allocation2 + $0xb] sm:$0xff] }
 0x146   : > { %v836_v13 = vmul.f32 0.2, %v810_v58  ;;  %vm823_vm10 = vcmp.ge.f32.partialorder %v810_v58, 0.0  ;;  %v811_v14 = vmul.f32 %v11940_v52, %v796_v43  ;;  %v807_v17 = vmul.f32 %v11940_v52, %v792_v28  ;;  %v1057_v63 = vld [vmem:[#allocation2 + $0x33] sm:$0xff] }
 0x147   : > { %10056 = vmatmul.mubr.msk.f32.vlgmr.msra.gmra.mrb[26].mxu0 %vm706_vm3, %v12351_v0  ;;  %10071 = vmatmul.mubr.msk.f32.vlgmr.msra.gmra.mrb[0].mxu1 %vm706_vm3, %v12354_v3  ;;  %v12371_v19 = vmul.f32 %v843_v9, %v12190_v47  ;;  %v812_v20 = vmul.f32 %v11940_v52, %v797_v49  ;;  %v12374_v21 = vmul.f32 %v848_v10, %v12249_v35  ;;  %v832_v23 = vmul.f32 0.2, %v806_v59 }
 0x148   : > { %10058 = vmatprep.mubr.msk.f32.mxu0 %vm11970_vm0, %v11969_v7  ;;  %10095 = vmatpush3.msra.mxu1 %v8802_v6  ;;  %v844_v22 = vsel %vm818_vm9, %v805_v18, %v831_v11  ;;  %v849_v26 = vsel %vm823_vm10, %v810_v58, %v836_v13  ;;  %vm819_vm11 = vcmp.ge.f32.partialorder %v806_v59, 0.0  ;;  %v837_v27 = vmul.f32 0.2, %v811_v14  ;;  %v1058_v13 = vld [vmem:[#allocation2 + $0x3b] sm:$0xff] }
 0x149   : > { %10073 = vmatprep.mubr.msk.f32.mxu1 %vm11970_vm0, %v11969_v7  ;;  %10136 = vmatpush3.msra.mxu0 %v8816_v38  ;;  %vm824_vm12 = vcmp.ge.f32.partialorder %v811_v14, 0.0  ;;  %v813_v30 = vmul.f32 %v11940_v52, %v798_v40  ;;  %v814_v31 = vmul.f32 %v11940_v52, %v799_v60  ;;  %v12387_v32 = vmul.f32 %v844_v22, %v12197_v50  ;;  %v1054_v22 = vld [vmem:[#allocation2 + $0x1b] sm:$0xff] }
 0x14a   : > { %10176 = vmatprep.subr.mxu1 %v11969_v7  ;;  %10217 = vmatprep.subr.mxu0 %v11969_v7  ;;  %v12390_v33 = vmul.f32 %v849_v26, %v12260_v51  ;;  %v845_v34 = vsel %vm819_vm11, %v806_v59, %v832_v23  ;;  %v833_v36 = vmul.f32 0.2, %v807_v17  ;;  %v850_v41 = vsel %vm824_vm12, %v811_v14, %v837_v27  ;;  %v8872_v59 = vld [vmem:[%s16314_s3 + $0x30] sm:$0xff]  ;;  %v1059_v23 = vld [vmem:[#allocation2 + $0x43] sm:$0xff] }
 0x14b   : > { %10059 = vmatmul.mubr.msk.f32.gmra.mrb[28].mxu0 %vm706_vm3, %v12371_v19  ;;  %10074 = vmatmul.mubr.msk.f32.gmra.mrb[2].mxu1 %vm706_vm3, %v12374_v21  ;;  %vm820_vm13 = vcmp.ge.f32.partialorder %v807_v17, 0.0  ;;  %v838_v42 = vmul.f32 0.2, %v812_v20  ;;  %vm825_vm14 = vcmp.ge.f32.partialorder %v812_v20, 0.0  ;;  %v12401_v45 = vmul.f32 %v845_v34, %v12216_v5  ;;  %v1055_v34 = vld [vmem:[#allocation2 + $0x23] sm:$0xff] }
 0x14c   : > { %10061 = vmatprep.mubr.msk.f32.mxu0 %vm11970_vm0, %v11969_v7  ;;  %10076 = vmatprep.mubr.msk.f32.mxu1 %vm11970_vm0, %v11969_v7  ;;  %v12404_v46 = vmul.f32 %v850_v41, %v12271_v62  ;;  %v846_v43 = vsel %vm820_vm13, %v807_v17, %v833_v36  ;;  %v839_v49 = vmul.f32 0.2, %v813_v30  ;;  %vm826_vm15 = vcmp.ge.f32.partialorder %v813_v30, 0.0  ;;  %v1060_v36 = vld [vmem:[#allocation2 + $0x4b] sm:$0xff] }
 0x14d   : > { %v851_v28 = vsel %vm825_vm14, %v812_v20, %v838_v42  ;;  %v12415_v40 = vmul.f32 %v846_v43, %v12227_v15  ;;  %v840_v54 = vmul.f32 0.2, %v814_v31  ;;  %vm827_vm1 = vcmp.ge.f32.partialorder %v814_v31, 0.0 }
 0x14e   : > { %v12418_v60 = vmul.f32 %v851_v28, %v12282_v12  ;;  %v852_v48 = vsel %vm826_vm15, %v813_v30, %v839_v49  ;;  %v841_v1 = vmul.f32 0.2, %v12348_v8  ;;  %vm828_vm2 = vcmp.ge.f32.partialorder %v12348_v8, 0.0  ;;  %v1056_v49 = vld [vmem:[#allocation2 + $0x2b] sm:$0xff] }
 0x14f   : > { %10062 = vmatmul.mubr.msk.f32.gmra.mrb[30].mxu0 %vm706_vm3, %v12387_v32  ;;  %10077 = vmatmul.mubr.msk.f32.gmra.mrb[4].mxu1 %vm706_vm3, %v12390_v33  ;;  %v12429_v52 = vmul.f32 %v852_v48, %v12293_v24  ;;  %v853_v55 = vsel %vm827_vm1, %v814_v31, %v840_v54  ;;  %vm881_vm5 = vcmask 519168   ;;  %vm1076_vm6 = vcmask 130048  }
 0x150   : > { %10064 = vmatprep.mubr.msk.f32.mxu0 %vm11970_vm0, %v11969_v7  ;;  %10079 = vmatprep.mubr.msk.f32.mxu1 %vm11970_vm0, %v11969_v7  ;;  %v12445_v57 = vmul.f32 %v853_v55, %v12304_v37  ;;  %v854_v18 = vsel %vm828_vm2, %v12348_v8, %v841_v1  ;;  %v8830_v8 = vld [vmem:[%s16314_s3 + $0x18] sm:$0xff]  ;;  %882 = vst.msk [vmem:[#allocation2 + $0x60] sm:$0xf] %vm881_vm5, %v11969_v7  ;;  %vm1088_vm7 = vcmask 122880   ;;  %vm1424_vm8 = vcmask 124928  }
 0x151   : > { %v12458_v58 = vmul.f32 %v854_v18, %v12315_v56  ;;  %vm1927_vm9 = vcmask 1046528   ;;  %vm1767_vm10 = vcmask 125952   ;;  %vm2576_vm11 = vcmask 1044480  }
 0x152   : > { %vm2361_vm12 = vcmask 1045504  }
 0x153   : > { %10065 = vmatmul.mubr.msk.f32.gmra.mrb[32].mxu0 %vm706_vm3, %v12401_v45  ;;  %10080 = vmatmul.mubr.msk.f32.gmra.mrb[6].mxu1 %vm706_vm3, %v12404_v46 }
 0x154   : > { %10067 = vmatprep.mubr.msk.f32.mxu0 %vm11970_vm0, %v11969_v7  ;;  %10082 = vmatprep.mubr.msk.f32.mxu1 %vm11970_vm0, %v11969_v7 }
 0x157   : > { %10068 = vmatmul.mubr.msk.f32.gmra.mrb[34].mxu0 %vm706_vm3, %v12415_v40  ;;  %10083 = vmatmul.mubr.msk.f32.gmra.mrb[8].mxu1 %vm706_vm3, %v12418_v60 }
 0x158   : > { %10137 = vmatprep.mubr.msk.f32.mxu0 %vm11970_vm0, %v11969_v7  ;;  %10085 = vmatprep.mubr.msk.f32.mxu1 %vm11970_vm0, %v11969_v7 }
 0x15b   : > { %10138 = vmatmul.mubr.msk.f32.vlgmr.msra.gmra.mrb[36].mxu0 %vm706_vm3, %v12351_v0  ;;  %10086 = vmatmul.mubr.msk.f32.gmra.mrb[10].mxu1 %vm706_vm3, %v12429_v52 }
 0x15c   : > { %10140 = vmatprep.mubr.msk.f32.mxu0 %vm11970_vm0, %v11969_v7  ;;  %10088 = vmatprep.mubr.msk.f32.mxu1 %vm11970_vm0, %v11969_v7 }
 0x15d   : > { %10218 = vmatpush3.msra.mxu0 %v8844_v53 }
 0x15e   : > { %10299 = vmatprep.subr.mxu0 %v11969_v7 }
 0x15f   : > { %10141 = vmatmul.mubr.msk.f32.gmra.mrb[38].mxu0 %vm706_vm3, %v12371_v19  ;;  %10089 = vmatmul.mubr.msk.f32.gmra.mrb[12].mxu1 %vm706_vm3, %v12445_v57 }
 0x160   : > { %10143 = vmatprep.mubr.msk.f32.mxu0 %vm11970_vm0, %v11969_v7  ;;  %10091 = vmatprep.mubr.msk.f32.mxu1 %vm11970_vm0, %v11969_v7 }
 0x163   : > { %10144 = vmatmul.mubr.msk.f32.gmra.mrb[40].mxu0 %vm706_vm3, %v12387_v32  ;;  %10092 = vmatmul.mubr.msk.f32.gmra.mrb[14].mxu1 %vm706_vm3, %v12458_v58 }
 0x164   : > { %10146 = vmatprep.mubr.msk.f32.mxu0 %vm11970_vm0, %v11969_v7  ;;  %10096 = vmatprep.mubr.msk.f32.mxu1 %vm11970_vm0, %v11969_v7 }
 0x167   : > { %10147 = vmatmul.mubr.msk.f32.gmra.mrb[42].mxu0 %vm706_vm3, %v12401_v45  ;;  %10097 = vmatmul.mubr.msk.f32.vlgmr.msra.gmra.mrb[16].mxu1 %vm706_vm3, %v12351_v0 }
 0x168   : > { %10149 = vmatprep.mubr.msk.f32.mxu0 %vm11970_vm0, %v11969_v7  ;;  %10177 = vmatpush3.msra.mxu1 %v8830_v8 }
 0x169   : > { %10099 = vmatprep.mubr.msk.f32.mxu1 %vm11970_vm0, %v11969_v7  ;;  %10258 = vmatprep.subr.mxu1 %v11969_v7 }
 0x16b   : > { %10150 = vmatmul.mubr.msk.f32.gmra.mrb[44].mxu0 %vm706_vm3, %v12415_v40  ;;  %10100 = vmatmul.mubr.msk.f32.gmra.mrb[18].mxu1 %vm706_vm3, %v12371_v19 }
 0x16c   : > { %10152 = vmatprep.mubr.msk.f32.mxu0 %vm11970_vm0, %v11969_v7  ;;  %10102 = vmatprep.mubr.msk.f32.mxu1 %vm11970_vm0, %v11969_v7 }
 0x16f   : > { %10153 = vmatmul.mubr.msk.f32.gmra.mrb[46].mxu0 %vm706_vm3, %v12354_v3  ;;  %10103 = vmatmul.mubr.msk.f32.gmra.mrb[20].mxu1 %vm706_vm3, %v12387_v32 }
 0x170   : > { %10155 = vmatprep.mubr.msk.f32.mxu0 %vm11970_vm0, %v11969_v7  ;;  %10105 = vmatprep.mubr.msk.f32.mxu1 %vm11970_vm0, %v11969_v7 }
 0x173   : > { %10156 = vmatmul.mubr.msk.f32.gmra.mrb[48].mxu0 %vm706_vm3, %v12374_v21  ;;  %10106 = vmatmul.mubr.msk.f32.gmra.mrb[22].mxu1 %vm706_vm3, %v12401_v45 }
 0x174   : > { %10158 = vmatprep.mubr.msk.f32.mxu0 %vm11970_vm0, %v11969_v7  ;;  %10108 = vmatprep.mubr.msk.f32.mxu1 %vm11970_vm0, %v11969_v7 }
 0x177   : > { %10159 = vmatmul.mubr.msk.f32.gmra.mrb[50].mxu0 %vm706_vm3, %v12390_v33  ;;  %10109 = vmatmul.mubr.msk.f32.gmra.mrb[24].mxu1 %vm706_vm3, %v12415_v40 }
 0x178   : > { %10161 = vmatprep.mubr.msk.f32.mxu0 %vm11970_vm0, %v11969_v7  ;;  %10111 = vmatprep.mubr.msk.f32.mxu1 %vm11970_vm0, %v11969_v7 }
 0x17b   : > { %10162 = vmatmul.mubr.msk.f32.gmra.mrb[52].mxu0 %vm706_vm3, %v12404_v46  ;;  %10112 = vmatmul.mubr.msk.f32.gmra.mrb[26].mxu1 %vm706_vm3, %v12354_v3 }
 0x17c   : > { %10164 = vmatprep.mubr.msk.f32.mxu0 %vm11970_vm0, %v11969_v7  ;;  %10114 = vmatprep.mubr.msk.f32.mxu1 %vm11970_vm0, %v11969_v7 }
 0x17f   : > { %10165 = vmatmul.mubr.msk.f32.gmra.mrb[54].mxu0 %vm706_vm3, %v12418_v60  ;;  %10115 = vmatmul.mubr.msk.f32.gmra.mrb[28].mxu1 %vm706_vm3, %v12374_v21 }
 0x180   : > { %10167 = vmatprep.mubr.msk.f32.mxu0 %vm11970_vm0, %v11969_v7  ;;  %10117 = vmatprep.mubr.msk.f32.mxu1 %vm11970_vm0, %v11969_v7 }
 0x183   : > { %10168 = vmatmul.mubr.msk.f32.gmra.mrb[56].mxu0 %vm706_vm3, %v12429_v52  ;;  %10118 = vmatmul.mubr.msk.f32.gmra.mrb[30].mxu1 %vm706_vm3, %v12390_v33 }
 0x184   : > { %10170 = vmatprep.mubr.msk.f32.mxu0 %vm11970_vm0, %v11969_v7  ;;  %10120 = vmatprep.mubr.msk.f32.mxu1 %vm11970_vm0, %v11969_v7 }
 0x187   : > { %10171 = vmatmul.mubr.msk.f32.gmra.mrb[58].mxu0 %vm706_vm3, %v12445_v57  ;;  %10121 = vmatmul.mubr.msk.f32.gmra.mrb[32].mxu1 %vm706_vm3, %v12404_v46 }
 0x188   : > { %10173 = vmatprep.mubr.msk.f32.mxu0 %vm11970_vm0, %v11969_v7  ;;  %10123 = vmatprep.mubr.msk.f32.mxu1 %vm11970_vm0, %v11969_v7 }
 0x18b   : > { %10174 = vmatmul.mubr.msk.f32.gmra.mrb[60].mxu0 %vm706_vm3, %v12458_v58  ;;  %10124 = vmatmul.mubr.msk.f32.gmra.mrb[34].mxu1 %vm706_vm3, %v12418_v60 }
 0x18c   : > { %10219 = vmatprep.mubr.msk.f32.mxu0 %vm11970_vm0, %v11969_v7  ;;  %10126 = vmatprep.mubr.msk.f32.mxu1 %vm11970_vm0, %v11969_v7 }
 0x18f   : > { %10220 = vmatmul.mubr.msk.f32.vlgmr.msra.gmra.mrb[62].mxu0 %vm706_vm3, %v12351_v0  ;;  %10127 = vmatmul.mubr.msk.f32.gmra.mrb[36].mxu1 %vm706_vm3, %v12429_v52 }
 0x190   : > { %10222 = vmatprep.mubr.msk.f32.mxu0 %vm11970_vm0, %v11969_v7  ;;  %10129 = vmatprep.mubr.msk.f32.mxu1 %vm11970_vm0, %v11969_v7 }
 0x191   : > { %10300 = vmatpush3.msra.mxu0 %v8872_v59 }
 0x192   : > { %10381 = vmatprep.subr.mxu0 %v11969_v7 }
 0x193   : > { %10223 = vmatmul.mubr.msk.f32.gmra.mrb[64].mxu0 %vm706_vm3, %v12371_v19  ;;  %10130 = vmatmul.mubr.msk.f32.gmra.mrb[38].mxu1 %vm706_vm3, %v12445_v57 }
 0x194   : > { %10225 = vmatprep.mubr.msk.f32.mxu0 %vm11970_vm0, %v11969_v7  ;;  %10132 = vmatprep.mubr.msk.f32.mxu1 %vm11970_vm0, %v11969_v7 }
 0x197   : > { %10226 = vmatmul.mubr.msk.f32.gmra.mrb[66].mxu0 %vm706_vm3, %v12387_v32  ;;  %10133 = vmatmul.mubr.msk.f32.gmra.mrb[40].mxu1 %vm706_vm3, %v12458_v58 }
 0x198   : > { %10228 = vmatprep.mubr.msk.f32.mxu0 %vm11970_vm0, %v11969_v7  ;;  %10178 = vmatprep.mubr.msk.f32.mxu1 %vm11970_vm0, %v11969_v7 }
 0x19b   : > { %10229 = vmatmul.mubr.msk.f32.gmra.mrb[68].mxu0 %vm706_vm3, %v12401_v45  ;;  %10179 = vmatmul.mubr.msk.f32.vlgmr.msra.gmra.mrb[42].mxu1 %vm706_vm3, %v12351_v0 }
 0x19c   : > { %10231 = vmatprep.mubr.msk.f32.mxu0 %vm11970_vm0, %v11969_v7  ;;  %10259 = vmatpush3.msra.mxu1 %v8858_v16 }
 0x19d   : > { %10181 = vmatprep.mubr.msk.f32.mxu1 %vm11970_vm0, %v11969_v7  ;;  %10340 = vmatprep.subr.mxu1 %v11969_v7 }
 0x19f   : > { %10232 = vmatmul.mubr.msk.f32.gmra.mrb[70].mxu0 %vm706_vm3, %v12415_v40  ;;  %10182 = vmatmul.mubr.msk.f32.gmra.mrb[44].mxu1 %vm706_vm3, %v12371_v19 }
 0x1a0   : > { %10234 = vmatprep.mubr.msk.f32.mxu0 %vm11970_vm0, %v11969_v7  ;;  %10184 = vmatprep.mubr.msk.f32.mxu1 %vm11970_vm0, %v11969_v7 }
 0x1a3   : > { %10235 = vmatmul.mubr.msk.f32.gmra.mrb[72].mxu0 %vm706_vm3, %v12354_v3  ;;  %10185 = vmatmul.mubr.msk.f32.gmra.mrb[46].mxu1 %vm706_vm3, %v12387_v32 }
 0x1a4   : > { %10237 = vmatprep.mubr.msk.f32.mxu0 %vm11970_vm0, %v11969_v7  ;;  %10187 = vmatprep.mubr.msk.f32.mxu1 %vm11970_vm0, %v11969_v7 }
 0x1a7   : > { %10238 = vmatmul.mubr.msk.f32.gmra.mrb[74].mxu0 %vm706_vm3, %v12374_v21  ;;  %10188 = vmatmul.mubr.msk.f32.gmra.mrb[48].mxu1 %vm706_vm3, %v12401_v45 }
 0x1a8   : > { %10240 = vmatprep.mubr.msk.f32.mxu0 %vm11970_vm0, %v11969_v7  ;;  %10190 = vmatprep.mubr.msk.f32.mxu1 %vm11970_vm0, %v11969_v7 }
 0x1ab   : > { %10241 = vmatmul.mubr.msk.f32.gmra.mrb[76].mxu0 %vm706_vm3, %v12390_v33  ;;  %10191 = vmatmul.mubr.msk.f32.gmra.mrb[50].mxu1 %vm706_vm3, %v12415_v40 }
 0x1ac   : > { %10243 = vmatprep.mubr.msk.f32.mxu0 %vm11970_vm0, %v11969_v7  ;;  %10193 = vmatprep.mubr.msk.f32.mxu1 %vm11970_vm0, %v11969_v7 }
 0x1af   : > { %10244 = vmatmul.mubr.msk.f32.gmra.mrb[78].mxu0 %vm706_vm3, %v12404_v46  ;;  %10194 = vmatmul.mubr.msk.f32.gmra.mrb[52].mxu1 %vm706_vm3, %v12354_v3 }
 0x1b0   : > { %10246 = vmatprep.mubr.msk.f32.mxu0 %vm11970_vm0, %v11969_v7  ;;  %10196 = vmatprep.mubr.msk.f32.mxu1 %vm11970_vm0, %v11969_v7 }
 0x1b3   : > { %10247 = vmatmul.mubr.msk.f32.gmra.mrb[80].mxu0 %vm706_vm3, %v12418_v60  ;;  %10197 = vmatmul.mubr.msk.f32.gmra.mrb[54].mxu1 %vm706_vm3, %v12374_v21 }
 0x1b4   : > { %10249 = vmatprep.mubr.msk.f32.mxu0 %vm11970_vm0, %v11969_v7  ;;  %10199 = vmatprep.mubr.msk.f32.mxu1 %vm11970_vm0, %v11969_v7 }
 0x1b7   : > { %10250 = vmatmul.mubr.msk.f32.gmra.mrb[82].mxu0 %vm706_vm3, %v12429_v52  ;;  %10200 = vmatmul.mubr.msk.f32.gmra.mrb[56].mxu1 %vm706_vm3, %v12390_v33 }
 0x1b8   : > { %10252 = vmatprep.mubr.msk.f32.mxu0 %vm11970_vm0, %v11969_v7  ;;  %10202 = vmatprep.mubr.msk.f32.mxu1 %vm11970_vm0, %v11969_v7 }
 0x1bb   : > { %10253 = vmatmul.mubr.msk.f32.gmra.mrb[84].mxu0 %vm706_vm3, %v12445_v57  ;;  %10203 = vmatmul.mubr.msk.f32.gmra.mrb[58].mxu1 %vm706_vm3, %v12404_v46 }
 0x1bc   : > { %10255 = vmatprep.mubr.msk.f32.mxu0 %vm11970_vm0, %v11969_v7  ;;  %10205 = vmatprep.mubr.msk.f32.mxu1 %vm11970_vm0, %v11969_v7 }
 0x1bf   : > { %10256 = vmatmul.mubr.msk.f32.gmra.mrb[86].mxu0 %vm706_vm3, %v12458_v58  ;;  %10206 = vmatmul.mubr.msk.f32.gmra.mrb[60].mxu1 %vm706_vm3, %v12418_v60 }
 0x1c0   : > { %10301 = vmatprep.mubr.msk.f32.mxu0 %vm11970_vm0, %v11969_v7  ;;  %10208 = vmatprep.mubr.msk.f32.mxu1 %vm11970_vm0, %v11969_v7 }
 0x1c3   : > { %10302 = vmatmul.mubr.msk.f32.vlgmr.msra.gmra.mrb[88].mxu0 %vm706_vm3, %v12351_v0  ;;  %10209 = vmatmul.mubr.msk.f32.gmra.mrb[62].mxu1 %vm706_vm3, %v12429_v52 }
 0x1c4   : > { %10304 = vmatprep.mubr.msk.f32.mxu0 %vm11970_vm0, %v11969_v7  ;;  %10211 = vmatprep.mubr.msk.f32.mxu1 %vm11970_vm0, %v11969_v7 }
 0x1c5   : > { %10382 = vmatpush3.msra.mxu0 %v8900_v29 }
 0x1c6   : > { %11736 = vmatprep.subr.bf16.mxu0 %v11968_v4 }
 0x1c7   : > { %10305 = vmatmul.mubr.msk.f32.gmra.mrb[90].mxu0 %vm706_vm3, %v12371_v19  ;;  %10212 = vmatmul.mubr.msk.f32.gmra.mrb[64].mxu1 %vm706_vm3, %v12445_v57 }
 0x1c8   : > { %10307 = vmatprep.mubr.msk.f32.mxu0 %vm11970_vm0, %v11969_v7  ;;  %10214 = vmatprep.mubr.msk.f32.mxu1 %vm11970_vm0, %v11969_v7 }
 0x1cb   : > { %10308 = vmatmul.mubr.msk.f32.gmra.mrb[92].mxu0 %vm706_vm3, %v12387_v32  ;;  %10215 = vmatmul.mubr.msk.f32.gmra.mrb[66].mxu1 %vm706_vm3, %v12458_v58 }
 0x1cc   : > { %10310 = vmatprep.mubr.msk.f32.mxu0 %vm11970_vm0, %v11969_v7  ;;  %10260 = vmatprep.mubr.msk.f32.mxu1 %vm11970_vm0, %v11969_v7 }
 0x1cf   : > { %10311 = vmatmul.mubr.msk.f32.gmra.mrb[94].mxu0 %vm706_vm3, %v12401_v45  ;;  %10261 = vmatmul.mubr.msk.f32.vlgmr.msra.gmra.mrb[68].mxu1 %vm706_vm3, %v12351_v0 }
 0x1d0   : > { %10313 = vmatprep.mubr.msk.f32.mxu0 %vm11970_vm0, %v11969_v7  ;;  %10341 = vmatpush3.msra.mxu1 %v8886_v61 }
 0x1d1   : > { %10263 = vmatprep.mubr.msk.f32.mxu1 %vm11970_vm0, %v11969_v7  ;;  %11733 = vmatprep.subr.bf16.mxu1 %v11968_v4 }
 0x1d3   : > { %10314 = vmatmul.mubr.msk.f32.gmra.mrb[96].mxu0 %vm706_vm3, %v12415_v40  ;;  %10264 = vmatmul.mubr.msk.f32.gmra.mrb[70].mxu1 %vm706_vm3, %v12371_v19 }
 0x1d4   : > { %10316 = vmatprep.mubr.msk.f32.mxu0 %vm11970_vm0, %v11969_v7  ;;  %10266 = vmatprep.mubr.msk.f32.mxu1 %vm11970_vm0, %v11969_v7 }
 0x1d7   : > { %10317 = vmatmul.mubr.msk.f32.gmra.mrb[98].mxu0 %vm706_vm3, %v12354_v3  ;;  %10267 = vmatmul.mubr.msk.f32.gmra.mrb[72].mxu1 %vm706_vm3, %v12387_v32 }
 0x1d8   : > { %10319 = vmatprep.mubr.msk.f32.mxu0 %vm11970_vm0, %v11969_v7  ;;  %10269 = vmatprep.mubr.msk.f32.mxu1 %vm11970_vm0, %v11969_v7 }
 0x1db   : > { %10320 = vmatmul.mubr.msk.f32.gmra.mrb[100].mxu0 %vm706_vm3, %v12374_v21  ;;  %10270 = vmatmul.mubr.msk.f32.gmra.mrb[74].mxu1 %vm706_vm3, %v12401_v45 }
 0x1dc   : > { %10322 = vmatprep.mubr.msk.f32.mxu0 %vm11970_vm0, %v11969_v7  ;;  %10272 = vmatprep.mubr.msk.f32.mxu1 %vm11970_vm0, %v11969_v7 }
 0x1df   : > { %10323 = vmatmul.mubr.msk.f32.gmra.mrb[102].mxu0 %vm706_vm3, %v12390_v33  ;;  %10273 = vmatmul.mubr.msk.f32.gmra.mrb[76].mxu1 %vm706_vm3, %v12415_v40 }
 0x1e0   : > { %10325 = vmatprep.mubr.msk.f32.mxu0 %vm11970_vm0, %v11969_v7  ;;  %10275 = vmatprep.mubr.msk.f32.mxu1 %vm11970_vm0, %v11969_v7 }
 0x1e3   : > { %10326 = vmatmul.mubr.msk.f32.gmra.mrb[104].mxu0 %vm706_vm3, %v12404_v46  ;;  %10276 = vmatmul.mubr.msk.f32.gmra.mrb[78].mxu1 %vm706_vm3, %v12354_v3 }
 0x1e4   : > { %10328 = vmatprep.mubr.msk.f32.mxu0 %vm11970_vm0, %v11969_v7  ;;  %10278 = vmatprep.mubr.msk.f32.mxu1 %vm11970_vm0, %v11969_v7 }
 0x1e7   : > { %10329 = vmatmul.mubr.msk.f32.gmra.mrb[106].mxu0 %vm706_vm3, %v12418_v60  ;;  %10279 = vmatmul.mubr.msk.f32.gmra.mrb[80].mxu1 %vm706_vm3, %v12374_v21 }
 0x1e8   : > { %10331 = vmatprep.mubr.msk.f32.mxu0 %vm11970_vm0, %v11969_v7  ;;  %10281 = vmatprep.mubr.msk.f32.mxu1 %vm11970_vm0, %v11969_v7 }
 0x1eb   : > { %10332 = vmatmul.mubr.msk.f32.gmra.mrb[108].mxu0 %vm706_vm3, %v12429_v52  ;;  %10282 = vmatmul.mubr.msk.f32.gmra.mrb[82].mxu1 %vm706_vm3, %v12390_v33 }
 0x1ec   : > { %10334 = vmatprep.mubr.msk.f32.mxu0 %vm11970_vm0, %v11969_v7  ;;  %10284 = vmatprep.mubr.msk.f32.mxu1 %vm11970_vm0, %v11969_v7 }
 0x1ef   : > { %10335 = vmatmul.mubr.msk.f32.gmra.mrb[110].mxu0 %vm706_vm3, %v12445_v57  ;;  %10285 = vmatmul.mubr.msk.f32.gmra.mrb[84].mxu1 %vm706_vm3, %v12404_v46 }
 0x1f0   : > { %10337 = vmatprep.mubr.msk.f32.mxu0 %vm11970_vm0, %v11969_v7  ;;  %10287 = vmatprep.mubr.msk.f32.mxu1 %vm11970_vm0, %v11969_v7 }
 0x1f3   : > { %10338 = vmatmul.mubr.msk.f32.gmra.mrb[112].mxu0 %vm706_vm3, %v12458_v58  ;;  %10288 = vmatmul.mubr.msk.f32.gmra.mrb[86].mxu1 %vm706_vm3, %v12418_v60 }
 0x1f4   : > { %10383 = vmatprep.mubr.msk.f32.mxu0 %vm11970_vm0, %v11969_v7  ;;  %10290 = vmatprep.mubr.msk.f32.mxu1 %vm11970_vm0, %v11969_v7 }
 0x1f7   : > { %10384 = vmatmul.mubr.msk.f32.vlgmr.msra.gmra.mrb[114].mxu0 %vm706_vm3, %v12351_v0  ;;  %10291 = vmatmul.mubr.msk.f32.gmra.mrb[88].mxu1 %vm706_vm3, %v12429_v52 }
 0x1f8   : > { %10386 = vmatprep.mubr.msk.f32.mxu0 %vm11970_vm0, %v11969_v7  ;;  %10293 = vmatprep.mubr.msk.f32.mxu1 %vm11970_vm0, %v11969_v7 }
 0x1fb   : > { %10387 = vmatmul.mubr.msk.f32.gmra.mrb[116].mxu0 %vm706_vm3, %v12371_v19  ;;  %10294 = vmatmul.mubr.msk.f32.gmra.mrb[90].mxu1 %vm706_vm3, %v12445_v57 }
 0x1fc   : > { %10389 = vmatprep.mubr.msk.f32.mxu0 %vm11970_vm0, %v11969_v7  ;;  %10296 = vmatprep.mubr.msk.f32.mxu1 %vm11970_vm0, %v11969_v7 }
 0x1ff   : > { %10390 = vmatmul.mubr.msk.f32.gmra.mrb[118].mxu0 %vm706_vm3, %v12387_v32  ;;  %10297 = vmatmul.mubr.msk.f32.gmra.mrb[92].mxu1 %vm706_vm3, %v12458_v58 }
 0x200   : > { %10392 = vmatprep.mubr.msk.f32.mxu0 %vm11970_vm0, %v11969_v7  ;;  %10342 = vmatprep.mubr.msk.f32.mxu1 %vm11970_vm0, %v11969_v7 }
 0x203   : > { %10393 = vmatmul.mubr.msk.f32.gmra.mrb[120].mxu0 %vm706_vm3, %v12401_v45  ;;  %10343 = vmatmul.mubr.msk.f32.vlgmr.msra.gmra.mrb[94].mxu1 %vm706_vm3, %v12351_v0 }
 0x204   : > { %10395 = vmatprep.mubr.msk.f32.mxu0 %vm11970_vm0, %v11969_v7  ;;  %10345 = vmatprep.mubr.msk.f32.mxu1 %vm11970_vm0, %v11969_v7 }
 0x207   : > { %10396 = vmatmul.mubr.msk.f32.gmra.mrb[122].mxu0 %vm706_vm3, %v12415_v40  ;;  %10346 = vmatmul.mubr.msk.f32.gmra.mrb[96].mxu1 %vm706_vm3, %v12371_v19 }
 0x208   : > { %10398 = vmatprep.mubr.msk.f32.mxu0 %vm11970_vm0, %v11969_v7  ;;  %10348 = vmatprep.mubr.msk.f32.mxu1 %vm11970_vm0, %v11969_v7 }
 0x20b   : > { %10399 = vmatmul.mubr.msk.f32.gmra.mrb[124].mxu0 %vm706_vm3, %v12354_v3  ;;  %10349 = vmatmul.mubr.msk.f32.gmra.mrb[98].mxu1 %vm706_vm3, %v12387_v32 }
 0x20c   : > { %10401 = vmatprep.mubr.msk.f32.mxu0 %vm11970_vm0, %v11969_v7  ;;  %10351 = vmatprep.mubr.msk.f32.mxu1 %vm11970_vm0, %v11969_v7 }
 0x20f   : > { %10402 = vmatmul.mubr.msk.f32.gmra.mrb[126].mxu0 %vm706_vm3, %v12374_v21  ;;  %10352 = vmatmul.mubr.msk.f32.gmra.mrb[100].mxu1 %vm706_vm3, %v12401_v45 }
 0x210   : > { %10404 = vmatprep.mubr.msk.f32.mxu0 %vm11970_vm0, %v11969_v7  ;;  %10354 = vmatprep.mubr.msk.f32.mxu1 %vm11970_vm0, %v11969_v7 }
 0x213   : > { %10405 = vmatmul.mubr.msk.f32.gmra.mrb[128].mxu0 %vm706_vm3, %v12390_v33  ;;  %10355 = vmatmul.mubr.msk.f32.gmra.mrb[102].mxu1 %vm706_vm3, %v12415_v40  ;;  %v1061_v40 = vld [vmem:[#allocation2 + $0x53] sm:$0xff] }
 0x214   : > { %10407 = vmatprep.mubr.msk.f32.mxu0 %vm11970_vm0, %v11969_v7  ;;  %10357 = vmatprep.mubr.msk.f32.mxu1 %vm11970_vm0, %v11969_v7 }
 0x217   : > { %10408 = vmatmul.mubr.msk.f32.gmra.mrb[130].mxu0 %vm706_vm3, %v12404_v46  ;;  %10358 = vmatmul.mubr.msk.f32.gmra.mrb[104].mxu1 %vm706_vm3, %v12354_v3  ;;  %v1053_v3 = vld [vmem:[#allocation2 + $0x13] sm:$0xff] }
 0x218   : > { %10410 = vmatprep.mubr.msk.f32.mxu0 %vm11970_vm0, %v11969_v7  ;;  %10360 = vmatprep.mubr.msk.f32.mxu1 %vm11970_vm0, %v11969_v7 }
 0x21a   : > { %v989_v0 = vpop.f32.mrb[26].mxu0  ;;  %v1014_v6 = vpop.f32.mrb[0].mxu1 }
 0x21b   : > { %v1064_v2 = vadd.f32 %v1052_v44, %v989_v0  ;;  %v10057_v9 = vpop.f32.mrb[27].mxu0  ;;  %10411 = vmatmul.mubr.msk.f32.gmra.mrb[132].mxu0 %vm706_vm3, %v12418_v60  ;;  %v1069_v10 = vadd.f32 %v1057_v63, %v1014_v6  ;;  %v10072_v11 = vpop.f32.mrb[1].mxu1  ;;  %10361 = vmatmul.mubr.msk.f32.gmra.mrb[106].mxu1 %vm706_vm3, %v12374_v21  ;;  %v1063_v44 = vld [vmem:[#allocation2 + $0x63] sm:$0x1] }
 0x21c   : > { %10413 = vmatprep.mubr.msk.f32.mxu0 %vm11970_vm0, %v11969_v7  ;;  %10363 = vmatprep.mubr.msk.f32.mxu1 %vm11970_vm0, %v11969_v7 }
 0x21d   : > { %1077 = vst.msk [vmem:[#allocation2 + $0xb] sm:$0xff] %vm1076_vm6, %v1064_v2  ;;  %1082 = vst.msk [vmem:[#allocation2 + $0x33] sm:$0xff] %vm1076_vm6, %v1069_v10 }
 0x21e   : > { %v994_v38 = vpop.f32.mrb[28].mxu0  ;;  %v1019_v17 = vpop.f32.mrb[2].mxu1 }
 0x21f   : > { %v1065_v14 = vadd.f32 %v1053_v3, %v994_v38  ;;  %v10060_v19 = vpop.f32.mrb[29].mxu0  ;;  %10414 = vmatmul.mubr.msk.f32.gmra.mrb[134].mxu0 %vm706_vm3, %v12429_v52  ;;  %v1070_v20 = vadd.f32 %v1058_v13, %v1019_v17  ;;  %v10075_v21 = vpop.f32.mrb[3].mxu1  ;;  %10364 = vmatmul.mubr.msk.f32.gmra.mrb[108].mxu1 %vm706_vm3, %v12390_v33 }
 0x220   : > { %10416 = vmatprep.mubr.msk.f32.mxu0 %vm11970_vm0, %v11969_v7  ;;  %10366 = vmatprep.mubr.msk.f32.mxu1 %vm11970_vm0, %v11969_v7 }
 0x221   : > { %1078 = vst.msk [vmem:[#allocation2 + $0x13] sm:$0xff] %vm1076_vm6, %v1065_v14  ;;  %1083 = vst.msk [vmem:[#allocation2 + $0x3b] sm:$0xff] %vm1076_vm6, %v1070_v20 }
 0x222   : > { %v999_v26 = vpop.f32.mrb[30].mxu0  ;;  %v1024_v30 = vpop.f32.mrb[4].mxu1 }
 0x223   : > { %v1066_v27 = vadd.f32 %v1054_v22, %v999_v26  ;;  %v10063_v31 = vpop.f32.mrb[31].mxu0  ;;  %10417 = vmatmul.mubr.msk.f32.gmra.mrb[136].mxu0 %vm706_vm3, %v12445_v57  ;;  %v1071_v32 = vadd.f32 %v1059_v23, %v1024_v30  ;;  %v10078_v33 = vpop.f32.mrb[5].mxu1  ;;  %10367 = vmatmul.mubr.msk.f32.gmra.mrb[110].mxu1 %vm706_vm3, %v12404_v46 }
 0x224   : > { %10419 = vmatprep.mubr.msk.f32.mxu0 %vm11970_vm0, %v11969_v7  ;;  %10369 = vmatprep.mubr.msk.f32.mxu1 %vm11970_vm0, %v11969_v7  ;;  %v1221_v38 = vld [vmem:[#allocation2 + $0xa] sm:$0xff] }
 0x225   : > { %1079 = vst.msk [vmem:[#allocation2 + $0x1b] sm:$0xff] %vm1076_vm6, %v1066_v27  ;;  %1084 = vst.msk [vmem:[#allocation2 + $0x43] sm:$0xff] %vm1076_vm6, %v1071_v32 }
 0x226   : > { %v1004_v41 = vpop.f32.mrb[32].mxu0  ;;  %v1029_v45 = vpop.f32.mrb[6].mxu1 }
 0x227   : > { %v1067_v42 = vadd.f32 %v1055_v34, %v1004_v41  ;;  %v10066_v43 = vpop.f32.mrb[33].mxu0  ;;  %10420 = vmatmul.mubr.msk.f32.gmra.mrb[138].mxu0 %vm706_vm3, %v12458_v58  ;;  %v1072_v46 = vadd.f32 %v1060_v36, %v1029_v45  ;;  %v10081_v28 = vpop.f32.mrb[7].mxu1  ;;  %10370 = vmatmul.mubr.msk.f32.gmra.mrb[112].mxu1 %vm706_vm3, %v12418_v60  ;;  %v1062_v60 = vld [vmem:[#allocation2 + $0x5b] sm:$0xff] }
 0x228   : > { %10469 = vmatprep.mubr.msk.f32.mxu0 %vm11970_vm0, %v11969_v7  ;;  %10372 = vmatprep.mubr.msk.f32.mxu1 %vm11970_vm0, %v11969_v7 }
 0x229   : > { %1080 = vst.msk [vmem:[#allocation2 + $0x23] sm:$0xff] %vm1076_vm6, %v1067_v42  ;;  %1085 = vst.msk [vmem:[#allocation2 + $0x4b] sm:$0xff] %vm1076_vm6, %v1072_v46 }
 0x22a   : > { %v1009_v48 = vpop.f32.mrb[34].mxu0  ;;  %v1034_v53 = vpop.f32.mrb[8].mxu1 }
 0x22b   : > { %v1068_v54 = vadd.f32 %v1056_v49, %v1009_v48  ;;  %v10069_v1 = vpop.f32.mrb[35].mxu0  ;;  %v1073_v55 = vadd.f32 %v1061_v40, %v1034_v53  ;;  %v10084_v18 = vpop.f32.mrb[9].mxu1  ;;  %10373 = vmatmul.mubr.msk.f32.gmra.mrb[114].mxu1 %vm706_vm3, %v12429_v52 }
 0x22c   : > { %10375 = vmatprep.mubr.msk.f32.mxu1 %vm11970_vm0, %v11969_v7  ;;  %v1223_v31 = vld [vmem:[#allocation2 + $0x1a] sm:$0xff] }
 0x22d   : > { %1081 = vst.msk [vmem:[#allocation2 + $0x2b] sm:$0xff] %vm1076_vm6, %v1068_v54  ;;  %1086 = vst.msk [vmem:[#allocation2 + $0x53] sm:$0xff] %vm1076_vm6, %v1073_v55 }
 0x22e   : > { %v1326_v8 = vpop.f32.mrb[36].mxu0  ;;  %v1039_v59 = vpop.f32.mrb[10].mxu1 }
 0x22f   : > { %v10139_v16 = vpop.f32.mrb[37].mxu0  ;;  %v1074_v29 = vadd.f32 %v1062_v60, %v1039_v59  ;;  %v10087_v61 = vpop.f32.mrb[11].mxu1  ;;  %10376 = vmatmul.mubr.msk.f32.gmra.mrb[116].mxu1 %vm706_vm3, %v12445_v57 }
 0x230   : > { %10378 = vmatprep.mubr.msk.f32.mxu1 %vm11970_vm0, %v11969_v7  ;;  %v1224_v43 = vld [vmem:[#allocation2 + $0x22] sm:$0xff] }
 0x231   : > { %1087 = vst.msk [vmem:[#allocation2 + $0x5b] sm:$0xff] %vm1076_vm6, %v1074_v29 }
 0x232   : > { %v1331_v52 = vpop.f32.mrb[38].mxu0  ;;  %v1044_v63 = vpop.f32.mrb[12].mxu1 }
 0x233   : > { %v10142_v0 = vpop.f32.mrb[39].mxu0  ;;  %v1075_v2 = vadd.f32 %v1063_v44, %v1044_v63  ;;  %v10090_v6 = vpop.f32.mrb[13].mxu1  ;;  %10379 = vmatmul.mubr.msk.f32.gmra.mrb[118].mxu1 %vm706_vm3, %v12458_v58  ;;  %v1222_v58 = vld [vmem:[#allocation2 + $0x12] sm:$0xff]  ;;  %vm1256_vm3 = vcmask 123904  }
 0x234   : > { %10426 = vmatprep.mubr.msk.f32.mxu1 %vm11970_vm0, %v11969_v7  ;;  %v1225_v1 = vld [vmem:[#allocation2 + $0x2a] sm:$0xff]  ;;  %v1226_v61 = vld [vmem:[#allocation2 + $0x32] sm:$0xff] }
 0x235   : > { %1089 = vst.msk [vmem:[#allocation2 + $0x63] sm:$0x1] %vm1088_vm7, %v1075_v2 }
 0x236   : > { %v1336_v57 = vpop.f32.mrb[40].mxu0  ;;  %v1049_v9 = vpop.f32.mrb[14].mxu1 }
 0x237   : > { %v10145_v10 = vpop.f32.mrb[41].mxu0  ;;  %v10093_v11 = vpop.f32.mrb[15].mxu1 }
 0x238   : > { %v1227_v10 = vld [vmem:[#allocation2 + $0x3a] sm:$0xff] }
 0x23a   : > { %v1341_v3 = vpop.f32.mrb[42].mxu0  ;;  %v1158_v13 = vpop.f32.mrb[16].mxu1 }
 0x23b   : > { %v10148_v14 = vpop.f32.mrb[43].mxu0  ;;  %v1233_v17 = vadd.f32 %v1221_v38, %v1158_v13  ;;  %v10098_v19 = vpop.f32.mrb[17].mxu1 }
 0x23d   : > { %1245 = vst.msk [vmem:[#allocation2 + $0xa] sm:$0xff] %vm1076_vm6, %v1233_v17 }
 0x23e   : > { %v1346_v20 = vpop.f32.mrb[44].mxu0  ;;  %v1163_v21 = vpop.f32.mrb[18].mxu1 }
 0x23f   : > { %v10151_v22 = vpop.f32.mrb[45].mxu0  ;;  %v1234_v23 = vadd.f32 %v1222_v58, %v1163_v21  ;;  %v10101_v26 = vpop.f32.mrb[19].mxu1  ;;  %v1228_v21 = vld [vmem:[#allocation2 + $0x42] sm:$0xff] }
 0x241   : > { %1246 = vst.msk [vmem:[#allocation2 + $0x12] sm:$0xff] %vm1076_vm6, %v1234_v23 }
 0x242   : > { %v1351_v27 = vpop.f32.mrb[46].mxu0  ;;  %v1168_v30 = vpop.f32.mrb[20].mxu1 }
 0x243   : > { %v10154_v32 = vpop.f32.mrb[47].mxu0  ;;  %v1235_v33 = vadd.f32 %v1223_v31, %v1168_v30  ;;  %v10104_v34 = vpop.f32.mrb[21].mxu1 }
 0x244   : > { %v1389_v36 = vld [vmem:[#allocation2 + $0x9] sm:$0xff] }
 0x245   : > { %1247 = vst.msk [vmem:[#allocation2 + $0x1a] sm:$0xff] %vm1076_vm6, %v1235_v33  ;;  %v1401_v42 = vadd.f32 %v1389_v36, %v1326_v8  ;;  %v1229_v32 = vld [vmem:[#allocation2 + $0x4a] sm:$0xff] }
 0x246   : > { %v1356_v41 = vpop.f32.mrb[48].mxu0  ;;  %v1173_v45 = vpop.f32.mrb[22].mxu1 }
 0x247   : > { %v10157_v46 = vpop.f32.mrb[49].mxu0  ;;  %v1236_v28 = vadd.f32 %v1224_v43, %v1173_v45  ;;  %v10107_v49 = vpop.f32.mrb[23].mxu1  ;;  %1413 = vst.msk [vmem:[#allocation2 + $0x9] sm:$0xff] %vm1076_vm6, %v1401_v42 }
 0x248   : > { %v1390_v40 = vld [vmem:[#allocation2 + $0x11] sm:$0xff] }
 0x249   : > { %1248 = vst.msk [vmem:[#allocation2 + $0x22] sm:$0xff] %vm1076_vm6, %v1236_v28  ;;  %v1402_v54 = vadd.f32 %v1390_v40, %v1331_v52  ;;  %v1230_v46 = vld [vmem:[#allocation2 + $0x52] sm:$0xff] }
 0x24a   : > { %v1361_v48 = vpop.f32.mrb[50].mxu0  ;;  %v1178_v53 = vpop.f32.mrb[24].mxu1 }
 0x24b   : > { %v10160_v55 = vpop.f32.mrb[51].mxu0  ;;  %v1237_v18 = vadd.f32 %v1225_v1, %v1178_v53  ;;  %v10110_v60 = vpop.f32.mrb[25].mxu1  ;;  %1414 = vst.msk [vmem:[#allocation2 + $0x11] sm:$0xff] %vm1076_vm6, %v1402_v54 }
 0x24c   : > { %v1391_v8 = vld [vmem:[#allocation2 + $0x19] sm:$0xff] }
 0x24d   : > { %1249 = vst.msk [vmem:[#allocation2 + $0x2a] sm:$0xff] %vm1076_vm6, %v1237_v18  ;;  %v1403_v16 = vadd.f32 %v1391_v8, %v1336_v57  ;;  %v1231_v55 = vld [vmem:[#allocation2 + $0x5a] sm:$0xff] }
 0x24e   : > { %v1366_v59 = vpop.f32.mrb[52].mxu0  ;;  %v1183_v29 = vpop.f32.mrb[26].mxu1 }
 0x24f   : > { %v10163_v44 = vpop.f32.mrb[53].mxu0  ;;  %v1238_v63 = vadd.f32 %v1226_v61, %v1183_v29  ;;  %v10113_v0 = vpop.f32.mrb[27].mxu1  ;;  %1415 = vst.msk [vmem:[#allocation2 + $0x19] sm:$0xff] %vm1076_vm6, %v1403_v16  ;;  %v1232_v61 = vld [vmem:[#allocation2 + $0x62] sm:$0x3] }
 0x250   : > { %v1392_v52 = vld [vmem:[#allocation2 + $0x21] sm:$0xff] }
 0x251   : > { %1250 = vst.msk [vmem:[#allocation2 + $0x32] sm:$0xff] %vm1076_vm6, %v1238_v63  ;;  %v1404_v6 = vadd.f32 %v1392_v52, %v1341_v3 }
 0x252   : > { %v1371_v2 = vpop.f32.mrb[54].mxu0  ;;  %v1188_v9 = vpop.f32.mrb[28].mxu1 }
 0x253   : > { %v10166_v11 = vpop.f32.mrb[55].mxu0  ;;  %v1239_v13 = vadd.f32 %v1227_v10, %v1188_v9  ;;  %v10116_v38 = vpop.f32.mrb[29].mxu1  ;;  %1416 = vst.msk [vmem:[#allocation2 + $0x21] sm:$0xff] %vm1076_vm6, %v1404_v6 }
 0x254   : > { %v1393_v57 = vld [vmem:[#allocation2 + $0x29] sm:$0xff]  ;;  %v1558_v38 = vld [vmem:[#allocation2 + $0x1] sm:$0xff] }
 0x255   : > { %1251 = vst.msk [vmem:[#allocation2 + $0x3a] sm:$0xff] %vm1076_vm6, %v1239_v13  ;;  %v1405_v17 = vadd.f32 %v1393_v57, %v1346_v20 }
 0x256   : > { %v1376_v14 = vpop.f32.mrb[56].mxu0  ;;  %v1193_v19 = vpop.f32.mrb[30].mxu1 }
 0x257   : > { %v10169_v58 = vpop.f32.mrb[57].mxu0  ;;  %v1240_v22 = vadd.f32 %v1228_v21, %v1193_v19  ;;  %v10119_v23 = vpop.f32.mrb[31].mxu1  ;;  %1417 = vst.msk [vmem:[#allocation2 + $0x29] sm:$0xff] %vm1076_vm6, %v1405_v17 }
 0x258   : > { %v1394_v3 = vld [vmem:[#allocation2 + $0x31] sm:$0xff] }
 0x259   : > { %1252 = vst.msk [vmem:[#allocation2 + $0x42] sm:$0xff] %vm1076_vm6, %v1240_v22  ;;  %v1406_v30 = vadd.f32 %v1394_v3, %v1351_v27 }
 0x25a   : > { %v1381_v26 = vpop.f32.mrb[58].mxu0  ;;  %v1198_v31 = vpop.f32.mrb[32].mxu1 }
 0x25b   : > { %v10172_v33 = vpop.f32.mrb[59].mxu0  ;;  %v1241_v34 = vadd.f32 %v1229_v32, %v1198_v31  ;;  %v10122_v36 = vpop.f32.mrb[33].mxu1  ;;  %1418 = vst.msk [vmem:[#allocation2 + $0x31] sm:$0xff] %vm1076_vm6, %v1406_v30  ;;  %v1559_v31 = vld [vmem:[#allocation2 + $0x9] sm:$0xff] }
 0x25c   : > { %v1395_v20 = vld [vmem:[#allocation2 + $0x39] sm:$0xff] }
 0x25d   : > { %1253 = vst.msk [vmem:[#allocation2 + $0x4a] sm:$0xff] %vm1076_vm6, %v1241_v34  ;;  %v1407_v45 = vadd.f32 %v1395_v20, %v1356_v41  ;;  %v1560_v20 = vld [vmem:[#allocation2 + $0x11] sm:$0xff] }
 0x25e   : > { %v1386_v42 = vpop.f32.mrb[60].mxu0  ;;  %v1203_v43 = vpop.f32.mrb[34].mxu1 }
 0x25f   : > { %v10175_v28 = vpop.f32.mrb[61].mxu0  ;;  %v1242_v49 = vadd.f32 %v1230_v46, %v1203_v43  ;;  %v10125_v40 = vpop.f32.mrb[35].mxu1  ;;  %1419 = vst.msk [vmem:[#allocation2 + $0x39] sm:$0xff] %vm1076_vm6, %v1407_v45 }
 0x260   : > { %v1396_v27 = vld [vmem:[#allocation2 + $0x41] sm:$0xff]  ;;  %v1561_v40 = vld [vmem:[#allocation2 + $0x19] sm:$0xff] }
 0x261   : > { %1254 = vst.msk [vmem:[#allocation2 + $0x52] sm:$0xff] %vm1076_vm6, %v1242_v49  ;;  %v1408_v53 = vadd.f32 %v1396_v27, %v1361_v48 }
 0x262   : > { %v1665_v54 = vpop.f32.mrb[62].mxu0  ;;  %v1208_v1 = vpop.f32.mrb[36].mxu1 }
 0x263   : > { %v10221_v18 = vpop.f32.mrb[63].mxu0  ;;  %v1243_v60 = vadd.f32 %v1231_v55, %v1208_v1  ;;  %v10128_v8 = vpop.f32.mrb[37].mxu1  ;;  %1420 = vst.msk [vmem:[#allocation2 + $0x41] sm:$0xff] %vm1076_vm6, %v1408_v53 }
 0x264   : > { %v1397_v41 = vld [vmem:[#allocation2 + $0x49] sm:$0xff] }
 0x265   : > { %1255 = vst.msk [vmem:[#allocation2 + $0x5a] sm:$0xff] %vm1076_vm6, %v1243_v60  ;;  %v1409_v29 = vadd.f32 %v1397_v41, %v1366_v59  ;;  %v1562_v41 = vld [vmem:[#allocation2 + $0x21] sm:$0xff] }
 0x266   : > { %v1670_v16 = vpop.f32.mrb[64].mxu0  ;;  %v1213_v44 = vpop.f32.mrb[38].mxu1 }
 0x267   : > { %v10224_v63 = vpop.f32.mrb[65].mxu0  ;;  %v1244_v0 = vadd.f32 %v1232_v61, %v1213_v44  ;;  %v10131_v52 = vpop.f32.mrb[39].mxu1  ;;  %1421 = vst.msk [vmem:[#allocation2 + $0x49] sm:$0xff] %vm1076_vm6, %v1409_v29 }
 0x268   : > { %v1398_v48 = vld [vmem:[#allocation2 + $0x51] sm:$0xff] }
 0x269   : > { %1257 = vst.msk [vmem:[#allocation2 + $0x62] sm:$0x3] %vm1256_vm3, %v1244_v0  ;;  %v1410_v9 = vadd.f32 %v1398_v48, %v1371_v2  ;;  %v1563_v48 = vld [vmem:[#allocation2 + $0x29] sm:$0xff] }
 0x26a   : > { %v1675_v6 = vpop.f32.mrb[66].mxu0  ;;  %v1218_v10 = vpop.f32.mrb[40].mxu1 }
 0x26b   : > { %v10227_v11 = vpop.f32.mrb[67].mxu0  ;;  %v10134_v13 = vpop.f32.mrb[41].mxu1  ;;  %1422 = vst.msk [vmem:[#allocation2 + $0x51] sm:$0xff] %vm1076_vm6, %v1410_v9 }
 0x26c   : > { %v1399_v59 = vld [vmem:[#allocation2 + $0x59] sm:$0xff] }
 0x26d   : > { %v1411_v17 = vadd.f32 %v1399_v59, %v1376_v14 }
 0x26e   : > { %v1680_v57 = vpop.f32.mrb[68].mxu0  ;;  %v1494_v19 = vpop.f32.mrb[42].mxu1 }
 0x26f   : > { %v10230_v21 = vpop.f32.mrb[69].mxu0  ;;  %v1571_v58 = vadd.f32 %v1558_v38, %v1494_v19  ;;  %v10180_v22 = vpop.f32.mrb[43].mxu1  ;;  %1423 = vst.msk [vmem:[#allocation2 + $0x59] sm:$0xff] %vm1076_vm6, %v1411_v17  ;;  %v1564_v17 = vld [vmem:[#allocation2 + $0x31] sm:$0xff] }
 0x270   : > { %v1400_v23 = vld [vmem:[#allocation2 + $0x61] sm:$0x7] }
 0x271   : > { %1584 = vst.msk [vmem:[#allocation2 + $0x1] sm:$0xff] %vm1076_vm6, %v1571_v58  ;;  %v1412_v3 = vadd.f32 %v1400_v23, %v1381_v26 }
 0x272   : > { %v1685_v2 = vpop.f32.mrb[70].mxu0  ;;  %v1499_v30 = vpop.f32.mrb[44].mxu1 }
 0x273   : > { %v10233_v32 = vpop.f32.mrb[71].mxu0  ;;  %v1572_v33 = vadd.f32 %v1559_v31, %v1499_v30  ;;  %v10183_v34 = vpop.f32.mrb[45].mxu1  ;;  %1425 = vst.msk [vmem:[#allocation2 + $0x61] sm:$0x7] %vm1424_vm8, %v1412_v3  ;;  %v1565_v30 = vld [vmem:[#allocation2 + $0x39] sm:$0xff] }
 0x275   : > { %1585 = vst.msk [vmem:[#allocation2 + $0x9] sm:$0xff] %vm1076_vm6, %v1572_v33 }
 0x276   : > { %v1690_v14 = vpop.f32.mrb[72].mxu0  ;;  %v1504_v36 = vpop.f32.mrb[46].mxu1 }
 0x277   : > { %v10236_v42 = vpop.f32.mrb[73].mxu0  ;;  %v1573_v45 = vadd.f32 %v1560_v20, %v1504_v36  ;;  %v10186_v43 = vpop.f32.mrb[47].mxu1 }
 0x278   : > { %v1729_v46 = vld [vmem:[#allocation2] sm:$0xff] }
 0x279   : > { %v1742_v28 = vadd.f32 %v1729_v46, %v1665_v54  ;;  %1586 = vst.msk [vmem:[#allocation2 + $0x11] sm:$0xff] %vm1076_vm6, %v1573_v45  ;;  %v1566_v42 = vld [vmem:[#allocation2 + $0x41] sm:$0xff] }
 0x27a   : > { %v1695_v26 = vpop.f32.mrb[74].mxu0  ;;  %v1509_v49 = vpop.f32.mrb[48].mxu1 }
 0x27b   : > { %v10239_v27 = vpop.f32.mrb[75].mxu0  ;;  %1755 = vst.msk [vmem:[#allocation2] sm:$0xff] %vm1076_vm6, %v1742_v28  ;;  %v1574_v53 = vadd.f32 %v1561_v40, %v1509_v49  ;;  %v10189_v1 = vpop.f32.mrb[49].mxu1 }
 0x27c   : > { %v1730_v55 = vld [vmem:[#allocation2 + $0x8] sm:$0xff] }
 0x27d   : > { %v1743_v18 = vadd.f32 %v1730_v55, %v1670_v16  ;;  %1587 = vst.msk [vmem:[#allocation2 + $0x19] sm:$0xff] %vm1076_vm6, %v1574_v53  ;;  %v1567_v27 = vld [vmem:[#allocation2 + $0x49] sm:$0xff] }
 0x27e   : > { %v1700_v60 = vpop.f32.mrb[76].mxu0  ;;  %v1514_v8 = vpop.f32.mrb[50].mxu1 }
 0x27f   : > { %v10242_v29 = vpop.f32.mrb[77].mxu0  ;;  %1756 = vst.msk [vmem:[#allocation2 + $0x8] sm:$0xff] %vm1076_vm6, %v1743_v18  ;;  %v1575_v54 = vadd.f32 %v1562_v41, %v1514_v8  ;;  %v10192_v61 = vpop.f32.mrb[51].mxu1 }
 0x280   : > { %v1731_v44 = vld [vmem:[#allocation2 + $0x10] sm:$0xff] }
 0x281   : > { %v1744_v63 = vadd.f32 %v1731_v44, %v1675_v6  ;;  %1588 = vst.msk [vmem:[#allocation2 + $0x21] sm:$0xff] %vm1076_vm6, %v1575_v54  ;;  %v1568_v29 = vld [vmem:[#allocation2 + $0x51] sm:$0xff] }
 0x282   : > { %v1705_v0 = vpop.f32.mrb[78].mxu0  ;;  %v1519_v52 = vpop.f32.mrb[52].mxu1 }
 0x283   : > { %v10245_v9 = vpop.f32.mrb[79].mxu0  ;;  %1757 = vst.msk [vmem:[#allocation2 + $0x10] sm:$0xff] %vm1076_vm6, %v1744_v63  ;;  %v1576_v16 = vadd.f32 %v1563_v48, %v1519_v52  ;;  %v10195_v10 = vpop.f32.mrb[53].mxu1 }
 0x284   : > { %v1732_v11 = vld [vmem:[#allocation2 + $0x18] sm:$0xff] }
 0x285   : > { %v1745_v13 = vadd.f32 %v1732_v11, %v1680_v57  ;;  %1589 = vst.msk [vmem:[#allocation2 + $0x29] sm:$0xff] %vm1076_vm6, %v1576_v16  ;;  %v1569_v9 = vld [vmem:[#allocation2 + $0x59] sm:$0xff] }
 0x286   : > { %v1710_v38 = vpop.f32.mrb[80].mxu0  ;;  %v1524_v59 = vpop.f32.mrb[54].mxu1 }
 0x287   : > { %v10248_v19 = vpop.f32.mrb[81].mxu0  ;;  %1758 = vst.msk [vmem:[#allocation2 + $0x18] sm:$0xff] %vm1076_vm6, %v1745_v13  ;;  %v1577_v6 = vadd.f32 %v1564_v17, %v1524_v59  ;;  %v10198_v21 = vpop.f32.mrb[55].mxu1 }
 0x288   : > { %v1733_v58 = vld [vmem:[#allocation2 + $0x20] sm:$0xff] }
 0x289   : > { %v1746_v22 = vadd.f32 %v1733_v58, %v1685_v2  ;;  %1590 = vst.msk [vmem:[#allocation2 + $0x31] sm:$0xff] %vm1076_vm6, %v1577_v6  ;;  %v1570_v6 = vld [vmem:[#allocation2 + $0x61] sm:$0x7] }
 0x28a   : > { %v12965_v23 = vpop.f32.mrb[82].mxu0  ;;  %v1529_v3 = vpop.f32.mrb[56].mxu1 }
 0x28b   : > { %v10251_v31 = vpop.f32.mrb[83].mxu0  ;;  %1759 = vst.msk [vmem:[#allocation2 + $0x20] sm:$0xff] %vm1076_vm6, %v1746_v22  ;;  %v1578_v57 = vadd.f32 %v1565_v30, %v1529_v3  ;;  %v10201_v32 = vpop.f32.mrb[57].mxu1 }
 0x28c   : > { %v1734_v33 = vld [vmem:[#allocation2 + $0x28] sm:$0xff] }
 0x28d   : > { %v1747_v34 = vadd.f32 %v1734_v33, %v1690_v14  ;;  %1591 = vst.msk [vmem:[#allocation2 + $0x39] sm:$0xff] %vm1076_vm6, %v1578_v57 }
 0x28e   : > { %v12969_v36 = vpop.f32.mrb[84].mxu0  ;;  %v1534_v20 = vpop.f32.mrb[58].mxu1 }
 0x28f   : > { %v10254_v2 = vpop.f32.mrb[85].mxu0  ;;  %1760 = vst.msk [vmem:[#allocation2 + $0x28] sm:$0xff] %vm1076_vm6, %v1747_v34  ;;  %v1579_v45 = vadd.f32 %v1566_v42, %v1534_v20  ;;  %v10204_v43 = vpop.f32.mrb[59].mxu1 }
 0x290   : > { %v1735_v46 = vld [vmem:[#allocation2 + $0x30] sm:$0xff]  ;;  %v2855_v2 = vld [vmem:[%s16315_s4] sm:$0xff] }
 0x291   : > { %v1748_v28 = vadd.f32 %v1735_v46, %v1695_v26  ;;  %1592 = vst.msk [vmem:[#allocation2 + $0x41] sm:$0xff] %vm1076_vm6, %v1579_v45 }
 0x292   : > { %v12973_v49 = vpop.f32.mrb[86].mxu0  ;;  %v1539_v40 = vpop.f32.mrb[60].mxu1 }
 0x293   : > { %v10257_v14 = vpop.f32.mrb[87].mxu0  ;;  %1761 = vst.msk [vmem:[#allocation2 + $0x30] sm:$0xff] %vm1076_vm6, %v1748_v28  ;;  %v1580_v53 = vadd.f32 %v1567_v27, %v1539_v40  ;;  %v10207_v1 = vpop.f32.mrb[61].mxu1  ;;  %v8928_v28 = vld [vmem:[%s16315_s4 + $0x10] sm:$0xff]  ;;  %v8929_v40 = vld [vmem:[%s16315_s4 + $0x18] sm:$0xff] }
 0x294   : > { %v1736_v55 = vld [vmem:[#allocation2 + $0x38] sm:$0xff]  ;;  %v11737_v1 = vpack.c.bf16 %v8929_v40, %v8928_v28 }
 0x295   : > { %v1749_v18 = vadd.f32 %v1736_v55, %v1700_v60  ;;  %1593 = vst.msk [vmem:[#allocation2 + $0x49] sm:$0xff] %vm1076_vm6, %v1580_v53 }
 0x296   : > { %v2060_v8 = vpop.f32.mrb[88].mxu0  ;;  %v1544_v41 = vpop.f32.mrb[62].mxu1  ;;  %11738 = vmatpush3.bf16.msra.mxu0 %v11737_v1 }
 0x297   : > { %v10303_v54 = vpop.f32.mrb[89].mxu0  ;;  %1762 = vst.msk [vmem:[#allocation2 + $0x38] sm:$0xff] %vm1076_vm6, %v1749_v18  ;;  %v1581_v26 = vadd.f32 %v1568_v29, %v1544_v41  ;;  %v10210_v61 = vpop.f32.mrb[63].mxu1  ;;  %v1901_v29 = vld [vmem:[#allocation2] sm:$0xff]  ;;  %11742 = vmatprep.subr.bf16.mxu0 %v11968_v4 }
 0x298   : > { %v1737_v44 = vld [vmem:[#allocation2 + $0x40] sm:$0xff] }
 0x299   : > { %v1750_v63 = vadd.f32 %v1737_v44, %v1705_v0  ;;  %1594 = vst.msk [vmem:[#allocation2 + $0x51] sm:$0xff] %vm1076_vm6, %v1581_v26 }
 0x29a   : > { %v2064_v52 = vpop.f32.mrb[90].mxu0  ;;  %v1549_v48 = vpop.f32.mrb[64].mxu1 }
 0x29b   : > { %v10306_v16 = vpop.f32.mrb[91].mxu0  ;;  %1763 = vst.msk [vmem:[#allocation2 + $0x40] sm:$0xff] %vm1076_vm6, %v1750_v63  ;;  %v1582_v60 = vadd.f32 %v1569_v9, %v1549_v48  ;;  %v10213_v10 = vpop.f32.mrb[65].mxu1  ;;  %v2147_v17 = vrot.slane %v2064_v52, 1 }
 0x29c   : > { %v1738_v11 = vld [vmem:[#allocation2 + $0x48] sm:$0xff] }
 0x29d   : > { %v1751_v13 = vadd.f32 %v1738_v11, %v1710_v38  ;;  %1595 = vst.msk [vmem:[#allocation2 + $0x59] sm:$0xff] %vm1076_vm6, %v1582_v60  ;;  %v1902_v10 = vld [vmem:[#allocation2 + $0x8] sm:$0xff] }
 0x29e   : > { %v2069_v59 = vpop.f32.mrb[92].mxu0  ;;  %v1554_v19 = vpop.f32.mrb[66].mxu1 }
 0x29f   : > { %v2148_v0 = vrot.slane %v2069_v59, 1  ;;  %v10309_v21 = vpop.f32.mrb[93].mxu0  ;;  %1764 = vst.msk [vmem:[#allocation2 + $0x48] sm:$0xff] %vm1076_vm6, %v1751_v13  ;;  %v1583_v58 = vadd.f32 %v1570_v6, %v1554_v19  ;;  %v10216_v22 = vpop.f32.mrb[67].mxu1 }
 0x2a0   : > { %v1739_v3 = vld [vmem:[#allocation2 + $0x50] sm:$0xff] }
 0x2a1   : > { %v12983_v30 = vsel %vm1927_vm9, %v2147_v17, %v2148_v0  ;;  %v1752_v31 = vadd.f32 %v1739_v3, %v12965_v23  ;;  %1596 = vst.msk [vmem:[#allocation2 + $0x61] sm:$0x7] %vm1424_vm8, %v1583_v58  ;;  %v2856_v23 = vld [vmem:[%s16315_s4 + $0x8] sm:$0xff]  ;;  %v1903_v58 = vld [vmem:[#allocation2 + $0x10] sm:$0xff] }
 0x2a2   : > { %v2074_v38 = vpop.f32.mrb[94].mxu0  ;;  %v1837_v57 = vpop.f32.mrb[68].mxu1  ;;  %v11734_v46 = vpack.c.bf16 %v2856_v23, %v2855_v2 }
 0x2a3   : > { %v2150_v32 = vrot.slane %v2074_v38, 1  ;;  %v10312_v33 = vpop.f32.mrb[95].mxu0  ;;  %1765 = vst.msk [vmem:[#allocation2 + $0x50] sm:$0xff] %vm1076_vm6, %v1752_v31  ;;  %v10262_v34 = vpop.f32.mrb[69].mxu1  ;;  %v1928_v55 = vrot.slane %v1837_v57, 1 }
 0x2a4   : > { %v1740_v20 = vld [vmem:[#allocation2 + $0x58] sm:$0xff]  ;;  %11735 = vmatpush3.bf16.msra.mxu1 %v11734_v46 }
 0x2a5   : > { %v12989_v42 = vsel %vm1927_vm9, %v2148_v0, %v2150_v32  ;;  %v1753_v45 = vadd.f32 %v1740_v20, %v12969_v36  ;;  %11739 = vmatprep.subr.bf16.mxu1 %v11968_v4 }
 0x2a6   : > { %v2079_v43 = vpop.f32.mrb[96].mxu0  ;;  %v1842_v27 = vpop.f32.mrb[70].mxu1 }
 0x2a7   : > { %v2152_v14 = vrot.slane %v2079_v43, 1  ;;  %v10315_v53 = vpop.f32.mrb[97].mxu0  ;;  %1766 = vst.msk [vmem:[#allocation2 + $0x58] sm:$0xff] %vm1076_vm6, %v1753_v45  ;;  %v1929_v18 = vrot.slane %v1842_v27, 1  ;;  %v10265_v8 = vpop.f32.mrb[71].mxu1  ;;  %v1904_v45 = vld [vmem:[#allocation2 + $0x18] sm:$0xff] }
 0x2a8   : > { %v1741_v41 = vld [vmem:[#allocation2 + $0x60] sm:$0xf] }
 0x2a9   : > { %v13006_v36 = vsel %vm1927_vm9, %v2150_v32, %v2152_v14  ;;  %v1930_v54 = vsel %vm1927_vm9, %v1928_v55, %v1929_v18  ;;  %v1754_v61 = vadd.f32 %v1741_v41, %v12973_v49  ;;  %v1905_v8 = vld [vmem:[#allocation2 + $0x20] sm:$0xff] }
 0x2aa   : > { %v2084_v26 = vpop.f32.mrb[98].mxu0  ;;  %v1966_v44 = vadd.f32 %v1930_v54, %v1901_v29  ;;  %v1847_v63 = vpop.f32.mrb[72].mxu1 }
 0x2ab   : > { %v2154_v52 = vrot.slane %v2084_v26, 1  ;;  %v10318_v48 = vpop.f32.mrb[99].mxu0  ;;  %v1931_v9 = vrot.slane %v1847_v63, 1  ;;  %v10268_v16 = vpop.f32.mrb[73].mxu1  ;;  %1768 = vst.msk [vmem:[#allocation2 + $0x60] sm:$0xf] %vm1767_vm10, %v1754_v61 }
 0x2ac   : > { %1979 = vst.msk [vmem:[#allocation2] sm:$0xff] %vm1076_vm6, %v1966_v44  ;;  %v1906_v16 = vld [vmem:[#allocation2 + $0x28] sm:$0xff] }
 0x2ad   : > { %v13015_v60 = vsel %vm1927_vm9, %v2152_v14, %v2154_v52  ;;  %v1932_v11 = vsel %vm1927_vm9, %v1929_v18, %v1931_v9 }
 0x2ae   : > { %v2089_v13 = vpop.f32.mrb[100].mxu0  ;;  %v1967_v49 = vadd.f32 %v1932_v11, %v1902_v10  ;;  %v1852_v59 = vpop.f32.mrb[74].mxu1 }
 0x2af   : > { %v2156_v17 = vrot.slane %v2089_v13, 1  ;;  %v10321_v19 = vpop.f32.mrb[101].mxu0  ;;  %v1933_v6 = vrot.slane %v1852_v59, 1  ;;  %v10271_v0 = vpop.f32.mrb[75].mxu1 }
 0x2b0   : > { %1980 = vst.msk [vmem:[#allocation2 + $0x8] sm:$0xff] %vm1076_vm6, %v1967_v49 }
 0x2b1   : > { %v13020_v21 = vsel %vm1927_vm9, %v2154_v52, %v2156_v17  ;;  %v1934_v22 = vsel %vm1927_vm9, %v1931_v9, %v1933_v6 }
 0x2b2   : > { %v2094_v3 = vpop.f32.mrb[102].mxu0  ;;  %v1968_v31 = vadd.f32 %v1934_v22, %v1903_v58  ;;  %v1857_v38 = vpop.f32.mrb[76].mxu1  ;;  %v1907_v22 = vld [vmem:[#allocation2 + $0x30] sm:$0xff] }
 0x2b3   : > { %v2158_v57 = vrot.slane %v2094_v3, 1  ;;  %v10324_v32 = vpop.f32.mrb[103].mxu0  ;;  %v1935_v33 = vrot.slane %v1857_v38, 1  ;;  %v10274_v34 = vpop.f32.mrb[77].mxu1  ;;  %v2123_v20 = vld [vmem:[#allocation2] sm:$0xff] }
 0x2b4   : > { %1981 = vst.msk [vmem:[#allocation2 + $0x10] sm:$0xff] %vm1076_vm6, %v1968_v31  ;;  %v2182_v23 = vadd.f32 %v12983_v30, %v2123_v20 }
 0x2b5   : > { %v13025_v2 = vsel %vm1927_vm9, %v2156_v17, %v2158_v57  ;;  %v1936_v43 = vsel %vm1927_vm9, %v1933_v6, %v1935_v33 }
 0x2b6   : > { %v2099_v46 = vpop.f32.mrb[104].mxu0  ;;  %v1969_v28 = vadd.f32 %v1936_v43, %v1904_v45  ;;  %v1862_v40 = vpop.f32.mrb[78].mxu1  ;;  %2194 = vst.msk [vmem:[#allocation2] sm:$0xff] %vm1076_vm6, %v2182_v23  ;;  %v1908_v43 = vld [vmem:[#allocation2 + $0x38] sm:$0xff] }
 0x2b7   : > { %v2160_v27 = vrot.slane %v2099_v46, 1  ;;  %v10327_v14 = vpop.f32.mrb[105].mxu0  ;;  %v1937_v53 = vrot.slane %v1862_v40, 1  ;;  %v10277_v1 = vpop.f32.mrb[79].mxu1  ;;  %v2124_v55 = vld [vmem:[#allocation2 + $0x8] sm:$0xff] }
 0x2b8   : > { %1982 = vst.msk [vmem:[#allocation2 + $0x18] sm:$0xff] %vm1076_vm6, %v1969_v28  ;;  %v2183_v30 = vadd.f32 %v12989_v42, %v2124_v55 }
 0x2b9   : > { %v13032_v18 = vsel %vm1927_vm9, %v2158_v57, %v2160_v27  ;;  %v1938_v41 = vsel %vm1927_vm9, %v1935_v33, %v1937_v53 }
 0x2ba   : > { %v2104_v29 = vpop.f32.mrb[106].mxu0  ;;  %v1970_v54 = vadd.f32 %v1938_v41, %v1905_v8  ;;  %v1867_v26 = vpop.f32.mrb[80].mxu1  ;;  %2195 = vst.msk [vmem:[#allocation2 + $0x8] sm:$0xff] %vm1076_vm6, %v2183_v30  ;;  %v1909_v41 = vld [vmem:[#allocation2 + $0x40] sm:$0xff] }
 0x2bb   : > { %v2162_v61 = vrot.slane %v2104_v29, 1  ;;  %v10330_v44 = vpop.f32.mrb[107].mxu0  ;;  %v1939_v63 = vrot.slane %v1867_v26, 1  ;;  %v10280_v52 = vpop.f32.mrb[81].mxu1  ;;  %v2125_v48 = vld [vmem:[#allocation2 + $0x10] sm:$0xff] }
 0x2bc   : > { %1983 = vst.msk [vmem:[#allocation2 + $0x20] sm:$0xff] %vm1076_vm6, %v1970_v54  ;;  %v2184_v42 = vadd.f32 %v13006_v36, %v2125_v48 }
 0x2bd   : > { %v13039_v9 = vsel %vm1927_vm9, %v2160_v27, %v2162_v61  ;;  %v1940_v10 = vsel %vm1927_vm9, %v1937_v53, %v1939_v63 }
 0x2be   : > { %v2109_v11 = vpop.f32.mrb[108].mxu0  ;;  %v1971_v13 = vadd.f32 %v1940_v10, %v1906_v16  ;;  %v1872_v49 = vpop.f32.mrb[82].mxu1  ;;  %2196 = vst.msk [vmem:[#allocation2 + $0x10] sm:$0xff] %vm1076_vm6, %v2184_v42  ;;  %v1910_v16 = vld [vmem:[#allocation2 + $0x48] sm:$0xff] }
 0x2bf   : > { %v2164_v59 = vrot.slane %v2109_v11, 1  ;;  %v10333_v17 = vpop.f32.mrb[109].mxu0  ;;  %v1941_v19 = vrot.slane %v1872_v49, 1  ;;  %v10283_v6 = vpop.f32.mrb[83].mxu1  ;;  %v2126_v0 = vld [vmem:[#allocation2 + $0x18] sm:$0xff] }
 0x2c0   : > { %1984 = vst.msk [vmem:[#allocation2 + $0x28] sm:$0xff] %vm1076_vm6, %v1971_v13  ;;  %v2185_v36 = vadd.f32 %v13015_v60, %v2126_v0  ;;  %v1911_v0 = vld [vmem:[#allocation2 + $0x50] sm:$0xff] }
 0x2c1   : > { %v13046_v58 = vsel %vm1927_vm9, %v2162_v61, %v2164_v59  ;;  %v1942_v3 = vsel %vm1927_vm9, %v1939_v63, %v1941_v19 }
 0x2c2   : > { %v2114_v31 = vpop.f32.mrb[110].mxu0  ;;  %v1972_v38 = vadd.f32 %v1942_v3, %v1907_v22  ;;  %v1877_v57 = vpop.f32.mrb[84].mxu1  ;;  %2197 = vst.msk [vmem:[#allocation2 + $0x18] sm:$0xff] %vm1076_vm6, %v2185_v36 }
 0x2c3   : > { %v2166_v32 = vrot.slane %v2114_v31, 1  ;;  %v10336_v33 = vpop.f32.mrb[111].mxu0  ;;  %v1943_v34 = vrot.slane %v1877_v57, 1  ;;  %v10286_v20 = vpop.f32.mrb[85].mxu1  ;;  %v2127_v23 = vld [vmem:[#allocation2 + $0x20] sm:$0xff] }
 0x2c4   : > { %1985 = vst.msk [vmem:[#allocation2 + $0x30] sm:$0xff] %vm1076_vm6, %v1972_v38  ;;  %v2186_v60 = vadd.f32 %v13020_v21, %v2127_v23  ;;  %v1913_v20 = vld [vmem:[#allocation2 + $0x60] sm:$0x7] }
 0x2c5   : > { %v13053_v45 = vsel %vm1927_vm9, %v2164_v59, %v2166_v32  ;;  %v1944_v46 = vsel %vm1927_vm9, %v1941_v19, %v1943_v34 }
 0x2c6   : > { %v13057_v28 = vpop.f32.mrb[112].mxu0  ;;  %v1973_v40 = vadd.f32 %v1944_v46, %v1908_v43  ;;  %v1882_v27 = vpop.f32.mrb[86].mxu1  ;;  %2198 = vst.msk [vmem:[#allocation2 + $0x20] sm:$0xff] %vm1076_vm6, %v2186_v60  ;;  %v1912_v60 = vld [vmem:[#allocation2 + $0x58] sm:$0xff] }
 0x2c7   : > { %v2168_v14 = vrot.slane %v13057_v28, 1  ;;  %v10339_v53 = vpop.f32.mrb[113].mxu0  ;;  %v1945_v1 = vrot.slane %v1882_v27, 1  ;;  %v10289_v55 = vpop.f32.mrb[87].mxu1  ;;  %v2128_v30 = vld [vmem:[#allocation2 + $0x28] sm:$0xff] }
 0x2c8   : > { %1986 = vst.msk [vmem:[#allocation2 + $0x38] sm:$0xff] %vm1076_vm6, %v1973_v40  ;;  %v2187_v8 = vadd.f32 %v13025_v2, %v2128_v30 }
 0x2c9   : > { %v13065_v21 = vsel %vm1927_vm9, %v2166_v32, %v2168_v14  ;;  %v1946_v29 = vsel %vm1927_vm9, %v1943_v34, %v1945_v1 }
 0x2ca   : > { %v2489_v54 = vpop.f32.mrb[114].mxu0  ;;  %v1974_v26 = vadd.f32 %v1946_v29, %v1909_v41  ;;  %v1887_v61 = vpop.f32.mrb[88].mxu1  ;;  %2199 = vst.msk [vmem:[#allocation2 + $0x28] sm:$0xff] %vm1076_vm6, %v2187_v8 }
 0x2cb   : > { %v10385_v44 = vpop.f32.mrb[115].mxu0  ;;  %v1947_v63 = vrot.slane %v1887_v61, 1  ;;  %v10292_v52 = vpop.f32.mrb[89].mxu1  ;;  %v2129_v48 = vld [vmem:[#allocation2 + $0x30] sm:$0xff] }
 0x2cc   : > { %1987 = vst.msk [vmem:[#allocation2 + $0x40] sm:$0xff] %vm1076_vm6, %v1974_v26  ;;  %v2188_v42 = vadd.f32 %v13032_v18, %v2129_v48 }
 0x2cd   : > { %v1948_v10 = vsel %vm1927_vm9, %v1945_v1, %v1947_v63 }
 0x2ce   : > { %v2493_v2 = vpop.f32.mrb[116].mxu0  ;;  %v1975_v11 = vadd.f32 %v1948_v10, %v1910_v16  ;;  %v1892_v13 = vpop.f32.mrb[90].mxu1  ;;  %2200 = vst.msk [vmem:[#allocation2 + $0x30] sm:$0xff] %vm1076_vm6, %v2188_v42 }
 0x2cf   : > { %v10388_v49 = vpop.f32.mrb[117].mxu0  ;;  %v1949_v59 = vrot.slane %v1892_v13, 1  ;;  %v10295_v17 = vpop.f32.mrb[91].mxu1  ;;  %v2130_v19 = vld [vmem:[#allocation2 + $0x38] sm:$0xff]  ;;  %v2577_v3 = vrot.slane %v2493_v2, 3 }
 0x2d0   : > { %1988 = vst.msk [vmem:[#allocation2 + $0x48] sm:$0xff] %vm1076_vm6, %v1975_v11  ;;  %v2189_v6 = vadd.f32 %v13039_v9, %v2130_v19  ;;  %v2337_v19 = vld [vmem:[#allocation2] sm:$0xff] }
 0x2d1   : > { %v1950_v36 = vsel %vm1927_vm9, %v1947_v63, %v1949_v59 }
 0x2d2   : > { %v2498_v18 = vpop.f32.mrb[118].mxu0  ;;  %v1976_v22 = vadd.f32 %v1950_v36, %v1911_v0  ;;  %v1897_v31 = vpop.f32.mrb[92].mxu1  ;;  %2201 = vst.msk [vmem:[#allocation2 + $0x38] sm:$0xff] %vm1076_vm6, %v2189_v6 }
 0x2d3   : > { %v2578_v38 = vrot.slane %v2498_v18, 3  ;;  %v10391_v57 = vpop.f32.mrb[119].mxu0  ;;  %v1951_v32 = vrot.slane %v1897_v31, 1  ;;  %v10298_v33 = vpop.f32.mrb[93].mxu1  ;;  %v2131_v34 = vld [vmem:[#allocation2 + $0x40] sm:$0xff] }
 0x2d4   : > { %1989 = vst.msk [vmem:[#allocation2 + $0x50] sm:$0xff] %vm1076_vm6, %v1976_v22  ;;  %v2190_v23 = vadd.f32 %v13046_v58, %v2131_v34 }
 0x2d5   : > { %v13080_v9 = vsel %vm2576_vm11, %v2577_v3, %v2578_v38  ;;  %v1952_v43 = vsel %vm1927_vm9, %v1949_v59, %v1951_v32  ;;  %v1978_v46 = vadd.f32 %v1951_v32, %v1913_v20 }
 0x2d6   : > { %v2503_v40 = vpop.f32.mrb[120].mxu0  ;;  %v1977_v27 = vadd.f32 %v1952_v43, %v1912_v60  ;;  %v2274_v53 = vpop.f32.mrb[94].mxu1  ;;  %2202 = vst.msk [vmem:[#allocation2 + $0x40] sm:$0xff] %vm1076_vm6, %v2190_v23 }
 0x2d7   : > { %v2580_v1 = vrot.slane %v2503_v40, 3  ;;  %v10394_v55 = vpop.f32.mrb[121].mxu0  ;;  %1991 = vst.msk [vmem:[#allocation2 + $0x60] sm:$0x7] %vm1424_vm8, %v1978_v46  ;;  %v10344_v30 = vpop.f32.mrb[95].mxu1  ;;  %v2132_v8 = vld [vmem:[#allocation2 + $0x48] sm:$0xff] }
 0x2d8   : > { %1990 = vst.msk [vmem:[#allocation2 + $0x58] sm:$0xff] %vm1076_vm6, %v1977_v27  ;;  %v2191_v58 = vadd.f32 %v13053_v45, %v2132_v8  ;;  %v2339_v40 = vld [vmem:[#allocation2 + $0x10] sm:$0xff] }
 0x2d9   : > { %v13088_v41 = vsel %vm2576_vm11, %v2578_v38, %v2580_v1 }
 0x2da   : > { %v2508_v29 = vpop.f32.mrb[122].mxu0  ;;  %v2278_v54 = vpop.f32.mrb[96].mxu1  ;;  %2203 = vst.msk [vmem:[#allocation2 + $0x48] sm:$0xff] %vm1076_vm6, %v2191_v58 }
 0x2db   : > { %v2582_v26 = vrot.slane %v2508_v29, 3  ;;  %v10397_v61 = vpop.f32.mrb[123].mxu0  ;;  %v10347_v44 = vpop.f32.mrb[97].mxu1  ;;  %v2133_v63 = vld [vmem:[#allocation2 + $0x50] sm:$0xff]  ;;  %v2362_v13 = vrot.slane %v2278_v54, 2 }
 0x2dc   : > { %v2192_v48 = vadd.f32 %v13065_v21, %v2133_v63  ;;  %v2340_v44 = vld [vmem:[#allocation2 + $0x18] sm:$0xff] }
 0x2dd   : > { %v13093_v52 = vsel %vm2576_vm11, %v2580_v1, %v2582_v26 }
 0x2de   : > { %v2513_v42 = vpop.f32.mrb[124].mxu0  ;;  %v13096_v16 = vld [vmem:[#allocation2 + $0x60] sm:$0xf]  ;;  %v2283_v10 = vpop.f32.mrb[98].mxu1  ;;  %2204 = vst.msk [vmem:[#allocation2 + $0x50] sm:$0xff] %vm1076_vm6, %v2192_v48 }
 0x2df   : > { %v2584_v2 = vrot.slane %v2513_v42, 3  ;;  %v10400_v45 = vpop.f32.mrb[125].mxu0  ;;  %v2134_v11 = vld [vmem:[#allocation2 + $0x58] sm:$0x7]  ;;  %2854 = vst.msk [vmem:[#allocation2 + $0x60] sm:$0xf] %vm881_vm5, %v11969_v7 }
 0x2e0   : > { %v2363_v49 = vrot.slane %v2283_v10, 2  ;;  %v10350_v59 = vpop.f32.mrb[99].mxu1  ;;  %v2193_v17 = vadd.f32 %v2168_v14, %v2134_v11  ;;  %v2338_v14 = vld [vmem:[#allocation2 + $0x8] sm:$0xff] }
 0x2e1   : > { %v13104_v21 = vsel %vm2576_vm11, %v2582_v26, %v2584_v2 }
 0x2e2   : > { %v2364_v6 = vsel %vm2361_vm12, %v2362_v13, %v2363_v49  ;;  %v2518_v0 = vpop.f32.mrb[126].mxu0  ;;  %2205 = vst.msk [vmem:[#allocation2 + $0x58] sm:$0x7] %vm1424_vm8, %v2193_v17  ;;  %v2288_v18 = vpop.f32.mrb[100].mxu1  ;;  %v2341_v17 = vld [vmem:[#allocation2 + $0x20] sm:$0xff] }
 0x2e3   : > { %v2397_v36 = vadd.f32 %v2364_v6, %v2337_v19  ;;  %v2586_v22 = vrot.slane %v2518_v0, 3  ;;  %v10403_v3 = vpop.f32.mrb[127].mxu0  ;;  %v2365_v31 = vrot.slane %v2288_v18, 2  ;;  %v10353_v38 = vpop.f32.mrb[101].mxu1 }
 0x2e5   : > { %2409 = vst.msk [vmem:[#allocation2] sm:$0xff] %vm1076_vm6, %v2397_v36  ;;  %v13110_v28 = vsel %vm2576_vm11, %v2584_v2, %v2586_v22  ;;  %v2366_v57 = vsel %vm2361_vm12, %v2363_v49, %v2365_v31 }
 0x2e6   : > { %v2523_v32 = vpop.f32.mrb[128].mxu0  ;;  %v2398_v33 = vadd.f32 %v2366_v57, %v2338_v14  ;;  %v2293_v34 = vpop.f32.mrb[102].mxu1 }
 0x2e7   : > { %v2588_v20 = vrot.slane %v2523_v32, 3  ;;  %v10406_v23 = vpop.f32.mrb[129].mxu0  ;;  %v2367_v60 = vrot.slane %v2293_v34, 2  ;;  %v10356_v43 = vpop.f32.mrb[103].mxu1  ;;  %v2342_v32 = vld [vmem:[#allocation2 + $0x28] sm:$0xff] }
 0x2e8   : > { %2410 = vst.msk [vmem:[#allocation2 + $0x8] sm:$0xff] %vm1076_vm6, %v2398_v33 }
 0x2e9   : > { %v13115_v46 = vsel %vm2576_vm11, %v2586_v22, %v2588_v20  ;;  %v2368_v27 = vsel %vm2361_vm12, %v2365_v31, %v2367_v60 }
 0x2ea   : > { %v2528_v53 = vpop.f32.mrb[130].mxu0  ;;  %v2399_v1 = vadd.f32 %v2368_v27, %v2339_v40  ;;  %v2298_v55 = vpop.f32.mrb[104].mxu1 }
 0x2eb   : > { %v2590_v30 = vrot.slane %v2528_v53, 3  ;;  %v10409_v8 = vpop.f32.mrb[131].mxu0  ;;  %v2369_v29 = vrot.slane %v2298_v55, 2  ;;  %v10359_v54 = vpop.f32.mrb[105].mxu1 }
 0x2ec   : > { %v2552_v58 = vld [vmem:[#allocation2] sm:$0xff]  ;;  %2411 = vst.msk [vmem:[#allocation2 + $0x10] sm:$0xff] %vm1076_vm6, %v2399_v1 }
 0x2ed   : > { %v2612_v26 = vadd.f32 %v13080_v9, %v2552_v58  ;;  %v13121_v61 = vsel %vm2576_vm11, %v2588_v20, %v2590_v30  ;;  %v2370_v63 = vsel %vm2361_vm12, %v2367_v60, %v2369_v29 }
 0x2ee   : > { %v2533_v48 = vpop.f32.mrb[132].mxu0  ;;  %v2400_v42 = vadd.f32 %v2370_v63, %v2340_v44  ;;  %v2303_v10 = vpop.f32.mrb[106].mxu1 }
 0x2ef   : > { %2624 = vst.msk [vmem:[#allocation2] sm:$0xff] %vm1076_vm6, %v2612_v26  ;;  %v2592_v2 = vrot.slane %v2533_v48, 3  ;;  %v10412_v45 = vpop.f32.mrb[133].mxu0  ;;  %v2553_v11 = vld [vmem:[#allocation2 + $0x8] sm:$0xff]  ;;  %v2371_v13 = vrot.slane %v2303_v10, 2  ;;  %v10362_v49 = vpop.f32.mrb[107].mxu1 }
 0x2f0   : > { %v2613_v9 = vadd.f32 %v13088_v41, %v2553_v11  ;;  %2412 = vst.msk [vmem:[#allocation2 + $0x18] sm:$0xff] %vm1076_vm6, %v2400_v42  ;;  %v2344_v45 = vld [vmem:[#allocation2 + $0x38] sm:$0xff] }
 0x2f1   : > { %v13128_v59 = vsel %vm2576_vm11, %v2590_v30, %v2592_v2  ;;  %v2372_v19 = vsel %vm2361_vm12, %v2369_v29, %v2371_v13  ;;  %v2343_v30 = vld [vmem:[#allocation2 + $0x30] sm:$0xff] }
 0x2f2   : > { %v2538_v6 = vpop.f32.mrb[134].mxu0  ;;  %2625 = vst.msk [vmem:[#allocation2 + $0x8] sm:$0xff] %vm1076_vm6, %v2613_v9  ;;  %v2401_v0 = vadd.f32 %v2372_v19, %v2341_v17  ;;  %v2308_v36 = vpop.f32.mrb[108].mxu1 }
 0x2f3   : > { %v2594_v18 = vrot.slane %v2538_v6, 3  ;;  %v10415_v22 = vpop.f32.mrb[135].mxu0  ;;  %v2554_v3 = vld [vmem:[#allocation2 + $0x10] sm:$0xff]  ;;  %v2373_v31 = vrot.slane %v2308_v36, 2  ;;  %v10365_v38 = vpop.f32.mrb[109].mxu1 }
 0x2f4   : > { %v2614_v41 = vadd.f32 %v13093_v52, %v2554_v3  ;;  %2413 = vst.msk [vmem:[#allocation2 + $0x20] sm:$0xff] %vm1076_vm6, %v2401_v0  ;;  %v2345_v0 = vld [vmem:[#allocation2 + $0x40] sm:$0xff] }
 0x2f5   : > { %v13135_v14 = vsel %vm2576_vm11, %v2592_v2, %v2594_v18  ;;  %v2374_v33 = vsel %vm2361_vm12, %v2371_v13, %v2373_v31  ;;  %v13173_v3 = vld [vmem:[%s16319_s8] ss:$0 sm:$0xff] }
 0x2f6   : > { %v2636_v57 = vld [vmem:[#allocation2] sm:$0xff]  ;;  %v2543_v34 = vpop.f32.mrb[136].mxu0  ;;  %2626 = vst.msk [vmem:[#allocation2 + $0x10] sm:$0xff] %vm1076_vm6, %v2614_v41  ;;  %v2402_v20 = vadd.f32 %v2374_v33, %v2342_v32  ;;  %v2313_v23 = vpop.f32.mrb[110].mxu1 }
 0x2f7   : > { %2842 = vst.msk [vmem:[#allocation2] sm:$0xff] %vm868_vm4, %v11969_v7  ;;  %v2596_v60 = vrot.slane %v2543_v34, 3  ;;  %v10418_v43 = vpop.f32.mrb[137].mxu0  ;;  %v2555_v52 = vld [vmem:[#allocation2 + $0x18] sm:$0xff]  ;;  %v2375_v40 = vrot.slane %v2313_v23, 2  ;;  %v10368_v27 = vpop.f32.mrb[111].mxu1  ;;  %v2656_v33 = vadd.f32 %v13173_v3, %v2636_v57 }
 0x2f8   : > { %v2615_v53 = vadd.f32 %v13104_v21, %v2555_v52  ;;  %2414 = vst.msk [vmem:[#allocation2 + $0x28] sm:$0xff] %vm1076_vm6, %v2402_v20  ;;  %v2346_v23 = vld [vmem:[#allocation2 + $0x48] sm:$0xff] }
 0x2f9   : > { %v13144_v1 = vsel %vm2576_vm11, %v2594_v18, %v2596_v60  ;;  %v2637_v55 = vld [vmem:[#allocation2 + $0x8] sm:$0xff]  ;;  %v2376_v8 = vsel %vm2361_vm12, %v2373_v31, %v2375_v40 }
 0x2fa   : > { %v13147_v58 = vpop.f32.mrb[138].mxu0  ;;  %2843 = vst.msk [vmem:[#allocation2 + $0x8] sm:$0xff] %vm868_vm4, %v11969_v7  ;;  %v2403_v29 = vadd.f32 %v2376_v8, %v2343_v30  ;;  %v2318_v54 = vpop.f32.mrb[112].mxu1  ;;  %v2657_v41 = vadd.f32 %v13173_v3, %v2637_v55  ;;  %v2348_v30 = vld [vmem:[#allocation2 + $0x58] sm:$0x3] }
 0x2fb   : > { %2627 = vst.msk [vmem:[#allocation2 + $0x18] sm:$0xff] %vm1076_vm6, %v2615_v53  ;;  %v2598_v21 = vrot.slane %v13147_v58, 3  ;;  %v10421_v26 = vpop.f32.mrb[139].mxu0  ;;  %v2556_v44 = vld [vmem:[#allocation2 + $0x20] sm:$0xff]  ;;  %v2377_v63 = vrot.slane %v2318_v54, 2  ;;  %v10371_v48 = vpop.f32.mrb[113].mxu1 }
 0x2fc   : > { %v2616_v42 = vadd.f32 %v13110_v28, %v2556_v44  ;;  %2415 = vst.msk [vmem:[#allocation2 + $0x30] sm:$0xff] %vm1076_vm6, %v2403_v29  ;;  %v13186_v57 = vmul.f32 %v2657_v41, %v12190_v47  ;;  %v2347_v54 = vld [vmem:[#allocation2 + $0x50] sm:$0xff] }
 0x2fd   : > { %v13158_v10 = vsel %vm2576_vm11, %v2596_v60, %v2598_v21  ;;  %v2638_v2 = vld [vmem:[#allocation2 + $0x10] sm:$0xff]  ;;  %v2378_v11 = vsel %vm2361_vm12, %v2375_v40, %v2377_v63 }
 0x2fe   : > { %2844 = vst.msk [vmem:[#allocation2 + $0x10] sm:$0xff] %vm868_vm4, %v11969_v7  ;;  %v2404_v13 = vadd.f32 %v2378_v11, %v2344_v45  ;;  %v2323_v49 = vpop.f32.mrb[114].mxu1  ;;  %v2658_v34 = vadd.f32 %v13173_v3, %v2638_v2  ;;  %v2715_v45 = vmul.f32 %v13186_v57, %v13186_v57 }
 0x2ff   : > { %2628 = vst.msk [vmem:[#allocation2 + $0x20] sm:$0xff] %vm1076_vm6, %v2616_v42  ;;  %v2557_v9 = vld [vmem:[#allocation2 + $0x28] sm:$0xff]  ;;  %v2379_v28 = vrot.slane %v2323_v49, 2  ;;  %v10374_v17 = vpop.f32.mrb[115].mxu1 }
 0x300   : > { %v2617_v19 = vadd.f32 %v13115_v46, %v2557_v9  ;;  %2416 = vst.msk [vmem:[#allocation2 + $0x38] sm:$0xff] %vm1076_vm6, %v2404_v13  ;;  %v13191_v8 = vmul.f32 %v2658_v34, %v12197_v50  ;;  %v2683_v17 = vsel %vm1076_vm6, %v13186_v57, 0.0 }
 0x301   : > { %v2380_v36 = vsel %vm2361_vm12, %v2377_v63, %v2379_v28  ;;  %v13195_v63 = vmul.f32 %v2656_v33, %v12183_v39 }
 0x302   : > { %v2639_v6 = vld [vmem:[#allocation2 + $0x18] sm:$0xff]  ;;  %2629 = vst.msk [vmem:[#allocation2 + $0x28] sm:$0xff] %vm1076_vm6, %v2617_v19  ;;  %v2405_v18 = vadd.f32 %v2380_v36, %v2345_v0  ;;  %v2328_v22 = vpop.f32.mrb[116].mxu1  ;;  %v2716_v49 = vmul.f32 %v13191_v8, %v13191_v8 }
 0x303   : > { %2845 = vst.msk [vmem:[#allocation2 + $0x18] sm:$0xff] %vm868_vm4, %v11969_v7  ;;  %v2558_v31 = vld [vmem:[#allocation2 + $0x30] sm:$0xff]  ;;  %v2381_v46 = vrot.slane %v2328_v22, 2  ;;  %v10377_v38 = vpop.f32.mrb[117].mxu1  ;;  %v2659_v40 = vadd.f32 %v13173_v3, %v2639_v6  ;;  %v2682_v36 = vsel %vm1076_vm6, %v13195_v63, 0.0  ;;  %v2685_v22 = vsel %vm1076_vm6, %v13191_v8, 0.0 }
 0x304   : > { %v2618_v32 = vadd.f32 %v13121_v61, %v2558_v31  ;;  %2417 = vst.msk [vmem:[#allocation2 + $0x40] sm:$0xff] %vm1076_vm6, %v2405_v18  ;;  %v2728_v18 = vsel %vm1076_vm6, %v2715_v45, 0.0  ;;  %v2730_v38 = vsel %vm1076_vm6, %v2716_v49, 0.0 }
 0x305   : > { %v2382_v60 = vsel %vm2361_vm12, %v2379_v28, %v2381_v46  ;;  %v13202_v42 = vmul.f32 %v2659_v40, %v12216_v5  ;;  %v2714_v28 = vmul.f32 %v13195_v63, %v13195_v63 }
 0x306   : > { %v2640_v20 = vld [vmem:[#allocation2 + $0x20] sm:$0xff]  ;;  %2630 = vst.msk [vmem:[#allocation2 + $0x30] sm:$0xff] %vm1076_vm6, %v2618_v32  ;;  %v2406_v43 = vadd.f32 %v2382_v60, %v2346_v23  ;;  %v2333_v52 = vpop.f32.mrb[118].mxu1  ;;  %v2684_v32 = vadd.f32 %v2683_v17, %v2682_v36 }
 0x307   : > { %2846 = vst.msk [vmem:[#allocation2 + $0x20] sm:$0xff] %vm868_vm4, %v11969_v7  ;;  %v2559_v61 = vld [vmem:[#allocation2 + $0x38] sm:$0xff]  ;;  %v2383_v27 = vrot.slane %v2333_v52, 2  ;;  %v10380_v53 = vpop.f32.mrb[119].mxu1  ;;  %v2660_v48 = vadd.f32 %v13173_v3, %v2640_v20  ;;  %v2727_v33 = vsel %vm1076_vm6, %v2714_v28, 0.0  ;;  %v2687_v34 = vsel %vm1076_vm6, %v13202_v42, 0.0 }
 0x308   : > { %v2619_v55 = vadd.f32 %v13128_v59, %v2559_v61  ;;  %2418 = vst.msk [vmem:[#allocation2 + $0x48] sm:$0xff] %vm1076_vm6, %v2406_v43  ;;  %v2686_v61 = vadd.f32 %v2685_v22, %v2684_v32 }
 0x309   : > { %v2641_v29 = vld [vmem:[#allocation2 + $0x28] sm:$0xff]  ;;  %v2384_v26 = vsel %vm2361_vm12, %v2381_v46, %v2383_v27  ;;  %v2408_v44 = vadd.f32 %v2383_v27, %v2348_v30  ;;  %v13217_v19 = vmul.f32 %v2660_v48, %v12227_v15  ;;  %v2729_v27 = vadd.f32 %v2728_v18, %v2727_v33 }
 0x30a   : > { %2847 = vst.msk [vmem:[#allocation2 + $0x28] sm:$0xff] %vm868_vm4, %v11969_v7  ;;  %v2407_v59 = vadd.f32 %v2384_v26, %v2347_v54  ;;  %v2661_v11 = vadd.f32 %v13173_v3, %v2641_v29  ;;  %v2688_v26 = vadd.f32 %v2687_v34, %v2686_v61 }
 0x30b   : > { %2631 = vst.msk [vmem:[#allocation2 + $0x38] sm:$0xff] %vm1076_vm6, %v2619_v55  ;;  %v2560_v2 = vld [vmem:[#allocation2 + $0x40] sm:$0xff]  ;;  %v2718_v20 = vmul.f32 %v13217_v19, %v13217_v19  ;;  %v2689_v53 = vsel %vm1076_vm6, %v13217_v19, 0.0 }
 0x30c   : > { %2420 = vst.msk [vmem:[#allocation2 + $0x58] sm:$0x3] %vm1256_vm3, %v2408_v44  ;;  %v2620_v13 = vadd.f32 %v13135_v14, %v2560_v2  ;;  %v2717_v14 = vmul.f32 %v13202_v42, %v13202_v42  ;;  %v13231_v31 = vmul.f32 %v2661_v11, %v12238_v25  ;;  %v2731_v44 = vadd.f32 %v2730_v38, %v2729_v27 }
 0x30d   : > { %2419 = vst.msk [vmem:[#allocation2 + $0x50] sm:$0xff] %vm1076_vm6, %v2407_v59  ;;  %v2642_v9 = vld [vmem:[#allocation2 + $0x30] sm:$0xff]  ;;  %v2734_v58 = vsel %vm1076_vm6, %v2718_v20, 0.0 }
 0x30e   : > { %v2662_v6 = vadd.f32 %v13173_v3, %v2642_v9  ;;  %2848 = vst.msk [vmem:[#allocation2 + $0x30] sm:$0xff] %vm868_vm4, %v11969_v7  ;;  %v2732_v43 = vsel %vm1076_vm6, %v2717_v14, 0.0  ;;  %v2719_v55 = vmul.f32 %v13231_v31, %v13231_v31 }
 0x30f   : > { %2632 = vst.msk [vmem:[#allocation2 + $0x40] sm:$0xff] %vm1076_vm6, %v2620_v13  ;;  %v2561_v0 = vld [vmem:[#allocation2 + $0x48] sm:$0xff]  ;;  %v2733_v2 = vadd.f32 %v2732_v43, %v2731_v44 }
 0x310   : > { %v2621_v46 = vadd.f32 %v13144_v1, %v2561_v0  ;;  %v13241_v23 = vmul.f32 %v2662_v6, %v12249_v35  ;;  %v2736_v45 = vsel %vm1076_vm6, %v2719_v55, 0.0 }
 0x311   : > { %v2735_v17 = vadd.f32 %v2734_v58, %v2733_v2 }
 0x312   : > { %v2643_v41 = vld [vmem:[#allocation2 + $0x38] sm:$0xff]  ;;  %2633 = vst.msk [vmem:[#allocation2 + $0x48] sm:$0xff] %vm1076_vm6, %v2621_v46  ;;  %v2720_v48 = vmul.f32 %v13241_v23, %v13241_v23  ;;  %v2693_v11 = vsel %vm1076_vm6, %v13241_v23, 0.0  ;;  %v2668_v46 = vadd.f32 %v13173_v3, %v13096_v16 }
 0x313   : > { %v2663_v60 = vadd.f32 %v13173_v3, %v2643_v41  ;;  %2849 = vst.msk [vmem:[#allocation2 + $0x38] sm:$0xff] %vm868_vm4, %v11969_v7  ;;  %v2563_v1 = vld [vmem:[#allocation2 + $0x58] sm:$0x1]  ;;  %v2737_v22 = vadd.f32 %v2736_v45, %v2735_v17 }
 0x314   : > { %v2562_v52 = vld [vmem:[#allocation2 + $0x50] sm:$0xff]  ;;  %v2623_v40 = vadd.f32 %v2598_v21, %v2563_v1  ;;  %v2691_v21 = vsel %vm1076_vm6, %v13231_v31, 0.0  ;;  %v2738_v6 = vsel %vm1076_vm6, %v2720_v48, 0.0  ;;  %v13307_v55 = vmul.f32 %v2668_v46, %v12315_v56 }
 0x315   : > { %v13255_v30 = vmul.f32 %v2663_v60, %v12260_v51  ;;  %v2622_v29 = vadd.f32 %v13158_v10, %v2562_v52  ;;  %v2690_v10 = vadd.f32 %v2689_v53, %v2688_v26  ;;  %v2739_v1 = vadd.f32 %v2738_v6, %v2737_v22 }
 0x316   : > { %v2644_v54 = vld [vmem:[#allocation2 + $0x40] sm:$0xff]  ;;  %2635 = vst.msk [vmem:[#allocation2 + $0x58] sm:$0x1] %vm1088_vm7, %v2623_v40 }
 0x317   : > { %v2664_v59 = vadd.f32 %v13173_v3, %v2644_v54  ;;  %2850 = vst.msk [vmem:[#allocation2 + $0x40] sm:$0xff] %vm868_vm4, %v11969_v7  ;;  %v2721_v13 = vmul.f32 %v13255_v30, %v13255_v30  ;;  %v2692_v28 = vadd.f32 %v2691_v21, %v2690_v10  ;;  %v2695_v14 = vsel %vm1076_vm6, %v13255_v30, 0.0 }
 0x318   : > { %2634 = vst.msk [vmem:[#allocation2 + $0x50] sm:$0xff] %vm1076_vm6, %v2622_v29  ;;  %v2726_v10 = vmul.f32 %v13307_v55, %v13307_v55 }
 0x319   : > { %v13274_v49 = vmul.f32 %v2664_v59, %v12271_v62  ;;  %v2645_v9 = vld [vmem:[#allocation2 + $0x48] sm:$0xff]  ;;  %v2694_v18 = vadd.f32 %v2693_v11, %v2692_v28  ;;  %v2740_v38 = vsel %vm1076_vm6, %v2721_v13, 0.0 }
 0x31a   : > { %v2665_v36 = vadd.f32 %v13173_v3, %v2645_v9  ;;  %2851 = vst.msk [vmem:[#allocation2 + $0x48] sm:$0xff] %vm868_vm4, %v11969_v7  ;;  %v2741_v53 = vadd.f32 %v2740_v38, %v2739_v1  ;;  %v2705_v9 = vsel %vm1767_vm10, %v13307_v55, 0.0 }
 0x31b   : > { %v2722_v0 = vmul.f32 %v13274_v49, %v13274_v49  ;;  %v2697_v41 = vsel %vm1076_vm6, %v13274_v49, 0.0  ;;  %v2696_v60 = vadd.f32 %v2695_v14, %v2694_v18  ;;  %v2750_v14 = vsel %vm1767_vm10, %v2726_v10, 0.0 }
 0x31c   : > { %v13290_v32 = vmul.f32 %v2665_v36, %v12282_v12 }
 0x31d   : > { %v2647_v33 = vld [vmem:[#allocation2 + $0x58] sm:$0xff]  ;;  %v2742_v43 = vsel %vm1076_vm6, %v2722_v0, 0.0  ;;  %v2698_v27 = vadd.f32 %v2697_v41, %v2696_v60 }
 0x31e   : > { %v2667_v20 = vadd.f32 %v13173_v3, %v2647_v33  ;;  %2853 = vst.msk [vmem:[#allocation2 + $0x58] sm:$0xff] %vm868_vm4, %v11969_v7  ;;  %v2699_v16 = vsel %vm1076_vm6, %v13290_v32, 0.0  ;;  %v2723_v52 = vmul.f32 %v13290_v32, %v13290_v32  ;;  %v2743_v44 = vadd.f32 %v2742_v43, %v2741_v53 }
 0x31f   : > { %v2646_v34 = vld [vmem:[#allocation2 + $0x50] sm:$0xff]  ;;  %v2700_v26 = vadd.f32 %v2699_v16, %v2698_v27 }
 0x320   : > { %v2666_v40 = vadd.f32 %v13173_v3, %v2646_v34  ;;  %2852 = vst.msk [vmem:[#allocation2 + $0x50] sm:$0xff] %vm868_vm4, %v11969_v7  ;;  %v13304_v61 = vmul.f32 %v2667_v20, %v12304_v37  ;;  %v2744_v29 = vsel %vm1076_vm6, %v2723_v52, 0.0 }
 0x321   : > { %v2745_v59 = vadd.f32 %v2744_v29, %v2743_v44 }
 0x322   : > { %v13311_v54 = vmul.f32 %v2666_v40, %v12293_v24  ;;  %v2725_v21 = vmul.f32 %v13304_v61, %v13304_v61  ;;  %v2703_v2 = vsel %vm1076_vm6, %v13304_v61, 0.0 }
 0x324   : > { %v2701_v3 = vsel %vm1076_vm6, %v13311_v54, 0.0  ;;  %v2724_v58 = vmul.f32 %v13311_v54, %v13311_v54  ;;  %v2748_v28 = vsel %vm1076_vm6, %v2725_v21, 0.0 }
 0x325   : > { %v2702_v48 = vadd.f32 %v2701_v3, %v2700_v26 }
 0x326   : > { %v2746_v45 = vsel %vm1076_vm6, %v2724_v58, 0.0 }
 0x327   : > { %v2704_v11 = vadd.f32 %v2703_v2, %v2702_v48  ;;  %v2747_v13 = vadd.f32 %v2746_v45, %v2745_v59 }
 0x329   : > { %v2706_v17 = vadd.f32 %v2705_v9, %v2704_v11  ;;  %v2749_v6 = vadd.f32 %v2748_v28, %v2747_v13  ;;  %v8958_v13 = vld [vmem:[%s16315_s4 + $0x30] sm:$0xff] }
 0x32b   : > { %v2707_v0 = vrot.slane %v2706_v17, 4  ;;  %v2751_v36 = vadd.f32 %v2750_v14, %v2749_v6 }
 0x32d   : > { %v2708_v18 = vadd.f32 %v2707_v0, %v2706_v17  ;;  %v2752_v22 = vrot.slane %v2751_v36, 4  ;;  %v8959_v17 = vld [vmem:[%s16315_s4 + $0x38] sm:$0xff] }
 0x32f   : > { %v2709_v46 = vrot.slane %v2708_v18, 2  ;;  %v2753_v38 = vadd.f32 %v2752_v22, %v2751_v36  ;;  %v11743_v36 = vpack.c.bf16 %v8959_v17, %v8958_v13  ;;  %v8989_v17 = vld [vmem:[%s16315_s4 + $0x58] sm:$0xff] }
 0x331   : > { %v2710_v41 = vadd.f32 %v2709_v46, %v2708_v18  ;;  %v2754_v33 = vrot.slane %v2753_v38, 2 }
 0x333   : > { %v2711_v34 = vrot.slane %v2710_v41, 1  ;;  %v2755_v20 = vadd.f32 %v2754_v33, %v2753_v38 }
 0x335   : > { %v2712_v60 = vadd.f32 %v2711_v34, %v2710_v41  ;;  %v2756_v1 = vrot.slane %v2755_v20, 1 }
 0x337   : > { %v13328_v43 = vmul.f32 0.015625, %v2712_v60  ;;  %v2757_v16 = vadd.f32 %v2756_v1, %v2755_v20 }
 0x339   : > { %v2758_v52 = vmul.f32 0.015625, %v2757_v16  ;;  %v2759_v40 = vmul.f32 %v13328_v43, %v13328_v43  ;;  %v2765_v27 = vsub.f32 %v13202_v42, %v13328_v43  ;;  %v2766_v53 = vsub.f32 %v13217_v19, %v13328_v43 }
 0x33a   : > { %v2767_v29 = vsub.f32 %v13231_v31, %v13328_v43  ;;  %v2768_v44 = vsub.f32 %v13241_v23, %v13328_v43  ;;  %v2769_v3 = vsub.f32 %v13255_v30, %v13328_v43  ;;  %v2770_v58 = vsub.f32 %v13274_v49, %v13328_v43 }
 0x33b   : > { %v2760_v26 = vsub.f32 %v2758_v52, %v2759_v40  ;;  %v2771_v21 = vsub.f32 %v13290_v32, %v13328_v43  ;;  %v2772_v42 = vsub.f32 %v13311_v54, %v13328_v43  ;;  %v2773_v19 = vsub.f32 %v13304_v61, %v13328_v43  ;;  %v8943_v61 = vld [vmem:[%s16315_s4 + $0x20] sm:$0xff]  ;;  %v8944_v54 = vld [vmem:[%s16315_s4 + $0x28] sm:$0xff] }
 0x33c   : > { %v2762_v23 = vsub.f32 %v13195_v63, %v13328_v43  ;;  %v2763_v30 = vsub.f32 %v13186_v57, %v13328_v43  ;;  %v2764_v32 = vsub.f32 %v13191_v8, %v13328_v43  ;;  %v11740_v14 = vpack.c.bf16 %v8944_v54, %v8943_v61 }
 0x33d   : > { %v2761_v31 = vmax.f32 %v2760_v26, 0.0  ;;  %v2774_v60 = vsub.f32 %v13307_v55, %v13328_v43 }
 0x33f   : > { %v2775_v48 = vadd.f32 1e-05, %v2761_v31 }
 0x341   : > { %11941 = vrsqrt.f32 %v2775_v48 }
 0x34b   : > { %v11942_v59 = vpop.eup %11941 }
 0x34c   : > { %v2777_v49 = vmul.f32 %v11942_v59, %v2762_v23  ;;  %v2778_v10 = vmul.f32 %v11942_v59, %v2763_v30  ;;  %v2780_v2 = vmul.f32 %v11942_v59, %v2765_v27  ;;  %v2781_v45 = vmul.f32 %v11942_v59, %v2766_v53 }
 0x34d   : > { %v2782_v63 = vmul.f32 %v11942_v59, %v2767_v29  ;;  %v13362_v11 = vmul.f32 %v11942_v59, %v2768_v44  ;;  %v13364_v57 = vmul.f32 %v11942_v59, %v2769_v3  ;;  %v2779_v28 = vmul.f32 %v11942_v59, %v2764_v32 }
 0x34e   : > { %vm2790_vm13 = vcmp.ge.f32.partialorder %v2777_v49, 0.0  ;;  %v2803_v8 = vmul.f32 0.2, %v2777_v49  ;;  %v2804_v9 = vmul.f32 0.2, %v2778_v10  ;;  %vm2791_vm14 = vcmp.ge.f32.partialorder %v2778_v10, 0.0 }
 0x34f   : > { %v2805_v22 = vmul.f32 0.2, %v2779_v28  ;;  %vm2792_vm15 = vcmp.ge.f32.partialorder %v2779_v28, 0.0  ;;  %v2785_v46 = vmul.f32 %v11942_v59, %v2770_v58  ;;  %v13381_v38 = vmul.f32 %v11942_v59, %v2771_v21 }
 0x350   : > { %v2816_v6 = vsel %vm2790_vm13, %v2777_v49, %v2803_v8  ;;  %v2817_v18 = vsel %vm2791_vm14, %v2778_v10, %v2804_v9  ;;  %v13388_v33 = vmul.f32 %v11942_v59, %v2772_v42  ;;  %v2806_v20 = vmul.f32 0.2, %v2780_v2  ;;  %v8973_v8 = vld [vmem:[%s16315_s4 + $0x40] sm:$0xff]  ;;  %v8974_v9 = vld [vmem:[%s16315_s4 + $0x48] sm:$0xff] }
 0x351   : > { %v13373_v0 = vmul.f32 %v2816_v6, %v12183_v39  ;;  %v13386_v41 = vmul.f32 %v2817_v18, %v12190_v47  ;;  %v2818_v34 = vsel %vm2792_vm15, %v2779_v28, %v2805_v22  ;;  %vm2793_vm1 = vcmp.ge.f32.partialorder %v2780_v2, 0.0  ;;  %v8988_v28 = vld [vmem:[%s16315_s4 + $0x50] sm:$0xff]  ;;  %v9004_v18 = vld [vmem:[%s16315_s4 + $0x68] sm:$0xff] }
 0x352   : > { %v13402_v1 = vmul.f32 %v11942_v59, %v2773_v19  ;;  %v13404_v55 = vmul.f32 %v11942_v59, %v2774_v60  ;;  %v13407_v43 = vmul.f32 %v2818_v34, %v12197_v50  ;;  %v2819_v16 = vsel %vm2793_vm1, %v2780_v2, %v2806_v20  ;;  %v9018_v22 = vld [vmem:[%s16315_s4 + $0x70] sm:$0xff]  ;;  %v9033_v34 = vld [vmem:[%s16315_s4 + $0x80] sm:$0xff]  ;;  %v9034_v20 = vld [vmem:[%s16315_s4 + $0x88] sm:$0xff] }
 0x353   : > { %10427 = vmatmul.mubr.msk.f32.vlgmr.msra.gmra.mrb[120].mxu1 %vm1076_vm6, %v13373_v0  ;;  %10470 = vmatmul.mubr.msk.f32.vlgmr.msra.gmra.mrb[140].mxu0 %vm1076_vm6, %v13373_v0  ;;  %v2807_v52 = vmul.f32 0.2, %v2781_v45  ;;  %vm2794_vm2 = vcmp.ge.f32.partialorder %v2781_v45, 0.0  ;;  %v13418_v40 = vmul.f32 %v2819_v16, %v12216_v5  ;;  %v2808_v53 = vmul.f32 0.2, %v2782_v63 }
 0x354   : > { %11741 = vmatpush3.bf16.msra.mxu1 %v11740_v14  ;;  %10429 = vmatprep.mubr.msk.f32.mxu1 %vm11970_vm0, %v11969_v7  ;;  %vm2795_vm7 = vcmp.ge.f32.partialorder %v2782_v63, 0.0  ;;  %v2809_v44 = vmul.f32 0.2, %v13362_v11  ;;  %vm2796_vm3 = vcmp.ge.f32.partialorder %v13362_v11, 0.0  ;;  %v2810_v21 = vmul.f32 0.2, %v13364_v57 }
 0x355   : > { %10472 = vmatprep.mubr.msk.f32.mxu0 %vm11970_vm0, %v11969_v7  ;;  %11744 = vmatpush3.bf16.msra.mxu0 %v11743_v36  ;;  %v2820_v27 = vsel %vm2794_vm2, %v2781_v45, %v2807_v52  ;;  %v2821_v26 = vsel %vm2795_vm7, %v2782_v63, %v2808_v53  ;;  %vm2797_vm8 = vcmp.ge.f32.partialorder %v13364_v57, 0.0  ;;  %v2811_v31 = vmul.f32 0.2, %v2785_v46  ;;  %v9003_v36 = vld [vmem:[%s16315_s4 + $0x60] sm:$0xff] }
 0x356   : > { %11745 = vmatprep.subr.bf16.mxu1 %v11968_v4  ;;  %11748 = vmatprep.subr.bf16.mxu0 %v11968_v4  ;;  %v13429_v29 = vmul.f32 %v2820_v27, %v12227_v15  ;;  %v13442_v3 = vmul.f32 %v2821_v26, %v12238_v25  ;;  %v2822_v58 = vsel %vm2796_vm3, %v13362_v11, %v2809_v44  ;;  %vm2798_vm10 = vcmp.ge.f32.partialorder %v2785_v46, 0.0  ;;  %v3026_v26 = vld [vmem:[#allocation2 + $0x13] sm:$0xff] }
 0x357   : > { %10430 = vmatmul.mubr.msk.f32.gmra.mrb[122].mxu1 %vm1076_vm6, %v13386_v41  ;;  %10473 = vmatmul.mubr.msk.f32.gmra.mrb[142].mxu0 %vm1076_vm6, %v13386_v41  ;;  %v13456_v42 = vmul.f32 %v2822_v58, %v12249_v35  ;;  %v2823_v19 = vsel %vm2797_vm8, %v13364_v57, %v2810_v21  ;;  %v2824_v23 = vsel %vm2798_vm10, %v2785_v46, %v2811_v31  ;;  %v2812_v30 = vmul.f32 0.2, %v13381_v38  ;;  %v9019_v46 = vld [vmem:[%s16315_s4 + $0x78] sm:$0xff] }
 0x358   : > { %10432 = vmatprep.mubr.msk.f32.mxu1 %vm11970_vm0, %v11969_v7  ;;  %10475 = vmatprep.mubr.msk.f32.mxu0 %vm11970_vm0, %v11969_v7  ;;  %v13468_v48 = vmul.f32 %v2823_v19, %v12260_v51  ;;  %vm2799_vm13 = vcmp.ge.f32.partialorder %v13381_v38, 0.0  ;;  %v13481_v59 = vmul.f32 %v2824_v23, %v12271_v62  ;;  %v2813_v10 = vmul.f32 0.2, %v13388_v33  ;;  %v3027_v31 = vld [vmem:[#allocation2 + $0x1b] sm:$0xff] }
 0x359   : > { %v2825_v49 = vsel %vm2799_vm13, %v13381_v38, %v2812_v30  ;;  %vm2800_vm14 = vcmp.ge.f32.partialorder %v13388_v33, 0.0  ;;  %v2814_v61 = vmul.f32 0.2, %v13402_v1  ;;  %vm2801_vm15 = vcmp.ge.f32.partialorder %v13402_v1, 0.0 }
 0x35a   : > { %v13495_v32 = vmul.f32 %v2825_v49, %v12282_v12  ;;  %v2826_v2 = vsel %vm2800_vm14, %v13388_v33, %v2813_v10  ;;  %v2815_v63 = vmul.f32 0.2, %v13404_v55  ;;  %vm2802_vm1 = vcmp.ge.f32.partialorder %v13404_v55, 0.0 }
 0x35b   : > { %10433 = vmatmul.mubr.msk.f32.gmra.mrb[124].mxu1 %vm1076_vm6, %v13407_v43  ;;  %10476 = vmatmul.mubr.msk.f32.gmra.mrb[144].mxu0 %vm1076_vm6, %v13407_v43  ;;  %v13509_v54 = vmul.f32 %v2826_v2, %v12293_v24  ;;  %v2827_v45 = vsel %vm2801_vm15, %v13402_v1, %v2814_v61  ;;  %v11746_v6 = vpack.c.bf16 %v8974_v9, %v8973_v8  ;;  %v3025_v1 = vld [vmem:[#allocation2 + $0xb] sm:$0xff]  ;;  %vm3049_vm2 = vcmask 261120   ;;  %v3028_v61 = vld [vmem:[#allocation2 + $0x23] sm:$0xff] }
 0x35c   : > { %10435 = vmatprep.mubr.msk.f32.mxu1 %vm11970_vm0, %v11969_v7  ;;  %10478 = vmatprep.mubr.msk.f32.mxu0 %vm11970_vm0, %v11969_v7  ;;  %v13523_v11 = vmul.f32 %v2827_v45, %v12304_v37  ;;  %v2828_v57 = vsel %vm2802_vm1, %v13404_v55, %v2815_v63  ;;  %v11749_v14 = vpack.c.bf16 %v8989_v17, %v8988_v28  ;;  %vm3061_vm7 = vcmask 253952  }
 0x35d   : > { %v13535_v13 = vmul.f32 %v2828_v57, %v12315_v56  ;;  %v11752_v38 = vpack.c.bf16 %v9004_v18, %v9003_v36  ;;  %v11755_v33 = vpack.c.bf16 %v9019_v46, %v9018_v22  ;;  %v11758_v60 = vpack.c.bf16 %v9034_v20, %v9033_v34 }
 0x35e   : > { %vm3399_vm3 = vcmask 256000   ;;  %vm3744_vm8 = vcmask 257024  }
 0x35f   : > { %10436 = vmatmul.mubr.msk.f32.gmra.mrb[126].mxu1 %vm1076_vm6, %v13418_v40  ;;  %10479 = vmatmul.mubr.msk.f32.gmra.mrb[146].mxu0 %vm1076_vm6, %v13418_v40 }
 0x360   : > { %10438 = vmatprep.mubr.msk.f32.mxu1 %vm11970_vm0, %v11969_v7  ;;  %10481 = vmatprep.mubr.msk.f32.mxu0 %vm11970_vm0, %v11969_v7 }
 0x363   : > { %10439 = vmatmul.mubr.msk.f32.gmra.mrb[128].mxu1 %vm1076_vm6, %v13429_v29  ;;  %10482 = vmatmul.mubr.msk.f32.gmra.mrb[148].mxu0 %vm1076_vm6, %v13429_v29 }
 0x364   : > { %10441 = vmatprep.mubr.msk.f32.mxu1 %vm11970_vm0, %v11969_v7  ;;  %10484 = vmatprep.mubr.msk.f32.mxu0 %vm11970_vm0, %v11969_v7 }
 0x367   : > { %10442 = vmatmul.mubr.msk.f32.gmra.mrb[130].mxu1 %vm1076_vm6, %v13442_v3  ;;  %10485 = vmatmul.mubr.msk.f32.gmra.mrb[150].mxu0 %vm1076_vm6, %v13442_v3 }
 0x368   : > { %10444 = vmatprep.mubr.msk.f32.mxu1 %vm11970_vm0, %v11969_v7  ;;  %10487 = vmatprep.mubr.msk.f32.mxu0 %vm11970_vm0, %v11969_v7 }
 0x36b   : > { %10445 = vmatmul.mubr.msk.f32.gmra.mrb[132].mxu1 %vm1076_vm6, %v13456_v42  ;;  %10488 = vmatmul.mubr.msk.f32.gmra.mrb[152].mxu0 %vm1076_vm6, %v13456_v42 }
 0x36c   : > { %10447 = vmatprep.mubr.msk.f32.mxu1 %vm11970_vm0, %v11969_v7  ;;  %10490 = vmatprep.mubr.msk.f32.mxu0 %vm11970_vm0, %v11969_v7 }
 0x36f   : > { %10448 = vmatmul.mubr.msk.f32.gmra.mrb[134].mxu1 %vm1076_vm6, %v13468_v48  ;;  %10491 = vmatmul.mubr.msk.f32.gmra.mrb[154].mxu0 %vm1076_vm6, %v13468_v48 }
 0x370   : > { %10450 = vmatprep.mubr.msk.f32.mxu1 %vm11970_vm0, %v11969_v7  ;;  %10493 = vmatprep.mubr.msk.f32.mxu0 %vm11970_vm0, %v11969_v7 }
 0x373   : > { %10451 = vmatmul.mubr.msk.f32.gmra.mrb[136].mxu1 %vm1076_vm6, %v13481_v59  ;;  %10494 = vmatmul.mubr.msk.f32.gmra.mrb[156].mxu0 %vm1076_vm6, %v13481_v59 }
 0x374   : > { %10453 = vmatprep.mubr.msk.f32.mxu1 %vm11970_vm0, %v11969_v7  ;;  %10496 = vmatprep.mubr.msk.f32.mxu0 %vm11970_vm0, %v11969_v7 }
 0x377   : > { %10454 = vmatmul.mubr.msk.f32.gmra.mrb[138].mxu1 %vm1076_vm6, %v13495_v32  ;;  %10497 = vmatmul.mubr.msk.f32.gmra.mrb[158].mxu0 %vm1076_vm6, %v13495_v32 }
 0x378   : > { %10456 = vmatprep.mubr.msk.f32.mxu1 %vm11970_vm0, %v11969_v7  ;;  %10499 = vmatprep.mubr.msk.f32.mxu0 %vm11970_vm0, %v11969_v7 }
 0x37b   : > { %10457 = vmatmul.mubr.msk.f32.gmra.mrb[140].mxu1 %vm1076_vm6, %v13509_v54  ;;  %10500 = vmatmul.mubr.msk.f32.gmra.mrb[160].mxu0 %vm1076_vm6, %v13509_v54 }
 0x37c   : > { %10459 = vmatprep.mubr.msk.f32.mxu1 %vm11970_vm0, %v11969_v7  ;;  %10502 = vmatprep.mubr.msk.f32.mxu0 %vm11970_vm0, %v11969_v7 }
 0x37f   : > { %10460 = vmatmul.mubr.msk.f32.gmra.mrb[142].mxu1 %vm1076_vm6, %v13523_v11  ;;  %10503 = vmatmul.mubr.msk.f32.gmra.mrb[162].mxu0 %vm1076_vm6, %v13523_v11 }
 0x380   : > { %10462 = vmatprep.mubr.msk.f32.mxu1 %vm11970_vm0, %v11969_v7  ;;  %10505 = vmatprep.mubr.msk.f32.mxu0 %vm11970_vm0, %v11969_v7 }
 0x383   : > { %10463 = vmatmul.mubr.msk.f32.gmra.mrb[144].mxu1 %vm1076_vm6, %v13535_v13  ;;  %10506 = vmatmul.mubr.msk.f32.gmra.mrb[164].mxu0 %vm1076_vm6, %v13535_v13 }
 0x384   : > { %10512 = vmatprep.mubr.msk.f32.mxu1 %vm11970_vm0, %v11969_v7  ;;  %10555 = vmatprep.mubr.msk.f32.mxu0 %vm11970_vm0, %v11969_v7 }
 0x387   : > { %10513 = vmatmul.mubr.msk.f32.vlgmr.msra.gmra.mrb[146].mxu1 %vm1076_vm6, %v13373_v0  ;;  %10556 = vmatmul.mubr.msk.f32.vlgmr.msra.gmra.mrb[166].mxu0 %vm1076_vm6, %v13373_v0 }
 0x388   : > { %11747 = vmatpush3.bf16.msra.mxu1 %v11746_v6  ;;  %10515 = vmatprep.mubr.msk.f32.mxu1 %vm11970_vm0, %v11969_v7 }
 0x389   : > { %10558 = vmatprep.mubr.msk.f32.mxu0 %vm11970_vm0, %v11969_v7  ;;  %11750 = vmatpush3.bf16.msra.mxu0 %v11749_v14 }
 0x38a   : > { %11751 = vmatprep.subr.bf16.mxu1 %v11968_v4  ;;  %11754 = vmatprep.subr.bf16.mxu0 %v11968_v4 }
 0x38b   : > { %10516 = vmatmul.mubr.msk.f32.gmra.mrb[148].mxu1 %vm1076_vm6, %v13386_v41  ;;  %10559 = vmatmul.mubr.msk.f32.gmra.mrb[168].mxu0 %vm1076_vm6, %v13386_v41 }
 0x38c   : > { %10518 = vmatprep.mubr.msk.f32.mxu1 %vm11970_vm0, %v11969_v7  ;;  %10561 = vmatprep.mubr.msk.f32.mxu0 %vm11970_vm0, %v11969_v7 }
 0x38f   : > { %10519 = vmatmul.mubr.msk.f32.gmra.mrb[150].mxu1 %vm1076_vm6, %v13407_v43  ;;  %10562 = vmatmul.mubr.msk.f32.gmra.mrb[170].mxu0 %vm1076_vm6, %v13407_v43 }
 0x390   : > { %10521 = vmatprep.mubr.msk.f32.mxu1 %vm11970_vm0, %v11969_v7  ;;  %10564 = vmatprep.mubr.msk.f32.mxu0 %vm11970_vm0, %v11969_v7 }
 0x393   : > { %10522 = vmatmul.mubr.msk.f32.gmra.mrb[152].mxu1 %vm1076_vm6, %v13418_v40  ;;  %10565 = vmatmul.mubr.msk.f32.gmra.mrb[172].mxu0 %vm1076_vm6, %v13418_v40 }
 0x394   : > { %10524 = vmatprep.mubr.msk.f32.mxu1 %vm11970_vm0, %v11969_v7  ;;  %10567 = vmatprep.mubr.msk.f32.mxu0 %vm11970_vm0, %v11969_v7 }
 0x397   : > { %10525 = vmatmul.mubr.msk.f32.gmra.mrb[154].mxu1 %vm1076_vm6, %v13429_v29  ;;  %10568 = vmatmul.mubr.msk.f32.gmra.mrb[174].mxu0 %vm1076_vm6, %v13429_v29 }
 0x398   : > { %10527 = vmatprep.mubr.msk.f32.mxu1 %vm11970_vm0, %v11969_v7  ;;  %10570 = vmatprep.mubr.msk.f32.mxu0 %vm11970_vm0, %v11969_v7 }
 0x39b   : > { %10528 = vmatmul.mubr.msk.f32.gmra.mrb[156].mxu1 %vm1076_vm6, %v13442_v3  ;;  %10571 = vmatmul.mubr.msk.f32.gmra.mrb[176].mxu0 %vm1076_vm6, %v13442_v3 }
 0x39c   : > { %10530 = vmatprep.mubr.msk.f32.mxu1 %vm11970_vm0, %v11969_v7  ;;  %10573 = vmatprep.mubr.msk.f32.mxu0 %vm11970_vm0, %v11969_v7 }
 0x39f   : > { %10531 = vmatmul.mubr.msk.f32.gmra.mrb[158].mxu1 %vm1076_vm6, %v13456_v42  ;;  %10574 = vmatmul.mubr.msk.f32.gmra.mrb[178].mxu0 %vm1076_vm6, %v13456_v42 }
 0x3a0   : > { %10533 = vmatprep.mubr.msk.f32.mxu1 %vm11970_vm0, %v11969_v7  ;;  %10576 = vmatprep.mubr.msk.f32.mxu0 %vm11970_vm0, %v11969_v7 }
 0x3a3   : > { %10534 = vmatmul.mubr.msk.f32.gmra.mrb[160].mxu1 %vm1076_vm6, %v13468_v48  ;;  %10577 = vmatmul.mubr.msk.f32.gmra.mrb[180].mxu0 %vm1076_vm6, %v13468_v48 }
 0x3a4   : > { %10536 = vmatprep.mubr.msk.f32.mxu1 %vm11970_vm0, %v11969_v7  ;;  %10579 = vmatprep.mubr.msk.f32.mxu0 %vm11970_vm0, %v11969_v7 }
 0x3a7   : > { %10537 = vmatmul.mubr.msk.f32.gmra.mrb[162].mxu1 %vm1076_vm6, %v13481_v59  ;;  %10580 = vmatmul.mubr.msk.f32.gmra.mrb[182].mxu0 %vm1076_vm6, %v13481_v59 }
 0x3a8   : > { %10539 = vmatprep.mubr.msk.f32.mxu1 %vm11970_vm0, %v11969_v7  ;;  %10582 = vmatprep.mubr.msk.f32.mxu0 %vm11970_vm0, %v11969_v7 }
 0x3ab   : > { %10540 = vmatmul.mubr.msk.f32.gmra.mrb[164].mxu1 %vm1076_vm6, %v13495_v32  ;;  %10583 = vmatmul.mubr.msk.f32.gmra.mrb[184].mxu0 %vm1076_vm6, %v13495_v32 }
 0x3ac   : > { %10542 = vmatprep.mubr.msk.f32.mxu1 %vm11970_vm0, %v11969_v7  ;;  %10585 = vmatprep.mubr.msk.f32.mxu0 %vm11970_vm0, %v11969_v7 }
 0x3af   : > { %10543 = vmatmul.mubr.msk.f32.gmra.mrb[166].mxu1 %vm1076_vm6, %v13509_v54  ;;  %10586 = vmatmul.mubr.msk.f32.gmra.mrb[186].mxu0 %vm1076_vm6, %v13509_v54 }
 0x3b0   : > { %10545 = vmatprep.mubr.msk.f32.mxu1 %vm11970_vm0, %v11969_v7  ;;  %10588 = vmatprep.mubr.msk.f32.mxu0 %vm11970_vm0, %v11969_v7 }
 0x3b3   : > { %10546 = vmatmul.mubr.msk.f32.gmra.mrb[168].mxu1 %vm1076_vm6, %v13523_v11  ;;  %10589 = vmatmul.mubr.msk.f32.gmra.mrb[188].mxu0 %vm1076_vm6, %v13523_v11 }
 0x3b4   : > { %10548 = vmatprep.mubr.msk.f32.mxu1 %vm11970_vm0, %v11969_v7  ;;  %10591 = vmatprep.mubr.msk.f32.mxu0 %vm11970_vm0, %v11969_v7 }
 0x3b7   : > { %10549 = vmatmul.mubr.msk.f32.gmra.mrb[170].mxu1 %vm1076_vm6, %v13535_v13  ;;  %10592 = vmatmul.mubr.msk.f32.gmra.mrb[190].mxu0 %vm1076_vm6, %v13535_v13 }
 0x3b8   : > { %10598 = vmatprep.mubr.msk.f32.mxu1 %vm11970_vm0, %v11969_v7  ;;  %10641 = vmatprep.mubr.msk.f32.mxu0 %vm11970_vm0, %v11969_v7 }
 0x3bb   : > { %10599 = vmatmul.mubr.msk.f32.vlgmr.msra.gmra.mrb[172].mxu1 %vm1076_vm6, %v13373_v0  ;;  %10642 = vmatmul.mubr.msk.f32.vlgmr.msra.gmra.mrb[192].mxu0 %vm1076_vm6, %v13373_v0 }
 0x3bc   : > { %11753 = vmatpush3.bf16.msra.mxu1 %v11752_v38  ;;  %10601 = vmatprep.mubr.msk.f32.mxu1 %vm11970_vm0, %v11969_v7 }
 0x3bd   : > { %10644 = vmatprep.mubr.msk.f32.mxu0 %vm11970_vm0, %v11969_v7  ;;  %11756 = vmatpush3.bf16.msra.mxu0 %v11755_v33 }
 0x3be   : > { %11757 = vmatprep.subr.bf16.mxu1 %v11968_v4  ;;  %11760 = vmatprep.subr.bf16.mxu0 %v11968_v4 }
 0x3bf   : > { %10602 = vmatmul.mubr.msk.f32.gmra.mrb[174].mxu1 %vm1076_vm6, %v13386_v41  ;;  %10645 = vmatmul.mubr.msk.f32.gmra.mrb[194].mxu0 %vm1076_vm6, %v13386_v41 }
 0x3c0   : > { %10604 = vmatprep.mubr.msk.f32.mxu1 %vm11970_vm0, %v11969_v7  ;;  %10647 = vmatprep.mubr.msk.f32.mxu0 %vm11970_vm0, %v11969_v7 }
 0x3c3   : > { %10605 = vmatmul.mubr.msk.f32.gmra.mrb[176].mxu1 %vm1076_vm6, %v13407_v43  ;;  %10648 = vmatmul.mubr.msk.f32.gmra.mrb[196].mxu0 %vm1076_vm6, %v13407_v43 }
 0x3c4   : > { %10607 = vmatprep.mubr.msk.f32.mxu1 %vm11970_vm0, %v11969_v7  ;;  %10650 = vmatprep.mubr.msk.f32.mxu0 %vm11970_vm0, %v11969_v7 }
 0x3c7   : > { %10608 = vmatmul.mubr.msk.f32.gmra.mrb[178].mxu1 %vm1076_vm6, %v13418_v40  ;;  %10651 = vmatmul.mubr.msk.f32.gmra.mrb[198].mxu0 %vm1076_vm6, %v13418_v40 }
 0x3c8   : > { %10610 = vmatprep.mubr.msk.f32.mxu1 %vm11970_vm0, %v11969_v7  ;;  %10653 = vmatprep.mubr.msk.f32.mxu0 %vm11970_vm0, %v11969_v7 }
 0x3cb   : > { %10611 = vmatmul.mubr.msk.f32.gmra.mrb[180].mxu1 %vm1076_vm6, %v13429_v29  ;;  %10654 = vmatmul.mubr.msk.f32.gmra.mrb[200].mxu0 %vm1076_vm6, %v13429_v29 }
 0x3cc   : > { %10613 = vmatprep.mubr.msk.f32.mxu1 %vm11970_vm0, %v11969_v7  ;;  %10656 = vmatprep.mubr.msk.f32.mxu0 %vm11970_vm0, %v11969_v7 }
 0x3cf   : > { %10614 = vmatmul.mubr.msk.f32.gmra.mrb[182].mxu1 %vm1076_vm6, %v13442_v3  ;;  %10657 = vmatmul.mubr.msk.f32.gmra.mrb[202].mxu0 %vm1076_vm6, %v13442_v3 }
 0x3d0   : > { %10616 = vmatprep.mubr.msk.f32.mxu1 %vm11970_vm0, %v11969_v7  ;;  %10659 = vmatprep.mubr.msk.f32.mxu0 %vm11970_vm0, %v11969_v7 }
 0x3d3   : > { %10617 = vmatmul.mubr.msk.f32.gmra.mrb[184].mxu1 %vm1076_vm6, %v13456_v42  ;;  %10660 = vmatmul.mubr.msk.f32.gmra.mrb[204].mxu0 %vm1076_vm6, %v13456_v42 }
 0x3d4   : > { %10619 = vmatprep.mubr.msk.f32.mxu1 %vm11970_vm0, %v11969_v7  ;;  %10662 = vmatprep.mubr.msk.f32.mxu0 %vm11970_vm0, %v11969_v7 }
 0x3d7   : > { %10620 = vmatmul.mubr.msk.f32.gmra.mrb[186].mxu1 %vm1076_vm6, %v13468_v48  ;;  %10663 = vmatmul.mubr.msk.f32.gmra.mrb[206].mxu0 %vm1076_vm6, %v13468_v48 }
 0x3d8   : > { %10622 = vmatprep.mubr.msk.f32.mxu1 %vm11970_vm0, %v11969_v7  ;;  %10665 = vmatprep.mubr.msk.f32.mxu0 %vm11970_vm0, %v11969_v7 }
 0x3db   : > { %10623 = vmatmul.mubr.msk.f32.gmra.mrb[188].mxu1 %vm1076_vm6, %v13481_v59  ;;  %10666 = vmatmul.mubr.msk.f32.gmra.mrb[208].mxu0 %vm1076_vm6, %v13481_v59 }
 0x3dc   : > { %10625 = vmatprep.mubr.msk.f32.mxu1 %vm11970_vm0, %v11969_v7  ;;  %10668 = vmatprep.mubr.msk.f32.mxu0 %vm11970_vm0, %v11969_v7 }
 0x3df   : > { %10626 = vmatmul.mubr.msk.f32.gmra.mrb[190].mxu1 %vm1076_vm6, %v13495_v32  ;;  %10669 = vmatmul.mubr.msk.f32.gmra.mrb[210].mxu0 %vm1076_vm6, %v13495_v32 }
 0x3e0   : > { %10628 = vmatprep.mubr.msk.f32.mxu1 %vm11970_vm0, %v11969_v7  ;;  %10671 = vmatprep.mubr.msk.f32.mxu0 %vm11970_vm0, %v11969_v7 }
 0x3e3   : > { %10629 = vmatmul.mubr.msk.f32.gmra.mrb[192].mxu1 %vm1076_vm6, %v13509_v54  ;;  %10672 = vmatmul.mubr.msk.f32.gmra.mrb[212].mxu0 %vm1076_vm6, %v13509_v54 }
 0x3e4   : > { %10631 = vmatprep.mubr.msk.f32.mxu1 %vm11970_vm0, %v11969_v7  ;;  %10674 = vmatprep.mubr.msk.f32.mxu0 %vm11970_vm0, %v11969_v7 }
 0x3e7   : > { %10632 = vmatmul.mubr.msk.f32.gmra.mrb[194].mxu1 %vm1076_vm6, %v13523_v11  ;;  %10675 = vmatmul.mubr.msk.f32.gmra.mrb[214].mxu0 %vm1076_vm6, %v13523_v11 }
 0x3e8   : > { %10634 = vmatprep.mubr.msk.f32.mxu1 %vm11970_vm0, %v11969_v7  ;;  %10677 = vmatprep.mubr.msk.f32.mxu0 %vm11970_vm0, %v11969_v7 }
 0x3eb   : > { %10635 = vmatmul.mubr.msk.f32.gmra.mrb[196].mxu1 %vm1076_vm6, %v13535_v13  ;;  %10678 = vmatmul.mubr.msk.f32.gmra.mrb[216].mxu0 %vm1076_vm6, %v13535_v13 }
 0x3ec   : > { %10684 = vmatprep.mubr.msk.f32.mxu1 %vm11970_vm0, %v11969_v7  ;;  %10727 = vmatprep.mubr.msk.f32.mxu0 %vm11970_vm0, %v11969_v7 }
 0x3ef   : > { %10685 = vmatmul.mubr.msk.f32.vlgmr.msra.gmra.mrb[198].mxu1 %vm1076_vm6, %v13373_v0  ;;  %10728 = vmatmul.mubr.msk.f32.vlgmr.msra.gmra.mrb[218].mxu0 %vm1076_vm6, %v13373_v0 }
 0x3f0   : > { %11759 = vmatpush3.bf16.msra.mxu1 %v11758_v60  ;;  %10687 = vmatprep.mubr.msk.f32.mxu1 %vm11970_vm0, %v11969_v7 }
 0x3f1   : > { %10730 = vmatprep.mubr.msk.f32.mxu0 %vm11970_vm0, %v11969_v7  ;;  %11766 = vmatprep.subr.bf16.mxu1 %v11968_v4 }
 0x3f3   : > { %10688 = vmatmul.mubr.msk.f32.gmra.mrb[200].mxu1 %vm1076_vm6, %v13386_v41  ;;  %10731 = vmatmul.mubr.msk.f32.gmra.mrb[220].mxu0 %vm1076_vm6, %v13386_v41 }
 0x3f4   : > { %10690 = vmatprep.mubr.msk.f32.mxu1 %vm11970_vm0, %v11969_v7  ;;  %10733 = vmatprep.mubr.msk.f32.mxu0 %vm11970_vm0, %v11969_v7 }
 0x3f7   : > { %10691 = vmatmul.mubr.msk.f32.gmra.mrb[202].mxu1 %vm1076_vm6, %v13407_v43  ;;  %10734 = vmatmul.mubr.msk.f32.gmra.mrb[222].mxu0 %vm1076_vm6, %v13407_v43 }
 0x3f8   : > { %10693 = vmatprep.mubr.msk.f32.mxu1 %vm11970_vm0, %v11969_v7  ;;  %10736 = vmatprep.mubr.msk.f32.mxu0 %vm11970_vm0, %v11969_v7 }
 0x3fb   : > { %10694 = vmatmul.mubr.msk.f32.gmra.mrb[204].mxu1 %vm1076_vm6, %v13418_v40  ;;  %10737 = vmatmul.mubr.msk.f32.gmra.mrb[224].mxu0 %vm1076_vm6, %v13418_v40 }
 0x3fc   : > { %10696 = vmatprep.mubr.msk.f32.mxu1 %vm11970_vm0, %v11969_v7  ;;  %10739 = vmatprep.mubr.msk.f32.mxu0 %vm11970_vm0, %v11969_v7 }
 0x3ff   : > { %10697 = vmatmul.mubr.msk.f32.gmra.mrb[206].mxu1 %vm1076_vm6, %v13429_v29  ;;  %10740 = vmatmul.mubr.msk.f32.gmra.mrb[226].mxu0 %vm1076_vm6, %v13429_v29 }
 0x400   : > { %10699 = vmatprep.mubr.msk.f32.mxu1 %vm11970_vm0, %v11969_v7  ;;  %10742 = vmatprep.mubr.msk.f32.mxu0 %vm11970_vm0, %v11969_v7 }
 0x403   : > { %10700 = vmatmul.mubr.msk.f32.gmra.mrb[208].mxu1 %vm1076_vm6, %v13442_v3  ;;  %10743 = vmatmul.mubr.msk.f32.gmra.mrb[228].mxu0 %vm1076_vm6, %v13442_v3 }
 0x404   : > { %10702 = vmatprep.mubr.msk.f32.mxu1 %vm11970_vm0, %v11969_v7  ;;  %10745 = vmatprep.mubr.msk.f32.mxu0 %vm11970_vm0, %v11969_v7 }
 0x407   : > { %10703 = vmatmul.mubr.msk.f32.gmra.mrb[210].mxu1 %vm1076_vm6, %v13456_v42  ;;  %10746 = vmatmul.mubr.msk.f32.gmra.mrb[230].mxu0 %vm1076_vm6, %v13456_v42 }
 0x408   : > { %10705 = vmatprep.mubr.msk.f32.mxu1 %vm11970_vm0, %v11969_v7  ;;  %10748 = vmatprep.mubr.msk.f32.mxu0 %vm11970_vm0, %v11969_v7 }
 0x40b   : > { %10706 = vmatmul.mubr.msk.f32.gmra.mrb[212].mxu1 %vm1076_vm6, %v13468_v48  ;;  %10749 = vmatmul.mubr.msk.f32.gmra.mrb[232].mxu0 %vm1076_vm6, %v13468_v48 }
 0x40c   : > { %10708 = vmatprep.mubr.msk.f32.mxu1 %vm11970_vm0, %v11969_v7  ;;  %10751 = vmatprep.mubr.msk.f32.mxu0 %vm11970_vm0, %v11969_v7 }
 0x40f   : > { %10709 = vmatmul.mubr.msk.f32.gmra.mrb[214].mxu1 %vm1076_vm6, %v13481_v59  ;;  %10752 = vmatmul.mubr.msk.f32.gmra.mrb[234].mxu0 %vm1076_vm6, %v13481_v59 }
 0x410   : > { %10711 = vmatprep.mubr.msk.f32.mxu1 %vm11970_vm0, %v11969_v7  ;;  %10754 = vmatprep.mubr.msk.f32.mxu0 %vm11970_vm0, %v11969_v7 }
 0x413   : > { %10712 = vmatmul.mubr.msk.f32.gmra.mrb[216].mxu1 %vm1076_vm6, %v13495_v32  ;;  %10755 = vmatmul.mubr.msk.f32.gmra.mrb[236].mxu0 %vm1076_vm6, %v13495_v32 }
 0x414   : > { %10714 = vmatprep.mubr.msk.f32.mxu1 %vm11970_vm0, %v11969_v7  ;;  %10757 = vmatprep.mubr.msk.f32.mxu0 %vm11970_vm0, %v11969_v7 }
 0x417   : > { %10715 = vmatmul.mubr.msk.f32.gmra.mrb[218].mxu1 %vm1076_vm6, %v13509_v54  ;;  %10758 = vmatmul.mubr.msk.f32.gmra.mrb[238].mxu0 %vm1076_vm6, %v13509_v54 }
 0x418   : > { %10717 = vmatprep.mubr.msk.f32.mxu1 %vm11970_vm0, %v11969_v7  ;;  %10760 = vmatprep.mubr.msk.f32.mxu0 %vm11970_vm0, %v11969_v7 }
 0x41b   : > { %10718 = vmatmul.mubr.msk.f32.gmra.mrb[220].mxu1 %vm1076_vm6, %v13523_v11  ;;  %10761 = vmatmul.mubr.msk.f32.gmra.mrb[240].mxu0 %vm1076_vm6, %v13523_v11 }
 0x41c   : > { %10720 = vmatprep.mubr.msk.f32.mxu1 %vm11970_vm0, %v11969_v7  ;;  %10763 = vmatprep.mubr.msk.f32.mxu0 %vm11970_vm0, %v11969_v7 }
 0x41f   : > { %10721 = vmatmul.mubr.msk.f32.gmra.mrb[222].mxu1 %vm1076_vm6, %v13535_v13  ;;  %10764 = vmatmul.mubr.msk.f32.gmra.mrb[242].mxu0 %vm1076_vm6, %v13535_v13 }
 0x420   : > { %10770 = vmatprep.mubr.msk.f32.mxu1 %vm11970_vm0, %v11969_v7  ;;  %10817 = vmatprep.mubr.msk.f32.mxu0 %vm11970_vm0, %v11969_v7 }
 0x423   : > { %10771 = vmatmul.mubr.msk.f32.vlgmr.msra.gmra.mrb[224].mxu1 %vm1076_vm6, %v13373_v0 }
 0x424   : > { %10773 = vmatprep.mubr.msk.f32.mxu1 %vm11970_vm0, %v11969_v7 }
 0x426   : > { %v2962_v55 = vpop.f32.mrb[120].mxu1  ;;  %v3132_v16 = vpop.f32.mrb[140].mxu0 }
 0x427   : > { %v3037_v52 = vadd.f32 %v3025_v1, %v2962_v55  ;;  %v10428_v27 = vpop.f32.mrb[121].mxu1  ;;  %v10471_v53 = vpop.f32.mrb[141].mxu0  ;;  %10774 = vmatmul.mubr.msk.f32.gmra.mrb[226].mxu1 %vm1076_vm6, %v13386_v41 }
 0x428   : > { %10776 = vmatprep.mubr.msk.f32.mxu1 %vm11970_vm0, %v11969_v7 }
 0x429   : > { %3050 = vst.msk [vmem:[#allocation2 + $0xb] sm:$0xff] %vm3049_vm2, %v3037_v52 }
 0x42a   : > { %v2967_v0 = vpop.f32.mrb[122].mxu1  ;;  %v3137_v44 = vpop.f32.mrb[142].mxu0 }
 0x42b   : > { %v3038_v58 = vadd.f32 %v3026_v26, %v2967_v0  ;;  %v10431_v21 = vpop.f32.mrb[123].mxu1  ;;  %v10474_v19 = vpop.f32.mrb[143].mxu0  ;;  %10777 = vmatmul.mubr.msk.f32.gmra.mrb[228].mxu1 %vm1076_vm6, %v13407_v43 }
 0x42c   : > { %10779 = vmatprep.mubr.msk.f32.mxu1 %vm11970_vm0, %v11969_v7 }
 0x42d   : > { %3051 = vst.msk [vmem:[#allocation2 + $0x13] sm:$0xff] %vm3049_vm2, %v3038_v58 }
 0x42e   : > { %v2972_v41 = vpop.f32.mrb[124].mxu1  ;;  %v3142_v23 = vpop.f32.mrb[144].mxu0 }
 0x42f   : > { %v3039_v30 = vadd.f32 %v3027_v31, %v2972_v41  ;;  %v10434_v49 = vpop.f32.mrb[125].mxu1  ;;  %v10477_v10 = vpop.f32.mrb[145].mxu0  ;;  %10780 = vmatmul.mubr.msk.f32.gmra.mrb[230].mxu1 %vm1076_vm6, %v13418_v40  ;;  %v3029_v40 = vld [vmem:[#allocation2 + $0x2b] sm:$0xff] }
 0x430   : > { %v3195_v2 = vld [vmem:[#allocation2 + $0xa] sm:$0xff]  ;;  %10782 = vmatprep.mubr.msk.f32.mxu1 %vm11970_vm0, %v11969_v7 }
 0x431   : > { %v3207_v43 = vadd.f32 %v3195_v2, %v3132_v16  ;;  %3052 = vst.msk [vmem:[#allocation2 + $0x1b] sm:$0xff] %vm3049_vm2, %v3039_v30 }
 0x432   : > { %v2977_v45 = vpop.f32.mrb[126].mxu1  ;;  %v3147_v63 = vpop.f32.mrb[146].mxu0 }
 0x433   : > { %3219 = vst.msk [vmem:[#allocation2 + $0xa] sm:$0xff] %vm3049_vm2, %v3207_v43  ;;  %v3040_v57 = vadd.f32 %v3028_v61, %v2977_v45  ;;  %v10437_v8 = vpop.f32.mrb[127].mxu1  ;;  %v10480_v9 = vpop.f32.mrb[147].mxu0  ;;  %10783 = vmatmul.mubr.msk.f32.gmra.mrb[232].mxu1 %vm1076_vm6, %v13429_v29  ;;  %v3030_v29 = vld [vmem:[#allocation2 + $0x33] sm:$0xff] }
 0x434   : > { %v3196_v28 = vld [vmem:[#allocation2 + $0x12] sm:$0xff]  ;;  %10785 = vmatprep.mubr.msk.f32.mxu1 %vm11970_vm0, %v11969_v7 }
 0x435   : > { %v3208_v17 = vadd.f32 %v3196_v28, %v3137_v44  ;;  %3053 = vst.msk [vmem:[#allocation2 + $0x23] sm:$0xff] %vm3049_vm2, %v3040_v57 }
 0x436   : > { %v2982_v6 = vpop.f32.mrb[128].mxu1  ;;  %v3152_v14 = vpop.f32.mrb[148].mxu0 }
 0x437   : > { %3220 = vst.msk [vmem:[#allocation2 + $0x12] sm:$0xff] %vm3049_vm2, %v3208_v17  ;;  %v3041_v36 = vadd.f32 %v3029_v40, %v2982_v6  ;;  %v10440_v18 = vpop.f32.mrb[129].mxu1  ;;  %v10483_v22 = vpop.f32.mrb[149].mxu0  ;;  %10786 = vmatmul.mubr.msk.f32.gmra.mrb[234].mxu1 %vm1076_vm6, %v13442_v3  ;;  %v3031_v3 = vld [vmem:[#allocation2 + $0x3b] sm:$0xff] }
 0x438   : > { %v3197_v46 = vld [vmem:[#allocation2 + $0x1a] sm:$0xff]  ;;  %10788 = vmatprep.mubr.msk.f32.mxu1 %vm11970_vm0, %v11969_v7 }
 0x439   : > { %v3209_v38 = vadd.f32 %v3197_v46, %v3142_v23  ;;  %3054 = vst.msk [vmem:[#allocation2 + $0x2b] sm:$0xff] %vm3049_vm2, %v3041_v36 }
 0x43a   : > { %v2987_v33 = vpop.f32.mrb[130].mxu1  ;;  %v3157_v34 = vpop.f32.mrb[150].mxu0 }
 0x43b   : > { %3221 = vst.msk [vmem:[#allocation2 + $0x1a] sm:$0xff] %vm3049_vm2, %v3209_v38  ;;  %v3042_v20 = vadd.f32 %v3030_v29, %v2987_v33  ;;  %v10443_v60 = vpop.f32.mrb[131].mxu1  ;;  %v10486_v1 = vpop.f32.mrb[151].mxu0  ;;  %10789 = vmatmul.mubr.msk.f32.gmra.mrb[236].mxu1 %vm1076_vm6, %v13456_v42  ;;  %v3032_v42 = vld [vmem:[#allocation2 + $0x43] sm:$0xff] }
 0x43c   : > { %v3198_v55 = vld [vmem:[#allocation2 + $0x22] sm:$0xff]  ;;  %10791 = vmatprep.mubr.msk.f32.mxu1 %vm11970_vm0, %v11969_v7 }
 0x43d   : > { %v3210_v16 = vadd.f32 %v3198_v55, %v3147_v63  ;;  %3055 = vst.msk [vmem:[#allocation2 + $0x33] sm:$0xff] %vm3049_vm2, %v3042_v20 }
 0x43e   : > { %v2992_v52 = vpop.f32.mrb[132].mxu1  ;;  %v3162_v27 = vpop.f32.mrb[152].mxu0 }
 0x43f   : > { %3222 = vst.msk [vmem:[#allocation2 + $0x22] sm:$0xff] %vm3049_vm2, %v3210_v16  ;;  %v3043_v53 = vadd.f32 %v3031_v3, %v2992_v52  ;;  %v10446_v26 = vpop.f32.mrb[133].mxu1  ;;  %v10489_v0 = vpop.f32.mrb[153].mxu0  ;;  %10792 = vmatmul.mubr.msk.f32.gmra.mrb[238].mxu1 %vm1076_vm6, %v13468_v48  ;;  %v3033_v48 = vld [vmem:[#allocation2 + $0x4b] sm:$0xff] }
 0x440   : > { %v3199_v44 = vld [vmem:[#allocation2 + $0x2a] sm:$0xff]  ;;  %10794 = vmatprep.mubr.msk.f32.mxu1 %vm11970_vm0, %v11969_v7  ;;  %v3534_v0 = vld [vmem:[#allocation2 + $0x1] sm:$0xff] }
 0x441   : > { %v3211_v58 = vadd.f32 %v3199_v44, %v3152_v14  ;;  %3056 = vst.msk [vmem:[#allocation2 + $0x3b] sm:$0xff] %vm3049_vm2, %v3043_v53 }
 0x442   : > { %v2997_v21 = vpop.f32.mrb[134].mxu1  ;;  %v3167_v19 = vpop.f32.mrb[154].mxu0 }
 0x443   : > { %3223 = vst.msk [vmem:[#allocation2 + $0x2a] sm:$0xff] %vm3049_vm2, %v3211_v58  ;;  %v3044_v31 = vadd.f32 %v3032_v42, %v2997_v21  ;;  %v10449_v41 = vpop.f32.mrb[135].mxu1  ;;  %v10492_v23 = vpop.f32.mrb[155].mxu0  ;;  %10795 = vmatmul.mubr.msk.f32.gmra.mrb[240].mxu1 %vm1076_vm6, %v13481_v59  ;;  %v3034_v59 = vld [vmem:[#allocation2 + $0x53] sm:$0xff]  ;;  %v3364_v58 = vld [vmem:[#allocation2 + $0x9] sm:$0xff] }
 0x444   : > { %v3200_v30 = vld [vmem:[#allocation2 + $0x32] sm:$0xff]  ;;  %10797 = vmatprep.mubr.msk.f32.mxu1 %vm11970_vm0, %v11969_v7 }
 0x445   : > { %v3212_v49 = vadd.f32 %v3200_v30, %v3157_v34  ;;  %3057 = vst.msk [vmem:[#allocation2 + $0x43] sm:$0xff] %vm3049_vm2, %v3044_v31 }
 0x446   : > { %v3002_v10 = vpop.f32.mrb[136].mxu1  ;;  %v3172_v2 = vpop.f32.mrb[156].mxu0 }
 0x447   : > { %3224 = vst.msk [vmem:[#allocation2 + $0x32] sm:$0xff] %vm3049_vm2, %v3212_v49  ;;  %v3045_v61 = vadd.f32 %v3033_v48, %v3002_v10  ;;  %v10452_v43 = vpop.f32.mrb[137].mxu1  ;;  %v10495_v45 = vpop.f32.mrb[157].mxu0  ;;  %10798 = vmatmul.mubr.msk.f32.gmra.mrb[242].mxu1 %vm1076_vm6, %v13495_v32  ;;  %v3035_v32 = vld [vmem:[#allocation2 + $0x5b] sm:$0xff]  ;;  %v3365_v49 = vld [vmem:[#allocation2 + $0x11] sm:$0xff] }
 0x448   : > { %v3201_v63 = vld [vmem:[#allocation2 + $0x3a] sm:$0xff]  ;;  %10800 = vmatprep.mubr.msk.f32.mxu1 %vm11970_vm0, %v11969_v7 }
 0x449   : > { %v3213_v57 = vadd.f32 %v3201_v63, %v3162_v27  ;;  %3058 = vst.msk [vmem:[#allocation2 + $0x4b] sm:$0xff] %vm3049_vm2, %v3045_v61  ;;  %v3366_v63 = vld [vmem:[#allocation2 + $0x19] sm:$0xff] }
 0x44a   : > { %v3007_v8 = vpop.f32.mrb[138].mxu1  ;;  %v3177_v9 = vpop.f32.mrb[158].mxu0 }
 0x44b   : > { %3225 = vst.msk [vmem:[#allocation2 + $0x3a] sm:$0xff] %vm3049_vm2, %v3213_v57  ;;  %v3046_v28 = vadd.f32 %v3034_v59, %v3007_v8  ;;  %v10455_v40 = vpop.f32.mrb[139].mxu1  ;;  %v10498_v17 = vpop.f32.mrb[159].mxu0  ;;  %10801 = vmatmul.mubr.msk.f32.gmra.mrb[244].mxu1 %vm1076_vm6, %v13509_v54  ;;  %v3036_v54 = vld [vmem:[#allocation2 + $0x63] sm:$0x1] }
 0x44c   : > { %v3202_v6 = vld [vmem:[#allocation2 + $0x42] sm:$0xff]  ;;  %10803 = vmatprep.mubr.msk.f32.mxu1 %vm11970_vm0, %v11969_v7 }
 0x44d   : > { %v3214_v14 = vadd.f32 %v3202_v6, %v3167_v19  ;;  %3059 = vst.msk [vmem:[#allocation2 + $0x53] sm:$0xff] %vm3049_vm2, %v3046_v28  ;;  %v3367_v6 = vld [vmem:[#allocation2 + $0x21] sm:$0xff] }
 0x44e   : > { %v3012_v36 = vpop.f32.mrb[140].mxu1  ;;  %v3182_v18 = vpop.f32.mrb[160].mxu0 }
 0x44f   : > { %3226 = vst.msk [vmem:[#allocation2 + $0x42] sm:$0xff] %vm3049_vm2, %v3214_v14  ;;  %v3047_v22 = vadd.f32 %v3035_v32, %v3012_v36  ;;  %v10458_v46 = vpop.f32.mrb[141].mxu1  ;;  %v10501_v29 = vpop.f32.mrb[161].mxu0  ;;  %10804 = vmatmul.mubr.msk.f32.gmra.mrb[246].mxu1 %vm1076_vm6, %v13523_v11 }
 0x450   : > { %v3203_v38 = vld [vmem:[#allocation2 + $0x4a] sm:$0xff]  ;;  %10806 = vmatprep.mubr.msk.f32.mxu1 %vm11970_vm0, %v11969_v7 }
 0x451   : > { %v3215_v33 = vadd.f32 %v3203_v38, %v3172_v2  ;;  %3060 = vst.msk [vmem:[#allocation2 + $0x5b] sm:$0xff] %vm3049_vm2, %v3047_v22  ;;  %v3368_v38 = vld [vmem:[#allocation2 + $0x29] sm:$0xff] }
 0x452   : > { %v3017_v34 = vpop.f32.mrb[142].mxu1  ;;  %v3187_v20 = vpop.f32.mrb[162].mxu0 }
 0x453   : > { %3227 = vst.msk [vmem:[#allocation2 + $0x4a] sm:$0xff] %vm3049_vm2, %v3215_v33  ;;  %v3048_v60 = vadd.f32 %v3036_v54, %v3017_v34  ;;  %v10461_v1 = vpop.f32.mrb[143].mxu1  ;;  %v10504_v55 = vpop.f32.mrb[163].mxu0  ;;  %10807 = vmatmul.mubr.msk.f32.gmra.mrb[248].mxu1 %vm1076_vm6, %v13535_v13  ;;  %vm3230_vm6 = vcmask 254976  }
 0x454   : > { %v3204_v11 = vld [vmem:[#allocation2 + $0x52] sm:$0xff]  ;;  %10864 = vmatprep.mubr.msk.f32.mxu1 %vm11970_vm0, %v11969_v7 }
 0x455   : > { %v3216_v3 = vadd.f32 %v3204_v11, %v3177_v9  ;;  %3062 = vst.msk [vmem:[#allocation2 + $0x63] sm:$0x1] %vm3061_vm7, %v3048_v60  ;;  %v3369_v11 = vld [vmem:[#allocation2 + $0x31] sm:$0xff] }
 0x456   : > { %v3022_v16 = vpop.f32.mrb[144].mxu1  ;;  %v3192_v52 = vpop.f32.mrb[164].mxu0 }
 0x457   : > { %3228 = vst.msk [vmem:[#allocation2 + $0x52] sm:$0xff] %vm3049_vm2, %v3216_v3  ;;  %v10464_v27 = vpop.f32.mrb[145].mxu1  ;;  %v10507_v53 = vpop.f32.mrb[165].mxu0 }
 0x458   : > { %v3205_v26 = vld [vmem:[#allocation2 + $0x5a] sm:$0xff] }
 0x459   : > { %v3217_v44 = vadd.f32 %v3205_v26, %v3182_v18 }
 0x45a   : > { %v3301_v42 = vpop.f32.mrb[146].mxu1  ;;  %v3470_v21 = vpop.f32.mrb[166].mxu0 }
 0x45b   : > { %3229 = vst.msk [vmem:[#allocation2 + $0x5a] sm:$0xff] %vm3049_vm2, %v3217_v44  ;;  %v3376_v13 = vadd.f32 %v3364_v58, %v3301_v42  ;;  %v3547_v19 = vadd.f32 %v3534_v0, %v3470_v21  ;;  %v10514_v31 = vpop.f32.mrb[147].mxu1  ;;  %v10557_v41 = vpop.f32.mrb[167].mxu0  ;;  %v3370_v44 = vld [vmem:[#allocation2 + $0x39] sm:$0xff] }
 0x45c   : > { %v3206_v23 = vld [vmem:[#allocation2 + $0x62] sm:$0x3] }
 0x45d   : > { %v3218_v30 = vadd.f32 %v3206_v23, %v3187_v20  ;;  %3388 = vst.msk [vmem:[#allocation2 + $0x9] sm:$0xff] %vm3049_vm2, %v3376_v13  ;;  %3560 = vst.msk [vmem:[#allocation2 + $0x1] sm:$0xff] %vm3049_vm2, %v3547_v19  ;;  %v3371_v23 = vld [vmem:[#allocation2 + $0x41] sm:$0xff] }
 0x45e   : > { %v3306_v48 = vpop.f32.mrb[148].mxu1  ;;  %v3475_v10 = vpop.f32.mrb[168].mxu0 }
 0x45f   : > { %v3377_v2 = vadd.f32 %v3365_v49, %v3306_v48  ;;  %v10517_v61 = vpop.f32.mrb[149].mxu1  ;;  %v10560_v43 = vpop.f32.mrb[169].mxu0  ;;  %3231 = vst.msk [vmem:[#allocation2 + $0x62] sm:$0x3] %vm3230_vm6, %v3218_v30 }
 0x461   : > { %3389 = vst.msk [vmem:[#allocation2 + $0x11] sm:$0xff] %vm3049_vm2, %v3377_v2 }
 0x462   : > { %v3311_v45 = vpop.f32.mrb[150].mxu1  ;;  %v3480_v59 = vpop.f32.mrb[170].mxu0 }
 0x463   : > { %v3378_v57 = vadd.f32 %v3366_v63, %v3311_v45  ;;  %v10520_v8 = vpop.f32.mrb[151].mxu1  ;;  %v10563_v9 = vpop.f32.mrb[171].mxu0  ;;  %v3372_v45 = vld [vmem:[#allocation2 + $0x49] sm:$0xff] }
 0x464   : > { %v3535_v28 = vld [vmem:[#allocation2 + $0x9] sm:$0xff] }
 0x465   : > { %v3548_v40 = vadd.f32 %v3535_v28, %v3475_v10  ;;  %3390 = vst.msk [vmem:[#allocation2 + $0x19] sm:$0xff] %vm3049_vm2, %v3378_v57 }
 0x466   : > { %v3316_v17 = vpop.f32.mrb[152].mxu1  ;;  %v3485_v32 = vpop.f32.mrb[172].mxu0 }
 0x467   : > { %3561 = vst.msk [vmem:[#allocation2 + $0x9] sm:$0xff] %vm3049_vm2, %v3548_v40  ;;  %v3379_v14 = vadd.f32 %v3367_v6, %v3316_v17  ;;  %v10523_v36 = vpop.f32.mrb[153].mxu1  ;;  %v10566_v18 = vpop.f32.mrb[173].mxu0  ;;  %v3373_v17 = vld [vmem:[#allocation2 + $0x51] sm:$0xff] }
 0x468   : > { %v3536_v22 = vld [vmem:[#allocation2 + $0x11] sm:$0xff] }
 0x469   : > { %v3549_v46 = vadd.f32 %v3536_v22, %v3480_v59  ;;  %3391 = vst.msk [vmem:[#allocation2 + $0x21] sm:$0xff] %vm3049_vm2, %v3379_v14 }
 0x46a   : > { %v3321_v29 = vpop.f32.mrb[154].mxu1  ;;  %v3490_v54 = vpop.f32.mrb[174].mxu0 }
 0x46b   : > { %3562 = vst.msk [vmem:[#allocation2 + $0x11] sm:$0xff] %vm3049_vm2, %v3549_v46  ;;  %v3380_v33 = vadd.f32 %v3368_v38, %v3321_v29  ;;  %v10526_v34 = vpop.f32.mrb[155].mxu1  ;;  %v10569_v20 = vpop.f32.mrb[175].mxu0  ;;  %v3374_v29 = vld [vmem:[#allocation2 + $0x59] sm:$0xff] }
 0x46c   : > { %v3537_v60 = vld [vmem:[#allocation2 + $0x19] sm:$0xff] }
 0x46d   : > { %v3550_v1 = vadd.f32 %v3537_v60, %v3485_v32  ;;  %3392 = vst.msk [vmem:[#allocation2 + $0x29] sm:$0xff] %vm3049_vm2, %v3380_v33 }
 0x46e   : > { %v3326_v55 = vpop.f32.mrb[156].mxu1  ;;  %v3495_v3 = vpop.f32.mrb[176].mxu0 }
 0x46f   : > { %3563 = vst.msk [vmem:[#allocation2 + $0x19] sm:$0xff] %vm3049_vm2, %v3550_v1  ;;  %v3381_v16 = vadd.f32 %v3369_v11, %v3326_v55  ;;  %v10529_v52 = vpop.f32.mrb[157].mxu1  ;;  %v10572_v27 = vpop.f32.mrb[177].mxu0  ;;  %v3375_v55 = vld [vmem:[#allocation2 + $0x61] sm:$0x7] }
 0x470   : > { %v3538_v53 = vld [vmem:[#allocation2 + $0x21] sm:$0xff] }
 0x471   : > { %v3551_v26 = vadd.f32 %v3538_v53, %v3490_v54  ;;  %3393 = vst.msk [vmem:[#allocation2 + $0x31] sm:$0xff] %vm3049_vm2, %v3381_v16 }
 0x472   : > { %v3331_v0 = vpop.f32.mrb[158].mxu1  ;;  %v3500_v42 = vpop.f32.mrb[178].mxu0 }
 0x473   : > { %3564 = vst.msk [vmem:[#allocation2 + $0x21] sm:$0xff] %vm3049_vm2, %v3551_v26  ;;  %v3382_v58 = vadd.f32 %v3370_v44, %v3331_v0  ;;  %v10532_v21 = vpop.f32.mrb[159].mxu1  ;;  %v10575_v13 = vpop.f32.mrb[179].mxu0 }
 0x474   : > { %v3539_v19 = vld [vmem:[#allocation2 + $0x29] sm:$0xff] }
 0x475   : > { %v3552_v31 = vadd.f32 %v3539_v19, %v3495_v3  ;;  %3394 = vst.msk [vmem:[#allocation2 + $0x39] sm:$0xff] %vm3049_vm2, %v3382_v58  ;;  %v3706_v19 = vld [vmem:[#allocation2] sm:$0xff] }
 0x476   : > { %v3336_v41 = vpop.f32.mrb[160].mxu1  ;;  %v3505_v30 = vpop.f32.mrb[180].mxu0 }
 0x477   : > { %3565 = vst.msk [vmem:[#allocation2 + $0x29] sm:$0xff] %vm3049_vm2, %v3552_v31  ;;  %v3383_v48 = vadd.f32 %v3371_v23, %v3336_v41  ;;  %v10535_v49 = vpop.f32.mrb[161].mxu1  ;;  %v10578_v10 = vpop.f32.mrb[181].mxu0 }
 0x478   : > { %v3540_v2 = vld [vmem:[#allocation2 + $0x31] sm:$0xff] }
 0x479   : > { %v3553_v61 = vadd.f32 %v3540_v2, %v3500_v42  ;;  %3395 = vst.msk [vmem:[#allocation2 + $0x41] sm:$0xff] %vm3049_vm2, %v3383_v48  ;;  %v3707_v2 = vld [vmem:[#allocation2 + $0x8] sm:$0xff] }
 0x47a   : > { %v3341_v43 = vpop.f32.mrb[162].mxu1  ;;  %v3510_v63 = vpop.f32.mrb[182].mxu0 }
 0x47b   : > { %3566 = vst.msk [vmem:[#allocation2 + $0x31] sm:$0xff] %vm3049_vm2, %v3553_v61  ;;  %v3384_v59 = vadd.f32 %v3372_v45, %v3341_v43  ;;  %v10538_v57 = vpop.f32.mrb[163].mxu1  ;;  %v10581_v8 = vpop.f32.mrb[183].mxu0 }
 0x47c   : > { %v3541_v9 = vld [vmem:[#allocation2 + $0x39] sm:$0xff] }
 0x47d   : > { %v3554_v28 = vadd.f32 %v3541_v9, %v3505_v30  ;;  %3396 = vst.msk [vmem:[#allocation2 + $0x49] sm:$0xff] %vm3049_vm2, %v3384_v59 }
 0x47e   : > { %v3346_v40 = vpop.f32.mrb[164].mxu1  ;;  %v3515_v6 = vpop.f32.mrb[184].mxu0 }
 0x47f   : > { %3567 = vst.msk [vmem:[#allocation2 + $0x39] sm:$0xff] %vm3049_vm2, %v3554_v28  ;;  %v3385_v32 = vadd.f32 %v3373_v17, %v3346_v40  ;;  %v10541_v14 = vpop.f32.mrb[165].mxu1  ;;  %v10584_v36 = vpop.f32.mrb[185].mxu0  ;;  %v3708_v28 = vld [vmem:[#allocation2 + $0x10] sm:$0xff] }
 0x480   : > { %v3542_v18 = vld [vmem:[#allocation2 + $0x41] sm:$0xff] }
 0x481   : > { %v3555_v22 = vadd.f32 %v3542_v18, %v3510_v63  ;;  %3397 = vst.msk [vmem:[#allocation2 + $0x51] sm:$0xff] %vm3049_vm2, %v3385_v32 }
 0x482   : > { %v3351_v46 = vpop.f32.mrb[166].mxu1  ;;  %v3520_v38 = vpop.f32.mrb[186].mxu0 }
 0x483   : > { %3568 = vst.msk [vmem:[#allocation2 + $0x41] sm:$0xff] %vm3049_vm2, %v3555_v22  ;;  %v3386_v54 = vadd.f32 %v3374_v29, %v3351_v46  ;;  %v10544_v33 = vpop.f32.mrb[167].mxu1  ;;  %v10587_v34 = vpop.f32.mrb[187].mxu0  ;;  %v3709_v29 = vld [vmem:[#allocation2 + $0x18] sm:$0xff] }
 0x484   : > { %v3543_v20 = vld [vmem:[#allocation2 + $0x49] sm:$0xff] }
 0x485   : > { %v3556_v60 = vadd.f32 %v3543_v20, %v3515_v6  ;;  %3398 = vst.msk [vmem:[#allocation2 + $0x59] sm:$0xff] %vm3049_vm2, %v3386_v54 }
 0x486   : > { %v3356_v1 = vpop.f32.mrb[168].mxu1  ;;  %v3525_v11 = vpop.f32.mrb[188].mxu0 }
 0x487   : > { %3569 = vst.msk [vmem:[#allocation2 + $0x49] sm:$0xff] %vm3049_vm2, %v3556_v60  ;;  %v3387_v3 = vadd.f32 %v3375_v55, %v3356_v1  ;;  %v10547_v16 = vpop.f32.mrb[169].mxu1  ;;  %v10590_v52 = vpop.f32.mrb[189].mxu0 }
 0x488   : > { %v3544_v27 = vld [vmem:[#allocation2 + $0x51] sm:$0xff] }
 0x489   : > { %v3557_v53 = vadd.f32 %v3544_v27, %v3520_v38  ;;  %3400 = vst.msk [vmem:[#allocation2 + $0x61] sm:$0x7] %vm3399_vm3, %v3387_v3  ;;  %v3710_v3 = vld [vmem:[#allocation2 + $0x20] sm:$0xff] }
 0x48a   : > { %v3361_v26 = vpop.f32.mrb[170].mxu1  ;;  %v3530_v0 = vpop.f32.mrb[190].mxu0 }
 0x48b   : > { %3570 = vst.msk [vmem:[#allocation2 + $0x51] sm:$0xff] %vm3049_vm2, %v3557_v53  ;;  %v10550_v44 = vpop.f32.mrb[171].mxu1  ;;  %v10593_v42 = vpop.f32.mrb[191].mxu0 }
 0x48c   : > { %v3545_v58 = vld [vmem:[#allocation2 + $0x59] sm:$0xff] }
 0x48d   : > { %v3558_v21 = vadd.f32 %v3545_v58, %v3525_v11 }
 0x48e   : > { %v3642_v13 = vpop.f32.mrb[172].mxu1  ;;  %v3815_v31 = vpop.f32.mrb[192].mxu0 }
 0x48f   : > { %3571 = vst.msk [vmem:[#allocation2 + $0x59] sm:$0xff] %vm3049_vm2, %v3558_v21  ;;  %v3719_v41 = vadd.f32 %v3706_v19, %v3642_v13  ;;  %v10600_v23 = vpop.f32.mrb[173].mxu1  ;;  %v10643_v30 = vpop.f32.mrb[193].mxu0  ;;  %v3905_v43 = vrot.slane %v3815_v31, 1  ;;  %v3711_v21 = vld [vmem:[#allocation2 + $0x28] sm:$0xff] }
 0x490   : > { %v3546_v48 = vld [vmem:[#allocation2 + $0x61] sm:$0x7] }
 0x491   : > { %v3559_v49 = vadd.f32 %v3546_v48, %v3530_v0  ;;  %3732 = vst.msk [vmem:[#allocation2] sm:$0xff] %vm3049_vm2, %v3719_v41 }
 0x492   : > { %v3647_v10 = vpop.f32.mrb[174].mxu1  ;;  %v3820_v61 = vpop.f32.mrb[194].mxu0 }
 0x493   : > { %3572 = vst.msk [vmem:[#allocation2 + $0x61] sm:$0x7] %vm3399_vm3, %v3559_v49  ;;  %v3720_v45 = vadd.f32 %v3707_v2, %v3647_v10  ;;  %v3906_v63 = vrot.slane %v3820_v61, 1  ;;  %v10603_v59 = vpop.f32.mrb[175].mxu1  ;;  %v10646_v57 = vpop.f32.mrb[195].mxu0  ;;  %v3712_v2 = vld [vmem:[#allocation2 + $0x30] sm:$0xff] }
 0x495   : > { %3733 = vst.msk [vmem:[#allocation2 + $0x8] sm:$0xff] %vm3049_vm2, %v3720_v45  ;;  %v3907_v8 = vsel %vm1927_vm9, %v3905_v43, %v3906_v63 }
 0x496   : > { %v3652_v9 = vpop.f32.mrb[176].mxu1  ;;  %v3825_v40 = vpop.f32.mrb[196].mxu0 }
 0x497   : > { %v3721_v17 = vadd.f32 %v3708_v28, %v3652_v9  ;;  %v3908_v6 = vrot.slane %v3825_v40, 1  ;;  %v10606_v32 = vpop.f32.mrb[177].mxu1  ;;  %v10649_v14 = vpop.f32.mrb[197].mxu0  ;;  %v3713_v40 = vld [vmem:[#allocation2 + $0x38] sm:$0xff] }
 0x498   : > { %v3879_v36 = vld [vmem:[#allocation2] sm:$0xff] }
 0x499   : > { %v3943_v18 = vadd.f32 %v3907_v8, %v3879_v36  ;;  %3734 = vst.msk [vmem:[#allocation2 + $0x10] sm:$0xff] %vm3049_vm2, %v3721_v17  ;;  %v3909_v22 = vsel %vm1927_vm9, %v3906_v63, %v3908_v6 }
 0x49a   : > { %v3657_v46 = vpop.f32.mrb[178].mxu1  ;;  %v3830_v38 = vpop.f32.mrb[198].mxu0 }
 0x49b   : > { %3956 = vst.msk [vmem:[#allocation2] sm:$0xff] %vm3049_vm2, %v3943_v18  ;;  %v3722_v54 = vadd.f32 %v3709_v29, %v3657_v46  ;;  %v3910_v33 = vrot.slane %v3830_v38, 1  ;;  %v10609_v34 = vpop.f32.mrb[179].mxu1  ;;  %v10652_v20 = vpop.f32.mrb[199].mxu0  ;;  %v3714_v38 = vld [vmem:[#allocation2 + $0x40] sm:$0xff] }
 0x49c   : > { %v3880_v60 = vld [vmem:[#allocation2 + $0x8] sm:$0xff] }
 0x49d   : > { %v3944_v1 = vadd.f32 %v3909_v22, %v3880_v60  ;;  %3735 = vst.msk [vmem:[#allocation2 + $0x18] sm:$0xff] %vm3049_vm2, %v3722_v54  ;;  %v3911_v55 = vsel %vm1927_vm9, %v3908_v6, %v3910_v33 }
 0x49e   : > { %v3662_v11 = vpop.f32.mrb[180].mxu1  ;;  %v3835_v16 = vpop.f32.mrb[200].mxu0 }
 0x49f   : > { %3957 = vst.msk [vmem:[#allocation2 + $0x8] sm:$0xff] %vm3049_vm2, %v3944_v1  ;;  %v3723_v52 = vadd.f32 %v3710_v3, %v3662_v11  ;;  %v3912_v27 = vrot.slane %v3835_v16, 1  ;;  %v10612_v53 = vpop.f32.mrb[181].mxu1  ;;  %v10655_v26 = vpop.f32.mrb[201].mxu0  ;;  %v3715_v16 = vld [vmem:[#allocation2 + $0x48] sm:$0xff] }
 0x4a0   : > { %v3881_v0 = vld [vmem:[#allocation2 + $0x10] sm:$0xff] }
 0x4a1   : > { %v3945_v44 = vadd.f32 %v3911_v55, %v3881_v0  ;;  %3736 = vst.msk [vmem:[#allocation2 + $0x20] sm:$0xff] %vm3049_vm2, %v3723_v52  ;;  %v3913_v42 = vsel %vm1927_vm9, %v3910_v33, %v3912_v27 }
 0x4a2   : > { %v3667_v58 = vpop.f32.mrb[182].mxu1  ;;  %v3840_v13 = vpop.f32.mrb[202].mxu0 }
 0x4a3   : > { %3958 = vst.msk [vmem:[#allocation2 + $0x10] sm:$0xff] %vm3049_vm2, %v3945_v44  ;;  %v3724_v19 = vadd.f32 %v3711_v21, %v3667_v58  ;;  %v3914_v31 = vrot.slane %v3840_v13, 1  ;;  %v10615_v41 = vpop.f32.mrb[183].mxu1  ;;  %v10658_v23 = vpop.f32.mrb[203].mxu0  ;;  %v3716_v13 = vld [vmem:[#allocation2 + $0x50] sm:$0xff] }
 0x4a4   : > { %v3882_v30 = vld [vmem:[#allocation2 + $0x18] sm:$0xff] }
 0x4a5   : > { %v3946_v48 = vadd.f32 %v3913_v42, %v3882_v30  ;;  %3737 = vst.msk [vmem:[#allocation2 + $0x28] sm:$0xff] %vm3049_vm2, %v3724_v19  ;;  %v3915_v49 = vsel %vm1927_vm9, %v3912_v27, %v3914_v31 }
 0x4a6   : > { %v3672_v10 = vpop.f32.mrb[184].mxu1  ;;  %v3845_v61 = vpop.f32.mrb[204].mxu0 }
 0x4a7   : > { %3959 = vst.msk [vmem:[#allocation2 + $0x18] sm:$0xff] %vm3049_vm2, %v3946_v48  ;;  %v3725_v43 = vadd.f32 %v3712_v2, %v3672_v10  ;;  %v3916_v45 = vrot.slane %v3845_v61, 1  ;;  %v10618_v63 = vpop.f32.mrb[185].mxu1  ;;  %v10661_v59 = vpop.f32.mrb[205].mxu0  ;;  %v3717_v61 = vld [vmem:[#allocation2 + $0x58] sm:$0xff] }
 0x4a8   : > { %v3883_v57 = vld [vmem:[#allocation2 + $0x20] sm:$0xff] }
 0x4a9   : > { %v3947_v8 = vadd.f32 %v3915_v49, %v3883_v57  ;;  %3738 = vst.msk [vmem:[#allocation2 + $0x30] sm:$0xff] %vm3049_vm2, %v3725_v43  ;;  %v3917_v9 = vsel %vm1927_vm9, %v3914_v31, %v3916_v45 }
 0x4aa   : > { %v3677_v28 = vpop.f32.mrb[186].mxu1  ;;  %v3850_v17 = vpop.f32.mrb[206].mxu0 }
 0x4ab   : > { %3960 = vst.msk [vmem:[#allocation2 + $0x20] sm:$0xff] %vm3049_vm2, %v3947_v8  ;;  %v3726_v6 = vadd.f32 %v3713_v40, %v3677_v28  ;;  %v3918_v32 = vrot.slane %v3850_v17, 1  ;;  %v10621_v14 = vpop.f32.mrb[187].mxu1  ;;  %v10664_v36 = vpop.f32.mrb[207].mxu0  ;;  %v3718_v17 = vld [vmem:[#allocation2 + $0x60] sm:$0xf] }
 0x4ac   : > { %v3884_v18 = vld [vmem:[#allocation2 + $0x28] sm:$0xff] }
 0x4ad   : > { %v3948_v22 = vadd.f32 %v3917_v9, %v3884_v18  ;;  %3739 = vst.msk [vmem:[#allocation2 + $0x38] sm:$0xff] %vm3049_vm2, %v3726_v6  ;;  %v3919_v46 = vsel %vm1927_vm9, %v3916_v45, %v3918_v32 }
 0x4ae   : > { %v3682_v29 = vpop.f32.mrb[188].mxu1  ;;  %v3855_v54 = vpop.f32.mrb[208].mxu0 }
 0x4af   : > { %3961 = vst.msk [vmem:[#allocation2 + $0x28] sm:$0xff] %vm3049_vm2, %v3948_v22  ;;  %v3727_v33 = vadd.f32 %v3714_v38, %v3682_v29  ;;  %v3920_v34 = vrot.slane %v3855_v54, 1  ;;  %v10624_v20 = vpop.f32.mrb[189].mxu1  ;;  %v10667_v60 = vpop.f32.mrb[209].mxu0 }
 0x4b0   : > { %v3885_v1 = vld [vmem:[#allocation2 + $0x30] sm:$0xff] }
 0x4b1   : > { %v3949_v55 = vadd.f32 %v3919_v46, %v3885_v1  ;;  %3740 = vst.msk [vmem:[#allocation2 + $0x40] sm:$0xff] %vm3049_vm2, %v3727_v33  ;;  %v3921_v11 = vsel %vm1927_vm9, %v3918_v32, %v3920_v34 }
 0x4b2   : > { %v3687_v3 = vpop.f32.mrb[190].mxu1  ;;  %v3860_v52 = vpop.f32.mrb[210].mxu0 }
 0x4b3   : > { %3962 = vst.msk [vmem:[#allocation2 + $0x30] sm:$0xff] %vm3049_vm2, %v3949_v55  ;;  %v3728_v27 = vadd.f32 %v3715_v16, %v3687_v3  ;;  %v3922_v53 = vrot.slane %v3860_v52, 1  ;;  %v10627_v26 = vpop.f32.mrb[191].mxu1  ;;  %v10670_v0 = vpop.f32.mrb[211].mxu0 }
 0x4b4   : > { %v3886_v44 = vld [vmem:[#allocation2 + $0x38] sm:$0xff] }
 0x4b5   : > { %v3950_v42 = vadd.f32 %v3921_v11, %v3886_v44  ;;  %3741 = vst.msk [vmem:[#allocation2 + $0x48] sm:$0xff] %vm3049_vm2, %v3728_v27  ;;  %v3923_v58 = vsel %vm1927_vm9, %v3920_v34, %v3922_v53 }
 0x4b6   : > { %v3692_v21 = vpop.f32.mrb[192].mxu1  ;;  %v3865_v19 = vpop.f32.mrb[212].mxu0 }
 0x4b7   : > { %3963 = vst.msk [vmem:[#allocation2 + $0x38] sm:$0xff] %vm3049_vm2, %v3950_v42  ;;  %v3729_v31 = vadd.f32 %v3716_v13, %v3692_v21  ;;  %v3924_v41 = vrot.slane %v3865_v19, 1  ;;  %v10630_v23 = vpop.f32.mrb[193].mxu1  ;;  %v10673_v30 = vpop.f32.mrb[213].mxu0  ;;  %v4101_v13 = vld [vmem:[#allocation2] sm:$0xff] }
 0x4b8   : > { %v3887_v48 = vld [vmem:[#allocation2 + $0x40] sm:$0xff] }
 0x4b9   : > { %v3951_v49 = vadd.f32 %v3923_v58, %v3887_v48  ;;  %3742 = vst.msk [vmem:[#allocation2 + $0x50] sm:$0xff] %vm3049_vm2, %v3729_v31  ;;  %v3925_v10 = vsel %vm1927_vm9, %v3922_v53, %v3924_v41 }
 0x4ba   : > { %v3697_v2 = vpop.f32.mrb[194].mxu1  ;;  %v3870_v43 = vpop.f32.mrb[214].mxu0 }
 0x4bb   : > { %3964 = vst.msk [vmem:[#allocation2 + $0x40] sm:$0xff] %vm3049_vm2, %v3951_v49  ;;  %v3730_v45 = vadd.f32 %v3717_v61, %v3697_v2  ;;  %v3926_v63 = vrot.slane %v3870_v43, 1  ;;  %v10633_v59 = vpop.f32.mrb[195].mxu1  ;;  %v10676_v57 = vpop.f32.mrb[215].mxu0  ;;  %v4102_v61 = vld [vmem:[#allocation2 + $0x8] sm:$0xff] }
 0x4bc   : > { %v3888_v8 = vld [vmem:[#allocation2 + $0x48] sm:$0xff] }
 0x4bd   : > { %v3952_v9 = vadd.f32 %v3925_v10, %v3888_v8  ;;  %3743 = vst.msk [vmem:[#allocation2 + $0x58] sm:$0xff] %vm3049_vm2, %v3730_v45  ;;  %v3927_v28 = vsel %vm1927_vm9, %v3924_v41, %v3926_v63 }
 0x4be   : > { %v3702_v40 = vpop.f32.mrb[196].mxu1  ;;  %v3875_v6 = vpop.f32.mrb[216].mxu0 }
 0x4bf   : > { %3965 = vst.msk [vmem:[#allocation2 + $0x48] sm:$0xff] %vm3049_vm2, %v3952_v9  ;;  %v3731_v32 = vadd.f32 %v3718_v17, %v3702_v40  ;;  %v3928_v14 = vrot.slane %v3875_v6, 1  ;;  %v10636_v36 = vpop.f32.mrb[197].mxu1  ;;  %v10679_v18 = vpop.f32.mrb[217].mxu0  ;;  %v4103_v6 = vld [vmem:[#allocation2 + $0x10] sm:$0xff] }
 0x4c0   : > { %v3889_v22 = vld [vmem:[#allocation2 + $0x50] sm:$0xff]  ;;  %v4833_v36 = vld [vmem:[%s16316_s5] sm:$0xff]  ;;  %v4834_v18 = vld [vmem:[%s16316_s5 + $0x8] sm:$0xff] }
 0x4c1   : > { %v3953_v46 = vadd.f32 %v3927_v28, %v3889_v22  ;;  %3745 = vst.msk [vmem:[#allocation2 + $0x60] sm:$0xf] %vm3744_vm8, %v3731_v32  ;;  %v3929_v29 = vsel %vm1927_vm9, %v3926_v63, %v3928_v14  ;;  %v4835_v22 = vld [vmem:[%s16316_s5 + $0x10] sm:$0xff] }
 0x4c2   : > { %v4038_v38 = vpop.f32.mrb[198].mxu1  ;;  %v4253_v54 = vpop.f32.mrb[218].mxu0 }
 0x4c3   : > { %3966 = vst.msk [vmem:[#allocation2 + $0x50] sm:$0xff] %vm3049_vm2, %v3953_v46  ;;  %v10686_v33 = vpop.f32.mrb[199].mxu1  ;;  %v10729_v34 = vpop.f32.mrb[219].mxu0  ;;  %v11761_v54 = vpack.c.bf16 %v4834_v18, %v4833_v36 }
 0x4c4   : > { %v3890_v20 = vld [vmem:[#allocation2 + $0x58] sm:$0xff]  ;;  %v9062_v34 = vld [vmem:[%s16316_s5 + $0x20] sm:$0xff] }
 0x4c5   : > { %v3954_v60 = vadd.f32 %v3929_v29, %v3890_v20  ;;  %v4836_v33 = vld [vmem:[%s16316_s5 + $0x18] sm:$0xff]  ;;  %v9063_v20 = vld [vmem:[%s16316_s5 + $0x28] sm:$0xff]  ;;  %11762 = vmatpush3.bf16.msra.mxu0 %v11761_v54 }
 0x4c6   : > { %v4042_v1 = vpop.f32.mrb[200].mxu1  ;;  %v4257_v55 = vpop.f32.mrb[220].mxu0  ;;  %11763 = vmatprep.subr.bf16.mxu0 %v11968_v4 }
 0x4c7   : > { %3967 = vst.msk [vmem:[#allocation2 + $0x58] sm:$0xff] %vm3049_vm2, %v3954_v60  ;;  %v10689_v11 = vpop.f32.mrb[201].mxu1  ;;  %v10732_v3 = vpop.f32.mrb[221].mxu0  ;;  %v4125_v26 = vrot.slane %v4042_v1, 1  ;;  %v4340_v0 = vrot.slane %v4257_v55, 2 }
 0x4c8   : > { %v3891_v16 = vld [vmem:[#allocation2 + $0x60] sm:$0x7] }
 0x4c9   : > { %v3955_v52 = vadd.f32 %v3928_v14, %v3891_v16 }
 0x4ca   : > { %v4047_v27 = vpop.f32.mrb[202].mxu1  ;;  %v4262_v53 = vpop.f32.mrb[222].mxu0 }
 0x4cb   : > { %3968 = vst.msk [vmem:[#allocation2 + $0x60] sm:$0x7] %vm3399_vm3, %v3955_v52  ;;  %v4126_v44 = vrot.slane %v4047_v27, 1  ;;  %v4341_v42 = vrot.slane %v4262_v53, 2  ;;  %v10692_v58 = vpop.f32.mrb[203].mxu1  ;;  %v10735_v21 = vpop.f32.mrb[223].mxu0  ;;  %v11764_v52 = vpack.c.bf16 %v4836_v33, %v4835_v22  ;;  %v11767_v27 = vpack.c.bf16 %v9063_v20, %v9062_v34 }
 0x4cc   : > { %v9064_v53 = vld [vmem:[%s16316_s5 + $0x30] sm:$0xff] }
 0x4cd   : > { %v4127_v19 = vsel %vm1927_vm9, %v4125_v26, %v4126_v44  ;;  %v4342_v31 = vsel %vm2361_vm12, %v4340_v0, %v4341_v42  ;;  %v9065_v26 = vld [vmem:[%s16316_s5 + $0x38] sm:$0xff]  ;;  %11768 = vmatpush3.bf16.msra.mxu1 %v11767_v27  ;;  %11765 = vmatpush3.bf16.msra.mxu0 %v11764_v52 }
 0x4ce   : > { %v4160_v41 = vadd.f32 %v4127_v19, %v4101_v13  ;;  %v4052_v23 = vpop.f32.mrb[204].mxu1  ;;  %v4267_v30 = vpop.f32.mrb[224].mxu0  ;;  %v4104_v0 = vld [vmem:[#allocation2 + $0x18] sm:$0xff]  ;;  %v11770_v19 = vpack.c.bf16 %v9065_v26, %v9064_v53  ;;  %11769 = vmatprep.subr.bf16.mxu1 %v11968_v4  ;;  %11772 = vmatprep.subr.bf16.mxu0 %v11968_v4 }
 0x4cf   : > { %v4128_v48 = vrot.slane %v4052_v23, 1  ;;  %v4343_v49 = vrot.slane %v4267_v30, 2  ;;  %v10695_v10 = vpop.f32.mrb[205].mxu1  ;;  %v10738_v2 = vpop.f32.mrb[225].mxu0 }
 0x4d0   : > { %4172 = vst.msk [vmem:[#allocation2] sm:$0xff] %vm3049_vm2, %v4160_v41  ;;  %v4105_v10 = vld [vmem:[#allocation2 + $0x20] sm:$0xff] }
 0x4d1   : > { %v4129_v43 = vsel %vm1927_vm9, %v4126_v44, %v4128_v48  ;;  %v4344_v45 = vsel %vm2361_vm12, %v4341_v42, %v4343_v49  ;;  %11771 = vmatpush3.bf16.msra.mxu1 %v11770_v19 }
 0x4d2   : > { %v4161_v63 = vadd.f32 %v4129_v43, %v4102_v61  ;;  %v4057_v59 = vpop.f32.mrb[206].mxu1  ;;  %v4272_v57 = vpop.f32.mrb[226].mxu0  ;;  %v14036_v8 = vld [vmem:[#allocation2 + $0x60] sm:$0xf]  ;;  %11778 = vmatprep.subr.bf16.mxu1 %v11968_v4 }
 0x4d3   : > { %v4130_v9 = vrot.slane %v4057_v59, 1  ;;  %v4345_v28 = vrot.slane %v4272_v57, 2  ;;  %v10698_v40 = vpop.f32.mrb[207].mxu1  ;;  %v10741_v17 = vpop.f32.mrb[227].mxu0  ;;  %4832 = vst.msk [vmem:[#allocation2 + $0x60] sm:$0xf] %vm881_vm5, %v11969_v7 }
 0x4d4   : > { %4173 = vst.msk [vmem:[#allocation2 + $0x8] sm:$0xff] %vm3049_vm2, %v4161_v63 }
 0x4d5   : > { %v4131_v32 = vsel %vm1927_vm9, %v4128_v48, %v4130_v9  ;;  %v4346_v14 = vsel %vm2361_vm12, %v4343_v49, %v4345_v28 }
 0x4d6   : > { %v4162_v46 = vadd.f32 %v4131_v32, %v4103_v6  ;;  %v4062_v29 = vpop.f32.mrb[208].mxu1  ;;  %v4277_v38 = vpop.f32.mrb[228].mxu0  ;;  %v4106_v6 = vld [vmem:[#allocation2 + $0x28] sm:$0xff] }
 0x4d7   : > { %v4316_v60 = vld [vmem:[#allocation2] sm:$0xff]  ;;  %v4132_v1 = vrot.slane %v4062_v29, 1  ;;  %v4347_v55 = vrot.slane %v4277_v38, 2  ;;  %v10701_v11 = vpop.f32.mrb[209].mxu1  ;;  %v10744_v3 = vpop.f32.mrb[229].mxu0 }
 0x4d8   : > { %v4375_v16 = vadd.f32 %v4342_v31, %v4316_v60  ;;  %4174 = vst.msk [vmem:[#allocation2 + $0x10] sm:$0xff] %vm3049_vm2, %v4162_v46 }
 0x4d9   : > { %v4133_v44 = vsel %vm1927_vm9, %v4130_v9, %v4132_v1  ;;  %v4348_v42 = vsel %vm2361_vm12, %v4345_v28, %v4347_v55 }
 0x4da   : > { %4387 = vst.msk [vmem:[#allocation2] sm:$0xff] %vm3049_vm2, %v4375_v16  ;;  %v4163_v58 = vadd.f32 %v4133_v44, %v4104_v0  ;;  %v4067_v21 = vpop.f32.mrb[210].mxu1  ;;  %v4282_v13 = vpop.f32.mrb[230].mxu0  ;;  %v4108_v44 = vld [vmem:[#allocation2 + $0x38] sm:$0xff] }
 0x4db   : > { %v4317_v31 = vld [vmem:[#allocation2 + $0x8] sm:$0xff]  ;;  %v4134_v41 = vrot.slane %v4067_v21, 1  ;;  %v4349_v23 = vrot.slane %v4282_v13, 2  ;;  %v10704_v30 = vpop.f32.mrb[211].mxu1  ;;  %v10747_v48 = vpop.f32.mrb[231].mxu0 }
 0x4dc   : > { %v4376_v49 = vadd.f32 %v4344_v45, %v4317_v31  ;;  %4175 = vst.msk [vmem:[#allocation2 + $0x18] sm:$0xff] %vm3049_vm2, %v4163_v58 }
 0x4dd   : > { %v4135_v2 = vsel %vm1927_vm9, %v4132_v1, %v4134_v41  ;;  %v4350_v61 = vsel %vm2361_vm12, %v4347_v55, %v4349_v23 }
 0x4de   : > { %4388 = vst.msk [vmem:[#allocation2 + $0x8] sm:$0xff] %vm3049_vm2, %v4376_v49  ;;  %v4164_v43 = vadd.f32 %v4135_v2, %v4105_v10  ;;  %v4072_v63 = vpop.f32.mrb[212].mxu1  ;;  %v4287_v59 = vpop.f32.mrb[232].mxu0  ;;  %v4109_v10 = vld [vmem:[#allocation2 + $0x40] sm:$0xff] }
 0x4df   : > { %v4318_v57 = vld [vmem:[#allocation2 + $0x10] sm:$0xff]  ;;  %v4136_v9 = vrot.slane %v4072_v63, 1  ;;  %v4351_v28 = vrot.slane %v4287_v59, 2  ;;  %v10707_v45 = vpop.f32.mrb[213].mxu1  ;;  %v10750_v40 = vpop.f32.mrb[233].mxu0 }
 0x4e0   : > { %v4377_v17 = vadd.f32 %v4346_v14, %v4318_v57  ;;  %4176 = vst.msk [vmem:[#allocation2 + $0x20] sm:$0xff] %vm3049_vm2, %v4164_v43  ;;  %v4107_v14 = vld [vmem:[#allocation2 + $0x30] sm:$0xff] }
 0x4e1   : > { %v4137_v32 = vsel %vm1927_vm9, %v4134_v41, %v4136_v9  ;;  %v4352_v36 = vsel %vm2361_vm12, %v4349_v23, %v4351_v28 }
 0x4e2   : > { %4389 = vst.msk [vmem:[#allocation2 + $0x10] sm:$0xff] %vm3049_vm2, %v4377_v17  ;;  %v4165_v18 = vadd.f32 %v4137_v32, %v4106_v6  ;;  %v4077_v22 = vpop.f32.mrb[214].mxu1  ;;  %v4292_v46 = vpop.f32.mrb[234].mxu0  ;;  %v4110_v6 = vld [vmem:[#allocation2 + $0x48] sm:$0xff] }
 0x4e3   : > { %v4319_v29 = vld [vmem:[#allocation2 + $0x18] sm:$0xff]  ;;  %v4138_v38 = vrot.slane %v4077_v22, 1  ;;  %v4353_v54 = vrot.slane %v4292_v46, 2  ;;  %v10710_v33 = vpop.f32.mrb[215].mxu1  ;;  %v10753_v34 = vpop.f32.mrb[235].mxu0 }
 0x4e4   : > { %v4378_v20 = vadd.f32 %v4348_v42, %v4319_v29  ;;  %4177 = vst.msk [vmem:[#allocation2 + $0x28] sm:$0xff] %vm3049_vm2, %v4165_v18 }
 0x4e5   : > { %v4139_v60 = vsel %vm1927_vm9, %v4136_v9, %v4138_v38  ;;  %v4354_v1 = vsel %vm2361_vm12, %v4351_v28, %v4353_v54 }
 0x4e6   : > { %4390 = vst.msk [vmem:[#allocation2 + $0x18] sm:$0xff] %vm3049_vm2, %v4378_v20  ;;  %v4166_v55 = vadd.f32 %v4139_v60, %v4107_v14  ;;  %v4082_v11 = vpop.f32.mrb[216].mxu1  ;;  %v4297_v3 = vpop.f32.mrb[236].mxu0  ;;  %v4112_v14 = vld [vmem:[#allocation2 + $0x58] sm:$0x7]  ;;  %v4111_v60 = vld [vmem:[#allocation2 + $0x50] sm:$0xff] }
 0x4e7   : > { %v4320_v16 = vld [vmem:[#allocation2 + $0x20] sm:$0xff]  ;;  %v4140_v52 = vrot.slane %v4082_v11, 1  ;;  %v4355_v27 = vrot.slane %v4297_v3, 2  ;;  %v10713_v53 = vpop.f32.mrb[217].mxu1  ;;  %v10756_v26 = vpop.f32.mrb[237].mxu0 }
 0x4e8   : > { %v4379_v0 = vadd.f32 %v4350_v61, %v4320_v16  ;;  %4178 = vst.msk [vmem:[#allocation2 + $0x30] sm:$0xff] %vm3049_vm2, %v4166_v55 }
 0x4e9   : > { %v4141_v42 = vsel %vm1927_vm9, %v4138_v38, %v4140_v52  ;;  %v4356_v58 = vsel %vm2361_vm12, %v4353_v54, %v4355_v27 }
 0x4ea   : > { %4391 = vst.msk [vmem:[#allocation2 + $0x20] sm:$0xff] %vm3049_vm2, %v4379_v0  ;;  %v4167_v21 = vadd.f32 %v4141_v42, %v4108_v44  ;;  %v4087_v13 = vpop.f32.mrb[218].mxu1  ;;  %v4302_v19 = vpop.f32.mrb[238].mxu0 }
 0x4eb   : > { %v4321_v31 = vld [vmem:[#allocation2 + $0x28] sm:$0xff]  ;;  %v4142_v41 = vrot.slane %v4087_v13, 1  ;;  %v4357_v23 = vrot.slane %v4302_v19, 2  ;;  %v10716_v30 = vpop.f32.mrb[219].mxu1  ;;  %v10759_v48 = vpop.f32.mrb[239].mxu0 }
 0x4ec   : > { %v4380_v49 = vadd.f32 %v4352_v36, %v4321_v31  ;;  %4179 = vst.msk [vmem:[#allocation2 + $0x38] sm:$0xff] %vm3049_vm2, %v4167_v21  ;;  %v4531_v48 = vld [vmem:[#allocation2] sm:$0xff] }
 0x4ed   : > { %v4143_v2 = vsel %vm1927_vm9, %v4140_v52, %v4142_v41  ;;  %v4358_v61 = vsel %vm2361_vm12, %v4355_v27, %v4357_v23 }
 0x4ee   : > { %4392 = vst.msk [vmem:[#allocation2 + $0x28] sm:$0xff] %vm3049_vm2, %v4380_v49  ;;  %v4168_v43 = vadd.f32 %v4143_v2, %v4109_v10  ;;  %v4092_v63 = vpop.f32.mrb[220].mxu1  ;;  %v4307_v59 = vpop.f32.mrb[240].mxu0 }
 0x4ef   : > { %v4322_v57 = vld [vmem:[#allocation2 + $0x30] sm:$0xff]  ;;  %v4144_v9 = vrot.slane %v4092_v63, 1  ;;  %v4359_v28 = vrot.slane %v4307_v59, 2  ;;  %v10719_v45 = vpop.f32.mrb[221].mxu1  ;;  %v10762_v40 = vpop.f32.mrb[241].mxu0  ;;  %v4532_v63 = vld [vmem:[#allocation2 + $0x8] sm:$0xff] }
 0x4f0   : > { %v4381_v17 = vadd.f32 %v4354_v1, %v4322_v57  ;;  %4180 = vst.msk [vmem:[#allocation2 + $0x40] sm:$0xff] %vm3049_vm2, %v4168_v43  ;;  %v4533_v40 = vld [vmem:[#allocation2 + $0x10] sm:$0xff] }
 0x4f1   : > { %v4145_v32 = vsel %vm1927_vm9, %v4142_v41, %v4144_v9  ;;  %v4360_v36 = vsel %vm2361_vm12, %v4357_v23, %v4359_v28 }
 0x4f2   : > { %4393 = vst.msk [vmem:[#allocation2 + $0x30] sm:$0xff] %vm3049_vm2, %v4381_v17  ;;  %v4169_v18 = vadd.f32 %v4145_v32, %v4110_v6  ;;  %v4097_v22 = vpop.f32.mrb[222].mxu1  ;;  %v4312_v46 = vpop.f32.mrb[242].mxu0 }
 0x4f3   : > { %v4323_v29 = vld [vmem:[#allocation2 + $0x38] sm:$0xff]  ;;  %v4146_v38 = vrot.slane %v4097_v22, 1  ;;  %v4361_v54 = vrot.slane %v4312_v46, 2  ;;  %v10722_v33 = vpop.f32.mrb[223].mxu1  ;;  %v10765_v34 = vpop.f32.mrb[243].mxu0 }
 0x4f4   : > { %v4382_v20 = vadd.f32 %v4356_v58, %v4323_v29  ;;  %4181 = vst.msk [vmem:[#allocation2 + $0x48] sm:$0xff] %vm3049_vm2, %v4169_v18  ;;  %v4534_v46 = vld [vmem:[#allocation2 + $0x18] sm:$0xff] }
 0x4f5   : > { %v4147_v1 = vsel %vm1927_vm9, %v4144_v9, %v4146_v38  ;;  %v4171_v55 = vadd.f32 %v4146_v38, %v4112_v14  ;;  %v4362_v11 = vsel %vm2361_vm12, %v4359_v28, %v4361_v54  ;;  %v4535_v14 = vld [vmem:[#allocation2 + $0x20] sm:$0xff] }
 0x4f6   : > { %4394 = vst.msk [vmem:[#allocation2 + $0x38] sm:$0xff] %vm3049_vm2, %v4382_v20  ;;  %v4170_v3 = vadd.f32 %v4147_v1, %v4111_v60  ;;  %v4468_v16 = vpop.f32.mrb[224].mxu1 }
 0x4f7   : > { %v4324_v52 = vld [vmem:[#allocation2 + $0x40] sm:$0xff]  ;;  %4183 = vst.msk [vmem:[#allocation2 + $0x58] sm:$0x7] %vm3399_vm3, %v4171_v55  ;;  %v10772_v27 = vpop.f32.mrb[225].mxu1 }
 0x4f8   : > { %v4383_v53 = vadd.f32 %v4358_v61, %v4324_v52  ;;  %4182 = vst.msk [vmem:[#allocation2 + $0x50] sm:$0xff] %vm3049_vm2, %v4170_v3  ;;  %v4536_v52 = vld [vmem:[#allocation2 + $0x28] sm:$0xff] }
 0x4fa   : > { %4395 = vst.msk [vmem:[#allocation2 + $0x40] sm:$0xff] %vm3049_vm2, %v4383_v53  ;;  %v4472_v26 = vpop.f32.mrb[226].mxu1 }
 0x4fb   : > { %v4325_v0 = vld [vmem:[#allocation2 + $0x48] sm:$0xff]  ;;  %v10775_v44 = vpop.f32.mrb[227].mxu1  ;;  %v4555_v31 = vrot.slane %v4472_v26, 3 }
 0x4fc   : > { %v4384_v42 = vadd.f32 %v4360_v36, %v4325_v0  ;;  %v14129_v0 = vld [vmem:[%s16320_s9] ss:$0 sm:$0xff] }
 0x4fe   : > { %4396 = vst.msk [vmem:[#allocation2 + $0x48] sm:$0xff] %vm3049_vm2, %v4384_v42  ;;  %v4327_v58 = vld [vmem:[#allocation2 + $0x58] sm:$0x3]  ;;  %v4477_v21 = vpop.f32.mrb[228].mxu1 }
 0x4ff   : > { %v4326_v13 = vld [vmem:[#allocation2 + $0x50] sm:$0xff]  ;;  %v4386_v19 = vadd.f32 %v4361_v54, %v4327_v58  ;;  %v4556_v41 = vrot.slane %v4477_v21, 3  ;;  %v10778_v23 = vpop.f32.mrb[229].mxu1 }
 0x500   : > { %v4385_v30 = vadd.f32 %v4362_v11, %v4326_v13  ;;  %v4537_v13 = vld [vmem:[#allocation2 + $0x30] sm:$0xff] }
 0x501   : > { %4398 = vst.msk [vmem:[#allocation2 + $0x58] sm:$0x3] %vm3230_vm6, %v4386_v19  ;;  %v4557_v49 = vsel %vm2576_vm11, %v4555_v31, %v4556_v41 }
 0x502   : > { %4397 = vst.msk [vmem:[#allocation2 + $0x50] sm:$0xff] %vm3049_vm2, %v4385_v30  ;;  %v4590_v10 = vadd.f32 %v4557_v49, %v4531_v48  ;;  %v4482_v2 = vpop.f32.mrb[230].mxu1 }
 0x503   : > { %v4558_v61 = vrot.slane %v4482_v2, 3  ;;  %v10781_v43 = vpop.f32.mrb[231].mxu1 }
 0x504   : > { %4602 = vst.msk [vmem:[#allocation2] sm:$0xff] %vm3049_vm2, %v4590_v10  ;;  %v4538_v43 = vld [vmem:[#allocation2 + $0x38] sm:$0xff] }
 0x505   : > { %v4559_v59 = vsel %vm2576_vm11, %v4556_v41, %v4558_v61 }
 0x506   : > { %v4591_v57 = vadd.f32 %v4559_v59, %v4532_v63  ;;  %v4487_v9 = vpop.f32.mrb[232].mxu1 }
 0x507   : > { %v4560_v28 = vrot.slane %v4487_v9, 3  ;;  %v10784_v45 = vpop.f32.mrb[233].mxu1 }
 0x508   : > { %4603 = vst.msk [vmem:[#allocation2 + $0x8] sm:$0xff] %vm3049_vm2, %v4591_v57 }
 0x509   : > { %v4561_v17 = vsel %vm2576_vm11, %v4558_v61, %v4560_v28 }
 0x50a   : > { %v4592_v6 = vadd.f32 %v4561_v17, %v4533_v40  ;;  %v4492_v32 = vpop.f32.mrb[234].mxu1 }
 0x50b   : > { %v4614_v36 = vld [vmem:[#allocation2] sm:$0xff]  ;;  %v4562_v18 = vrot.slane %v4492_v32, 3  ;;  %v10787_v22 = vpop.f32.mrb[235].mxu1 }
 0x50c   : > { %4820 = vst.msk [vmem:[#allocation2] sm:$0xff] %vm868_vm4, %v11969_v7  ;;  %v4634_v31 = vadd.f32 %v14129_v0, %v4614_v36 }
 0x50d   : > { %4604 = vst.msk [vmem:[#allocation2 + $0x10] sm:$0xff] %vm3049_vm2, %v4592_v6  ;;  %v4563_v29 = vsel %vm2576_vm11, %v4560_v28, %v4562_v18 }
 0x50e   : > { %v4593_v38 = vadd.f32 %v4563_v29, %v4534_v46  ;;  %v4497_v54 = vpop.f32.mrb[236].mxu1  ;;  %v14147_v59 = vmul.f32 %v4634_v31, %v12183_v39 }
 0x50f   : > { %v4615_v33 = vld [vmem:[#allocation2 + $0x8] sm:$0xff]  ;;  %v4564_v34 = vrot.slane %v4497_v54, 3  ;;  %v10790_v20 = vpop.f32.mrb[237].mxu1 }
 0x510   : > { %4821 = vst.msk [vmem:[#allocation2 + $0x8] sm:$0xff] %vm868_vm4, %v11969_v7  ;;  %v4635_v21 = vadd.f32 %v14129_v0, %v4615_v33  ;;  %v4692_v46 = vmul.f32 %v14147_v59, %v14147_v59 }
 0x511   : > { %4605 = vst.msk [vmem:[#allocation2 + $0x18] sm:$0xff] %vm3049_vm2, %v4593_v38  ;;  %v4565_v60 = vsel %vm2576_vm11, %v4562_v18, %v4564_v34  ;;  %v4539_v18 = vld [vmem:[#allocation2 + $0x40] sm:$0xff] }
 0x512   : > { %v4594_v1 = vadd.f32 %v4565_v60, %v4535_v14  ;;  %v4502_v55 = vpop.f32.mrb[238].mxu1  ;;  %v14139_v2 = vmul.f32 %v4635_v21, %v12190_v47 }
 0x513   : > { %v4566_v3 = vrot.slane %v4502_v55, 3  ;;  %v10793_v16 = vpop.f32.mrb[239].mxu1 }
 0x514   : > { %v4616_v11 = vld [vmem:[#allocation2 + $0x10] sm:$0xff]  ;;  %4606 = vst.msk [vmem:[#allocation2 + $0x20] sm:$0xff] %vm3049_vm2, %v4594_v1  ;;  %v4693_v6 = vmul.f32 %v14139_v2, %v14139_v2  ;;  %v4661_v60 = vsel %vm3049_vm2, %v14139_v2, 0.0 }
 0x515   : > { %4822 = vst.msk [vmem:[#allocation2 + $0x10] sm:$0xff] %vm868_vm4, %v11969_v7  ;;  %v4567_v27 = vsel %vm2576_vm11, %v4564_v34, %v4566_v3  ;;  %v4636_v30 = vadd.f32 %v14129_v0, %v4616_v11 }
 0x516   : > { %v4595_v53 = vadd.f32 %v4567_v27, %v4536_v52  ;;  %v4507_v26 = vpop.f32.mrb[240].mxu1  ;;  %v4706_v1 = vsel %vm3049_vm2, %v4693_v6, 0.0  ;;  %v4540_v52 = vld [vmem:[#allocation2 + $0x48] sm:$0xff] }
 0x517   : > { %v4568_v42 = vrot.slane %v4507_v26, 3  ;;  %v10796_v58 = vpop.f32.mrb[241].mxu1  ;;  %v14150_v28 = vmul.f32 %v4636_v30, %v12197_v50 }
 0x518   : > { %v4617_v44 = vld [vmem:[#allocation2 + $0x18] sm:$0xff]  ;;  %4607 = vst.msk [vmem:[#allocation2 + $0x28] sm:$0xff] %vm3049_vm2, %v4595_v53  ;;  %v4705_v53 = vsel %vm3049_vm2, %v4692_v46, 0.0 }
 0x519   : > { %4823 = vst.msk [vmem:[#allocation2 + $0x18] sm:$0xff] %vm868_vm4, %v11969_v7  ;;  %v4569_v19 = vsel %vm2576_vm11, %v4566_v3, %v4568_v42  ;;  %v4637_v61 = vadd.f32 %v14129_v0, %v4617_v44  ;;  %v4694_v33 = vmul.f32 %v14150_v28, %v14150_v28  ;;  %v4660_v3 = vsel %vm3049_vm2, %v14147_v59, 0.0 }
 0x51a   : > { %v4596_v41 = vadd.f32 %v4569_v19, %v4537_v13  ;;  %v4512_v23 = vpop.f32.mrb[242].mxu1  ;;  %v4663_v26 = vsel %vm3049_vm2, %v14150_v28, 0.0  ;;  %v4662_v21 = vadd.f32 %v4661_v60, %v4660_v3  ;;  %v4707_v13 = vadd.f32 %v4706_v1, %v4705_v53 }
 0x51b   : > { %v4618_v48 = vld [vmem:[#allocation2 + $0x20] sm:$0xff]  ;;  %v4570_v49 = vrot.slane %v4512_v23, 3  ;;  %v10799_v10 = vpop.f32.mrb[243].mxu1  ;;  %v14159_v36 = vmul.f32 %v4637_v61, %v12216_v5  ;;  %v4708_v19 = vsel %vm3049_vm2, %v4694_v33, 0.0  ;;  %v4542_v61 = vld [vmem:[#allocation2 + $0x58] sm:$0x1] }
 0x51c   : > { %4824 = vst.msk [vmem:[#allocation2 + $0x20] sm:$0xff] %vm868_vm4, %v11969_v7  ;;  %v4638_v32 = vadd.f32 %v14129_v0, %v4618_v48 }
 0x51d   : > { %4608 = vst.msk [vmem:[#allocation2 + $0x30] sm:$0xff] %vm3049_vm2, %v4596_v41  ;;  %v4571_v63 = vsel %vm2576_vm11, %v4568_v42, %v4570_v49  ;;  %v4695_v16 = vmul.f32 %v14159_v36, %v14159_v36  ;;  %v4665_v30 = vsel %vm3049_vm2, %v14159_v36, 0.0 }
 0x51e   : > { %v4597_v57 = vadd.f32 %v4571_v63, %v4538_v43  ;;  %v4517_v9 = vpop.f32.mrb[244].mxu1  ;;  %v14171_v55 = vmul.f32 %v4638_v32, %v12227_v15  ;;  %v4664_v43 = vadd.f32 %v4663_v26, %v4662_v21 }
 0x51f   : > { %v4619_v45 = vld [vmem:[#allocation2 + $0x28] sm:$0xff]  ;;  %v4572_v40 = vrot.slane %v4517_v9, 3  ;;  %v10802_v17 = vpop.f32.mrb[245].mxu1  ;;  %v4710_v63 = vsel %vm3049_vm2, %v4695_v16, 0.0 }
 0x520   : > { %4825 = vst.msk [vmem:[#allocation2 + $0x28] sm:$0xff] %vm868_vm4, %v11969_v7  ;;  %v4639_v29 = vadd.f32 %v14129_v0, %v4619_v45  ;;  %v4696_v48 = vmul.f32 %v14171_v55, %v14171_v55 }
 0x521   : > { %4609 = vst.msk [vmem:[#allocation2 + $0x38] sm:$0xff] %vm3049_vm2, %v4597_v57  ;;  %v4573_v22 = vsel %vm2576_vm11, %v4570_v49, %v4572_v40  ;;  %v4541_v57 = vld [vmem:[#allocation2 + $0x50] sm:$0xff] }
 0x522   : > { %v4598_v38 = vadd.f32 %v4573_v22, %v4539_v18  ;;  %v4522_v54 = vpop.f32.mrb[246].mxu1  ;;  %v14186_v44 = vmul.f32 %v4639_v29, %v12238_v25  ;;  %v4709_v18 = vadd.f32 %v4708_v19, %v4707_v13  ;;  %v4666_v22 = vadd.f32 %v4665_v30, %v4664_v43 }
 0x523   : > { %v4574_v20 = vrot.slane %v4522_v54, 3  ;;  %v10805_v14 = vpop.f32.mrb[247].mxu1  ;;  %v4712_v29 = vsel %vm3049_vm2, %v4696_v48, 0.0 }
 0x524   : > { %v4620_v34 = vld [vmem:[#allocation2 + $0x30] sm:$0xff]  ;;  %4610 = vst.msk [vmem:[#allocation2 + $0x40] sm:$0xff] %vm3049_vm2, %v4598_v38  ;;  %v4697_v17 = vmul.f32 %v14186_v44, %v14186_v44  ;;  %v4669_v38 = vsel %vm3049_vm2, %v14186_v44, 0.0 }
 0x525   : > { %v4640_v11 = vadd.f32 %v14129_v0, %v4620_v34  ;;  %4826 = vst.msk [vmem:[#allocation2 + $0x30] sm:$0xff] %vm868_vm4, %v11969_v7  ;;  %v4575_v27 = vsel %vm2576_vm11, %v4572_v40, %v4574_v20  ;;  %v4667_v40 = vsel %vm3049_vm2, %v14171_v55, 0.0  ;;  %v4711_v34 = vadd.f32 %v4710_v63, %v4709_v18 }
 0x526   : > { %v4599_v42 = vadd.f32 %v4575_v27, %v4540_v52  ;;  %v4527_v58 = vpop.f32.mrb[248].mxu1  ;;  %v4714_v14 = vsel %vm3049_vm2, %v4697_v17, 0.0 }
 0x527   : > { %v4576_v41 = vrot.slane %v4527_v58, 3  ;;  %v10808_v23 = vpop.f32.mrb[249].mxu1  ;;  %v14194_v49 = vmul.f32 %v4640_v11, %v12249_v35  ;;  %v4713_v3 = vadd.f32 %v4712_v29, %v4711_v34 }
 0x528   : > { %v4621_v31 = vld [vmem:[#allocation2 + $0x38] sm:$0xff]  ;;  %4611 = vst.msk [vmem:[#allocation2 + $0x48] sm:$0xff] %vm3049_vm2, %v4599_v42  ;;  %v4646_v23 = vadd.f32 %v14129_v0, %v14036_v8 }
 0x529   : > { %v4641_v10 = vadd.f32 %v14129_v0, %v4621_v31  ;;  %4827 = vst.msk [vmem:[#allocation2 + $0x38] sm:$0xff] %vm868_vm4, %v11969_v7  ;;  %v4577_v9 = vsel %vm2576_vm11, %v4574_v20, %v4576_v41  ;;  %v4601_v45 = vadd.f32 %v4576_v41, %v4542_v61  ;;  %v4698_v54 = vmul.f32 %v14194_v49, %v14194_v49 }
 0x52a   : > { %v4600_v32 = vadd.f32 %v4577_v9, %v4541_v57  ;;  %v4668_v20 = vadd.f32 %v4667_v40, %v4666_v22  ;;  %v4671_v60 = vsel %vm3049_vm2, %v14194_v49, 0.0  ;;  %v4715_v58 = vadd.f32 %v4714_v14, %v4713_v3 }
 0x52b   : > { %v14207_v6 = vmul.f32 %v4641_v10, %v12260_v51  ;;  %v4622_v46 = vld [vmem:[#allocation2 + $0x40] sm:$0xff]  ;;  %4613 = vst.msk [vmem:[#allocation2 + $0x58] sm:$0x1] %vm3061_vm7, %v4601_v45  ;;  %v4716_v27 = vsel %vm3049_vm2, %v4698_v54, 0.0  ;;  %v14262_v18 = vmul.f32 %v4646_v23, %v12315_v56 }
 0x52c   : > { %v4642_v33 = vadd.f32 %v14129_v0, %v4622_v46  ;;  %4828 = vst.msk [vmem:[#allocation2 + $0x40] sm:$0xff] %vm868_vm4, %v11969_v7  ;;  %v4670_v16 = vadd.f32 %v4669_v38, %v4668_v20  ;;  %v4717_v30 = vadd.f32 %v4716_v27, %v4715_v58 }
 0x52d   : > { %4612 = vst.msk [vmem:[#allocation2 + $0x50] sm:$0xff] %vm3049_vm2, %v4600_v32  ;;  %v4699_v1 = vmul.f32 %v14207_v6, %v14207_v6  ;;  %v4673_v53 = vsel %vm3049_vm2, %v14207_v6, 0.0  ;;  %v4704_v20 = vmul.f32 %v14262_v18, %v14262_v18  ;;  %v4683_v3 = vsel %vm3744_vm8, %v14262_v18, 0.0 }
 0x52e   : > { %v14225_v11 = vmul.f32 %v4642_v33, %v12271_v62  ;;  %v4672_v21 = vadd.f32 %v4671_v60, %v4670_v16 }
 0x52f   : > { %v4623_v52 = vld [vmem:[#allocation2 + $0x48] sm:$0xff]  ;;  %v4718_v13 = vsel %vm3049_vm2, %v4699_v1, 0.0 }
 0x530   : > { %v4700_v26 = vmul.f32 %v14225_v11, %v14225_v11  ;;  %v4643_v42 = vadd.f32 %v14129_v0, %v4623_v52  ;;  %4829 = vst.msk [vmem:[#allocation2 + $0x48] sm:$0xff] %vm868_vm4, %v11969_v7  ;;  %v4675_v19 = vsel %vm3049_vm2, %v14225_v11, 0.0  ;;  %v4674_v48 = vadd.f32 %v4673_v53, %v4672_v21 }
 0x531   : > { %v4719_v8 = vadd.f32 %v4718_v13, %v4717_v30  ;;  %v4728_v53 = vsel %vm3744_vm8, %v4704_v20, 0.0 }
 0x532   : > { %v14239_v31 = vmul.f32 %v4643_v42, %v12282_v12  ;;  %v4625_v41 = vld [vmem:[#allocation2 + $0x58] sm:$0xff]  ;;  %v4720_v43 = vsel %vm3049_vm2, %v4700_v26, 0.0  ;;  %v4676_v45 = vadd.f32 %v4675_v19, %v4674_v48 }
 0x533   : > { %v4645_v61 = vadd.f32 %v14129_v0, %v4625_v41  ;;  %4831 = vst.msk [vmem:[#allocation2 + $0x58] sm:$0xff] %vm868_vm4, %v11969_v7  ;;  %v4721_v22 = vadd.f32 %v4720_v43, %v4719_v8 }
 0x534   : > { %v4624_v10 = vld [vmem:[#allocation2 + $0x50] sm:$0xff]  ;;  %v4677_v63 = vsel %vm3049_vm2, %v14239_v31, 0.0  ;;  %v4701_v57 = vmul.f32 %v14239_v31, %v14239_v31 }
 0x535   : > { %v4644_v9 = vadd.f32 %v14129_v0, %v4624_v10  ;;  %4830 = vst.msk [vmem:[#allocation2 + $0x50] sm:$0xff] %vm868_vm4, %v11969_v7  ;;  %v14255_v40 = vmul.f32 %v4645_v61, %v12304_v37  ;;  %v4678_v46 = vadd.f32 %v4677_v63, %v4676_v45 }
 0x536   : > { %v4722_v17 = vsel %vm3049_vm2, %v4701_v57, 0.0 }
 0x537   : > { %v14259_v32 = vmul.f32 %v4644_v9, %v12293_v24  ;;  %v4703_v38 = vmul.f32 %v14255_v40, %v14255_v40  ;;  %v4723_v54 = vadd.f32 %v4722_v17, %v4721_v22  ;;  %v4681_v34 = vsel %vm3049_vm2, %v14255_v40, 0.0 }
 0x539   : > { %v4679_v0 = vsel %vm3049_vm2, %v14259_v32, 0.0  ;;  %v4702_v29 = vmul.f32 %v14259_v32, %v14259_v32  ;;  %v4726_v16 = vsel %vm3049_vm2, %v4703_v38, 0.0 }
 0x53a   : > { %v4680_v33 = vadd.f32 %v4679_v0, %v4678_v46 }
 0x53b   : > { %v4724_v14 = vsel %vm3049_vm2, %v4702_v29, 0.0 }
 0x53c   : > { %v4682_v60 = vadd.f32 %v4681_v34, %v4680_v33  ;;  %v4725_v1 = vadd.f32 %v4724_v14, %v4723_v54 }
 0x53e   : > { %v4684_v52 = vadd.f32 %v4683_v3, %v4682_v60  ;;  %v4727_v27 = vadd.f32 %v4726_v16, %v4725_v1  ;;  %v9096_v16 = vld [vmem:[%s16316_s5 + $0x60] sm:$0xff] }
 0x540   : > { %v4685_v26 = vrot.slane %v4684_v52, 4  ;;  %v4729_v42 = vadd.f32 %v4728_v53, %v4727_v27 }
 0x542   : > { %v4686_v58 = vadd.f32 %v4685_v26, %v4684_v52  ;;  %v4730_v21 = vrot.slane %v4729_v42, 4  ;;  %v9097_v52 = vld [vmem:[%s16316_s5 + $0x68] sm:$0xff] }
 0x544   : > { %v4687_v13 = vrot.slane %v4686_v58, 2  ;;  %v4731_v19 = vadd.f32 %v4730_v21, %v4729_v42  ;;  %v9081_v21 = vld [vmem:[%s16316_s5 + $0x50] sm:$0xff] }
 0x546   : > { %v4688_v41 = vadd.f32 %v4687_v13, %v4686_v58  ;;  %v4732_v23 = vrot.slane %v4731_v19, 2  ;;  %v9082_v13 = vld [vmem:[%s16316_s5 + $0x58] sm:$0xff] }
 0x548   : > { %v4689_v30 = vrot.slane %v4688_v41, 1  ;;  %v4733_v48 = vadd.f32 %v4732_v23, %v4731_v19  ;;  %v11779_v19 = vpack.c.bf16 %v9097_v52, %v9096_v16  ;;  %v9099_v23 = vld [vmem:[%s16316_s5 + $0x78] sm:$0xff] }
 0x54a   : > { %v4690_v10 = vadd.f32 %v4689_v30, %v4688_v41  ;;  %v4734_v61 = vrot.slane %v4733_v48, 1  ;;  %v9098_v41 = vld [vmem:[%s16316_s5 + $0x70] sm:$0xff] }
 0x54c   : > { %v14279_v43 = vmul.f32 0.015625, %v4690_v10  ;;  %v4735_v63 = vadd.f32 %v4734_v61, %v4733_v48  ;;  %v11776_v61 = vpack.c.bf16 %v9082_v13, %v9081_v21  ;;  %v9130_v21 = vld [vmem:[%s16316_s5 + $0xa0] sm:$0xff]  ;;  %v9131_v13 = vld [vmem:[%s16316_s5 + $0xa8] sm:$0xff] }
 0x54e   : > { %v4736_v57 = vmul.f32 0.015625, %v4735_v63  ;;  %v4737_v9 = vmul.f32 %v14279_v43, %v14279_v43  ;;  %v4743_v8 = vsub.f32 %v14159_v36, %v14279_v43  ;;  %v4744_v45 = vsub.f32 %v14171_v55, %v14279_v43 }
 0x54f   : > { %v4745_v17 = vsub.f32 %v14186_v44, %v14279_v43  ;;  %v4746_v46 = vsub.f32 %v14194_v49, %v14279_v43  ;;  %v4747_v0 = vsub.f32 %v14207_v6, %v14279_v43  ;;  %v4748_v29 = vsub.f32 %v14225_v11, %v14279_v43 }
 0x550   : > { %v4738_v22 = vsub.f32 %v4736_v57, %v4737_v9  ;;  %v4749_v38 = vsub.f32 %v14239_v31, %v14279_v43  ;;  %v4750_v36 = vsub.f32 %v14259_v32, %v14279_v43  ;;  %v4751_v55 = vsub.f32 %v14255_v40, %v14279_v43  ;;  %v9079_v40 = vld [vmem:[%s16316_s5 + $0x40] sm:$0xff]  ;;  %v9080_v32 = vld [vmem:[%s16316_s5 + $0x48] sm:$0xff] }
 0x551   : > { %v4740_v49 = vsub.f32 %v14147_v59, %v14279_v43  ;;  %v4741_v6 = vsub.f32 %v14139_v2, %v14279_v43  ;;  %v4742_v31 = vsub.f32 %v14150_v28, %v14279_v43  ;;  %v11773_v53 = vpack.c.bf16 %v9080_v32, %v9079_v40 }
 0x552   : > { %v4739_v44 = vmax.f32 %v4738_v22, 0.0 }
 0x554   : > { %v4753_v54 = vadd.f32 1e-05, %v4739_v44 }
 0x556   : > { %11943 = vrsqrt.f32 %v4753_v54 }
 0x560   : > { %v11944_v33 = vpop.eup %11943 }
 0x561   : > { %v4755_v11 = vmul.f32 %v11944_v33, %v4740_v49  ;;  %v4756_v34 = vmul.f32 %v11944_v33, %v4741_v6  ;;  %v4758_v20 = vmul.f32 %v11944_v33, %v4743_v8  ;;  %v4759_v14 = vmul.f32 %v11944_v33, %v4744_v45 }
 0x562   : > { %v14313_v59 = vmul.f32 %v11944_v33, %v4745_v17  ;;  %v14315_v60 = vmul.f32 %v11944_v33, %v4746_v46  ;;  %v14317_v2 = vmul.f32 %v11944_v33, %v4747_v0  ;;  %v4757_v28 = vmul.f32 %v11944_v33, %v4742_v31 }
 0x563   : > { %vm4768_vm10 = vcmp.ge.f32.partialorder %v4755_v11, 0.0  ;;  %v4781_v1 = vmul.f32 0.2, %v4755_v11  ;;  %v4782_v3 = vmul.f32 0.2, %v4756_v34  ;;  %vm4769_vm13 = vcmp.ge.f32.partialorder %v4756_v34, 0.0 }
 0x564   : > { %v4783_v58 = vmul.f32 0.2, %v4757_v28  ;;  %vm4770_vm14 = vcmp.ge.f32.partialorder %v4757_v28, 0.0  ;;  %v14346_v30 = vmul.f32 %v11944_v33, %v4748_v29  ;;  %v14348_v48 = vmul.f32 %v11944_v33, %v4749_v38 }
 0x565   : > { %v4794_v27 = vsel %vm4768_vm10, %v4755_v11, %v4781_v1  ;;  %v4795_v42 = vsel %vm4769_vm13, %v4756_v34, %v4782_v3  ;;  %v14356_v63 = vmul.f32 %v11944_v33, %v4750_v36  ;;  %v4784_v9 = vmul.f32 0.2, %v4758_v20 }
 0x566   : > { %v14326_v26 = vmul.f32 %v4794_v27, %v12183_v39  ;;  %v14353_v10 = vmul.f32 %v4795_v42, %v12190_v47  ;;  %v4796_v57 = vsel %vm4770_vm14, %v4757_v28, %v4783_v58  ;;  %v4752_v8 = vsub.f32 %v14262_v18, %v14279_v43  ;;  %v9113_v42 = vld [vmem:[%s16316_s5 + $0x80] sm:$0xff]  ;;  %v9114_v58 = vld [vmem:[%s16316_s5 + $0x88] sm:$0xff] }
 0x567   : > { %v11782_v45 = vpack.c.bf16 %v9099_v23, %v9098_v41  ;;  %vm4771_vm15 = vcmp.ge.f32.partialorder %v4758_v20, 0.0  ;;  %v14368_v17 = vmul.f32 %v11944_v33, %v4751_v55  ;;  %v14373_v18 = vmul.f32 %v4796_v57, %v12197_v50  ;;  %v9115_v41 = vld [vmem:[%s16316_s5 + $0x90] sm:$0xff]  ;;  %v9116_v23 = vld [vmem:[%s16316_s5 + $0x98] sm:$0xff] }
 0x568   : > { %10818 = vmatmul.mubr.msk.f32.vlgmr.msra.gmra.mrb[244].mxu0 %vm3049_vm2, %v14326_v26  ;;  %10865 = vmatmul.mubr.msk.f32.vlgmr.msra.gmra.mrb[250].mxu1 %vm3049_vm2, %v14326_v26  ;;  %v14370_v22 = vmul.f32 %v11944_v33, %v4752_v8  ;;  %v4797_v43 = vsel %vm4771_vm15, %v4758_v20, %v4784_v9  ;;  %v4785_v46 = vmul.f32 0.2, %v4759_v14  ;;  %vm4772_vm1 = vcmp.ge.f32.partialorder %v4759_v14, 0.0  ;;  %v9147_v9 = vld [vmem:[%s16316_s5 + $0xc0] sm:$0xff]  ;;  %v9148_v8 = vld [vmem:[%s16316_s5 + $0xc8] sm:$0xff] }
 0x569   : > { %11774 = vmatpush3.bf16.msra.mxu0 %v11773_v53  ;;  %10820 = vmatprep.mubr.msk.f32.mxu0 %vm11970_vm0, %v11969_v7  ;;  %v14386_v0 = vmul.f32 %v4797_v43, %v12216_v5  ;;  %v4786_v38 = vmul.f32 0.2, %v14313_v59  ;;  %vm4773_vm7 = vcmp.ge.f32.partialorder %v14313_v59, 0.0  ;;  %v4787_v44 = vmul.f32 0.2, %v14315_v60  ;;  %v9149_v43 = vld [vmem:[%s16316_s5 + $0xd0] sm:$0xff] }
 0x56a   : > { %10867 = vmatprep.mubr.msk.f32.mxu1 %vm11970_vm0, %v11969_v7  ;;  %11775 = vmatprep.subr.bf16.mxu0 %v11968_v4  ;;  %v4798_v29 = vsel %vm4772_vm1, %v4759_v14, %v4785_v46  ;;  %vm4774_vm6 = vcmp.ge.f32.partialorder %v14315_v60, 0.0  ;;  %v4788_v6 = vmul.f32 0.2, %v14317_v2  ;;  %vm4775_vm3 = vcmp.ge.f32.partialorder %v14317_v2, 0.0  ;;  %v9150_v46 = vld [vmem:[%s16316_s5 + $0xd8] sm:$0xff] }
 0x56b   : > { %11780 = vmatpush3.bf16.msra.mxu1 %v11779_v19  ;;  %v14400_v36 = vmul.f32 %v4798_v29, %v12227_v15  ;;  %v4799_v55 = vsel %vm4773_vm7, %v14313_v59, %v4786_v38  ;;  %v4800_v49 = vsel %vm4774_vm6, %v14315_v60, %v4787_v44  ;;  %v4789_v34 = vmul.f32 0.2, %v14346_v30  ;;  %v9166_v38 = vld [vmem:[%s16316_s5 + $0xf0] sm:$0xff] }
 0x56c   : > { %10821 = vmatmul.mubr.msk.f32.gmra.mrb[246].mxu0 %vm3049_vm2, %v14353_v10  ;;  %10868 = vmatmul.mubr.msk.f32.gmra.mrb[252].mxu1 %vm3049_vm2, %v14353_v10  ;;  %v14414_v54 = vmul.f32 %v4799_v55, %v12238_v25  ;;  %v14428_v33 = vmul.f32 %v4800_v49, %v12249_v35  ;;  %v4801_v11 = vsel %vm4775_vm3, %v14317_v2, %v4788_v6  ;;  %vm4776_vm8 = vcmp.ge.f32.partialorder %v14346_v30, 0.0  ;;  %v9167_v55 = vld [vmem:[%s16316_s5 + $0xf8] sm:$0xff]  ;;  %v9181_v6 = vld [vmem:[%s16316_s5 + $0x100] sm:$0xff] }
 0x56d   : > { %10823 = vmatprep.mubr.msk.f32.mxu0 %vm11970_vm0, %v11969_v7  ;;  %10870 = vmatprep.mubr.msk.f32.mxu1 %vm11970_vm0, %v11969_v7  ;;  %v14442_v31 = vmul.f32 %v4801_v11, %v12260_v51  ;;  %v4802_v20 = vsel %vm4776_vm8, %v14346_v30, %v4789_v34  ;;  %v4790_v40 = vmul.f32 0.2, %v14348_v48  ;;  %vm4777_vm10 = vcmp.ge.f32.partialorder %v14348_v48, 0.0  ;;  %v9182_v11 = vld [vmem:[%s16316_s5 + $0x108] sm:$0xff] }
 0x56e   : > { %11777 = vmatpush3.bf16.msra.mxu0 %v11776_v61  ;;  %11781 = vmatprep.subr.bf16.mxu1 %v11968_v4  ;;  %v14456_v32 = vmul.f32 %v4802_v20, %v12271_v62  ;;  %v4791_v59 = vmul.f32 0.2, %v14356_v63  ;;  %vm4778_vm13 = vcmp.ge.f32.partialorder %v14356_v63, 0.0  ;;  %v4792_v1 = vmul.f32 0.2, %v14368_v17  ;;  %v9133_v61 = vld [vmem:[%s16316_s5 + $0xb8] sm:$0xff] }
 0x56f   : > { %11783 = vmatpush3.bf16.msra.mxu1 %v11782_v45  ;;  %11784 = vmatprep.subr.bf16.mxu0 %v11968_v4  ;;  %v4803_v14 = vsel %vm4777_vm10, %v14348_v48, %v4790_v40  ;;  %vm4779_vm14 = vcmp.ge.f32.partialorder %v14368_v17, 0.0  ;;  %v4793_v16 = vmul.f32 0.2, %v14370_v22  ;;  %vm4780_vm15 = vcmp.ge.f32.partialorder %v14370_v22, 0.0  ;;  %v9132_v48 = vld [vmem:[%s16316_s5 + $0xb0] sm:$0xff]  ;;  %v9164_v45 = vld [vmem:[%s16316_s5 + $0xe0] sm:$0xff] }
 0x570   : > { %10824 = vmatmul.mubr.msk.f32.gmra.mrb[248].mxu0 %vm3049_vm2, %v14373_v18  ;;  %10871 = vmatmul.mubr.msk.f32.gmra.mrb[254].mxu1 %vm3049_vm2, %v14373_v18  ;;  %v14470_v60 = vmul.f32 %v4803_v14, %v12282_v12  ;;  %v4804_v2 = vsel %vm4778_vm13, %v14356_v63, %v4791_v59  ;;  %v4805_v28 = vsel %vm4779_vm14, %v14368_v17, %v4792_v1  ;;  %v9165_v17 = vld [vmem:[%s16316_s5 + $0xe8] sm:$0xff]  ;;  %v9183_v20 = vld [vmem:[%s16316_s5 + $0x110] sm:$0xff]  ;;  %v9184_v40 = vld [vmem:[%s16316_s5 + $0x118] sm:$0xff]  ;;  %vm5040_vm1 = vcmask 516096  }
 0x571   : > { %10826 = vmatprep.mubr.msk.f32.mxu0 %vm11970_vm0, %v11969_v7  ;;  %10873 = vmatprep.mubr.msk.f32.mxu1 %vm11970_vm0, %v11969_v7  ;;  %v14484_v3 = vmul.f32 %v4804_v2, %v12293_v24  ;;  %v14498_v52 = vmul.f32 %v4805_v28, %v12304_v37  ;;  %v4806_v27 = vsel %vm4780_vm15, %v14370_v22, %v4793_v16  ;;  %v5005_v59 = vld [vmem:[#allocation2 + $0xb] sm:$0xff]  ;;  %vm5382_vm7 = vcmask 518144  }
 0x572   : > { %11790 = vmatprep.subr.bf16.mxu1 %v11968_v4  ;;  %v14510_v53 = vmul.f32 %v4806_v27, %v12315_v56  ;;  %v11785_v19 = vpack.c.bf16 %v9114_v58, %v9113_v42  ;;  %v11791_v30 = vpack.c.bf16 %v9131_v13, %v9130_v21  ;;  %v11788_v63 = vpack.c.bf16 %v9116_v23, %v9115_v41  ;;  %v5006_v42 = vld [vmem:[#allocation2 + $0x13] sm:$0xff]  ;;  %v5007_v41 = vld [vmem:[#allocation2 + $0x1b] sm:$0xff] }
 0x573   : > { %v11794_v57 = vpack.c.bf16 %v9133_v61, %v9132_v48  ;;  %v11797_v22 = vpack.c.bf16 %v9148_v8, %v9147_v9  ;;  %v11803_v29 = vpack.c.bf16 %v9165_v17, %v9164_v45  ;;  %v11800_v44 = vpack.c.bf16 %v9150_v46, %v9149_v43 }
 0x574   : > { %10827 = vmatmul.mubr.msk.f32.gmra.mrb[250].mxu0 %vm3049_vm2, %v14386_v0  ;;  %10874 = vmatmul.mubr.msk.f32.gmra.mrb[0].mxu1 %vm3049_vm2, %v14386_v0  ;;  %v11806_v49 = vpack.c.bf16 %v9167_v55, %v9166_v38  ;;  %v11809_v34 = vpack.c.bf16 %v9182_v11, %v9181_v6  ;;  %v11812_v14 = vpack.c.bf16 %v9184_v40, %v9183_v20 }
 0x575   : > { %10829 = vmatprep.mubr.msk.f32.mxu0 %vm11970_vm0, %v11969_v7  ;;  %10876 = vmatprep.mubr.msk.f32.mxu1 %vm11970_vm0, %v11969_v7 }
 0x578   : > { %10830 = vmatmul.mubr.msk.f32.gmra.mrb[252].mxu0 %vm3049_vm2, %v14400_v36  ;;  %10877 = vmatmul.mubr.msk.f32.gmra.mrb[2].mxu1 %vm3049_vm2, %v14400_v36 }
 0x579   : > { %10832 = vmatprep.mubr.msk.f32.mxu0 %vm11970_vm0, %v11969_v7  ;;  %10879 = vmatprep.mubr.msk.f32.mxu1 %vm11970_vm0, %v11969_v7 }
 0x57c   : > { %10833 = vmatmul.mubr.msk.f32.gmra.mrb[254].mxu0 %vm3049_vm2, %v14414_v54  ;;  %10880 = vmatmul.mubr.msk.f32.gmra.mrb[4].mxu1 %vm3049_vm2, %v14414_v54 }
 0x57d   : > { %10835 = vmatprep.mubr.msk.f32.mxu0 %vm11970_vm0, %v11969_v7  ;;  %10882 = vmatprep.mubr.msk.f32.mxu1 %vm11970_vm0, %v11969_v7 }
 0x580   : > { %10836 = vmatmul.mubr.msk.f32.gmra.mrb[0].mxu0 %vm3049_vm2, %v14428_v33  ;;  %10883 = vmatmul.mubr.msk.f32.gmra.mrb[6].mxu1 %vm3049_vm2, %v14428_v33 }
 0x581   : > { %10838 = vmatprep.mubr.msk.f32.mxu0 %vm11970_vm0, %v11969_v7  ;;  %10885 = vmatprep.mubr.msk.f32.mxu1 %vm11970_vm0, %v11969_v7 }
 0x584   : > { %10839 = vmatmul.mubr.msk.f32.gmra.mrb[2].mxu0 %vm3049_vm2, %v14442_v31  ;;  %10886 = vmatmul.mubr.msk.f32.gmra.mrb[8].mxu1 %vm3049_vm2, %v14442_v31 }
 0x585   : > { %10841 = vmatprep.mubr.msk.f32.mxu0 %vm11970_vm0, %v11969_v7  ;;  %10888 = vmatprep.mubr.msk.f32.mxu1 %vm11970_vm0, %v11969_v7 }
 0x588   : > { %10842 = vmatmul.mubr.msk.f32.gmra.mrb[4].mxu0 %vm3049_vm2, %v14456_v32  ;;  %10889 = vmatmul.mubr.msk.f32.gmra.mrb[10].mxu1 %vm3049_vm2, %v14456_v32 }
 0x589   : > { %10844 = vmatprep.mubr.msk.f32.mxu0 %vm11970_vm0, %v11969_v7  ;;  %10891 = vmatprep.mubr.msk.f32.mxu1 %vm11970_vm0, %v11969_v7 }
 0x58c   : > { %10845 = vmatmul.mubr.msk.f32.gmra.mrb[6].mxu0 %vm3049_vm2, %v14470_v60  ;;  %10892 = vmatmul.mubr.msk.f32.gmra.mrb[12].mxu1 %vm3049_vm2, %v14470_v60 }
 0x58d   : > { %10847 = vmatprep.mubr.msk.f32.mxu0 %vm11970_vm0, %v11969_v7  ;;  %10894 = vmatprep.mubr.msk.f32.mxu1 %vm11970_vm0, %v11969_v7 }
 0x590   : > { %10848 = vmatmul.mubr.msk.f32.gmra.mrb[8].mxu0 %vm3049_vm2, %v14484_v3  ;;  %10895 = vmatmul.mubr.msk.f32.gmra.mrb[14].mxu1 %vm3049_vm2, %v14484_v3 }
 0x591   : > { %10850 = vmatprep.mubr.msk.f32.mxu0 %vm11970_vm0, %v11969_v7  ;;  %10897 = vmatprep.mubr.msk.f32.mxu1 %vm11970_vm0, %v11969_v7 }
 0x594   : > { %10851 = vmatmul.mubr.msk.f32.gmra.mrb[10].mxu0 %vm3049_vm2, %v14498_v52  ;;  %10898 = vmatmul.mubr.msk.f32.gmra.mrb[16].mxu1 %vm3049_vm2, %v14498_v52 }
 0x595   : > { %10853 = vmatprep.mubr.msk.f32.mxu0 %vm11970_vm0, %v11969_v7  ;;  %10900 = vmatprep.mubr.msk.f32.mxu1 %vm11970_vm0, %v11969_v7 }
 0x598   : > { %10854 = vmatmul.mubr.msk.f32.gmra.mrb[12].mxu0 %vm3049_vm2, %v14510_v53  ;;  %10901 = vmatmul.mubr.msk.f32.gmra.mrb[18].mxu1 %vm3049_vm2, %v14510_v53 }
 0x599   : > { %10911 = vmatprep.mubr.msk.f32.mxu0 %vm11970_vm0, %v11969_v7  ;;  %10958 = vmatprep.mubr.msk.f32.mxu1 %vm11970_vm0, %v11969_v7 }
 0x59c   : > { %10912 = vmatmul.mubr.msk.f32.vlgmr.msra.gmra.mrb[14].mxu0 %vm3049_vm2, %v14326_v26  ;;  %10959 = vmatmul.mubr.msk.f32.vlgmr.msra.gmra.mrb[20].mxu1 %vm3049_vm2, %v14326_v26 }
 0x59d   : > { %11786 = vmatpush3.bf16.msra.mxu0 %v11785_v19  ;;  %10914 = vmatprep.mubr.msk.f32.mxu0 %vm11970_vm0, %v11969_v7 }
 0x59e   : > { %10961 = vmatprep.mubr.msk.f32.mxu1 %vm11970_vm0, %v11969_v7  ;;  %11787 = vmatprep.subr.bf16.mxu0 %v11968_v4 }
 0x59f   : > { %11792 = vmatpush3.bf16.msra.mxu1 %v11791_v30 }
 0x5a0   : > { %10915 = vmatmul.mubr.msk.f32.gmra.mrb[16].mxu0 %vm3049_vm2, %v14353_v10  ;;  %10962 = vmatmul.mubr.msk.f32.gmra.mrb[22].mxu1 %vm3049_vm2, %v14353_v10 }
 0x5a1   : > { %10917 = vmatprep.mubr.msk.f32.mxu0 %vm11970_vm0, %v11969_v7  ;;  %10964 = vmatprep.mubr.msk.f32.mxu1 %vm11970_vm0, %v11969_v7 }
 0x5a2   : > { %11789 = vmatpush3.bf16.msra.mxu0 %v11788_v63  ;;  %11793 = vmatprep.subr.bf16.mxu1 %v11968_v4 }
 0x5a3   : > { %11795 = vmatpush3.bf16.msra.mxu1 %v11794_v57  ;;  %11796 = vmatprep.subr.bf16.mxu0 %v11968_v4  ;;  %v5008_v57 = vld [vmem:[#allocation2 + $0x23] sm:$0xff] }
 0x5a4   : > { %10918 = vmatmul.mubr.msk.f32.gmra.mrb[18].mxu0 %vm3049_vm2, %v14373_v18  ;;  %10965 = vmatmul.mubr.msk.f32.gmra.mrb[24].mxu1 %vm3049_vm2, %v14373_v18 }
 0x5a5   : > { %10920 = vmatprep.mubr.msk.f32.mxu0 %vm11970_vm0, %v11969_v7  ;;  %10967 = vmatprep.mubr.msk.f32.mxu1 %vm11970_vm0, %v11969_v7 }
 0x5a6   : > { %11802 = vmatprep.subr.bf16.mxu1 %v11968_v4 }
 0x5a8   : > { %10921 = vmatmul.mubr.msk.f32.gmra.mrb[20].mxu0 %vm3049_vm2, %v14386_v0  ;;  %10968 = vmatmul.mubr.msk.f32.gmra.mrb[26].mxu1 %vm3049_vm2, %v14386_v0 }
 0x5a9   : > { %10923 = vmatprep.mubr.msk.f32.mxu0 %vm11970_vm0, %v11969_v7  ;;  %10970 = vmatprep.mubr.msk.f32.mxu1 %vm11970_vm0, %v11969_v7 }
 0x5ac   : > { %10924 = vmatmul.mubr.msk.f32.gmra.mrb[22].mxu0 %vm3049_vm2, %v14400_v36  ;;  %10971 = vmatmul.mubr.msk.f32.gmra.mrb[28].mxu1 %vm3049_vm2, %v14400_v36 }
 0x5ad   : > { %10926 = vmatprep.mubr.msk.f32.mxu0 %vm11970_vm0, %v11969_v7  ;;  %10973 = vmatprep.mubr.msk.f32.mxu1 %vm11970_vm0, %v11969_v7 }
 0x5b0   : > { %10927 = vmatmul.mubr.msk.f32.gmra.mrb[24].mxu0 %vm3049_vm2, %v14414_v54  ;;  %10974 = vmatmul.mubr.msk.f32.gmra.mrb[30].mxu1 %vm3049_vm2, %v14414_v54 }
 0x5b1   : > { %10929 = vmatprep.mubr.msk.f32.mxu0 %vm11970_vm0, %v11969_v7  ;;  %10976 = vmatprep.mubr.msk.f32.mxu1 %vm11970_vm0, %v11969_v7 }
 0x5b4   : > { %10930 = vmatmul.mubr.msk.f32.gmra.mrb[26].mxu0 %vm3049_vm2, %v14428_v33  ;;  %10977 = vmatmul.mubr.msk.f32.gmra.mrb[32].mxu1 %vm3049_vm2, %v14428_v33 }
 0x5b5   : > { %10932 = vmatprep.mubr.msk.f32.mxu0 %vm11970_vm0, %v11969_v7  ;;  %10979 = vmatprep.mubr.msk.f32.mxu1 %vm11970_vm0, %v11969_v7 }
 0x5b8   : > { %10933 = vmatmul.mubr.msk.f32.gmra.mrb[28].mxu0 %vm3049_vm2, %v14442_v31  ;;  %10980 = vmatmul.mubr.msk.f32.gmra.mrb[34].mxu1 %vm3049_vm2, %v14442_v31 }
 0x5b9   : > { %10935 = vmatprep.mubr.msk.f32.mxu0 %vm11970_vm0, %v11969_v7  ;;  %10982 = vmatprep.mubr.msk.f32.mxu1 %vm11970_vm0, %v11969_v7 }
 0x5bc   : > { %10936 = vmatmul.mubr.msk.f32.gmra.mrb[30].mxu0 %vm3049_vm2, %v14456_v32  ;;  %10983 = vmatmul.mubr.msk.f32.gmra.mrb[36].mxu1 %vm3049_vm2, %v14456_v32 }
 0x5bd   : > { %10938 = vmatprep.mubr.msk.f32.mxu0 %vm11970_vm0, %v11969_v7  ;;  %10985 = vmatprep.mubr.msk.f32.mxu1 %vm11970_vm0, %v11969_v7 }
 0x5c0   : > { %10939 = vmatmul.mubr.msk.f32.gmra.mrb[32].mxu0 %vm3049_vm2, %v14470_v60  ;;  %10986 = vmatmul.mubr.msk.f32.gmra.mrb[38].mxu1 %vm3049_vm2, %v14470_v60 }
 0x5c1   : > { %10941 = vmatprep.mubr.msk.f32.mxu0 %vm11970_vm0, %v11969_v7  ;;  %10988 = vmatprep.mubr.msk.f32.mxu1 %vm11970_vm0, %v11969_v7 }
 0x5c4   : > { %10942 = vmatmul.mubr.msk.f32.gmra.mrb[34].mxu0 %vm3049_vm2, %v14484_v3  ;;  %10989 = vmatmul.mubr.msk.f32.gmra.mrb[40].mxu1 %vm3049_vm2, %v14484_v3 }
 0x5c5   : > { %10944 = vmatprep.mubr.msk.f32.mxu0 %vm11970_vm0, %v11969_v7  ;;  %10991 = vmatprep.mubr.msk.f32.mxu1 %vm11970_vm0, %v11969_v7 }
 0x5c8   : > { %10945 = vmatmul.mubr.msk.f32.gmra.mrb[36].mxu0 %vm3049_vm2, %v14498_v52  ;;  %10992 = vmatmul.mubr.msk.f32.gmra.mrb[42].mxu1 %vm3049_vm2, %v14498_v52 }
 0x5c9   : > { %10947 = vmatprep.mubr.msk.f32.mxu0 %vm11970_vm0, %v11969_v7  ;;  %10994 = vmatprep.mubr.msk.f32.mxu1 %vm11970_vm0, %v11969_v7 }
 0x5cc   : > { %10948 = vmatmul.mubr.msk.f32.gmra.mrb[38].mxu0 %vm3049_vm2, %v14510_v53  ;;  %10995 = vmatmul.mubr.msk.f32.gmra.mrb[44].mxu1 %vm3049_vm2, %v14510_v53 }
 0x5cd   : > { %11005 = vmatprep.mubr.msk.f32.mxu0 %vm11970_vm0, %v11969_v7  ;;  %11052 = vmatprep.mubr.msk.f32.mxu1 %vm11970_vm0, %v11969_v7 }
 0x5d0   : > { %11006 = vmatmul.mubr.msk.f32.vlgmr.msra.gmra.mrb[40].mxu0 %vm3049_vm2, %v14326_v26  ;;  %11053 = vmatmul.mubr.msk.f32.vlgmr.msra.gmra.mrb[46].mxu1 %vm3049_vm2, %v14326_v26 }
 0x5d1   : > { %11798 = vmatpush3.bf16.msra.mxu0 %v11797_v22  ;;  %11008 = vmatprep.mubr.msk.f32.mxu0 %vm11970_vm0, %v11969_v7 }
 0x5d2   : > { %11055 = vmatprep.mubr.msk.f32.mxu1 %vm11970_vm0, %v11969_v7  ;;  %11799 = vmatprep.subr.bf16.mxu0 %v11968_v4 }
 0x5d3   : > { %11804 = vmatpush3.bf16.msra.mxu1 %v11803_v29 }
 0x5d4   : > { %11009 = vmatmul.mubr.msk.f32.gmra.mrb[42].mxu0 %vm3049_vm2, %v14353_v10  ;;  %11056 = vmatmul.mubr.msk.f32.gmra.mrb[48].mxu1 %vm3049_vm2, %v14353_v10 }
 0x5d5   : > { %11011 = vmatprep.mubr.msk.f32.mxu0 %vm11970_vm0, %v11969_v7  ;;  %11058 = vmatprep.mubr.msk.f32.mxu1 %vm11970_vm0, %v11969_v7 }
 0x5d6   : > { %11801 = vmatpush3.bf16.msra.mxu0 %v11800_v44  ;;  %11805 = vmatprep.subr.bf16.mxu1 %v11968_v4 }
 0x5d7   : > { %11807 = vmatpush3.bf16.msra.mxu1 %v11806_v49  ;;  %11808 = vmatprep.subr.bf16.mxu0 %v11968_v4 }
 0x5d8   : > { %11012 = vmatmul.mubr.msk.f32.gmra.mrb[44].mxu0 %vm3049_vm2, %v14373_v18  ;;  %11059 = vmatmul.mubr.msk.f32.gmra.mrb[50].mxu1 %vm3049_vm2, %v14373_v18 }
 0x5d9   : > { %11014 = vmatprep.mubr.msk.f32.mxu0 %vm11970_vm0, %v11969_v7  ;;  %11061 = vmatprep.mubr.msk.f32.mxu1 %vm11970_vm0, %v11969_v7 }
 0x5da   : > { %11814 = vmatprep.subr.bf16.mxu1 %v11968_v4 }
 0x5dc   : > { %11015 = vmatmul.mubr.msk.f32.gmra.mrb[46].mxu0 %vm3049_vm2, %v14386_v0  ;;  %11062 = vmatmul.mubr.msk.f32.gmra.mrb[52].mxu1 %vm3049_vm2, %v14386_v0 }
 0x5dd   : > { %11017 = vmatprep.mubr.msk.f32.mxu0 %vm11970_vm0, %v11969_v7  ;;  %11064 = vmatprep.mubr.msk.f32.mxu1 %vm11970_vm0, %v11969_v7 }
 0x5e0   : > { %11018 = vmatmul.mubr.msk.f32.gmra.mrb[48].mxu0 %vm3049_vm2, %v14400_v36  ;;  %11065 = vmatmul.mubr.msk.f32.gmra.mrb[54].mxu1 %vm3049_vm2, %v14400_v36 }
 0x5e1   : > { %11020 = vmatprep.mubr.msk.f32.mxu0 %vm11970_vm0, %v11969_v7  ;;  %11067 = vmatprep.mubr.msk.f32.mxu1 %vm11970_vm0, %v11969_v7 }
 0x5e4   : > { %11021 = vmatmul.mubr.msk.f32.gmra.mrb[50].mxu0 %vm3049_vm2, %v14414_v54  ;;  %11068 = vmatmul.mubr.msk.f32.gmra.mrb[56].mxu1 %vm3049_vm2, %v14414_v54 }
 0x5e5   : > { %11023 = vmatprep.mubr.msk.f32.mxu0 %vm11970_vm0, %v11969_v7  ;;  %11070 = vmatprep.mubr.msk.f32.mxu1 %vm11970_vm0, %v11969_v7 }
 0x5e8   : > { %11024 = vmatmul.mubr.msk.f32.gmra.mrb[52].mxu0 %vm3049_vm2, %v14428_v33  ;;  %11071 = vmatmul.mubr.msk.f32.gmra.mrb[58].mxu1 %vm3049_vm2, %v14428_v33 }
 0x5e9   : > { %11026 = vmatprep.mubr.msk.f32.mxu0 %vm11970_vm0, %v11969_v7  ;;  %11073 = vmatprep.mubr.msk.f32.mxu1 %vm11970_vm0, %v11969_v7 }
 0x5ec   : > { %11027 = vmatmul.mubr.msk.f32.gmra.mrb[54].mxu0 %vm3049_vm2, %v14442_v31  ;;  %11074 = vmatmul.mubr.msk.f32.gmra.mrb[60].mxu1 %vm3049_vm2, %v14442_v31 }
 0x5ed   : > { %11029 = vmatprep.mubr.msk.f32.mxu0 %vm11970_vm0, %v11969_v7  ;;  %11076 = vmatprep.mubr.msk.f32.mxu1 %vm11970_vm0, %v11969_v7 }
 0x5f0   : > { %11030 = vmatmul.mubr.msk.f32.gmra.mrb[56].mxu0 %vm3049_vm2, %v14456_v32  ;;  %11077 = vmatmul.mubr.msk.f32.gmra.mrb[62].mxu1 %vm3049_vm2, %v14456_v32 }
 0x5f1   : > { %11032 = vmatprep.mubr.msk.f32.mxu0 %vm11970_vm0, %v11969_v7  ;;  %11079 = vmatprep.mubr.msk.f32.mxu1 %vm11970_vm0, %v11969_v7 }
 0x5f4   : > { %11033 = vmatmul.mubr.msk.f32.gmra.mrb[58].mxu0 %vm3049_vm2, %v14470_v60  ;;  %11080 = vmatmul.mubr.msk.f32.gmra.mrb[64].mxu1 %vm3049_vm2, %v14470_v60 }
 0x5f5   : > { %11035 = vmatprep.mubr.msk.f32.mxu0 %vm11970_vm0, %v11969_v7  ;;  %11082 = vmatprep.mubr.msk.f32.mxu1 %vm11970_vm0, %v11969_v7 }
 0x5f8   : > { %11036 = vmatmul.mubr.msk.f32.gmra.mrb[60].mxu0 %vm3049_vm2, %v14484_v3  ;;  %11083 = vmatmul.mubr.msk.f32.gmra.mrb[66].mxu1 %vm3049_vm2, %v14484_v3 }
 0x5f9   : > { %11038 = vmatprep.mubr.msk.f32.mxu0 %vm11970_vm0, %v11969_v7  ;;  %11085 = vmatprep.mubr.msk.f32.mxu1 %vm11970_vm0, %v11969_v7 }
 0x5fc   : > { %11039 = vmatmul.mubr.msk.f32.gmra.mrb[62].mxu0 %vm3049_vm2, %v14498_v52  ;;  %11086 = vmatmul.mubr.msk.f32.gmra.mrb[68].mxu1 %vm3049_vm2, %v14498_v52 }
 0x5fd   : > { %11041 = vmatprep.mubr.msk.f32.mxu0 %vm11970_vm0, %v11969_v7  ;;  %11088 = vmatprep.mubr.msk.f32.mxu1 %vm11970_vm0, %v11969_v7 }
 0x600   : > { %11042 = vmatmul.mubr.msk.f32.gmra.mrb[64].mxu0 %vm3049_vm2, %v14510_v53  ;;  %11089 = vmatmul.mubr.msk.f32.gmra.mrb[70].mxu1 %vm3049_vm2, %v14510_v53 }
 0x601   : > { %11099 = vmatprep.mubr.msk.f32.mxu0 %vm11970_vm0, %v11969_v7  ;;  %11146 = vmatprep.mubr.msk.f32.mxu1 %vm11970_vm0, %v11969_v7 }
 0x604   : > { %11100 = vmatmul.mubr.msk.f32.vlgmr.msra.gmra.mrb[66].mxu0 %vm3049_vm2, %v14326_v26  ;;  %11147 = vmatmul.mubr.msk.f32.vlgmr.msra.gmra.mrb[72].mxu1 %vm3049_vm2, %v14326_v26 }
 0x605   : > { %11810 = vmatpush3.bf16.msra.mxu0 %v11809_v34  ;;  %11102 = vmatprep.mubr.msk.f32.mxu0 %vm11970_vm0, %v11969_v7 }
 0x606   : > { %11149 = vmatprep.mubr.msk.f32.mxu1 %vm11970_vm0, %v11969_v7  ;;  %11811 = vmatprep.subr.bf16.mxu0 %v11968_v4 }
 0x608   : > { %11103 = vmatmul.mubr.msk.f32.gmra.mrb[68].mxu0 %vm3049_vm2, %v14353_v10  ;;  %11150 = vmatmul.mubr.msk.f32.gmra.mrb[74].mxu1 %vm3049_vm2, %v14353_v10 }
 0x609   : > { %11105 = vmatprep.mubr.msk.f32.mxu0 %vm11970_vm0, %v11969_v7  ;;  %11152 = vmatprep.mubr.msk.f32.mxu1 %vm11970_vm0, %v11969_v7 }
 0x60a   : > { %11813 = vmatpush3.bf16.msra.mxu0 %v11812_v14 }
 0x60b   : > { %11826 = vmatprep.subr.bf16.mxu0 %v11968_v4 }
 0x60c   : > { %11106 = vmatmul.mubr.msk.f32.gmra.mrb[70].mxu0 %vm3049_vm2, %v14373_v18  ;;  %11153 = vmatmul.mubr.msk.f32.gmra.mrb[76].mxu1 %vm3049_vm2, %v14373_v18 }
 0x60d   : > { %11108 = vmatprep.mubr.msk.f32.mxu0 %vm11970_vm0, %v11969_v7  ;;  %11155 = vmatprep.mubr.msk.f32.mxu1 %vm11970_vm0, %v11969_v7 }
 0x610   : > { %11109 = vmatmul.mubr.msk.f32.gmra.mrb[72].mxu0 %vm3049_vm2, %v14386_v0  ;;  %11156 = vmatmul.mubr.msk.f32.gmra.mrb[78].mxu1 %vm3049_vm2, %v14386_v0 }
 0x611   : > { %11111 = vmatprep.mubr.msk.f32.mxu0 %vm11970_vm0, %v11969_v7  ;;  %11158 = vmatprep.mubr.msk.f32.mxu1 %vm11970_vm0, %v11969_v7 }
 0x614   : > { %11112 = vmatmul.mubr.msk.f32.gmra.mrb[74].mxu0 %vm3049_vm2, %v14400_v36  ;;  %11159 = vmatmul.mubr.msk.f32.gmra.mrb[80].mxu1 %vm3049_vm2, %v14400_v36 }
 0x615   : > { %11114 = vmatprep.mubr.msk.f32.mxu0 %vm11970_vm0, %v11969_v7  ;;  %11161 = vmatprep.mubr.msk.f32.mxu1 %vm11970_vm0, %v11969_v7 }
 0x618   : > { %11115 = vmatmul.mubr.msk.f32.gmra.mrb[76].mxu0 %vm3049_vm2, %v14414_v54  ;;  %11162 = vmatmul.mubr.msk.f32.gmra.mrb[82].mxu1 %vm3049_vm2, %v14414_v54 }
 0x619   : > { %11117 = vmatprep.mubr.msk.f32.mxu0 %vm11970_vm0, %v11969_v7  ;;  %11164 = vmatprep.mubr.msk.f32.mxu1 %vm11970_vm0, %v11969_v7 }
 0x61c   : > { %11118 = vmatmul.mubr.msk.f32.gmra.mrb[78].mxu0 %vm3049_vm2, %v14428_v33  ;;  %11165 = vmatmul.mubr.msk.f32.gmra.mrb[84].mxu1 %vm3049_vm2, %v14428_v33 }
 0x61d   : > { %11120 = vmatprep.mubr.msk.f32.mxu0 %vm11970_vm0, %v11969_v7  ;;  %11167 = vmatprep.mubr.msk.f32.mxu1 %vm11970_vm0, %v11969_v7 }
 0x620   : > { %11121 = vmatmul.mubr.msk.f32.gmra.mrb[80].mxu0 %vm3049_vm2, %v14442_v31  ;;  %11168 = vmatmul.mubr.msk.f32.gmra.mrb[86].mxu1 %vm3049_vm2, %v14442_v31 }
 0x621   : > { %11123 = vmatprep.mubr.msk.f32.mxu0 %vm11970_vm0, %v11969_v7  ;;  %11170 = vmatprep.mubr.msk.f32.mxu1 %vm11970_vm0, %v11969_v7 }
 0x624   : > { %11124 = vmatmul.mubr.msk.f32.gmra.mrb[82].mxu0 %vm3049_vm2, %v14456_v32  ;;  %11171 = vmatmul.mubr.msk.f32.gmra.mrb[88].mxu1 %vm3049_vm2, %v14456_v32 }
 0x625   : > { %11126 = vmatprep.mubr.msk.f32.mxu0 %vm11970_vm0, %v11969_v7  ;;  %11173 = vmatprep.mubr.msk.f32.mxu1 %vm11970_vm0, %v11969_v7 }
 0x628   : > { %11127 = vmatmul.mubr.msk.f32.gmra.mrb[84].mxu0 %vm3049_vm2, %v14470_v60  ;;  %11174 = vmatmul.mubr.msk.f32.gmra.mrb[90].mxu1 %vm3049_vm2, %v14470_v60 }
 0x629   : > { %11129 = vmatprep.mubr.msk.f32.mxu0 %vm11970_vm0, %v11969_v7  ;;  %11176 = vmatprep.mubr.msk.f32.mxu1 %vm11970_vm0, %v11969_v7 }
 0x62c   : > { %11130 = vmatmul.mubr.msk.f32.gmra.mrb[86].mxu0 %vm3049_vm2, %v14484_v3  ;;  %11177 = vmatmul.mubr.msk.f32.gmra.mrb[92].mxu1 %vm3049_vm2, %v14484_v3 }
 0x62d   : > { %11132 = vmatprep.mubr.msk.f32.mxu0 %vm11970_vm0, %v11969_v7  ;;  %11179 = vmatprep.mubr.msk.f32.mxu1 %vm11970_vm0, %v11969_v7 }
 0x630   : > { %11133 = vmatmul.mubr.msk.f32.gmra.mrb[88].mxu0 %vm3049_vm2, %v14498_v52  ;;  %11180 = vmatmul.mubr.msk.f32.gmra.mrb[94].mxu1 %vm3049_vm2, %v14498_v52 }
 0x631   : > { %11135 = vmatprep.mubr.msk.f32.mxu0 %vm11970_vm0, %v11969_v7  ;;  %11182 = vmatprep.mubr.msk.f32.mxu1 %vm11970_vm0, %v11969_v7 }
 0x634   : > { %11136 = vmatmul.mubr.msk.f32.gmra.mrb[90].mxu0 %vm3049_vm2, %v14510_v53  ;;  %11183 = vmatmul.mubr.msk.f32.gmra.mrb[96].mxu1 %vm3049_vm2, %v14510_v53 }
 0x635   : > { %11193 = vmatprep.mubr.msk.f32.mxu0 %vm11970_vm0, %v11969_v7  ;;  %11248 = vmatprep.mubr.msk.f32.mxu1 %vm11970_vm0, %v11969_v7 }
 0x638   : > { %11194 = vmatmul.mubr.msk.f32.vlgmr.msra.gmra.mrb[92].mxu0 %vm3049_vm2, %v14326_v26 }
 0x639   : > { %11196 = vmatprep.mubr.msk.f32.mxu0 %vm11970_vm0, %v11969_v7 }
 0x63b   : > { %v4942_v2 = vpop.f32.mrb[244].mxu0  ;;  %v5113_v1 = vpop.f32.mrb[250].mxu1 }
 0x63c   : > { %v5017_v28 = vadd.f32 %v5005_v59, %v4942_v2  ;;  %v10819_v16 = vpop.f32.mrb[245].mxu0  ;;  %v10866_v27 = vpop.f32.mrb[251].mxu1  ;;  %11197 = vmatmul.mubr.msk.f32.gmra.mrb[94].mxu0 %vm3049_vm2, %v14353_v10 }
 0x63d   : > { %11199 = vmatprep.mubr.msk.f32.mxu0 %vm11970_vm0, %v11969_v7 }
 0x63e   : > { %5029 = vst.msk [vmem:[#allocation2 + $0xb] sm:$0xff] %vm868_vm4, %v5017_v28 }
 0x63f   : > { %v4947_v58 = vpop.f32.mrb[246].mxu0  ;;  %v5118_v26 = vpop.f32.mrb[252].mxu1 }
 0x640   : > { %v5018_v21 = vadd.f32 %v5006_v42, %v4947_v58  ;;  %v10822_v13 = vpop.f32.mrb[247].mxu0  ;;  %v10869_v19 = vpop.f32.mrb[253].mxu1  ;;  %11200 = vmatmul.mubr.msk.f32.gmra.mrb[96].mxu0 %vm3049_vm2, %v14373_v18 }
 0x641   : > { %11202 = vmatprep.mubr.msk.f32.mxu0 %vm11970_vm0, %v11969_v7 }
 0x642   : > { %5030 = vst.msk [vmem:[#allocation2 + $0x13] sm:$0xff] %vm868_vm4, %v5018_v21 }
 0x643   : > { %v4952_v10 = vpop.f32.mrb[248].mxu0  ;;  %v5123_v23 = vpop.f32.mrb[254].mxu1 }
 0x644   : > { %v5019_v30 = vadd.f32 %v5007_v41, %v4952_v10  ;;  %v10825_v48 = vpop.f32.mrb[249].mxu0  ;;  %v10872_v61 = vpop.f32.mrb[255].mxu1  ;;  %11203 = vmatmul.mubr.msk.f32.gmra.mrb[98].mxu0 %vm3049_vm2, %v14386_v0  ;;  %v5009_v0 = vld [vmem:[#allocation2 + $0x2b] sm:$0xff] }
 0x645   : > { %v5176_v63 = vld [vmem:[#allocation2 + $0xa] sm:$0xff]  ;;  %11205 = vmatprep.mubr.msk.f32.mxu0 %vm11970_vm0, %v11969_v7 }
 0x646   : > { %v5188_v18 = vadd.f32 %v5176_v63, %v5113_v1  ;;  %5031 = vst.msk [vmem:[#allocation2 + $0x1b] sm:$0xff] %vm868_vm4, %v5019_v30 }
 0x647   : > { %v4957_v9 = vpop.f32.mrb[250].mxu0  ;;  %v5128_v8 = vpop.f32.mrb[0].mxu1 }
 0x648   : > { %5200 = vst.msk [vmem:[#allocation2 + $0xa] sm:$0xff] %vm868_vm4, %v5188_v18  ;;  %v5020_v45 = vadd.f32 %v5008_v57, %v4957_v9  ;;  %v10828_v17 = vpop.f32.mrb[251].mxu0  ;;  %v10875_v22 = vpop.f32.mrb[1].mxu1  ;;  %11206 = vmatmul.mubr.msk.f32.gmra.mrb[100].mxu0 %vm3049_vm2, %v14400_v36  ;;  %v5010_v36 = vld [vmem:[#allocation2 + $0x33] sm:$0xff] }
 0x649   : > { %v5177_v43 = vld [vmem:[#allocation2 + $0x12] sm:$0xff]  ;;  %11208 = vmatprep.mubr.msk.f32.mxu0 %vm11970_vm0, %v11969_v7 }
 0x64a   : > { %v5189_v46 = vadd.f32 %v5177_v43, %v5118_v26  ;;  %5032 = vst.msk [vmem:[#allocation2 + $0x23] sm:$0xff] %vm868_vm4, %v5020_v45 }
 0x64b   : > { %v4962_v29 = vpop.f32.mrb[252].mxu0  ;;  %v5133_v38 = vpop.f32.mrb[2].mxu1 }
 0x64c   : > { %5201 = vst.msk [vmem:[#allocation2 + $0x12] sm:$0xff] %vm868_vm4, %v5189_v46  ;;  %v5021_v55 = vadd.f32 %v5009_v0, %v4962_v29  ;;  %v10831_v44 = vpop.f32.mrb[253].mxu0  ;;  %v10878_v49 = vpop.f32.mrb[3].mxu1  ;;  %11209 = vmatmul.mubr.msk.f32.gmra.mrb[102].mxu0 %vm3049_vm2, %v14414_v54  ;;  %v5011_v54 = vld [vmem:[#allocation2 + $0x3b] sm:$0xff] }
 0x64d   : > { %v5178_v6 = vld [vmem:[#allocation2 + $0x1a] sm:$0xff]  ;;  %11211 = vmatprep.mubr.msk.f32.mxu0 %vm11970_vm0, %v11969_v7 }
 0x64e   : > { %v5190_v11 = vadd.f32 %v5178_v6, %v5123_v23  ;;  %5033 = vst.msk [vmem:[#allocation2 + $0x2b] sm:$0xff] %vm868_vm4, %v5021_v55 }
 0x64f   : > { %v4967_v34 = vpop.f32.mrb[254].mxu0  ;;  %v5138_v20 = vpop.f32.mrb[4].mxu1 }
 0x650   : > { %5202 = vst.msk [vmem:[#allocation2 + $0x1a] sm:$0xff] %vm868_vm4, %v5190_v11  ;;  %v5022_v40 = vadd.f32 %v5010_v36, %v4967_v34  ;;  %v10834_v14 = vpop.f32.mrb[255].mxu0  ;;  %v10881_v59 = vpop.f32.mrb[5].mxu1  ;;  %11212 = vmatmul.mubr.msk.f32.gmra.mrb[104].mxu0 %vm3049_vm2, %v14428_v33  ;;  %v5012_v33 = vld [vmem:[#allocation2 + $0x43] sm:$0xff] }
 0x651   : > { %v5179_v2 = vld [vmem:[#allocation2 + $0x22] sm:$0xff]  ;;  %11214 = vmatprep.mubr.msk.f32.mxu0 %vm11970_vm0, %v11969_v7 }
 0x652   : > { %v5191_v1 = vadd.f32 %v5179_v2, %v5128_v8  ;;  %5034 = vst.msk [vmem:[#allocation2 + $0x33] sm:$0xff] %vm868_vm4, %v5022_v40 }
 0x653   : > { %v4972_v28 = vpop.f32.mrb[0].mxu0  ;;  %v5143_v16 = vpop.f32.mrb[6].mxu1 }
 0x654   : > { %5203 = vst.msk [vmem:[#allocation2 + $0x22] sm:$0xff] %vm868_vm4, %v5191_v1  ;;  %v5023_v27 = vadd.f32 %v5011_v54, %v4972_v28  ;;  %v10837_v42 = vpop.f32.mrb[1].mxu0  ;;  %v10884_v58 = vpop.f32.mrb[7].mxu1  ;;  %11215 = vmatmul.mubr.msk.f32.gmra.mrb[106].mxu0 %vm3049_vm2, %v14442_v31  ;;  %v5013_v31 = vld [vmem:[#allocation2 + $0x4b] sm:$0xff] }
 0x655   : > { %v5180_v26 = vld [vmem:[#allocation2 + $0x2a] sm:$0xff]  ;;  %11217 = vmatprep.mubr.msk.f32.mxu0 %vm11970_vm0, %v11969_v7  ;;  %v5519_v58 = vld [vmem:[#allocation2 + $0x1] sm:$0xff] }
 0x656   : > { %v5192_v21 = vadd.f32 %v5180_v26, %v5133_v38  ;;  %5035 = vst.msk [vmem:[#allocation2 + $0x3b] sm:$0xff] %vm868_vm4, %v5023_v27 }
 0x657   : > { %v4977_v13 = vpop.f32.mrb[2].mxu0  ;;  %v5148_v19 = vpop.f32.mrb[8].mxu1 }
 0x658   : > { %5204 = vst.msk [vmem:[#allocation2 + $0x2a] sm:$0xff] %vm868_vm4, %v5192_v21  ;;  %v5024_v41 = vadd.f32 %v5012_v33, %v4977_v13  ;;  %v10840_v10 = vpop.f32.mrb[3].mxu0  ;;  %v10887_v23 = vpop.f32.mrb[9].mxu1  ;;  %11218 = vmatmul.mubr.msk.f32.gmra.mrb[108].mxu0 %vm3049_vm2, %v14456_v32  ;;  %v5014_v32 = vld [vmem:[#allocation2 + $0x53] sm:$0xff]  ;;  %v5347_v21 = vld [vmem:[#allocation2 + $0x9] sm:$0xff] }
 0x659   : > { %v5181_v30 = vld [vmem:[#allocation2 + $0x32] sm:$0xff]  ;;  %11220 = vmatprep.mubr.msk.f32.mxu0 %vm11970_vm0, %v11969_v7 }
 0x65a   : > { %v5193_v48 = vadd.f32 %v5181_v30, %v5138_v20  ;;  %5036 = vst.msk [vmem:[#allocation2 + $0x43] sm:$0xff] %vm868_vm4, %v5024_v41 }
 0x65b   : > { %v4982_v61 = vpop.f32.mrb[4].mxu0  ;;  %v5153_v63 = vpop.f32.mrb[10].mxu1 }
 0x65c   : > { %5205 = vst.msk [vmem:[#allocation2 + $0x32] sm:$0xff] %vm868_vm4, %v5193_v48  ;;  %v5025_v57 = vadd.f32 %v5013_v31, %v4982_v61  ;;  %v10843_v18 = vpop.f32.mrb[5].mxu0  ;;  %v10890_v9 = vpop.f32.mrb[11].mxu1  ;;  %11221 = vmatmul.mubr.msk.f32.gmra.mrb[110].mxu0 %vm3049_vm2, %v14470_v60  ;;  %v5015_v60 = vld [vmem:[#allocation2 + $0x5b] sm:$0xff]  ;;  %v5348_v48 = vld [vmem:[#allocation2 + $0x11] sm:$0xff] }
 0x65d   : > { %v5182_v8 = vld [vmem:[#allocation2 + $0x3a] sm:$0xff]  ;;  %11223 = vmatprep.mubr.msk.f32.mxu0 %vm11970_vm0, %v11969_v7 }
 0x65e   : > { %v5194_v45 = vadd.f32 %v5182_v8, %v5143_v16  ;;  %5037 = vst.msk [vmem:[#allocation2 + $0x4b] sm:$0xff] %vm868_vm4, %v5025_v57  ;;  %v5349_v8 = vld [vmem:[#allocation2 + $0x19] sm:$0xff] }
 0x65f   : > { %v4987_v17 = vpop.f32.mrb[6].mxu0  ;;  %v5158_v22 = vpop.f32.mrb[12].mxu1 }
 0x660   : > { %5206 = vst.msk [vmem:[#allocation2 + $0x3a] sm:$0xff] %vm868_vm4, %v5194_v45  ;;  %v5026_v43 = vadd.f32 %v5014_v32, %v4987_v17  ;;  %v10846_v0 = vpop.f32.mrb[7].mxu0  ;;  %v10893_v46 = vpop.f32.mrb[13].mxu1  ;;  %11224 = vmatmul.mubr.msk.f32.gmra.mrb[112].mxu0 %vm3049_vm2, %v14484_v3  ;;  %v5016_v3 = vld [vmem:[#allocation2 + $0x63] sm:$0x1] }
 0x661   : > { %v5183_v29 = vld [vmem:[#allocation2 + $0x42] sm:$0xff]  ;;  %11226 = vmatprep.mubr.msk.f32.mxu0 %vm11970_vm0, %v11969_v7 }
 0x662   : > { %v5195_v38 = vadd.f32 %v5183_v29, %v5148_v19  ;;  %5038 = vst.msk [vmem:[#allocation2 + $0x53] sm:$0xff] %vm868_vm4, %v5026_v43  ;;  %v5350_v29 = vld [vmem:[#allocation2 + $0x21] sm:$0xff] }
 0x663   : > { %v4992_v55 = vpop.f32.mrb[8].mxu0  ;;  %v5163_v44 = vpop.f32.mrb[14].mxu1 }
 0x664   : > { %5207 = vst.msk [vmem:[#allocation2 + $0x42] sm:$0xff] %vm868_vm4, %v5195_v38  ;;  %v5027_v49 = vadd.f32 %v5015_v60, %v4992_v55  ;;  %v10849_v6 = vpop.f32.mrb[9].mxu0  ;;  %v10896_v36 = vpop.f32.mrb[15].mxu1  ;;  %11227 = vmatmul.mubr.msk.f32.gmra.mrb[114].mxu0 %vm3049_vm2, %v14498_v52 }
 0x665   : > { %v5184_v11 = vld [vmem:[#allocation2 + $0x4a] sm:$0xff]  ;;  %11229 = vmatprep.mubr.msk.f32.mxu0 %vm11970_vm0, %v11969_v7 }
 0x666   : > { %v5196_v34 = vadd.f32 %v5184_v11, %v5153_v63  ;;  %5039 = vst.msk [vmem:[#allocation2 + $0x5b] sm:$0xff] %vm868_vm4, %v5027_v49  ;;  %v5351_v11 = vld [vmem:[#allocation2 + $0x29] sm:$0xff] }
 0x667   : > { %v4997_v20 = vpop.f32.mrb[10].mxu0  ;;  %v5168_v40 = vpop.f32.mrb[16].mxu1 }
 0x668   : > { %5208 = vst.msk [vmem:[#allocation2 + $0x4a] sm:$0xff] %vm868_vm4, %v5196_v34  ;;  %v5028_v14 = vadd.f32 %v5016_v3, %v4997_v20  ;;  %v10852_v59 = vpop.f32.mrb[11].mxu0  ;;  %v10899_v2 = vpop.f32.mrb[17].mxu1  ;;  %11230 = vmatmul.mubr.msk.f32.gmra.mrb[116].mxu0 %vm3049_vm2, %v14510_v53  ;;  %vm5211_vm2 = vcmask 517120  }
 0x669   : > { %v5185_v52 = vld [vmem:[#allocation2 + $0x52] sm:$0xff]  ;;  %11303 = vmatprep.mubr.msk.f32.mxu0 %vm11970_vm0, %v11969_v7 }
 0x66a   : > { %v5197_v54 = vadd.f32 %v5185_v52, %v5158_v22  ;;  %5041 = vst.msk [vmem:[#allocation2 + $0x63] sm:$0x1] %vm5040_vm1, %v5028_v14  ;;  %v5352_v52 = vld [vmem:[#allocation2 + $0x31] sm:$0xff] }
 0x66b   : > { %v5002_v1 = vpop.f32.mrb[12].mxu0  ;;  %v5173_v28 = vpop.f32.mrb[18].mxu1 }
 0x66c   : > { %5209 = vst.msk [vmem:[#allocation2 + $0x52] sm:$0xff] %vm868_vm4, %v5197_v54  ;;  %v10855_v16 = vpop.f32.mrb[13].mxu0  ;;  %v10902_v27 = vpop.f32.mrb[19].mxu1 }
 0x66d   : > { %v5186_v42 = vld [vmem:[#allocation2 + $0x5a] sm:$0xff] }
 0x66e   : > { %v5198_v26 = vadd.f32 %v5186_v42, %v5163_v44 }
 0x66f   : > { %v5284_v33 = vpop.f32.mrb[14].mxu0  ;;  %v5455_v13 = vpop.f32.mrb[20].mxu1 }
 0x670   : > { %5210 = vst.msk [vmem:[#allocation2 + $0x5a] sm:$0xff] %vm868_vm4, %v5198_v26  ;;  %v5359_v53 = vadd.f32 %v5347_v21, %v5284_v33  ;;  %v5532_v19 = vadd.f32 %v5519_v58, %v5455_v13  ;;  %v10913_v41 = vpop.f32.mrb[15].mxu0  ;;  %v10960_v10 = vpop.f32.mrb[21].mxu1  ;;  %v5353_v26 = vld [vmem:[#allocation2 + $0x39] sm:$0xff] }
 0x671   : > { %v5187_v23 = vld [vmem:[#allocation2 + $0x62] sm:$0x3] }
 0x672   : > { %v5199_v30 = vadd.f32 %v5187_v23, %v5168_v40  ;;  %5371 = vst.msk [vmem:[#allocation2 + $0x9] sm:$0xff] %vm868_vm4, %v5359_v53  ;;  %5545 = vst.msk [vmem:[#allocation2 + $0x1] sm:$0xff] %vm868_vm4, %v5532_v19  ;;  %v5354_v23 = vld [vmem:[#allocation2 + $0x41] sm:$0xff] }
 0x673   : > { %v5289_v31 = vpop.f32.mrb[16].mxu0  ;;  %v5460_v61 = vpop.f32.mrb[22].mxu1 }
 0x674   : > { %v5360_v63 = vadd.f32 %v5348_v48, %v5289_v31  ;;  %v10916_v57 = vpop.f32.mrb[17].mxu0  ;;  %v10963_v18 = vpop.f32.mrb[23].mxu1  ;;  %5212 = vst.msk [vmem:[#allocation2 + $0x62] sm:$0x3] %vm5211_vm2, %v5199_v30 }
 0x676   : > { %5372 = vst.msk [vmem:[#allocation2 + $0x11] sm:$0xff] %vm868_vm4, %v5360_v63 }
 0x677   : > { %v5294_v9 = vpop.f32.mrb[18].mxu0  ;;  %v5465_v32 = vpop.f32.mrb[24].mxu1 }
 0x678   : > { %v5361_v45 = vadd.f32 %v5349_v8, %v5294_v9  ;;  %v10919_v17 = vpop.f32.mrb[19].mxu0  ;;  %v10966_v22 = vpop.f32.mrb[25].mxu1  ;;  %v5355_v9 = vld [vmem:[#allocation2 + $0x49] sm:$0xff] }
 0x679   : > { %v5520_v43 = vld [vmem:[#allocation2 + $0x9] sm:$0xff] }
 0x67a   : > { %v5533_v0 = vadd.f32 %v5520_v43, %v5460_v61  ;;  %5373 = vst.msk [vmem:[#allocation2 + $0x19] sm:$0xff] %vm868_vm4, %v5361_v45 }
 0x67b   : > { %v5299_v46 = vpop.f32.mrb[20].mxu0  ;;  %v5470_v60 = vpop.f32.mrb[26].mxu1 }
 0x67c   : > { %5546 = vst.msk [vmem:[#allocation2 + $0x9] sm:$0xff] %vm868_vm4, %v5533_v0  ;;  %v5362_v38 = vadd.f32 %v5350_v29, %v5299_v46  ;;  %v10922_v55 = vpop.f32.mrb[21].mxu0  ;;  %v10969_v44 = vpop.f32.mrb[27].mxu1  ;;  %v5356_v46 = vld [vmem:[#allocation2 + $0x51] sm:$0xff] }
 0x67d   : > { %v5521_v49 = vld [vmem:[#allocation2 + $0x11] sm:$0xff] }
 0x67e   : > { %v5534_v6 = vadd.f32 %v5521_v49, %v5465_v32  ;;  %5374 = vst.msk [vmem:[#allocation2 + $0x21] sm:$0xff] %vm868_vm4, %v5362_v38 }
 0x67f   : > { %v5304_v36 = vpop.f32.mrb[22].mxu0  ;;  %v5475_v3 = vpop.f32.mrb[28].mxu1 }
 0x680   : > { %5547 = vst.msk [vmem:[#allocation2 + $0x11] sm:$0xff] %vm868_vm4, %v5534_v6  ;;  %v5363_v34 = vadd.f32 %v5351_v11, %v5304_v36  ;;  %v10925_v20 = vpop.f32.mrb[23].mxu0  ;;  %v10972_v40 = vpop.f32.mrb[29].mxu1  ;;  %v5357_v36 = vld [vmem:[#allocation2 + $0x59] sm:$0xff] }
 0x681   : > { %v5522_v14 = vld [vmem:[#allocation2 + $0x19] sm:$0xff] }
 0x682   : > { %v5535_v59 = vadd.f32 %v5522_v14, %v5470_v60  ;;  %5375 = vst.msk [vmem:[#allocation2 + $0x29] sm:$0xff] %vm868_vm4, %v5363_v34 }
 0x683   : > { %v5309_v2 = vpop.f32.mrb[24].mxu0  ;;  %v5480_v54 = vpop.f32.mrb[30].mxu1 }
 0x684   : > { %5548 = vst.msk [vmem:[#allocation2 + $0x19] sm:$0xff] %vm868_vm4, %v5535_v59  ;;  %v5364_v1 = vadd.f32 %v5352_v52, %v5309_v2  ;;  %v10928_v28 = vpop.f32.mrb[25].mxu0  ;;  %v10975_v16 = vpop.f32.mrb[31].mxu1  ;;  %v5358_v2 = vld [vmem:[#allocation2 + $0x61] sm:$0x7] }
 0x685   : > { %v5523_v27 = vld [vmem:[#allocation2 + $0x21] sm:$0xff] }
 0x686   : > { %v5536_v42 = vadd.f32 %v5523_v27, %v5475_v3  ;;  %5376 = vst.msk [vmem:[#allocation2 + $0x31] sm:$0xff] %vm868_vm4, %v5364_v1 }
 0x687   : > { %v5314_v58 = vpop.f32.mrb[26].mxu0  ;;  %v5485_v33 = vpop.f32.mrb[32].mxu1 }
 0x688   : > { %5549 = vst.msk [vmem:[#allocation2 + $0x21] sm:$0xff] %vm868_vm4, %v5536_v42  ;;  %v5365_v21 = vadd.f32 %v5353_v26, %v5314_v58  ;;  %v10931_v13 = vpop.f32.mrb[27].mxu0  ;;  %v10978_v53 = vpop.f32.mrb[33].mxu1 }
 0x689   : > { %v5524_v19 = vld [vmem:[#allocation2 + $0x29] sm:$0xff] }
 0x68a   : > { %v5537_v41 = vadd.f32 %v5524_v19, %v5480_v54  ;;  %5377 = vst.msk [vmem:[#allocation2 + $0x39] sm:$0xff] %vm868_vm4, %v5365_v21  ;;  %v5693_v19 = vld [vmem:[#allocation2] sm:$0xff] }
 0x68b   : > { %v5319_v10 = vpop.f32.mrb[28].mxu0  ;;  %v5490_v30 = vpop.f32.mrb[34].mxu1 }
 0x68c   : > { %5550 = vst.msk [vmem:[#allocation2 + $0x29] sm:$0xff] %vm868_vm4, %v5537_v41  ;;  %v5366_v31 = vadd.f32 %v5354_v23, %v5319_v10  ;;  %v10934_v48 = vpop.f32.mrb[29].mxu0  ;;  %v10981_v61 = vpop.f32.mrb[35].mxu1 }
 0x68d   : > { %v5525_v63 = vld [vmem:[#allocation2 + $0x31] sm:$0xff] }
 0x68e   : > { %v5538_v57 = vadd.f32 %v5525_v63, %v5485_v33  ;;  %5378 = vst.msk [vmem:[#allocation2 + $0x41] sm:$0xff] %vm868_vm4, %v5366_v31  ;;  %v5694_v63 = vld [vmem:[#allocation2 + $0x8] sm:$0xff] }
 0x68f   : > { %v5324_v18 = vpop.f32.mrb[30].mxu0  ;;  %v5495_v8 = vpop.f32.mrb[36].mxu1 }
 0x690   : > { %5551 = vst.msk [vmem:[#allocation2 + $0x31] sm:$0xff] %vm868_vm4, %v5538_v57  ;;  %v5367_v32 = vadd.f32 %v5355_v9, %v5324_v18  ;;  %v10937_v45 = vpop.f32.mrb[31].mxu0  ;;  %v10984_v17 = vpop.f32.mrb[37].mxu1 }
 0x691   : > { %v5526_v22 = vld [vmem:[#allocation2 + $0x39] sm:$0xff] }
 0x692   : > { %v5539_v43 = vadd.f32 %v5526_v22, %v5490_v30  ;;  %5379 = vst.msk [vmem:[#allocation2 + $0x49] sm:$0xff] %vm868_vm4, %v5367_v32 }
 0x693   : > { %v5329_v0 = vpop.f32.mrb[32].mxu0  ;;  %v5500_v29 = vpop.f32.mrb[38].mxu1 }
 0x694   : > { %5552 = vst.msk [vmem:[#allocation2 + $0x39] sm:$0xff] %vm868_vm4, %v5539_v43  ;;  %v5368_v60 = vadd.f32 %v5356_v46, %v5329_v0  ;;  %v10940_v38 = vpop.f32.mrb[33].mxu0  ;;  %v10987_v55 = vpop.f32.mrb[39].mxu1  ;;  %v5695_v43 = vld [vmem:[#allocation2 + $0x10] sm:$0xff] }
 0x695   : > { %v5527_v44 = vld [vmem:[#allocation2 + $0x41] sm:$0xff] }
 0x696   : > { %v5540_v49 = vadd.f32 %v5527_v44, %v5495_v8  ;;  %5380 = vst.msk [vmem:[#allocation2 + $0x51] sm:$0xff] %vm868_vm4, %v5368_v60 }
 0x697   : > { %v5334_v6 = vpop.f32.mrb[34].mxu0  ;;  %v5505_v11 = vpop.f32.mrb[40].mxu1 }
 0x698   : > { %5553 = vst.msk [vmem:[#allocation2 + $0x41] sm:$0xff] %vm868_vm4, %v5540_v49  ;;  %v5369_v3 = vadd.f32 %v5357_v36, %v5334_v6  ;;  %v10943_v34 = vpop.f32.mrb[35].mxu0  ;;  %v10990_v20 = vpop.f32.mrb[41].mxu1  ;;  %v5696_v36 = vld [vmem:[#allocation2 + $0x18] sm:$0xff] }
 0x699   : > { %v5528_v40 = vld [vmem:[#allocation2 + $0x49] sm:$0xff] }
 0x69a   : > { %v5541_v14 = vadd.f32 %v5528_v40, %v5500_v29  ;;  %5381 = vst.msk [vmem:[#allocation2 + $0x59] sm:$0xff] %vm868_vm4, %v5369_v3 }
 0x69b   : > { %v5339_v59 = vpop.f32.mrb[36].mxu0  ;;  %v5510_v52 = vpop.f32.mrb[42].mxu1 }
 0x69c   : > { %5554 = vst.msk [vmem:[#allocation2 + $0x49] sm:$0xff] %vm868_vm4, %v5541_v14  ;;  %v5370_v54 = vadd.f32 %v5358_v2, %v5339_v59  ;;  %v10946_v1 = vpop.f32.mrb[37].mxu0  ;;  %v10993_v28 = vpop.f32.mrb[43].mxu1 }
 0x69d   : > { %v5529_v16 = vld [vmem:[#allocation2 + $0x51] sm:$0xff] }
 0x69e   : > { %v5542_v27 = vadd.f32 %v5529_v16, %v5505_v11  ;;  %5383 = vst.msk [vmem:[#allocation2 + $0x61] sm:$0x7] %vm5382_vm7, %v5370_v54  ;;  %v5697_v54 = vld [vmem:[#allocation2 + $0x20] sm:$0xff] }
 0x69f   : > { %v5344_v42 = vpop.f32.mrb[38].mxu0  ;;  %v5515_v58 = vpop.f32.mrb[44].mxu1 }
 0x6a0   : > { %5555 = vst.msk [vmem:[#allocation2 + $0x51] sm:$0xff] %vm868_vm4, %v5542_v27  ;;  %v10949_v26 = vpop.f32.mrb[39].mxu0  ;;  %v10996_v33 = vpop.f32.mrb[45].mxu1 }
 0x6a1   : > { %v5530_v21 = vld [vmem:[#allocation2 + $0x59] sm:$0xff] }
 0x6a2   : > { %v5543_v13 = vadd.f32 %v5530_v21, %v5510_v52 }
 0x6a3   : > { %v5629_v53 = vpop.f32.mrb[40].mxu0  ;;  %v5803_v41 = vpop.f32.mrb[46].mxu1 }
 0x6a4   : > { %5556 = vst.msk [vmem:[#allocation2 + $0x59] sm:$0xff] %vm868_vm4, %v5543_v13  ;;  %v5706_v10 = vadd.f32 %v5693_v19, %v5629_v53  ;;  %v11007_v23 = vpop.f32.mrb[41].mxu0  ;;  %v11054_v30 = vpop.f32.mrb[47].mxu1  ;;  %v5893_v18 = vrot.slane %v5803_v41, 1  ;;  %v5698_v13 = vld [vmem:[#allocation2 + $0x28] sm:$0xff] }
 0x6a5   : > { %v5531_v31 = vld [vmem:[#allocation2 + $0x61] sm:$0x7] }
 0x6a6   : > { %v5544_v48 = vadd.f32 %v5531_v31, %v5515_v58  ;;  %5719 = vst.msk [vmem:[#allocation2] sm:$0xff] %vm868_vm4, %v5706_v10 }
 0x6a7   : > { %v5634_v61 = vpop.f32.mrb[42].mxu0  ;;  %v5808_v57 = vpop.f32.mrb[48].mxu1 }
 0x6a8   : > { %5557 = vst.msk [vmem:[#allocation2 + $0x61] sm:$0x7] %vm5382_vm7, %v5544_v48  ;;  %v5707_v9 = vadd.f32 %v5694_v63, %v5634_v61  ;;  %v5894_v8 = vrot.slane %v5808_v57, 1  ;;  %v11010_v32 = vpop.f32.mrb[43].mxu0  ;;  %v11057_v45 = vpop.f32.mrb[49].mxu1  ;;  %v5699_v63 = vld [vmem:[#allocation2 + $0x30] sm:$0xff] }
 0x6aa   : > { %5720 = vst.msk [vmem:[#allocation2 + $0x8] sm:$0xff] %vm868_vm4, %v5707_v9  ;;  %v5895_v17 = vsel %vm1927_vm9, %v5893_v18, %v5894_v8 }
 0x6ab   : > { %v5639_v22 = vpop.f32.mrb[44].mxu0  ;;  %v5813_v0 = vpop.f32.mrb[50].mxu1 }
 0x6ac   : > { %v5708_v46 = vadd.f32 %v5695_v43, %v5639_v22  ;;  %v5896_v29 = vrot.slane %v5813_v0, 1  ;;  %v11013_v60 = vpop.f32.mrb[45].mxu0  ;;  %v11060_v38 = vpop.f32.mrb[51].mxu1  ;;  %v5700_v0 = vld [vmem:[#allocation2 + $0x38] sm:$0xff] }
 0x6ad   : > { %v5867_v55 = vld [vmem:[#allocation2] sm:$0xff] }
 0x6ae   : > { %v5931_v44 = vadd.f32 %v5895_v17, %v5867_v55  ;;  %5721 = vst.msk [vmem:[#allocation2 + $0x10] sm:$0xff] %vm868_vm4, %v5708_v46  ;;  %v5897_v49 = vsel %vm1927_vm9, %v5894_v8, %v5896_v29 }
 0x6af   : > { %v5644_v6 = vpop.f32.mrb[46].mxu0  ;;  %v5818_v11 = vpop.f32.mrb[52].mxu1 }
 0x6b0   : > { %5944 = vst.msk [vmem:[#allocation2] sm:$0xff] %vm868_vm4, %v5931_v44  ;;  %v5709_v3 = vadd.f32 %v5696_v36, %v5644_v6  ;;  %v5898_v34 = vrot.slane %v5818_v11, 1  ;;  %v11016_v20 = vpop.f32.mrb[47].mxu0  ;;  %v11063_v40 = vpop.f32.mrb[53].mxu1  ;;  %v5701_v11 = vld [vmem:[#allocation2 + $0x40] sm:$0xff] }
 0x6b1   : > { %v5868_v14 = vld [vmem:[#allocation2 + $0x8] sm:$0xff] }
 0x6b2   : > { %v5932_v59 = vadd.f32 %v5897_v49, %v5868_v14  ;;  %5722 = vst.msk [vmem:[#allocation2 + $0x18] sm:$0xff] %vm868_vm4, %v5709_v3  ;;  %v5899_v2 = vsel %vm1927_vm9, %v5896_v29, %v5898_v34 }
 0x6b3   : > { %v5649_v52 = vpop.f32.mrb[48].mxu0  ;;  %v5823_v1 = vpop.f32.mrb[54].mxu1 }
 0x6b4   : > { %5945 = vst.msk [vmem:[#allocation2 + $0x8] sm:$0xff] %vm868_vm4, %v5932_v59  ;;  %v5710_v28 = vadd.f32 %v5697_v54, %v5649_v52  ;;  %v5900_v16 = vrot.slane %v5823_v1, 1  ;;  %v11019_v27 = vpop.f32.mrb[49].mxu0  ;;  %v11066_v42 = vpop.f32.mrb[55].mxu1  ;;  %v5702_v1 = vld [vmem:[#allocation2 + $0x48] sm:$0xff] }
 0x6b5   : > { %v5869_v58 = vld [vmem:[#allocation2 + $0x10] sm:$0xff] }
 0x6b6   : > { %v5933_v26 = vadd.f32 %v5899_v2, %v5869_v58  ;;  %5723 = vst.msk [vmem:[#allocation2 + $0x20] sm:$0xff] %vm868_vm4, %v5710_v28  ;;  %v5901_v33 = vsel %vm1927_vm9, %v5898_v34, %v5900_v16 }
 0x6b7   : > { %v5654_v21 = vpop.f32.mrb[50].mxu0  ;;  %v5828_v53 = vpop.f32.mrb[56].mxu1 }
 0x6b8   : > { %5946 = vst.msk [vmem:[#allocation2 + $0x10] sm:$0xff] %vm868_vm4, %v5933_v26  ;;  %v5711_v19 = vadd.f32 %v5698_v13, %v5654_v21  ;;  %v5902_v41 = vrot.slane %v5828_v53, 1  ;;  %v11022_v10 = vpop.f32.mrb[51].mxu0  ;;  %v11069_v23 = vpop.f32.mrb[57].mxu1  ;;  %v5703_v53 = vld [vmem:[#allocation2 + $0x50] sm:$0xff] }
 0x6b9   : > { %v5870_v30 = vld [vmem:[#allocation2 + $0x18] sm:$0xff] }
 0x6ba   : > { %v5934_v31 = vadd.f32 %v5901_v33, %v5870_v30  ;;  %5724 = vst.msk [vmem:[#allocation2 + $0x28] sm:$0xff] %vm868_vm4, %v5711_v19  ;;  %v5903_v48 = vsel %vm1927_vm9, %v5900_v16, %v5902_v41 }
 0x6bb   : > { %v5659_v61 = vpop.f32.mrb[52].mxu0  ;;  %v5833_v57 = vpop.f32.mrb[58].mxu1 }
 0x6bc   : > { %5947 = vst.msk [vmem:[#allocation2 + $0x18] sm:$0xff] %vm868_vm4, %v5934_v31  ;;  %v5712_v18 = vadd.f32 %v5699_v63, %v5659_v61  ;;  %v5904_v9 = vrot.slane %v5833_v57, 1  ;;  %v11025_v8 = vpop.f32.mrb[53].mxu0  ;;  %v11072_v32 = vpop.f32.mrb[59].mxu1  ;;  %v5704_v57 = vld [vmem:[#allocation2 + $0x58] sm:$0xff] }
 0x6bd   : > { %v5871_v45 = vld [vmem:[#allocation2 + $0x20] sm:$0xff] }
 0x6be   : > { %v5935_v17 = vadd.f32 %v5903_v48, %v5871_v45  ;;  %5725 = vst.msk [vmem:[#allocation2 + $0x30] sm:$0xff] %vm868_vm4, %v5712_v18  ;;  %v5905_v22 = vsel %vm1927_vm9, %v5902_v41, %v5904_v9 }
 0x6bf   : > { %v5664_v43 = vpop.f32.mrb[54].mxu0  ;;  %v5838_v46 = vpop.f32.mrb[60].mxu1 }
 0x6c0   : > { %5948 = vst.msk [vmem:[#allocation2 + $0x20] sm:$0xff] %vm868_vm4, %v5935_v17  ;;  %v5713_v29 = vadd.f32 %v5700_v0, %v5664_v43  ;;  %v5906_v60 = vrot.slane %v5838_v46, 1  ;;  %v11028_v38 = vpop.f32.mrb[55].mxu0  ;;  %v11075_v55 = vpop.f32.mrb[61].mxu1  ;;  %v5705_v0 = vld [vmem:[#allocation2 + $0x60] sm:$0xf] }
 0x6c1   : > { %v5872_v44 = vld [vmem:[#allocation2 + $0x28] sm:$0xff] }
 0x6c2   : > { %v5936_v49 = vadd.f32 %v5905_v22, %v5872_v44  ;;  %5726 = vst.msk [vmem:[#allocation2 + $0x38] sm:$0xff] %vm868_vm4, %v5713_v29  ;;  %v5907_v6 = vsel %vm1927_vm9, %v5904_v9, %v5906_v60 }
 0x6c3   : > { %v5669_v36 = vpop.f32.mrb[56].mxu0  ;;  %v5843_v3 = vpop.f32.mrb[62].mxu1 }
 0x6c4   : > { %5949 = vst.msk [vmem:[#allocation2 + $0x28] sm:$0xff] %vm868_vm4, %v5936_v49  ;;  %v5714_v34 = vadd.f32 %v5701_v11, %v5669_v36  ;;  %v5908_v20 = vrot.slane %v5843_v3, 1  ;;  %v11031_v40 = vpop.f32.mrb[57].mxu0  ;;  %v11078_v14 = vpop.f32.mrb[63].mxu1 }
 0x6c5   : > { %v5873_v59 = vld [vmem:[#allocation2 + $0x30] sm:$0xff] }
 0x6c6   : > { %v5937_v2 = vadd.f32 %v5907_v6, %v5873_v59  ;;  %5727 = vst.msk [vmem:[#allocation2 + $0x40] sm:$0xff] %vm868_vm4, %v5714_v34  ;;  %v5909_v52 = vsel %vm1927_vm9, %v5906_v60, %v5908_v20 }
 0x6c7   : > { %v5674_v54 = vpop.f32.mrb[58].mxu0  ;;  %v5848_v28 = vpop.f32.mrb[64].mxu1 }
 0x6c8   : > { %5950 = vst.msk [vmem:[#allocation2 + $0x30] sm:$0xff] %vm868_vm4, %v5937_v2  ;;  %v5715_v16 = vadd.f32 %v5702_v1, %v5674_v54  ;;  %v5910_v27 = vrot.slane %v5848_v28, 1  ;;  %v11034_v42 = vpop.f32.mrb[59].mxu0  ;;  %v11081_v58 = vpop.f32.mrb[65].mxu1 }
 0x6c9   : > { %v5874_v26 = vld [vmem:[#allocation2 + $0x38] sm:$0xff] }
 0x6ca   : > { %v5938_v33 = vadd.f32 %v5909_v52, %v5874_v26  ;;  %5728 = vst.msk [vmem:[#allocation2 + $0x48] sm:$0xff] %vm868_vm4, %v5715_v16  ;;  %v5911_v21 = vsel %vm1927_vm9, %v5908_v20, %v5910_v27 }
 0x6cb   : > { %v5679_v13 = vpop.f32.mrb[60].mxu0  ;;  %v5853_v19 = vpop.f32.mrb[66].mxu1 }
 0x6cc   : > { %5951 = vst.msk [vmem:[#allocation2 + $0x38] sm:$0xff] %vm868_vm4, %v5938_v33  ;;  %v5716_v41 = vadd.f32 %v5703_v53, %v5679_v13  ;;  %v5912_v10 = vrot.slane %v5853_v19, 1  ;;  %v11037_v23 = vpop.f32.mrb[61].mxu0  ;;  %v11084_v30 = vpop.f32.mrb[67].mxu1  ;;  %v6091_v53 = vld [vmem:[#allocation2] sm:$0xff] }
 0x6cd   : > { %v5875_v31 = vld [vmem:[#allocation2 + $0x40] sm:$0xff] }
 0x6ce   : > { %v5939_v48 = vadd.f32 %v5911_v21, %v5875_v31  ;;  %5729 = vst.msk [vmem:[#allocation2 + $0x50] sm:$0xff] %vm868_vm4, %v5716_v41  ;;  %v5913_v61 = vsel %vm1927_vm9, %v5910_v27, %v5912_v10 }
 0x6cf   : > { %v5684_v63 = vpop.f32.mrb[62].mxu0  ;;  %v5858_v18 = vpop.f32.mrb[68].mxu1 }
 0x6d0   : > { %5952 = vst.msk [vmem:[#allocation2 + $0x40] sm:$0xff] %vm868_vm4, %v5939_v48  ;;  %v5717_v9 = vadd.f32 %v5704_v57, %v5684_v63  ;;  %v5914_v8 = vrot.slane %v5858_v18, 1  ;;  %v11040_v32 = vpop.f32.mrb[63].mxu0  ;;  %v11087_v45 = vpop.f32.mrb[69].mxu1  ;;  %v6092_v57 = vld [vmem:[#allocation2 + $0x8] sm:$0xff] }
 0x6d1   : > { %v5876_v17 = vld [vmem:[#allocation2 + $0x48] sm:$0xff] }
 0x6d2   : > { %v5940_v22 = vadd.f32 %v5913_v61, %v5876_v17  ;;  %5730 = vst.msk [vmem:[#allocation2 + $0x58] sm:$0xff] %vm868_vm4, %v5717_v9  ;;  %v5915_v43 = vsel %vm1927_vm9, %v5912_v10, %v5914_v8 }
 0x6d3   : > { %v5689_v46 = vpop.f32.mrb[64].mxu0  ;;  %v5863_v29 = vpop.f32.mrb[70].mxu1 }
 0x6d4   : > { %5953 = vst.msk [vmem:[#allocation2 + $0x48] sm:$0xff] %vm868_vm4, %v5940_v22  ;;  %v5718_v60 = vadd.f32 %v5705_v0, %v5689_v46  ;;  %v5916_v38 = vrot.slane %v5863_v29, 1  ;;  %v11043_v55 = vpop.f32.mrb[65].mxu0  ;;  %v11090_v44 = vpop.f32.mrb[71].mxu1  ;;  %v6093_v29 = vld [vmem:[#allocation2 + $0x10] sm:$0xff] }
 0x6d5   : > { %v5877_v49 = vld [vmem:[#allocation2 + $0x50] sm:$0xff]  ;;  %v6827_v55 = vld [vmem:[%s16317_s6] sm:$0xff]  ;;  %v6828_v44 = vld [vmem:[%s16317_s6 + $0x8] sm:$0xff] }
 0x6d6   : > { %v5941_v6 = vadd.f32 %v5915_v43, %v5877_v49  ;;  %5731 = vst.msk [vmem:[#allocation2 + $0x60] sm:$0xf] %vm881_vm5, %v5718_v60  ;;  %v5917_v36 = vsel %vm1927_vm9, %v5914_v8, %v5916_v38  ;;  %v6829_v49 = vld [vmem:[%s16317_s6 + $0x10] sm:$0xff] }
 0x6d7   : > { %v6028_v11 = vpop.f32.mrb[66].mxu0  ;;  %v6245_v3 = vpop.f32.mrb[72].mxu1 }
 0x6d8   : > { %5954 = vst.msk [vmem:[#allocation2 + $0x50] sm:$0xff] %vm868_vm4, %v5941_v6  ;;  %v11101_v34 = vpop.f32.mrb[67].mxu0  ;;  %v11148_v20 = vpop.f32.mrb[73].mxu1  ;;  %v11815_v3 = vpack.c.bf16 %v6828_v44, %v6827_v55 }
 0x6d9   : > { %v5878_v40 = vld [vmem:[#allocation2 + $0x58] sm:$0xff] }
 0x6da   : > { %v5942_v14 = vadd.f32 %v5917_v36, %v5878_v40  ;;  %v6830_v34 = vld [vmem:[%s16317_s6 + $0x18] sm:$0xff]  ;;  %11816 = vmatpush3.bf16.msra.mxu1 %v11815_v3 }
 0x6db   : > { %v6032_v59 = vpop.f32.mrb[68].mxu0  ;;  %v6249_v2 = vpop.f32.mrb[74].mxu1  ;;  %v6094_v40 = vld [vmem:[#allocation2 + $0x18] sm:$0xff]  ;;  %11817 = vmatprep.subr.bf16.mxu1 %v11968_v4 }
 0x6dc   : > { %5955 = vst.msk [vmem:[#allocation2 + $0x58] sm:$0xff] %vm868_vm4, %v5942_v14  ;;  %v11104_v52 = vpop.f32.mrb[69].mxu0  ;;  %v11151_v54 = vpop.f32.mrb[75].mxu1  ;;  %v6115_v42 = vrot.slane %v6032_v59, 1  ;;  %v6332_v58 = vrot.slane %v6249_v2, 2 }
 0x6dd   : > { %v5879_v1 = vld [vmem:[#allocation2 + $0x60] sm:$0x7] }
 0x6de   : > { %v5943_v28 = vadd.f32 %v5916_v38, %v5879_v1  ;;  %v11818_v1 = vpack.c.bf16 %v6830_v34, %v6829_v49  ;;  %v9218_v34 = vld [vmem:[%s16317_s6 + $0x70] sm:$0xff] }
 0x6df   : > { %v6037_v16 = vpop.f32.mrb[70].mxu0  ;;  %v6254_v27 = vpop.f32.mrb[76].mxu1 }
 0x6e0   : > { %5956 = vst.msk [vmem:[#allocation2 + $0x60] sm:$0x7] %vm5382_vm7, %v5943_v28  ;;  %v6116_v26 = vrot.slane %v6037_v16, 1  ;;  %v6333_v33 = vrot.slane %v6254_v27, 2  ;;  %v11107_v21 = vpop.f32.mrb[71].mxu0  ;;  %v11154_v13 = vpop.f32.mrb[77].mxu1  ;;  %11819 = vmatpush3.bf16.msra.mxu1 %v11818_v1 }
 0x6e1   : > { %v6831_v28 = vld [vmem:[%s16317_s6 + $0x20] sm:$0xff]  ;;  %v9213_v27 = vld [vmem:[%s16317_s6 + $0x48] sm:$0xff]  ;;  %v9214_v21 = vld [vmem:[%s16317_s6 + $0x50] sm:$0xff]  ;;  %11820 = vmatprep.subr.bf16.mxu1 %v11968_v4 }
 0x6e2   : > { %v6117_v19 = vsel %vm1927_vm9, %v6115_v42, %v6116_v26  ;;  %v6334_v41 = vsel %vm2361_vm12, %v6332_v58, %v6333_v33  ;;  %v9212_v16 = vld [vmem:[%s16317_s6 + $0x40] sm:$0xff]  ;;  %v9215_v13 = vld [vmem:[%s16317_s6 + $0x58] sm:$0xff] }
 0x6e3   : > { %v6150_v10 = vadd.f32 %v6117_v19, %v6091_v53  ;;  %v6042_v23 = vpop.f32.mrb[72].mxu0  ;;  %v6259_v30 = vpop.f32.mrb[78].mxu1 }
 0x6e4   : > { %v6118_v31 = vrot.slane %v6042_v23, 1  ;;  %v6335_v48 = vrot.slane %v6259_v30, 2  ;;  %v11110_v61 = vpop.f32.mrb[73].mxu0  ;;  %v11157_v63 = vpop.f32.mrb[79].mxu1 }
 0x6e5   : > { %6162 = vst.msk [vmem:[#allocation2] sm:$0xff] %vm868_vm4, %v6150_v10  ;;  %v11830_v61 = vpack.c.bf16 %v9215_v13, %v9214_v21 }
 0x6e6   : > { %v6119_v18 = vsel %vm1927_vm9, %v6116_v26, %v6118_v31  ;;  %v6336_v9 = vsel %vm2361_vm12, %v6333_v33, %v6335_v48  ;;  %v6832_v26 = vld [vmem:[%s16317_s6 + $0x28] sm:$0xff]  ;;  %v11827_v33 = vpack.c.bf16 %v9213_v27, %v9212_v16 }
 0x6e7   : > { %v6151_v8 = vadd.f32 %v6119_v18, %v6092_v57  ;;  %v6047_v32 = vpop.f32.mrb[74].mxu0  ;;  %v6264_v45 = vpop.f32.mrb[80].mxu1  ;;  %v15046_v17 = vld [vmem:[#allocation2 + $0x60] sm:$0xf]  ;;  %v11821_v57 = vpack.c.bf16 %v6832_v26, %v6831_v28 }
 0x6e8   : > { %v6120_v22 = vrot.slane %v6047_v32, 1  ;;  %v6337_v43 = vrot.slane %v6264_v45, 2  ;;  %v11113_v0 = vpop.f32.mrb[75].mxu0  ;;  %v11160_v46 = vpop.f32.mrb[81].mxu1  ;;  %6826 = vst.msk [vmem:[#allocation2 + $0x60] sm:$0xf] %vm881_vm5, %v11969_v7  ;;  %11828 = vmatpush3.bf16.msra.mxu0 %v11827_v33 }
 0x6e9   : > { %6163 = vst.msk [vmem:[#allocation2 + $0x8] sm:$0xff] %vm868_vm4, %v6151_v8  ;;  %11829 = vmatprep.subr.bf16.mxu0 %v11968_v4  ;;  %v9216_v18 = vld [vmem:[%s16317_s6 + $0x60] sm:$0xff]  ;;  %v9217_v8 = vld [vmem:[%s16317_s6 + $0x68] sm:$0xff]  ;;  %11822 = vmatpush3.bf16.msra.mxu1 %v11821_v57  ;;  %v6097_v33 = vld [vmem:[#allocation2 + $0x30] sm:$0xff] }
 0x6ea   : > { %v6121_v60 = vsel %vm1927_vm9, %v6118_v31, %v6120_v22  ;;  %v15053_v38 = vsel %vm2361_vm12, %v6335_v48, %v6337_v43  ;;  %v6095_v32 = vld [vmem:[#allocation2 + $0x20] sm:$0xff]  ;;  %11823 = vmatprep.subr.bf16.mxu1 %v11968_v4 }
 0x6eb   : > { %v6152_v6 = vadd.f32 %v6121_v60, %v6093_v29  ;;  %v6052_v36 = vpop.f32.mrb[76].mxu0  ;;  %v6269_v11 = vpop.f32.mrb[82].mxu1 }
 0x6ec   : > { %v6308_v20 = vld [vmem:[#allocation2] sm:$0xff]  ;;  %v6122_v14 = vrot.slane %v6052_v36, 1  ;;  %v6339_v59 = vrot.slane %v6269_v11, 2  ;;  %v11116_v2 = vpop.f32.mrb[77].mxu0  ;;  %v11163_v52 = vpop.f32.mrb[83].mxu1  ;;  %11831 = vmatpush3.bf16.msra.mxu0 %v11830_v61  ;;  %v11833_v36 = vpack.c.bf16 %v9217_v8, %v9216_v18  ;;  %v6098_v61 = vld [vmem:[#allocation2 + $0x38] sm:$0xff] }
 0x6ed   : > { %v6367_v54 = vadd.f32 %v6334_v41, %v6308_v20  ;;  %6164 = vst.msk [vmem:[#allocation2 + $0x10] sm:$0xff] %vm868_vm4, %v6152_v6  ;;  %11832 = vmatprep.subr.bf16.mxu0 %v11968_v4  ;;  %v9219_v20 = vld [vmem:[%s16317_s6 + $0x78] sm:$0xff] }
 0x6ee   : > { %v6123_v42 = vsel %vm1927_vm9, %v6120_v22, %v6122_v14  ;;  %v15079_v58 = vsel %vm2361_vm12, %v6337_v43, %v6339_v59  ;;  %v6834_v43 = vld [vmem:[%s16317_s6 + $0x38] sm:$0xff] }
 0x6ef   : > { %6379 = vst.msk [vmem:[#allocation2] sm:$0xff] %vm868_vm4, %v6367_v54  ;;  %v6153_v53 = vadd.f32 %v6123_v42, %v6094_v40  ;;  %v6057_v19 = vpop.f32.mrb[78].mxu0  ;;  %v6274_v41 = vpop.f32.mrb[84].mxu1  ;;  %v6096_v40 = vld [vmem:[#allocation2 + $0x28] sm:$0xff]  ;;  %v11836_v42 = vpack.c.bf16 %v9219_v20, %v9218_v34 }
 0x6f0   : > { %v6309_v10 = vld [vmem:[#allocation2 + $0x8] sm:$0xff]  ;;  %v6124_v23 = vrot.slane %v6057_v19, 1  ;;  %v6341_v30 = vrot.slane %v6274_v41, 2  ;;  %v11119_v31 = vpop.f32.mrb[79].mxu0  ;;  %v11166_v48 = vpop.f32.mrb[85].mxu1  ;;  %11834 = vmatpush3.bf16.msra.mxu0 %v11833_v36 }
 0x6f1   : > { %v6368_v63 = vadd.f32 %v6336_v9, %v6309_v10  ;;  %6165 = vst.msk [vmem:[#allocation2 + $0x18] sm:$0xff] %vm868_vm4, %v6153_v53  ;;  %v6833_v9 = vld [vmem:[%s16317_s6 + $0x30] sm:$0xff]  ;;  %11835 = vmatprep.subr.bf16.mxu0 %v11968_v4 }
 0x6f2   : > { %v6125_v45 = vsel %vm1927_vm9, %v6122_v14, %v6124_v23  ;;  %v6342_v22 = vsel %vm2361_vm12, %v6339_v59, %v6341_v30  ;;  %v11824_v3 = vpack.c.bf16 %v6834_v43, %v6833_v9 }
 0x6f3   : > { %6380 = vst.msk [vmem:[#allocation2 + $0x8] sm:$0xff] %vm868_vm4, %v6368_v63  ;;  %v6154_v0 = vadd.f32 %v6125_v45, %v6095_v32  ;;  %v6062_v46 = vpop.f32.mrb[80].mxu0  ;;  %v6279_v29 = vpop.f32.mrb[86].mxu1 }
 0x6f4   : > { %v6310_v60 = vld [vmem:[#allocation2 + $0x10] sm:$0xff]  ;;  %v6126_v55 = vrot.slane %v6062_v46, 1  ;;  %v6343_v44 = vrot.slane %v6279_v29, 2  ;;  %v11122_v49 = vpop.f32.mrb[81].mxu0  ;;  %v11169_v6 = vpop.f32.mrb[87].mxu1  ;;  %11825 = vmatpush3.bf16.msra.mxu1 %v11824_v3  ;;  %11837 = vmatpush3.bf16.msra.mxu0 %v11836_v42  ;;  %v6099_v29 = vld [vmem:[#allocation2 + $0x40] sm:$0xff] }
 0x6f5   : > { %v6369_v11 = vadd.f32 %v15053_v38, %v6310_v60  ;;  %6166 = vst.msk [vmem:[#allocation2 + $0x20] sm:$0xff] %vm868_vm4, %v6154_v0  ;;  %11838 = vmatprep.subr.bf16.mxu1 %v11968_v4  ;;  %11850 = vmatprep.subr.bf16.mxu0 %v11968_v4 }
 0x6f6   : > { %v6127_v14 = vsel %vm1927_vm9, %v6124_v23, %v6126_v55  ;;  %v6344_v59 = vsel %vm2361_vm12, %v6341_v30, %v6343_v44 }
 0x6f7   : > { %6381 = vst.msk [vmem:[#allocation2 + $0x10] sm:$0xff] %vm868_vm4, %v6369_v11  ;;  %v6155_v38 = vadd.f32 %v6127_v14, %v6096_v40  ;;  %v6067_v2 = vpop.f32.mrb[82].mxu0  ;;  %v6284_v52 = vpop.f32.mrb[88].mxu1  ;;  %v6100_v14 = vld [vmem:[#allocation2 + $0x48] sm:$0xff] }
 0x6f8   : > { %v6311_v54 = vld [vmem:[#allocation2 + $0x18] sm:$0xff]  ;;  %v6128_v1 = vrot.slane %v6067_v2, 1  ;;  %v6345_v28 = vrot.slane %v6284_v52, 2  ;;  %v11125_v16 = vpop.f32.mrb[83].mxu0  ;;  %v11172_v27 = vpop.f32.mrb[89].mxu1 }
 0x6f9   : > { %v6370_v26 = vadd.f32 %v15079_v58, %v6311_v54  ;;  %6167 = vst.msk [vmem:[#allocation2 + $0x28] sm:$0xff] %vm868_vm4, %v6155_v38 }
 0x6fa   : > { %v6129_v21 = vsel %vm1927_vm9, %v6126_v55, %v6128_v1  ;;  %v6346_v13 = vsel %vm2361_vm12, %v6343_v44, %v6345_v28 }
 0x6fb   : > { %6382 = vst.msk [vmem:[#allocation2 + $0x18] sm:$0xff] %vm868_vm4, %v6370_v26  ;;  %v6156_v53 = vadd.f32 %v6129_v21, %v6097_v33  ;;  %v6072_v19 = vpop.f32.mrb[84].mxu0  ;;  %v6289_v41 = vpop.f32.mrb[90].mxu1  ;;  %v6102_v33 = vld [vmem:[#allocation2 + $0x58] sm:$0x7]  ;;  %v6101_v21 = vld [vmem:[#allocation2 + $0x50] sm:$0xff] }
 0x6fc   : > { %v6312_v10 = vld [vmem:[#allocation2 + $0x20] sm:$0xff]  ;;  %v6130_v23 = vrot.slane %v6072_v19, 1  ;;  %v6347_v58 = vrot.slane %v6289_v41, 2  ;;  %v11128_v30 = vpop.f32.mrb[85].mxu0  ;;  %v11175_v31 = vpop.f32.mrb[91].mxu1 }
 0x6fd   : > { %v6371_v48 = vadd.f32 %v6342_v22, %v6312_v10  ;;  %6168 = vst.msk [vmem:[#allocation2 + $0x30] sm:$0xff] %vm868_vm4, %v6156_v53 }
 0x6fe   : > { %v6131_v63 = vsel %vm1927_vm9, %v6128_v1, %v6130_v23  ;;  %v6348_v57 = vsel %vm2361_vm12, %v6345_v28, %v6347_v58 }
 0x6ff   : > { %6383 = vst.msk [vmem:[#allocation2 + $0x20] sm:$0xff] %vm868_vm4, %v6371_v48  ;;  %v6157_v18 = vadd.f32 %v6131_v63, %v6098_v61  ;;  %v6077_v8 = vpop.f32.mrb[86].mxu0  ;;  %v6294_v32 = vpop.f32.mrb[92].mxu1 }
 0x700   : > { %v6313_v45 = vld [vmem:[#allocation2 + $0x28] sm:$0xff]  ;;  %v6132_v9 = vrot.slane %v6077_v8, 1  ;;  %v6349_v43 = vrot.slane %v6294_v32, 2  ;;  %v11131_v0 = vpop.f32.mrb[87].mxu0  ;;  %v11178_v46 = vpop.f32.mrb[93].mxu1 }
 0x701   : > { %v6372_v22 = vadd.f32 %v6344_v59, %v6313_v45  ;;  %6169 = vst.msk [vmem:[#allocation2 + $0x38] sm:$0xff] %vm868_vm4, %v6157_v18  ;;  %v6525_v46 = vld [vmem:[#allocation2] sm:$0xff] }
 0x702   : > { %v6133_v60 = vsel %vm1927_vm9, %v6130_v23, %v6132_v9  ;;  %v6350_v55 = vsel %vm2361_vm12, %v6347_v58, %v6349_v43 }
 0x703   : > { %6384 = vst.msk [vmem:[#allocation2 + $0x28] sm:$0xff] %vm868_vm4, %v6372_v22  ;;  %v6158_v44 = vadd.f32 %v6133_v60, %v6099_v29  ;;  %v6082_v49 = vpop.f32.mrb[88].mxu0  ;;  %v6299_v6 = vpop.f32.mrb[94].mxu1 }
 0x704   : > { %v6314_v36 = vld [vmem:[#allocation2 + $0x30] sm:$0xff]  ;;  %v6134_v11 = vrot.slane %v6082_v49, 1  ;;  %v6351_v3 = vrot.slane %v6299_v6, 2  ;;  %v11134_v34 = vpop.f32.mrb[89].mxu0  ;;  %v11181_v20 = vpop.f32.mrb[95].mxu1  ;;  %v6526_v49 = vld [vmem:[#allocation2 + $0x8] sm:$0xff] }
 0x705   : > { %v6373_v40 = vadd.f32 %v6346_v13, %v6314_v36  ;;  %6170 = vst.msk [vmem:[#allocation2 + $0x40] sm:$0xff] %vm868_vm4, %v6158_v44  ;;  %v6527_v20 = vld [vmem:[#allocation2 + $0x10] sm:$0xff] }
 0x706   : > { %v6135_v59 = vsel %vm1927_vm9, %v6132_v9, %v6134_v11  ;;  %v6352_v38 = vsel %vm2361_vm12, %v6349_v43, %v6351_v3 }
 0x707   : > { %6385 = vst.msk [vmem:[#allocation2 + $0x30] sm:$0xff] %vm868_vm4, %v6373_v40  ;;  %v6159_v2 = vadd.f32 %v6135_v59, %v6100_v14  ;;  %v6087_v52 = vpop.f32.mrb[90].mxu0  ;;  %v6304_v54 = vpop.f32.mrb[96].mxu1 }
 0x708   : > { %v6315_v1 = vld [vmem:[#allocation2 + $0x38] sm:$0xff]  ;;  %v6136_v28 = vrot.slane %v6087_v52, 1  ;;  %v6353_v16 = vrot.slane %v6304_v54, 2  ;;  %v11137_v27 = vpop.f32.mrb[91].mxu0  ;;  %v11184_v42 = vpop.f32.mrb[97].mxu1 }
 0x709   : > { %v6374_v26 = vadd.f32 %v6348_v57, %v6315_v1  ;;  %6171 = vst.msk [vmem:[#allocation2 + $0x48] sm:$0xff] %vm868_vm4, %v6159_v2  ;;  %v6528_v54 = vld [vmem:[#allocation2 + $0x18] sm:$0xff] }
 0x70a   : > { %v6137_v13 = vsel %vm1927_vm9, %v6134_v11, %v6136_v28  ;;  %v6161_v53 = vadd.f32 %v6136_v28, %v6102_v33  ;;  %v6354_v19 = vsel %vm2361_vm12, %v6351_v3, %v6353_v16  ;;  %v6529_v33 = vld [vmem:[#allocation2 + $0x20] sm:$0xff] }
 0x70b   : > { %6386 = vst.msk [vmem:[#allocation2 + $0x38] sm:$0xff] %vm868_vm4, %v6374_v26  ;;  %v6160_v41 = vadd.f32 %v6137_v13, %v6101_v21  ;;  %v6462_v10 = vpop.f32.mrb[92].mxu0 }
 0x70c   : > { %v6316_v23 = vld [vmem:[#allocation2 + $0x40] sm:$0xff]  ;;  %6173 = vst.msk [vmem:[#allocation2 + $0x58] sm:$0x7] %vm5382_vm7, %v6161_v53  ;;  %v11195_v58 = vpop.f32.mrb[93].mxu0 }
 0x70d   : > { %v6375_v30 = vadd.f32 %v6350_v55, %v6316_v23  ;;  %6172 = vst.msk [vmem:[#allocation2 + $0x50] sm:$0xff] %vm868_vm4, %v6160_v41  ;;  %v6530_v23 = vld [vmem:[#allocation2 + $0x28] sm:$0xff] }
 0x70f   : > { %6387 = vst.msk [vmem:[#allocation2 + $0x40] sm:$0xff] %vm868_vm4, %v6375_v30  ;;  %v6466_v31 = vpop.f32.mrb[94].mxu0 }
 0x710   : > { %v6317_v48 = vld [vmem:[#allocation2 + $0x48] sm:$0xff]  ;;  %v11198_v61 = vpop.f32.mrb[95].mxu0  ;;  %v6549_v45 = vrot.slane %v6466_v31, 3 }
 0x711   : > { %v6376_v63 = vadd.f32 %v6352_v38, %v6317_v48  ;;  %v15173_v48 = vld [vmem:[%s16321_s10] ss:$0 sm:$0xff] }
 0x713   : > { %6388 = vst.msk [vmem:[#allocation2 + $0x48] sm:$0xff] %vm868_vm4, %v6376_v63  ;;  %v6319_v57 = vld [vmem:[#allocation2 + $0x58] sm:$0x3]  ;;  %v6471_v18 = vpop.f32.mrb[96].mxu0 }
 0x714   : > { %v6318_v8 = vld [vmem:[#allocation2 + $0x50] sm:$0xff]  ;;  %v6378_v32 = vadd.f32 %v6353_v16, %v6319_v57  ;;  %v6550_v9 = vrot.slane %v6471_v18, 3  ;;  %v11201_v43 = vpop.f32.mrb[97].mxu0 }
 0x715   : > { %v6377_v0 = vadd.f32 %v6354_v19, %v6318_v8  ;;  %v6531_v8 = vld [vmem:[#allocation2 + $0x30] sm:$0xff] }
 0x716   : > { %6390 = vst.msk [vmem:[#allocation2 + $0x58] sm:$0x3] %vm5211_vm2, %v6378_v32  ;;  %v6551_v22 = vsel %vm2576_vm11, %v6549_v45, %v6550_v9 }
 0x717   : > { %6389 = vst.msk [vmem:[#allocation2 + $0x50] sm:$0xff] %vm868_vm4, %v6377_v0  ;;  %v6584_v29 = vadd.f32 %v6551_v22, %v6525_v46  ;;  %v6476_v60 = vpop.f32.mrb[98].mxu0 }
 0x718   : > { %v6552_v55 = vrot.slane %v6476_v60, 3  ;;  %v11204_v44 = vpop.f32.mrb[99].mxu0 }
 0x719   : > { %6596 = vst.msk [vmem:[#allocation2] sm:$0xff] %vm868_vm4, %v6584_v29  ;;  %v6532_v44 = vld [vmem:[#allocation2 + $0x38] sm:$0xff] }
 0x71a   : > { %v6553_v6 = vsel %vm2576_vm11, %v6550_v9, %v6552_v55 }
 0x71b   : > { %v6585_v36 = vadd.f32 %v6553_v6, %v6526_v49  ;;  %v6481_v11 = vpop.f32.mrb[100].mxu0 }
 0x71c   : > { %v6554_v3 = vrot.slane %v6481_v11, 3  ;;  %v11207_v34 = vpop.f32.mrb[101].mxu0 }
 0x71d   : > { %6597 = vst.msk [vmem:[#allocation2 + $0x8] sm:$0xff] %vm868_vm4, %v6585_v36 }
 0x71e   : > { %v6555_v40 = vsel %vm2576_vm11, %v6552_v55, %v6554_v3 }
 0x71f   : > { %v6586_v14 = vadd.f32 %v6555_v40, %v6527_v20  ;;  %v6486_v59 = vpop.f32.mrb[102].mxu0 }
 0x720   : > { %v6608_v38 = vld [vmem:[#allocation2] sm:$0xff]  ;;  %v6556_v2 = vrot.slane %v6486_v59, 3  ;;  %v11210_v52 = vpop.f32.mrb[103].mxu0 }
 0x721   : > { %6814 = vst.msk [vmem:[#allocation2] sm:$0xff] %vm868_vm4, %v11969_v7  ;;  %6598 = vst.msk [vmem:[#allocation2 + $0x10] sm:$0xff] %vm868_vm4, %v6586_v14  ;;  %v6628_v45 = vadd.f32 %v15173_v48, %v6608_v38 }
 0x722   : > { %v6557_v1 = vsel %vm2576_vm11, %v6554_v3, %v6556_v2 }
 0x723   : > { %v6587_v28 = vadd.f32 %v6557_v1, %v6528_v54  ;;  %v6491_v16 = vpop.f32.mrb[104].mxu0  ;;  %v15191_v6 = vmul.f32 %v6628_v45, %v12183_v39 }
 0x724   : > { %v6609_v27 = vld [vmem:[#allocation2 + $0x8] sm:$0xff]  ;;  %v6558_v42 = vrot.slane %v6491_v16, 3  ;;  %v11213_v26 = vpop.f32.mrb[105].mxu0 }
 0x725   : > { %6815 = vst.msk [vmem:[#allocation2 + $0x8] sm:$0xff] %vm868_vm4, %v11969_v7  ;;  %6599 = vst.msk [vmem:[#allocation2 + $0x18] sm:$0xff] %vm868_vm4, %v6587_v28  ;;  %v6629_v18 = vadd.f32 %v15173_v48, %v6609_v27  ;;  %v6686_v54 = vmul.f32 %v15191_v6, %v15191_v6 }
 0x726   : > { %v6559_v21 = vsel %vm2576_vm11, %v6556_v2, %v6558_v42  ;;  %v6533_v2 = vld [vmem:[#allocation2 + $0x40] sm:$0xff] }
 0x727   : > { %v6588_v13 = vadd.f32 %v6559_v21, %v6529_v33  ;;  %v6496_v53 = vpop.f32.mrb[106].mxu0  ;;  %v15183_v60 = vmul.f32 %v6629_v18, %v12190_v47 }
 0x728   : > { %v6610_v19 = vld [vmem:[#allocation2 + $0x10] sm:$0xff]  ;;  %v6560_v41 = vrot.slane %v6496_v53, 3  ;;  %v11216_v10 = vpop.f32.mrb[107].mxu0 }
 0x729   : > { %6816 = vst.msk [vmem:[#allocation2 + $0x10] sm:$0xff] %vm868_vm4, %v11969_v7  ;;  %6600 = vst.msk [vmem:[#allocation2 + $0x20] sm:$0xff] %vm868_vm4, %v6588_v13  ;;  %v6630_v0 = vadd.f32 %v15173_v48, %v6610_v19  ;;  %v6687_v14 = vmul.f32 %v15183_v60, %v15183_v60  ;;  %v6655_v21 = vsel %vm868_vm4, %v15183_v60, 0.0 }
 0x72a   : > { %v6561_v58 = vsel %vm2576_vm11, %v6558_v42, %v6560_v41 }
 0x72b   : > { %v6589_v30 = vadd.f32 %v6561_v58, %v6530_v23  ;;  %v6501_v31 = vpop.f32.mrb[108].mxu0  ;;  %v15194_v3 = vmul.f32 %v6630_v0, %v12197_v50  ;;  %v6700_v13 = vsel %vm868_vm4, %v6687_v14, 0.0  ;;  %v6534_v23 = vld [vmem:[#allocation2 + $0x48] sm:$0xff] }
 0x72c   : > { %v6611_v61 = vld [vmem:[#allocation2 + $0x18] sm:$0xff]  ;;  %v6562_v63 = vrot.slane %v6501_v31, 3  ;;  %v11219_v57 = vpop.f32.mrb[109].mxu0 }
 0x72d   : > { %6817 = vst.msk [vmem:[#allocation2 + $0x18] sm:$0xff] %vm868_vm4, %v11969_v7  ;;  %6601 = vst.msk [vmem:[#allocation2 + $0x28] sm:$0xff] %vm868_vm4, %v6589_v30  ;;  %v6631_v55 = vadd.f32 %v15173_v48, %v6611_v61  ;;  %v6688_v27 = vmul.f32 %v15194_v3, %v15194_v3  ;;  %v6699_v30 = vsel %vm868_vm4, %v6686_v54, 0.0  ;;  %v6657_v31 = vsel %vm868_vm4, %v15194_v3, 0.0 }
 0x72e   : > { %v6563_v32 = vsel %vm2576_vm11, %v6560_v41, %v6562_v63  ;;  %v6654_v41 = vsel %vm868_vm4, %v15191_v6, 0.0 }
 0x72f   : > { %v6590_v9 = vadd.f32 %v6563_v32, %v6531_v8  ;;  %v6506_v43 = vpop.f32.mrb[110].mxu0  ;;  %v15203_v38 = vmul.f32 %v6631_v55, %v12216_v5  ;;  %v6656_v18 = vadd.f32 %v6655_v21, %v6654_v41  ;;  %v6701_v8 = vadd.f32 %v6700_v13, %v6699_v30  ;;  %v6536_v55 = vld [vmem:[#allocation2 + $0x58] sm:$0x1] }
 0x730   : > { %v6612_v46 = vld [vmem:[#allocation2 + $0x20] sm:$0xff]  ;;  %v6564_v22 = vrot.slane %v6506_v43, 3  ;;  %v11222_v29 = vpop.f32.mrb[111].mxu0  ;;  %v6702_v32 = vsel %vm868_vm4, %v6688_v27, 0.0 }
 0x731   : > { %6818 = vst.msk [vmem:[#allocation2 + $0x20] sm:$0xff] %vm868_vm4, %v11969_v7  ;;  %6602 = vst.msk [vmem:[#allocation2 + $0x30] sm:$0xff] %vm868_vm4, %v6590_v9  ;;  %v6632_v59 = vadd.f32 %v15173_v48, %v6612_v46  ;;  %v6689_v10 = vmul.f32 %v15203_v38, %v15203_v38  ;;  %v6659_v0 = vsel %vm868_vm4, %v15203_v38, 0.0 }
 0x732   : > { %v6565_v49 = vsel %vm2576_vm11, %v6562_v63, %v6564_v22 }
 0x733   : > { %v6591_v36 = vadd.f32 %v6565_v49, %v6532_v44  ;;  %v6511_v11 = vpop.f32.mrb[112].mxu0  ;;  %v15215_v53 = vmul.f32 %v6632_v59, %v12227_v15  ;;  %v6658_v44 = vadd.f32 %v6657_v31, %v6656_v18  ;;  %v6704_v49 = vsel %vm868_vm4, %v6689_v10, 0.0 }
 0x734   : > { %v6613_v34 = vld [vmem:[#allocation2 + $0x28] sm:$0xff]  ;;  %v6566_v20 = vrot.slane %v6511_v11, 3  ;;  %v11225_v40 = vpop.f32.mrb[113].mxu0 }
 0x735   : > { %6819 = vst.msk [vmem:[#allocation2 + $0x28] sm:$0xff] %vm868_vm4, %v11969_v7  ;;  %6603 = vst.msk [vmem:[#allocation2 + $0x38] sm:$0xff] %vm868_vm4, %v6591_v36  ;;  %v6633_v1 = vadd.f32 %v15173_v48, %v6613_v34  ;;  %v6690_v46 = vmul.f32 %v15215_v53, %v15215_v53  ;;  %v6535_v36 = vld [vmem:[#allocation2 + $0x50] sm:$0xff] }
 0x736   : > { %v6567_v52 = vsel %vm2576_vm11, %v6564_v22, %v6566_v20 }
 0x737   : > { %v6592_v28 = vadd.f32 %v6567_v52, %v6533_v2  ;;  %v6516_v16 = vpop.f32.mrb[114].mxu0  ;;  %v15230_v61 = vmul.f32 %v6633_v1, %v12238_v25  ;;  %v6703_v2 = vadd.f32 %v6702_v32, %v6701_v8  ;;  %v6660_v52 = vadd.f32 %v6659_v0, %v6658_v44 }
 0x738   : > { %v6614_v42 = vld [vmem:[#allocation2 + $0x30] sm:$0xff]  ;;  %v6568_v26 = vrot.slane %v6516_v16, 3  ;;  %v11228_v33 = vpop.f32.mrb[115].mxu0  ;;  %v6706_v1 = vsel %vm868_vm4, %v6690_v46, 0.0 }
 0x739   : > { %v6634_v19 = vadd.f32 %v15173_v48, %v6614_v42  ;;  %6820 = vst.msk [vmem:[#allocation2 + $0x30] sm:$0xff] %vm868_vm4, %v11969_v7  ;;  %6604 = vst.msk [vmem:[#allocation2 + $0x40] sm:$0xff] %vm868_vm4, %v6592_v28  ;;  %v6691_v40 = vmul.f32 %v15230_v61, %v15230_v61  ;;  %v6663_v28 = vsel %vm868_vm4, %v15230_v61, 0.0  ;;  %v6705_v42 = vadd.f32 %v6704_v49, %v6703_v2 }
 0x73a   : > { %v6569_v58 = vsel %vm2576_vm11, %v6566_v20, %v6568_v26  ;;  %v6661_v20 = vsel %vm868_vm4, %v15215_v53, 0.0 }
 0x73b   : > { %v6593_v63 = vadd.f32 %v6569_v58, %v6534_v23  ;;  %v6521_v57 = vpop.f32.mrb[116].mxu0  ;;  %v15238_v22 = vmul.f32 %v6634_v19, %v12249_v35  ;;  %v6708_v33 = vsel %vm868_vm4, %v6691_v40, 0.0  ;;  %v6707_v41 = vadd.f32 %v6706_v1, %v6705_v42 }
 0x73c   : > { %v6615_v45 = vld [vmem:[#allocation2 + $0x38] sm:$0xff]  ;;  %v6570_v9 = vrot.slane %v6521_v57, 3  ;;  %v11231_v43 = vpop.f32.mrb[117].mxu0 }
 0x73d   : > { %v6635_v29 = vadd.f32 %v15173_v48, %v6615_v45  ;;  %6821 = vst.msk [vmem:[#allocation2 + $0x38] sm:$0xff] %vm868_vm4, %v11969_v7  ;;  %6605 = vst.msk [vmem:[#allocation2 + $0x48] sm:$0xff] %vm868_vm4, %v6593_v63  ;;  %v6692_v16 = vmul.f32 %v15238_v22, %v15238_v22  ;;  %v6665_v21 = vsel %vm868_vm4, %v15238_v22, 0.0  ;;  %v6709_v57 = vadd.f32 %v6708_v33, %v6707_v41 }
 0x73e   : > { %v6571_v11 = vsel %vm2576_vm11, %v6568_v26, %v6570_v9  ;;  %v6595_v34 = vadd.f32 %v6570_v9, %v6536_v55  ;;  %v6662_v26 = vadd.f32 %v6661_v20, %v6660_v52  ;;  %v6640_v43 = vadd.f32 %v15173_v48, %v15046_v17 }
 0x73f   : > { %v15251_v14 = vmul.f32 %v6635_v29, %v12260_v51  ;;  %v6594_v59 = vadd.f32 %v6571_v11, %v6535_v36  ;;  %v6710_v58 = vsel %vm868_vm4, %v6692_v16, 0.0 }
 0x740   : > { %v6616_v54 = vld [vmem:[#allocation2 + $0x40] sm:$0xff]  ;;  %6607 = vst.msk [vmem:[#allocation2 + $0x58] sm:$0x1] %vm5040_vm1, %v6595_v34  ;;  %v6664_v10 = vadd.f32 %v6663_v28, %v6662_v26  ;;  %v6711_v0 = vadd.f32 %v6710_v58, %v6709_v57  ;;  %v15306_v2 = vmul.f32 %v6640_v43, %v12315_v56 }
 0x741   : > { %v6636_v27 = vadd.f32 %v15173_v48, %v6616_v54  ;;  %6822 = vst.msk [vmem:[#allocation2 + $0x40] sm:$0xff] %vm868_vm4, %v11969_v7  ;;  %6606 = vst.msk [vmem:[#allocation2 + $0x50] sm:$0xff] %vm868_vm4, %v6594_v59  ;;  %v6693_v13 = vmul.f32 %v15251_v14, %v15251_v14  ;;  %v6667_v30 = vsel %vm868_vm4, %v15251_v14, 0.0 }
 0x742   : > { %v6666_v18 = vadd.f32 %v6665_v21, %v6664_v10  ;;  %v6698_v26 = vmul.f32 %v15306_v2, %v15306_v2  ;;  %v6677_v41 = vsel %vm881_vm5, %v15306_v2, 0.0 }
 0x743   : > { %v15269_v19 = vmul.f32 %v6636_v27, %v12271_v62  ;;  %v6712_v8 = vsel %vm868_vm4, %v6693_v13, 0.0 }
 0x744   : > { %v6617_v23 = vld [vmem:[#allocation2 + $0x48] sm:$0xff]  ;;  %v6668_v46 = vadd.f32 %v6667_v30, %v6666_v18  ;;  %v6713_v17 = vadd.f32 %v6712_v8, %v6711_v0  ;;  %v6722_v30 = vsel %vm881_vm5, %v6698_v26, 0.0 }
 0x745   : > { %v6694_v31 = vmul.f32 %v15269_v19, %v15269_v19  ;;  %v6637_v63 = vadd.f32 %v15173_v48, %v6617_v23  ;;  %6823 = vst.msk [vmem:[#allocation2 + $0x48] sm:$0xff] %vm868_vm4, %v11969_v7  ;;  %v6669_v32 = vsel %vm868_vm4, %v15269_v19, 0.0 }
 0x746   : > { %v6670_v34 = vadd.f32 %v6669_v32, %v6668_v46 }
 0x747   : > { %v15283_v45 = vmul.f32 %v6637_v63, %v12282_v12  ;;  %v6619_v9 = vld [vmem:[#allocation2 + $0x58] sm:$0xff]  ;;  %v6714_v44 = vsel %vm868_vm4, %v6694_v31, 0.0 }
 0x748   : > { %v6618_v29 = vld [vmem:[#allocation2 + $0x50] sm:$0xff]  ;;  %v6639_v55 = vadd.f32 %v15173_v48, %v6619_v9  ;;  %6825 = vst.msk [vmem:[#allocation2 + $0x58] sm:$0xff] %vm868_vm4, %v11969_v7  ;;  %v6715_v52 = vadd.f32 %v6714_v44, %v6713_v17 }
 0x749   : > { %v6671_v49 = vsel %vm868_vm4, %v15283_v45, 0.0  ;;  %v6695_v36 = vmul.f32 %v15283_v45, %v15283_v45  ;;  %v6638_v11 = vadd.f32 %v15173_v48, %v6618_v29  ;;  %6824 = vst.msk [vmem:[#allocation2 + $0x50] sm:$0xff] %vm868_vm4, %v11969_v7 }
 0x74a   : > { %v15299_v20 = vmul.f32 %v6639_v55, %v12304_v37  ;;  %v6672_v54 = vadd.f32 %v6671_v49, %v6670_v34 }
 0x74b   : > { %v6716_v40 = vsel %vm868_vm4, %v6695_v36, 0.0  ;;  %v15303_v59 = vmul.f32 %v6638_v11, %v12293_v24 }
 0x74c   : > { %v6697_v28 = vmul.f32 %v15299_v20, %v15299_v20  ;;  %v6717_v16 = vadd.f32 %v6716_v40, %v6715_v52  ;;  %v6675_v42 = vsel %vm868_vm4, %v15299_v20, 0.0 }
 0x74d   : > { %v6673_v48 = vsel %vm868_vm4, %v15303_v59, 0.0  ;;  %v6696_v1 = vmul.f32 %v15303_v59, %v15303_v59 }
 0x74e   : > { %v6674_v27 = vadd.f32 %v6673_v48, %v6672_v54  ;;  %v6720_v10 = vsel %vm868_vm4, %v6697_v28, 0.0 }
 0x74f   : > { %v6718_v33 = vsel %vm868_vm4, %v6696_v1, 0.0 }
 0x750   : > { %v6676_v21 = vadd.f32 %v6675_v42, %v6674_v27  ;;  %v6719_v13 = vadd.f32 %v6718_v33, %v6717_v16  ;;  %v9233_v27 = vld [vmem:[%s16317_s6 + $0x80] sm:$0xff] }
 0x751   : > { %v9254_v33 = vld [vmem:[%s16317_s6 + $0xc0] sm:$0xff] }
 0x752   : > { %v6678_v23 = vadd.f32 %v6677_v41, %v6676_v21  ;;  %v6721_v58 = vadd.f32 %v6720_v10, %v6719_v13 }
 0x754   : > { %v6679_v31 = vrot.slane %v6678_v23, 4  ;;  %v6723_v63 = vadd.f32 %v6722_v30, %v6721_v58 }
 0x756   : > { %v6680_v57 = vadd.f32 %v6679_v31, %v6678_v23  ;;  %v6724_v18 = vrot.slane %v6723_v63, 4  ;;  %v9235_v31 = vld [vmem:[%s16317_s6 + $0x90] sm:$0xff] }
 0x758   : > { %v6681_v8 = vrot.slane %v6680_v57, 2  ;;  %v6725_v32 = vadd.f32 %v6724_v18, %v6723_v63  ;;  %v9236_v63 = vld [vmem:[%s16317_s6 + $0x98] sm:$0xff] }
 0x75a   : > { %v6682_v9 = vadd.f32 %v6681_v8, %v6680_v57  ;;  %v6726_v43 = vrot.slane %v6725_v32, 2 }
 0x75c   : > { %v6683_v0 = vrot.slane %v6682_v9, 1  ;;  %v6727_v46 = vadd.f32 %v6726_v43, %v6725_v32  ;;  %v11842_v32 = vpack.c.bf16 %v9236_v63, %v9235_v31 }
 0x75e   : > { %v6684_v29 = vadd.f32 %v6683_v0, %v6682_v9  ;;  %v6728_v55 = vrot.slane %v6727_v46, 1 }
 0x760   : > { %v15323_v44 = vmul.f32 0.015625, %v6684_v29  ;;  %v6729_v49 = vadd.f32 %v6728_v55, %v6727_v46  ;;  %v9237_v46 = vld [vmem:[%s16317_s6 + $0xa0] sm:$0xff]  ;;  %v9259_v55 = vld [vmem:[%s16317_s6 + $0xe8] sm:$0xff] }
 0x762   : > { %v6730_v36 = vmul.f32 0.015625, %v6729_v49  ;;  %v6731_v11 = vmul.f32 %v15323_v44, %v15323_v44  ;;  %v6734_v52 = vsub.f32 %v15191_v6, %v15323_v44  ;;  %v6735_v54 = vsub.f32 %v15183_v60, %v15323_v44  ;;  %v9234_v6 = vld [vmem:[%s16317_s6 + $0x88] sm:$0xff] }
 0x763   : > { %v6736_v16 = vsub.f32 %v15194_v3, %v15323_v44  ;;  %v9255_v3 = vld [vmem:[%s16317_s6 + $0xc8] sm:$0xff]  ;;  %v11839_v13 = vpack.c.bf16 %v9234_v6, %v9233_v27  ;;  %v6737_v41 = vsub.f32 %v15203_v38, %v15323_v44  ;;  %v9257_v38 = vld [vmem:[%s16317_s6 + $0xd8] sm:$0xff]  ;;  %v6738_v18 = vsub.f32 %v15215_v53, %v15323_v44 }
 0x764   : > { %v6732_v17 = vsub.f32 %v6730_v36, %v6731_v11  ;;  %v11851_v57 = vpack.c.bf16 %v9255_v3, %v9254_v33  ;;  %v9238_v53 = vld [vmem:[%s16317_s6 + $0xa8] sm:$0xff]  ;;  %v6739_v49 = vsub.f32 %v15230_v61, %v15323_v44  ;;  %v9240_v61 = vld [vmem:[%s16317_s6 + $0xb8] sm:$0xff] }
 0x765   : > { %v11845_v11 = vpack.c.bf16 %v9238_v53, %v9237_v46  ;;  %v9276_v53 = vld [vmem:[%s16317_s6 + $0x108] sm:$0xff] }
 0x766   : > { %v6733_v34 = vmax.f32 %v6732_v17, 0.0 }
 0x768   : > { %v6747_v40 = vadd.f32 1e-05, %v6733_v34 }
 0x76a   : > { %11945 = vrsqrt.f32 %v6747_v40 }
 0x774   : > { %v15331_v48 = vpop.eup %11945 }
 0x775   : > { %v6749_v1 = vmul.f32 %v15331_v48, %v6734_v52  ;;  %v6750_v28 = vmul.f32 %v15331_v48, %v6735_v54  ;;  %v6751_v26 = vmul.f32 %v15331_v48, %v6736_v16  ;;  %v6752_v30 = vmul.f32 %v15331_v48, %v6737_v41  ;;  %v9239_v52 = vld [vmem:[%s16317_s6 + $0xb0] sm:$0xff] }
 0x776   : > { %v6753_v0 = vmul.f32 %v15331_v48, %v6738_v18  ;;  %v6754_v40 = vmul.f32 %v15331_v48, %v6739_v49  ;;  %v9260_v54 = vld [vmem:[%s16317_s6 + $0xf0] sm:$0xff]  ;;  %v11848_v27 = vpack.c.bf16 %v9240_v61, %v9239_v52  ;;  %v9278_v49 = vld [vmem:[%s16317_s6 + $0x118] sm:$0xff]  ;;  %v9279_v52 = vld [vmem:[%s16317_s6 + $0x120] sm:$0xff] }
 0x777   : > { %vm6762_vm5 = vcmp.ge.f32.partialorder %v6749_v1, 0.0  ;;  %v6775_v42 = vmul.f32 0.2, %v6749_v1  ;;  %v6776_v60 = vmul.f32 0.2, %v6750_v28  ;;  %vm6763_vm6 = vcmp.ge.f32.partialorder %v6750_v28, 0.0 }
 0x778   : > { %v6777_v58 = vmul.f32 0.2, %v6751_v26  ;;  %vm6764_vm3 = vcmp.ge.f32.partialorder %v6751_v26, 0.0  ;;  %v6778_v43 = vmul.f32 0.2, %v6752_v30  ;;  %vm6765_vm8 = vcmp.ge.f32.partialorder %v6752_v30, 0.0 }
 0x779   : > { %v6788_v21 = vsel %vm6762_vm5, %v6749_v1, %v6775_v42  ;;  %v6789_v23 = vsel %vm6763_vm6, %v6750_v28, %v6776_v60  ;;  %v6779_v34 = vmul.f32 0.2, %v6753_v0  ;;  %vm6766_vm10 = vcmp.ge.f32.partialorder %v6753_v0, 0.0  ;;  %v9261_v1 = vld [vmem:[%s16317_s6 + $0xf8] sm:$0xff]  ;;  %v9280_v61 = vld [vmem:[%s16317_s6 + $0x128] sm:$0xff] }
 0x77a   : > { %v15353_v10 = vmul.f32 %v6788_v21, %v12183_v39  ;;  %v9256_v39 = vld [vmem:[%s16317_s6 + $0xd0] sm:$0xff]  ;;  %v15379_v8 = vmul.f32 %v6789_v23, %v12190_v47  ;;  %v6790_v9 = vsel %vm6764_vm3, %v6751_v26, %v6777_v58  ;;  %v9258_v47 = vld [vmem:[%s16317_s6 + $0xe0] sm:$0xff]  ;;  %v6791_v17 = vsel %vm6765_vm8, %v6752_v30, %v6778_v43 }
 0x77b   : > { %v11854_v29 = vpack.c.bf16 %v9257_v38, %v9256_v39  ;;  %v15406_v36 = vmul.f32 %v6790_v9, %v12197_v50  ;;  %v11857_v50 = vpack.c.bf16 %v9259_v55, %v9258_v47  ;;  %v6740_v28 = vsub.f32 %v15238_v22, %v15323_v44  ;;  %v9277_v55 = vld [vmem:[%s16317_s6 + $0x110] sm:$0xff] }
 0x77c   : > { %11249 = vmatmul.mubr.msk.f32.vlgmr.msra.gmra.mrb[98].mxu1 %vm868_vm4, %v15353_v10  ;;  %11304 = vmatmul.mubr.msk.f32.vlgmr.msra.gmra.mrb[118].mxu0 %vm868_vm4, %v15353_v10  ;;  %v15434_v16 = vmul.f32 %v6791_v17, %v12216_v5  ;;  %v6792_v6 = vsel %vm6766_vm10, %v6753_v0, %v6779_v34  ;;  %v6780_v42 = vmul.f32 0.2, %v6754_v40  ;;  %v11860_v26 = vpack.c.bf16 %v9261_v1, %v9260_v54  ;;  %v9298_v17 = vld [vmem:[%s16317_s6 + $0x150] sm:$0xff]  ;;  %v9299_v34 = vld [vmem:[%s16317_s6 + $0x158] sm:$0xff]  ;;  %v9300_v54 = vld [vmem:[%s16317_s6 + $0x160] sm:$0xff] }
 0x77d   : > { %11840 = vmatpush3.bf16.msra.mxu1 %v11839_v13  ;;  %11251 = vmatprep.mubr.msk.f32.mxu1 %vm11970_vm0, %v11969_v7  ;;  %v6755_v60 = vmul.f32 %v15331_v48, %v6740_v28  ;;  %vm6767_vm13 = vcmp.ge.f32.partialorder %v6754_v40, 0.0  ;;  %v6741_v5 = vsub.f32 %v15251_v14, %v15323_v44  ;;  %v15450_v22 = vmul.f32 %v6792_v6, %v12227_v15  ;;  %v9301_v1 = vld [vmem:[%s16317_s6 + $0x168] sm:$0xff]  ;;  %v9282_v6 = vld [vmem:[%s16317_s6 + $0x138] sm:$0xff] }
 0x77e   : > { %11306 = vmatprep.mubr.msk.f32.mxu0 %vm11970_vm0, %v11969_v7  ;;  %11841 = vmatprep.subr.bf16.mxu1 %v11968_v4  ;;  %v6793_v33 = vsel %vm6767_vm13, %v6754_v40, %v6780_v42  ;;  %v6742_v15 = vsub.f32 %v15269_v19, %v15323_v44  ;;  %v11866_v40 = vpack.c.bf16 %v9278_v49, %v9277_v55  ;;  %v9363_v55 = vld [vmem:[%s16317_s6 + $0x220] sm:$0xff]  ;;  %v9364_v49 = vld [vmem:[%s16317_s6 + $0x228] sm:$0xff]  ;;  %vm7027_vm3 = vcmask 7168  }
 0x77f   : > { %11852 = vmatpush3.bf16.msra.mxu0 %v11851_v57  ;;  %v6781_v3 = vmul.f32 0.2, %v6755_v60  ;;  %v6756_v21 = vmul.f32 %v15331_v48, %v6741_v5  ;;  %vm6768_vm14 = vcmp.ge.f32.partialorder %v6755_v60, 0.0  ;;  %v15466_v14 = vmul.f32 %v6793_v33, %v12238_v25 }
 0x780   : > { %11252 = vmatmul.mubr.msk.f32.gmra.mrb[100].mxu1 %vm868_vm4, %v15379_v8  ;;  %11307 = vmatmul.mubr.msk.f32.gmra.mrb[120].mxu0 %vm868_vm4, %v15379_v8  ;;  %v6757_v23 = vmul.f32 %v15331_v48, %v6742_v15  ;;  %v6743_v25 = vsub.f32 %v15283_v45, %v15323_v44  ;;  %v11869_v28 = vpack.c.bf16 %v9280_v61, %v9279_v52  ;;  %v9338_v15 = vld [vmem:[%s16317_s6 + $0x1c0] sm:$0xff]  ;;  %vm7039_vm8 = vcmask 0  }
 0x781   : > { %11254 = vmatprep.mubr.msk.f32.mxu1 %vm11970_vm0, %v11969_v7  ;;  %11309 = vmatprep.mubr.msk.f32.mxu0 %vm11970_vm0, %v11969_v7  ;;  %v6794_v13 = vsel %vm6768_vm14, %v6755_v60, %v6781_v3  ;;  %v6782_v41 = vmul.f32 0.2, %v6756_v21  ;;  %vm6769_vm15 = vcmp.ge.f32.partialorder %v6756_v21, 0.0  ;;  %v11881_v42 = vpack.c.bf16 %v9301_v1, %v9300_v54  ;;  %v9302_v60 = vld [vmem:[%s16317_s6 + $0x170] sm:$0xff]  ;;  %v9317_v3 = vld [vmem:[%s16317_s6 + $0x180] sm:$0xff] }
 0x782   : > { %11843 = vmatpush3.bf16.msra.mxu1 %v11842_v32  ;;  %11853 = vmatprep.subr.bf16.mxu0 %v11968_v4  ;;  %v15481_v19 = vmul.f32 %v6794_v13, %v12249_v35  ;;  %v6783_v30 = vmul.f32 0.2, %v6757_v23  ;;  %v6758_v31 = vmul.f32 %v15331_v48, %v6743_v25  ;;  %vm6770_vm1 = vcmp.ge.f32.partialorder %v6757_v23, 0.0  ;;  %v9339_v13 = vld [vmem:[%s16317_s6 + $0x1c8] sm:$0xff]  ;;  %v9320_v25 = vld [vmem:[%s16317_s6 + $0x198] sm:$0xff] }
 0x783   : > { %11844 = vmatprep.subr.bf16.mxu1 %v11968_v4  ;;  %11855 = vmatpush3.bf16.msra.mxu0 %v11854_v29  ;;  %v6795_v58 = vsel %vm6769_vm15, %v6756_v21, %v6782_v41  ;;  %v6744_v35 = vsub.f32 %v15303_v59, %v15323_v44  ;;  %v9296_v29 = vld [vmem:[%s16317_s6 + $0x140] sm:$0xff]  ;;  %v9318_v21 = vld [vmem:[%s16317_s6 + $0x188] sm:$0xff]  ;;  %vm7746_vm10 = vcmask 3072  }
 0x784   : > { %11255 = vmatmul.mubr.msk.f32.gmra.mrb[102].mxu1 %vm868_vm4, %v15406_v36  ;;  %11310 = vmatmul.mubr.msk.f32.gmra.mrb[122].mxu0 %vm868_vm4, %v15406_v36  ;;  %v15495_v45 = vmul.f32 %v6795_v58, %v12260_v51  ;;  %v6796_v63 = vsel %vm6770_vm1, %v6757_v23, %v6783_v30  ;;  %v6784_v57 = vmul.f32 0.2, %v6758_v31  ;;  %vm6771_vm2 = vcmp.ge.f32.partialorder %v6758_v31, 0.0  ;;  %v9319_v23 = vld [vmem:[%s16317_s6 + $0x190] sm:$0xff] }
 0x785   : > { %11257 = vmatprep.mubr.msk.f32.mxu1 %vm11970_vm0, %v11969_v7  ;;  %11312 = vmatprep.mubr.msk.f32.mxu0 %vm11970_vm0, %v11969_v7  ;;  %v6759_v39 = vmul.f32 %v15331_v48, %v6744_v35  ;;  %v6745_v51 = vsub.f32 %v15299_v20, %v15323_v44  ;;  %v15509_v59 = vmul.f32 %v6796_v63, %v12271_v62  ;;  %v9340_v30 = vld [vmem:[%s16317_s6 + $0x1d0] sm:$0xff]  ;;  %v9321_v63 = vld [vmem:[%s16317_s6 + $0x1a0] sm:$0xff] }
 0x786   : > { %11846 = vmatpush3.bf16.msra.mxu1 %v11845_v11  ;;  %11856 = vmatprep.subr.bf16.mxu0 %v11968_v4  ;;  %v6797_v38 = vsel %vm6771_vm2, %v6758_v31, %v6784_v57  ;;  %v6746_v62 = vsub.f32 %v15306_v2, %v15323_v44  ;;  %v11887_v41 = vpack.c.bf16 %v9318_v21, %v9317_v3  ;;  %v9341_v31 = vld [vmem:[%s16317_s6 + $0x1d8] sm:$0xff]  ;;  %v9322_v57 = vld [vmem:[%s16317_s6 + $0x1a8] sm:$0xff] }
 0x787   : > { %11847 = vmatprep.subr.bf16.mxu1 %v11968_v4  ;;  %11858 = vmatpush3.bf16.msra.mxu0 %v11857_v50  ;;  %v6785_v18 = vmul.f32 0.2, %v6759_v39  ;;  %v6760_v32 = vmul.f32 %v15331_v48, %v6745_v51  ;;  %vm6772_vm7 = vcmp.ge.f32.partialorder %v6759_v39, 0.0  ;;  %v15523_v20 = vmul.f32 %v6797_v38, %v12282_v12  ;;  %v9342_v51 = vld [vmem:[%s16317_s6 + $0x1e0] sm:$0xff]  ;;  %v9343_v38 = vld [vmem:[%s16317_s6 + $0x1e8] sm:$0xff] }
 0x788   : > { %11258 = vmatmul.mubr.msk.f32.gmra.mrb[104].mxu1 %vm868_vm4, %v15434_v16  ;;  %11313 = vmatmul.mubr.msk.f32.gmra.mrb[124].mxu0 %vm868_vm4, %v15434_v16  ;;  %v6761_v0 = vmul.f32 %v15331_v48, %v6746_v62  ;;  %v11878_v50 = vpack.c.bf16 %v9299_v34, %v9298_v17  ;;  %v11899_v58 = vpack.c.bf16 %v9339_v13, %v9338_v15  ;;  %v9324_v62 = vld [vmem:[%s16317_s6 + $0x1b8] sm:$0xff]  ;;  %v9365_v17 = vld [vmem:[%s16317_s6 + $0x230] sm:$0xff]  ;;  %v7006_v13 = vld [vmem:[#allocation2 + $0x23] sm:$0xff] }
 0x789   : > { %11260 = vmatprep.mubr.msk.f32.mxu1 %vm11970_vm0, %v11969_v7  ;;  %11315 = vmatprep.mubr.msk.f32.mxu0 %vm11970_vm0, %v11969_v7  ;;  %v6798_v9 = vsel %vm6772_vm7, %v6759_v39, %v6785_v18  ;;  %v6786_v43 = vmul.f32 0.2, %v6760_v32  ;;  %vm6773_vm5 = vcmp.ge.f32.partialorder %v6760_v32, 0.0  ;;  %v11890_v35 = vpack.c.bf16 %v9320_v25, %v9319_v23  ;;  %v9366_v34 = vld [vmem:[%s16317_s6 + $0x238] sm:$0xff] }
 0x78a   : > { %11849 = vmatpush3.bf16.msra.mxu1 %v11848_v27  ;;  %11859 = vmatprep.subr.bf16.mxu0 %v11968_v4  ;;  %v15535_v12 = vmul.f32 %v6798_v9, %v12293_v24  ;;  %v6787_v44 = vmul.f32 0.2, %v6761_v0  ;;  %vm6774_vm6 = vcmp.ge.f32.partialorder %v6761_v0, 0.0  ;;  %v9281_v27 = vld [vmem:[%s16317_s6 + $0x130] sm:$0xff]  ;;  %v11902_v39 = vpack.c.bf16 %v9341_v31, %v9340_v30 }
 0x78b   : > { %11861 = vmatpush3.bf16.msra.mxu0 %v11860_v26  ;;  %11862 = vmatprep.subr.bf16.mxu1 %v11968_v4  ;;  %v6799_v2 = vsel %vm6773_vm5, %v6760_v32, %v6786_v43  ;;  %v9303_v26 = vld [vmem:[%s16317_s6 + $0x178] sm:$0xff]  ;;  %v11872_v5 = vpack.c.bf16 %v9282_v6, %v9281_v27  ;;  %v11893_v18 = vpack.c.bf16 %v9322_v57, %v9321_v63  ;;  %v9323_v32 = vld [vmem:[%s16317_s6 + $0x1b0] sm:$0xff] }
 0x78c   : > { %11261 = vmatmul.mubr.msk.f32.gmra.mrb[106].mxu1 %vm868_vm4, %v15450_v22  ;;  %11316 = vmatmul.mubr.msk.f32.gmra.mrb[126].mxu0 %vm868_vm4, %v15450_v22  ;;  %v15546_v48 = vmul.f32 %v6799_v2, %v12304_v37  ;;  %v6800_v24 = vsel %vm6774_vm6, %v6761_v0, %v6787_v44  ;;  %v9275_v37 = vld [vmem:[%s16317_s6 + $0x100] sm:$0xff]  ;;  %v11884_v33 = vpack.c.bf16 %v9303_v26, %v9302_v60  ;;  %v9344_v43 = vld [vmem:[%s16317_s6 + $0x1f0] sm:$0xff]  ;;  %v9345_v0 = vld [vmem:[%s16317_s6 + $0x1f8] sm:$0xff] }
 0x78d   : > { %11263 = vmatprep.mubr.msk.f32.mxu1 %vm11970_vm0, %v11969_v7  ;;  %11318 = vmatprep.mubr.msk.f32.mxu0 %vm11970_vm0, %v11969_v7  ;;  %v15557_v46 = vmul.f32 %v6800_v24, %v12315_v56  ;;  %v9297_v56 = vld [vmem:[%s16317_s6 + $0x148] sm:$0xff]  ;;  %v11863_v47 = vpack.c.bf16 %v9276_v53, %v9275_v37  ;;  %v11905_v9 = vpack.c.bf16 %v9343_v38, %v9342_v51  ;;  %v9359_v24 = vld [vmem:[%s16317_s6 + $0x200] sm:$0xff] }
 0x78e   : > { %11874 = vmatprep.subr.bf16.mxu0 %v11968_v4  ;;  %v11875_v11 = vpack.c.bf16 %v9297_v56, %v9296_v29  ;;  %v11896_v2 = vpack.c.bf16 %v9324_v62, %v9323_v32  ;;  %v11908_v44 = vpack.c.bf16 %v9345_v0, %v9344_v43  ;;  %v9360_v37 = vld [vmem:[%s16317_s6 + $0x208] sm:$0xff]  ;;  %v9361_v29 = vld [vmem:[%s16317_s6 + $0x210] sm:$0xff]  ;;  %v9362_v56 = vld [vmem:[%s16317_s6 + $0x218] sm:$0xff] }
 0x78f   : > { %v11911_v53 = vpack.c.bf16 %v9360_v37, %v9359_v24  ;;  %v7005_v26 = vld [vmem:[#allocation2 + $0x1b] sm:$0xff] }
 0x790   : > { %11264 = vmatmul.mubr.msk.f32.gmra.mrb[108].mxu1 %vm868_vm4, %v15466_v14  ;;  %11319 = vmatmul.mubr.msk.f32.gmra.mrb[128].mxu0 %vm868_vm4, %v15466_v14 }
 0x791   : > { %11266 = vmatprep.mubr.msk.f32.mxu1 %vm11970_vm0, %v11969_v7  ;;  %11321 = vmatprep.mubr.msk.f32.mxu0 %vm11970_vm0, %v11969_v7 }
 0x794   : > { %11267 = vmatmul.mubr.msk.f32.gmra.mrb[110].mxu1 %vm868_vm4, %v15481_v19  ;;  %11322 = vmatmul.mubr.msk.f32.gmra.mrb[130].mxu0 %vm868_vm4, %v15481_v19 }
 0x795   : > { %11269 = vmatprep.mubr.msk.f32.mxu1 %vm11970_vm0, %v11969_v7  ;;  %11324 = vmatprep.mubr.msk.f32.mxu0 %vm11970_vm0, %v11969_v7 }
 0x798   : > { %11270 = vmatmul.mubr.msk.f32.gmra.mrb[112].mxu1 %vm868_vm4, %v15495_v45  ;;  %11325 = vmatmul.mubr.msk.f32.gmra.mrb[132].mxu0 %vm868_vm4, %v15495_v45 }
 0x799   : > { %11272 = vmatprep.mubr.msk.f32.mxu1 %vm11970_vm0, %v11969_v7  ;;  %11327 = vmatprep.mubr.msk.f32.mxu0 %vm11970_vm0, %v11969_v7 }
 0x79c   : > { %11273 = vmatmul.mubr.msk.f32.gmra.mrb[114].mxu1 %vm868_vm4, %v15509_v59  ;;  %11328 = vmatmul.mubr.msk.f32.gmra.mrb[134].mxu0 %vm868_vm4, %v15509_v59 }
 0x79d   : > { %11275 = vmatprep.mubr.msk.f32.mxu1 %vm11970_vm0, %v11969_v7  ;;  %11330 = vmatprep.mubr.msk.f32.mxu0 %vm11970_vm0, %v11969_v7 }
 0x7a0   : > { %11276 = vmatmul.mubr.msk.f32.gmra.mrb[116].mxu1 %vm868_vm4, %v15523_v20  ;;  %11331 = vmatmul.mubr.msk.f32.gmra.mrb[136].mxu0 %vm868_vm4, %v15523_v20 }
 0x7a1   : > { %11278 = vmatprep.mubr.msk.f32.mxu1 %vm11970_vm0, %v11969_v7  ;;  %11333 = vmatprep.mubr.msk.f32.mxu0 %vm11970_vm0, %v11969_v7 }
 0x7a4   : > { %11279 = vmatmul.mubr.msk.f32.gmra.mrb[118].mxu1 %vm868_vm4, %v15535_v12  ;;  %11334 = vmatmul.mubr.msk.f32.gmra.mrb[138].mxu0 %vm868_vm4, %v15535_v12 }
 0x7a5   : > { %11281 = vmatprep.mubr.msk.f32.mxu1 %vm11970_vm0, %v11969_v7  ;;  %11336 = vmatprep.mubr.msk.f32.mxu0 %vm11970_vm0, %v11969_v7 }
 0x7a8   : > { %11282 = vmatmul.mubr.msk.f32.gmra.mrb[120].mxu1 %vm868_vm4, %v15546_v48  ;;  %11337 = vmatmul.mubr.msk.f32.gmra.mrb[140].mxu0 %vm868_vm4, %v15546_v48 }
 0x7a9   : > { %11284 = vmatprep.mubr.msk.f32.mxu1 %vm11970_vm0, %v11969_v7  ;;  %11339 = vmatprep.mubr.msk.f32.mxu0 %vm11970_vm0, %v11969_v7 }
 0x7ac   : > { %11285 = vmatmul.mubr.msk.f32.gmra.mrb[122].mxu1 %vm868_vm4, %v15557_v46  ;;  %11340 = vmatmul.mubr.msk.f32.gmra.mrb[142].mxu0 %vm868_vm4, %v15557_v46 }
 0x7ad   : > { %11358 = vmatprep.mubr.msk.f32.mxu1 %vm11970_vm0, %v11969_v7  ;;  %11413 = vmatprep.mubr.msk.f32.mxu0 %vm11970_vm0, %v11969_v7 }
 0x7b0   : > { %11359 = vmatmul.mubr.msk.f32.vlgmr.msra.gmra.mrb[124].mxu1 %vm868_vm4, %v15353_v10  ;;  %11414 = vmatmul.mubr.msk.f32.vlgmr.msra.gmra.mrb[144].mxu0 %vm868_vm4, %v15353_v10 }
 0x7b1   : > { %11864 = vmatpush3.bf16.msra.mxu1 %v11863_v47  ;;  %11361 = vmatprep.mubr.msk.f32.mxu1 %vm11970_vm0, %v11969_v7  ;;  %v11914_v47 = vpack.c.bf16 %v9362_v56, %v9361_v29 }
 0x7b2   : > { %11416 = vmatprep.mubr.msk.f32.mxu0 %vm11970_vm0, %v11969_v7  ;;  %11865 = vmatprep.subr.bf16.mxu1 %v11968_v4 }
 0x7b3   : > { %11876 = vmatpush3.bf16.msra.mxu0 %v11875_v11  ;;  %v11917_v11 = vpack.c.bf16 %v9364_v49, %v9363_v55 }
 0x7b4   : > { %11362 = vmatmul.mubr.msk.f32.gmra.mrb[126].mxu1 %vm868_vm4, %v15379_v8  ;;  %11417 = vmatmul.mubr.msk.f32.gmra.mrb[146].mxu0 %vm868_vm4, %v15379_v8 }
 0x7b5   : > { %11364 = vmatprep.mubr.msk.f32.mxu1 %vm11970_vm0, %v11969_v7  ;;  %11419 = vmatprep.mubr.msk.f32.mxu0 %vm11970_vm0, %v11969_v7 }
 0x7b6   : > { %11867 = vmatpush3.bf16.msra.mxu1 %v11866_v40  ;;  %11877 = vmatprep.subr.bf16.mxu0 %v11968_v4  ;;  %v11920_v40 = vpack.c.bf16 %v9366_v34, %v9365_v17 }
 0x7b7   : > { %11868 = vmatprep.subr.bf16.mxu1 %v11968_v4  ;;  %11879 = vmatpush3.bf16.msra.mxu0 %v11878_v50 }
 0x7b8   : > { %11365 = vmatmul.mubr.msk.f32.gmra.mrb[128].mxu1 %vm868_vm4, %v15406_v36  ;;  %11420 = vmatmul.mubr.msk.f32.gmra.mrb[148].mxu0 %vm868_vm4, %v15406_v36 }
 0x7b9   : > { %11367 = vmatprep.mubr.msk.f32.mxu1 %vm11970_vm0, %v11969_v7  ;;  %11422 = vmatprep.mubr.msk.f32.mxu0 %vm11970_vm0, %v11969_v7 }
 0x7ba   : > { %11870 = vmatpush3.bf16.msra.mxu1 %v11869_v28  ;;  %11880 = vmatprep.subr.bf16.mxu0 %v11968_v4  ;;  %v7004_v28 = vld [vmem:[#allocation2 + $0x13] sm:$0xff] }
 0x7bb   : > { %11871 = vmatprep.subr.bf16.mxu1 %v11968_v4  ;;  %11882 = vmatpush3.bf16.msra.mxu0 %v11881_v42 }
 0x7bc   : > { %11368 = vmatmul.mubr.msk.f32.gmra.mrb[130].mxu1 %vm868_vm4, %v15434_v16  ;;  %11423 = vmatmul.mubr.msk.f32.gmra.mrb[150].mxu0 %vm868_vm4, %v15434_v16 }
 0x7bd   : > { %11370 = vmatprep.mubr.msk.f32.mxu1 %vm11970_vm0, %v11969_v7  ;;  %11425 = vmatprep.mubr.msk.f32.mxu0 %vm11970_vm0, %v11969_v7 }
 0x7be   : > { %11873 = vmatpush3.bf16.msra.mxu1 %v11872_v5  ;;  %11883 = vmatprep.subr.bf16.mxu0 %v11968_v4 }
 0x7bf   : > { %11885 = vmatpush3.bf16.msra.mxu0 %v11884_v33  ;;  %11886 = vmatprep.subr.bf16.mxu1 %v11968_v4 }
 0x7c0   : > { %11371 = vmatmul.mubr.msk.f32.gmra.mrb[132].mxu1 %vm868_vm4, %v15450_v22  ;;  %11426 = vmatmul.mubr.msk.f32.gmra.mrb[152].mxu0 %vm868_vm4, %v15450_v22 }
 0x7c1   : > { %11373 = vmatprep.mubr.msk.f32.mxu1 %vm11970_vm0, %v11969_v7  ;;  %11428 = vmatprep.mubr.msk.f32.mxu0 %vm11970_vm0, %v11969_v7 }
 0x7c2   : > { %11898 = vmatprep.subr.bf16.mxu0 %v11968_v4 }
 0x7c4   : > { %11374 = vmatmul.mubr.msk.f32.gmra.mrb[134].mxu1 %vm868_vm4, %v15466_v14  ;;  %11429 = vmatmul.mubr.msk.f32.gmra.mrb[154].mxu0 %vm868_vm4, %v15466_v14 }
 0x7c5   : > { %11376 = vmatprep.mubr.msk.f32.mxu1 %vm11970_vm0, %v11969_v7  ;;  %11431 = vmatprep.mubr.msk.f32.mxu0 %vm11970_vm0, %v11969_v7 }
 0x7c8   : > { %11377 = vmatmul.mubr.msk.f32.gmra.mrb[136].mxu1 %vm868_vm4, %v15481_v19  ;;  %11432 = vmatmul.mubr.msk.f32.gmra.mrb[156].mxu0 %vm868_vm4, %v15481_v19 }
 0x7c9   : > { %11379 = vmatprep.mubr.msk.f32.mxu1 %vm11970_vm0, %v11969_v7  ;;  %11434 = vmatprep.mubr.msk.f32.mxu0 %vm11970_vm0, %v11969_v7 }
 0x7cc   : > { %11380 = vmatmul.mubr.msk.f32.gmra.mrb[138].mxu1 %vm868_vm4, %v15495_v45  ;;  %11435 = vmatmul.mubr.msk.f32.gmra.mrb[158].mxu0 %vm868_vm4, %v15495_v45 }
 0x7cd   : > { %11382 = vmatprep.mubr.msk.f32.mxu1 %vm11970_vm0, %v11969_v7  ;;  %11437 = vmatprep.mubr.msk.f32.mxu0 %vm11970_vm0, %v11969_v7 }
 0x7d0   : > { %11383 = vmatmul.mubr.msk.f32.gmra.mrb[140].mxu1 %vm868_vm4, %v15509_v59  ;;  %11438 = vmatmul.mubr.msk.f32.gmra.mrb[160].mxu0 %vm868_vm4, %v15509_v59 }
 0x7d1   : > { %11385 = vmatprep.mubr.msk.f32.mxu1 %vm11970_vm0, %v11969_v7  ;;  %11440 = vmatprep.mubr.msk.f32.mxu0 %vm11970_vm0, %v11969_v7 }
 0x7d4   : > { %11386 = vmatmul.mubr.msk.f32.gmra.mrb[142].mxu1 %vm868_vm4, %v15523_v20  ;;  %11441 = vmatmul.mubr.msk.f32.gmra.mrb[162].mxu0 %vm868_vm4, %v15523_v20 }
 0x7d5   : > { %11388 = vmatprep.mubr.msk.f32.mxu1 %vm11970_vm0, %v11969_v7  ;;  %11443 = vmatprep.mubr.msk.f32.mxu0 %vm11970_vm0, %v11969_v7 }
 0x7d8   : > { %11389 = vmatmul.mubr.msk.f32.gmra.mrb[144].mxu1 %vm868_vm4, %v15535_v12  ;;  %11444 = vmatmul.mubr.msk.f32.gmra.mrb[164].mxu0 %vm868_vm4, %v15535_v12 }
 0x7d9   : > { %11391 = vmatprep.mubr.msk.f32.mxu1 %vm11970_vm0, %v11969_v7  ;;  %11446 = vmatprep.mubr.msk.f32.mxu0 %vm11970_vm0, %v11969_v7 }
 0x7dc   : > { %11392 = vmatmul.mubr.msk.f32.gmra.mrb[146].mxu1 %vm868_vm4, %v15546_v48  ;;  %11447 = vmatmul.mubr.msk.f32.gmra.mrb[166].mxu0 %vm868_vm4, %v15546_v48 }
 0x7dd   : > { %11394 = vmatprep.mubr.msk.f32.mxu1 %vm11970_vm0, %v11969_v7  ;;  %11449 = vmatprep.mubr.msk.f32.mxu0 %vm11970_vm0, %v11969_v7 }
 0x7e0   : > { %11395 = vmatmul.mubr.msk.f32.gmra.mrb[148].mxu1 %vm868_vm4, %v15557_v46  ;;  %11450 = vmatmul.mubr.msk.f32.gmra.mrb[168].mxu0 %vm868_vm4, %v15557_v46 }
 0x7e1   : > { %11468 = vmatprep.mubr.msk.f32.mxu1 %vm11970_vm0, %v11969_v7  ;;  %11523 = vmatprep.mubr.msk.f32.mxu0 %vm11970_vm0, %v11969_v7 }
 0x7e4   : > { %11469 = vmatmul.mubr.msk.f32.vlgmr.msra.gmra.mrb[150].mxu1 %vm868_vm4, %v15353_v10  ;;  %11524 = vmatmul.mubr.msk.f32.vlgmr.msra.gmra.mrb[170].mxu0 %vm868_vm4, %v15353_v10 }
 0x7e5   : > { %11888 = vmatpush3.bf16.msra.mxu1 %v11887_v41  ;;  %11471 = vmatprep.mubr.msk.f32.mxu1 %vm11970_vm0, %v11969_v7 }
 0x7e6   : > { %11526 = vmatprep.mubr.msk.f32.mxu0 %vm11970_vm0, %v11969_v7  ;;  %11889 = vmatprep.subr.bf16.mxu1 %v11968_v4 }
 0x7e7   : > { %11900 = vmatpush3.bf16.msra.mxu0 %v11899_v58 }
 0x7e8   : > { %11472 = vmatmul.mubr.msk.f32.gmra.mrb[152].mxu1 %vm868_vm4, %v15379_v8  ;;  %11527 = vmatmul.mubr.msk.f32.gmra.mrb[172].mxu0 %vm868_vm4, %v15379_v8 }
 0x7e9   : > { %11474 = vmatprep.mubr.msk.f32.mxu1 %vm11970_vm0, %v11969_v7  ;;  %11529 = vmatprep.mubr.msk.f32.mxu0 %vm11970_vm0, %v11969_v7 }
 0x7ea   : > { %11891 = vmatpush3.bf16.msra.mxu1 %v11890_v35  ;;  %11901 = vmatprep.subr.bf16.mxu0 %v11968_v4 }
 0x7eb   : > { %11892 = vmatprep.subr.bf16.mxu1 %v11968_v4  ;;  %11903 = vmatpush3.bf16.msra.mxu0 %v11902_v39 }
 0x7ec   : > { %11475 = vmatmul.mubr.msk.f32.gmra.mrb[154].mxu1 %vm868_vm4, %v15406_v36  ;;  %11530 = vmatmul.mubr.msk.f32.gmra.mrb[174].mxu0 %vm868_vm4, %v15406_v36 }
 0x7ed   : > { %11477 = vmatprep.mubr.msk.f32.mxu1 %vm11970_vm0, %v11969_v7  ;;  %11532 = vmatprep.mubr.msk.f32.mxu0 %vm11970_vm0, %v11969_v7 }
 0x7ee   : > { %11894 = vmatpush3.bf16.msra.mxu1 %v11893_v18  ;;  %11904 = vmatprep.subr.bf16.mxu0 %v11968_v4 }
 0x7ef   : > { %11895 = vmatprep.subr.bf16.mxu1 %v11968_v4  ;;  %11906 = vmatpush3.bf16.msra.mxu0 %v11905_v9 }
 0x7f0   : > { %11478 = vmatmul.mubr.msk.f32.gmra.mrb[156].mxu1 %vm868_vm4, %v15434_v16  ;;  %11533 = vmatmul.mubr.msk.f32.gmra.mrb[176].mxu0 %vm868_vm4, %v15434_v16 }
 0x7f1   : > { %11480 = vmatprep.mubr.msk.f32.mxu1 %vm11970_vm0, %v11969_v7  ;;  %11535 = vmatprep.mubr.msk.f32.mxu0 %vm11970_vm0, %v11969_v7 }
 0x7f2   : > { %11897 = vmatpush3.bf16.msra.mxu1 %v11896_v2  ;;  %11907 = vmatprep.subr.bf16.mxu0 %v11968_v4 }
 0x7f3   : > { %11909 = vmatpush3.bf16.msra.mxu0 %v11908_v44  ;;  %11910 = vmatprep.subr.bf16.mxu1 %v11968_v4 }
 0x7f4   : > { %11481 = vmatmul.mubr.msk.f32.gmra.mrb[158].mxu1 %vm868_vm4, %v15450_v22  ;;  %11536 = vmatmul.mubr.msk.f32.gmra.mrb[178].mxu0 %vm868_vm4, %v15450_v22 }
 0x7f5   : > { %11483 = vmatprep.mubr.msk.f32.mxu1 %vm11970_vm0, %v11969_v7  ;;  %11538 = vmatprep.mubr.msk.f32.mxu0 %vm11970_vm0, %v11969_v7 }
 0x7f8   : > { %11484 = vmatmul.mubr.msk.f32.gmra.mrb[160].mxu1 %vm868_vm4, %v15466_v14  ;;  %11539 = vmatmul.mubr.msk.f32.gmra.mrb[180].mxu0 %vm868_vm4, %v15466_v14 }
 0x7f9   : > { %11486 = vmatprep.mubr.msk.f32.mxu1 %vm11970_vm0, %v11969_v7  ;;  %11541 = vmatprep.mubr.msk.f32.mxu0 %vm11970_vm0, %v11969_v7 }
 0x7fc   : > { %11487 = vmatmul.mubr.msk.f32.gmra.mrb[162].mxu1 %vm868_vm4, %v15481_v19  ;;  %11542 = vmatmul.mubr.msk.f32.gmra.mrb[182].mxu0 %vm868_vm4, %v15481_v19 }
 0x7fd   : > { %11489 = vmatprep.mubr.msk.f32.mxu1 %vm11970_vm0, %v11969_v7  ;;  %11544 = vmatprep.mubr.msk.f32.mxu0 %vm11970_vm0, %v11969_v7 }
 0x800   : > { %11490 = vmatmul.mubr.msk.f32.gmra.mrb[164].mxu1 %vm868_vm4, %v15495_v45  ;;  %11545 = vmatmul.mubr.msk.f32.gmra.mrb[184].mxu0 %vm868_vm4, %v15495_v45 }
 0x801   : > { %11492 = vmatprep.mubr.msk.f32.mxu1 %vm11970_vm0, %v11969_v7  ;;  %11547 = vmatprep.mubr.msk.f32.mxu0 %vm11970_vm0, %v11969_v7 }
 0x804   : > { %11493 = vmatmul.mubr.msk.f32.gmra.mrb[166].mxu1 %vm868_vm4, %v15509_v59  ;;  %11548 = vmatmul.mubr.msk.f32.gmra.mrb[186].mxu0 %vm868_vm4, %v15509_v59 }
 0x805   : > { %11495 = vmatprep.mubr.msk.f32.mxu1 %vm11970_vm0, %v11969_v7  ;;  %11550 = vmatprep.mubr.msk.f32.mxu0 %vm11970_vm0, %v11969_v7 }
 0x808   : > { %11496 = vmatmul.mubr.msk.f32.gmra.mrb[168].mxu1 %vm868_vm4, %v15523_v20  ;;  %11551 = vmatmul.mubr.msk.f32.gmra.mrb[188].mxu0 %vm868_vm4, %v15523_v20 }
 0x809   : > { %11498 = vmatprep.mubr.msk.f32.mxu1 %vm11970_vm0, %v11969_v7  ;;  %11553 = vmatprep.mubr.msk.f32.mxu0 %vm11970_vm0, %v11969_v7 }
 0x80c   : > { %11499 = vmatmul.mubr.msk.f32.gmra.mrb[170].mxu1 %vm868_vm4, %v15535_v12  ;;  %11554 = vmatmul.mubr.msk.f32.gmra.mrb[190].mxu0 %vm868_vm4, %v15535_v12 }
 0x80d   : > { %11501 = vmatprep.mubr.msk.f32.mxu1 %vm11970_vm0, %v11969_v7  ;;  %11556 = vmatprep.mubr.msk.f32.mxu0 %vm11970_vm0, %v11969_v7 }
 0x810   : > { %11502 = vmatmul.mubr.msk.f32.gmra.mrb[172].mxu1 %vm868_vm4, %v15546_v48  ;;  %11557 = vmatmul.mubr.msk.f32.gmra.mrb[192].mxu0 %vm868_vm4, %v15546_v48 }
 0x811   : > { %11504 = vmatprep.mubr.msk.f32.mxu1 %vm11970_vm0, %v11969_v7  ;;  %11559 = vmatprep.mubr.msk.f32.mxu0 %vm11970_vm0, %v11969_v7 }
 0x814   : > { %11505 = vmatmul.mubr.msk.f32.gmra.mrb[174].mxu1 %vm868_vm4, %v15557_v46  ;;  %11560 = vmatmul.mubr.msk.f32.gmra.mrb[194].mxu0 %vm868_vm4, %v15557_v46 }
 0x815   : > { %11578 = vmatprep.mubr.msk.f32.mxu1 %vm11970_vm0, %v11969_v7  ;;  %11633 = vmatprep.mubr.msk.f32.mxu0 %vm11970_vm0, %v11969_v7 }
 0x818   : > { %11579 = vmatmul.mubr.msk.f32.vlgmr.msra.gmra.mrb[176].mxu1 %vm868_vm4, %v15353_v10  ;;  %11634 = vmatmul.mubr.msk.f32.vlgmr.msra.gmra.mrb[196].mxu0 %vm868_vm4, %v15353_v10 }
 0x819   : > { %11912 = vmatpush3.bf16.msra.mxu1 %v11911_v53  ;;  %11581 = vmatprep.mubr.msk.f32.mxu1 %vm11970_vm0, %v11969_v7 }
 0x81a   : > { %11636 = vmatprep.mubr.msk.f32.mxu0 %vm11970_vm0, %v11969_v7  ;;  %11913 = vmatprep.subr.bf16.mxu1 %v11968_v4 }
 0x81c   : > { %11582 = vmatmul.mubr.msk.f32.gmra.mrb[178].mxu1 %vm868_vm4, %v15379_v8  ;;  %11637 = vmatmul.mubr.msk.f32.gmra.mrb[198].mxu0 %vm868_vm4, %v15379_v8 }
 0x81d   : > { %11584 = vmatprep.mubr.msk.f32.mxu1 %vm11970_vm0, %v11969_v7  ;;  %11639 = vmatprep.mubr.msk.f32.mxu0 %vm11970_vm0, %v11969_v7 }
 0x81e   : > { %11915 = vmatpush3.bf16.msra.mxu1 %v11914_v47 }
 0x81f   : > { %11916 = vmatprep.subr.bf16.mxu1 %v11968_v4 }
 0x820   : > { %11585 = vmatmul.mubr.msk.f32.gmra.mrb[180].mxu1 %vm868_vm4, %v15406_v36  ;;  %11640 = vmatmul.mubr.msk.f32.gmra.mrb[200].mxu0 %vm868_vm4, %v15406_v36 }
 0x821   : > { %11587 = vmatprep.mubr.msk.f32.mxu1 %vm11970_vm0, %v11969_v7  ;;  %11642 = vmatprep.mubr.msk.f32.mxu0 %vm11970_vm0, %v11969_v7 }
 0x822   : > { %11918 = vmatpush3.bf16.msra.mxu1 %v11917_v11 }
 0x823   : > { %11919 = vmatprep.subr.bf16.mxu1 %v11968_v4  ;;  %v7003_v4 = vld [vmem:[#allocation2 + $0xb] sm:$0xff] }
 0x824   : > { %11588 = vmatmul.mubr.msk.f32.gmra.mrb[182].mxu1 %vm868_vm4, %v15434_v16  ;;  %11643 = vmatmul.mubr.msk.f32.gmra.mrb[202].mxu0 %vm868_vm4, %v15434_v16 }
 0x825   : > { %11590 = vmatprep.mubr.msk.f32.mxu1 %vm11970_vm0, %v11969_v7  ;;  %11645 = vmatprep.mubr.msk.f32.mxu0 %vm11970_vm0, %v11969_v7 }
 0x826   : > { %11921 = vmatpush3.bf16.msra.mxu1 %v11920_v40 }
 0x828   : > { %11591 = vmatmul.mubr.msk.f32.gmra.mrb[184].mxu1 %vm868_vm4, %v15450_v22  ;;  %11646 = vmatmul.mubr.msk.f32.gmra.mrb[204].mxu0 %vm868_vm4, %v15450_v22 }
 0x829   : > { %11593 = vmatprep.mubr.msk.f32.mxu1 %vm11970_vm0, %v11969_v7  ;;  %11648 = vmatprep.mubr.msk.f32.mxu0 %vm11970_vm0, %v11969_v7 }
 0x82c   : > { %11594 = vmatmul.mubr.msk.f32.gmra.mrb[186].mxu1 %vm868_vm4, %v15466_v14  ;;  %11649 = vmatmul.mubr.msk.f32.gmra.mrb[206].mxu0 %vm868_vm4, %v15466_v14 }
 0x82d   : > { %11596 = vmatprep.mubr.msk.f32.mxu1 %vm11970_vm0, %v11969_v7  ;;  %11651 = vmatprep.mubr.msk.f32.mxu0 %vm11970_vm0, %v11969_v7 }
 0x830   : > { %11597 = vmatmul.mubr.msk.f32.gmra.mrb[188].mxu1 %vm868_vm4, %v15481_v19  ;;  %11652 = vmatmul.mubr.msk.f32.gmra.mrb[208].mxu0 %vm868_vm4, %v15481_v19 }
 0x831   : > { %11599 = vmatprep.mubr.msk.f32.mxu1 %vm11970_vm0, %v11969_v7  ;;  %11654 = vmatprep.mubr.msk.f32.mxu0 %vm11970_vm0, %v11969_v7 }
 0x834   : > { %11600 = vmatmul.mubr.msk.f32.gmra.mrb[190].mxu1 %vm868_vm4, %v15495_v45  ;;  %11655 = vmatmul.mubr.msk.f32.gmra.mrb[210].mxu0 %vm868_vm4, %v15495_v45 }
 0x835   : > { %11602 = vmatprep.mubr.msk.f32.mxu1 %vm11970_vm0, %v11969_v7  ;;  %11657 = vmatprep.mubr.msk.f32.mxu0 %vm11970_vm0, %v11969_v7 }
 0x838   : > { %11603 = vmatmul.mubr.msk.f32.gmra.mrb[192].mxu1 %vm868_vm4, %v15509_v59  ;;  %11658 = vmatmul.mubr.msk.f32.gmra.mrb[212].mxu0 %vm868_vm4, %v15509_v59 }
 0x839   : > { %11605 = vmatprep.mubr.msk.f32.mxu1 %vm11970_vm0, %v11969_v7  ;;  %11660 = vmatprep.mubr.msk.f32.mxu0 %vm11970_vm0, %v11969_v7 }
 0x83c   : > { %11606 = vmatmul.mubr.msk.f32.gmra.mrb[194].mxu1 %vm868_vm4, %v15523_v20  ;;  %11661 = vmatmul.mubr.msk.f32.gmra.mrb[214].mxu0 %vm868_vm4, %v15523_v20 }
 0x83d   : > { %11608 = vmatprep.mubr.msk.f32.mxu1 %vm11970_vm0, %v11969_v7  ;;  %11663 = vmatprep.mubr.msk.f32.mxu0 %vm11970_vm0, %v11969_v7 }
 0x840   : > { %11609 = vmatmul.mubr.msk.f32.gmra.mrb[196].mxu1 %vm868_vm4, %v15535_v12  ;;  %11664 = vmatmul.mubr.msk.f32.gmra.mrb[216].mxu0 %vm868_vm4, %v15535_v12 }
 0x841   : > { %11611 = vmatprep.mubr.msk.f32.mxu1 %vm11970_vm0, %v11969_v7  ;;  %11666 = vmatprep.mubr.msk.f32.mxu0 %vm11970_vm0, %v11969_v7 }
 0x844   : > { %11612 = vmatmul.mubr.msk.f32.gmra.mrb[198].mxu1 %vm868_vm4, %v15546_v48  ;;  %11667 = vmatmul.mubr.msk.f32.gmra.mrb[218].mxu0 %vm868_vm4, %v15546_v48 }
 0x845   : > { %11614 = vmatprep.mubr.msk.f32.mxu1 %vm11970_vm0, %v11969_v7  ;;  %11669 = vmatprep.mubr.msk.f32.mxu0 %vm11970_vm0, %v11969_v7 }
 0x848   : > { %11615 = vmatmul.mubr.msk.f32.gmra.mrb[200].mxu1 %vm868_vm4, %v15557_v46  ;;  %11670 = vmatmul.mubr.msk.f32.gmra.mrb[220].mxu0 %vm868_vm4, %v15557_v46 }
 0x849   : > { %11688 = vmatprep.mubr.msk.f32.mxu1 %vm11970_vm0, %v11969_v7 }
 0x84c   : > { %11689 = vmatmul.mubr.msk.f32.vlgmr.msra.gmra.mrb[202].mxu1 %vm868_vm4, %v15353_v10 }
 0x84d   : > { %11691 = vmatprep.mubr.msk.f32.mxu1 %vm11970_vm0, %v11969_v7 }
 0x84f   : > { %v6940_v52 = vpop.f32.mrb[98].mxu1  ;;  %v7116_v61 = vpop.f32.mrb[118].mxu0 }
 0x850   : > { %v7015_v50 = vadd.f32 %v7003_v4, %v6940_v52  ;;  %v11250_v54 = vpop.f32.mrb[99].mxu1  ;;  %v11305_v1 = vpop.f32.mrb[119].mxu0  ;;  %11692 = vmatmul.mubr.msk.f32.gmra.mrb[204].mxu1 %vm868_vm4, %v15379_v8 }
 0x851   : > { %11694 = vmatprep.mubr.msk.f32.mxu1 %vm11970_vm0, %v11969_v7 }
 0x852   : > { %7028 = vst.msk [vmem:[#allocation2 + $0xb] sm:$0xff] %vm7027_vm3, %v7015_v50 }
 0x853   : > { %v6945_v10 = vpop.f32.mrb[100].mxu1  ;;  %v7121_v27 = vpop.f32.mrb[120].mxu0 }
 0x854   : > { %v7016_v6 = vadd.f32 %v7004_v28, %v6945_v10  ;;  %v11253_v42 = vpop.f32.mrb[101].mxu1  ;;  %v11308_v60 = vpop.f32.mrb[121].mxu0  ;;  %11695 = vmatmul.mubr.msk.f32.gmra.mrb[206].mxu1 %vm868_vm4, %v15406_v36 }
 0x855   : > { %11697 = vmatprep.mubr.msk.f32.mxu1 %vm11970_vm0, %v11969_v7 }
 0x856   : > { %7029 = vst.msk [vmem:[#allocation2 + $0x13] sm:$0xff] %vm7027_vm3, %v7016_v6 }
 0x857   : > { %v6950_v8 = vpop.f32.mrb[102].mxu1  ;;  %v7126_v5 = vpop.f32.mrb[122].mxu0 }
 0x858   : > { %v7017_v33 = vadd.f32 %v7005_v26, %v6950_v8  ;;  %v11256_v3 = vpop.f32.mrb[103].mxu1  ;;  %v11311_v21 = vpop.f32.mrb[123].mxu0  ;;  %11698 = vmatmul.mubr.msk.f32.gmra.mrb[208].mxu1 %vm868_vm4, %v15434_v16  ;;  %v7007_v16 = vld [vmem:[#allocation2 + $0x2b] sm:$0xff] }
 0x859   : > { %v7179_v15 = vld [vmem:[#allocation2 + $0xa] sm:$0xff]  ;;  %11700 = vmatprep.mubr.msk.f32.mxu1 %vm11970_vm0, %v11969_v7 }
 0x85a   : > { %v7191_v36 = vadd.f32 %v7179_v15, %v7116_v61  ;;  %7030 = vst.msk [vmem:[#allocation2 + $0x1b] sm:$0xff] %vm7027_vm3, %v7017_v33 }
 0x85b   : > { %v6955_v41 = vpop.f32.mrb[104].mxu1  ;;  %v7131_v23 = vpop.f32.mrb[124].mxu0 }
 0x85c   : > { %7203 = vst.msk [vmem:[#allocation2 + $0xa] sm:$0xff] %vm7027_vm3, %v7191_v36  ;;  %v7018_v25 = vadd.f32 %v7006_v13, %v6955_v41  ;;  %v11259_v58 = vpop.f32.mrb[105].mxu1  ;;  %v11314_v30 = vpop.f32.mrb[125].mxu0  ;;  %11701 = vmatmul.mubr.msk.f32.gmra.mrb[210].mxu1 %vm868_vm4, %v15450_v22  ;;  %v7008_v22 = vld [vmem:[#allocation2 + $0x33] sm:$0xff] }
 0x85d   : > { %v7180_v31 = vld [vmem:[#allocation2 + $0x12] sm:$0xff]  ;;  %11703 = vmatprep.mubr.msk.f32.mxu1 %vm11970_vm0, %v11969_v7 }
 0x85e   : > { %v7192_v35 = vadd.f32 %v7180_v31, %v7121_v27  ;;  %7031 = vst.msk [vmem:[#allocation2 + $0x23] sm:$0xff] %vm7027_vm3, %v7018_v25 }
 0x85f   : > { %v6960_v63 = vpop.f32.mrb[106].mxu1  ;;  %v7136_v57 = vpop.f32.mrb[126].mxu0 }
 0x860   : > { %7204 = vst.msk [vmem:[#allocation2 + $0x12] sm:$0xff] %vm7027_vm3, %v7192_v35  ;;  %v7019_v39 = vadd.f32 %v7007_v16, %v6960_v63  ;;  %v11262_v51 = vpop.f32.mrb[107].mxu1  ;;  %v11317_v38 = vpop.f32.mrb[127].mxu0  ;;  %11704 = vmatmul.mubr.msk.f32.gmra.mrb[212].mxu1 %vm868_vm4, %v15466_v14  ;;  %v7009_v14 = vld [vmem:[#allocation2 + $0x3b] sm:$0xff] }
 0x861   : > { %v7181_v18 = vld [vmem:[#allocation2 + $0x1a] sm:$0xff]  ;;  %11706 = vmatprep.mubr.msk.f32.mxu1 %vm11970_vm0, %v11969_v7 }
 0x862   : > { %v7193_v32 = vadd.f32 %v7181_v18, %v7126_v5  ;;  %7032 = vst.msk [vmem:[#allocation2 + $0x2b] sm:$0xff] %vm7027_vm3, %v7019_v39  ;;  %v7530_v18 = vld [vmem:[#allocation2 + $0x1] sm:$0xff] }
 0x863   : > { %v6965_v62 = vpop.f32.mrb[108].mxu1  ;;  %v7141_v9 = vpop.f32.mrb[128].mxu0 }
 0x864   : > { %7205 = vst.msk [vmem:[#allocation2 + $0x1a] sm:$0xff] %vm7027_vm3, %v7193_v32  ;;  %v7020_v43 = vadd.f32 %v7008_v22, %v6965_v62  ;;  %v11265_v0 = vpop.f32.mrb[109].mxu1  ;;  %v11320_v2 = vpop.f32.mrb[129].mxu0  ;;  %11707 = vmatmul.mubr.msk.f32.gmra.mrb[214].mxu1 %vm868_vm4, %v15481_v19  ;;  %v7010_v19 = vld [vmem:[#allocation2 + $0x43] sm:$0xff] }
 0x865   : > { %v7182_v44 = vld [vmem:[#allocation2 + $0x22] sm:$0xff]  ;;  %11709 = vmatprep.mubr.msk.f32.mxu1 %vm11970_vm0, %v11969_v7 }
 0x866   : > { %v7194_v24 = vadd.f32 %v7182_v44, %v7131_v23  ;;  %7033 = vst.msk [vmem:[#allocation2 + $0x33] sm:$0xff] %vm7027_vm3, %v7020_v43  ;;  %v7354_v62 = vld [vmem:[#allocation2 + $0x9] sm:$0xff] }
 0x867   : > { %v6970_v37 = vpop.f32.mrb[110].mxu1  ;;  %v7146_v53 = vpop.f32.mrb[130].mxu0 }
 0x868   : > { %7206 = vst.msk [vmem:[#allocation2 + $0x22] sm:$0xff] %vm7027_vm3, %v7194_v24  ;;  %v7021_v29 = vadd.f32 %v7009_v14, %v6970_v37  ;;  %v11268_v56 = vpop.f32.mrb[111].mxu1  ;;  %v11323_v47 = vpop.f32.mrb[131].mxu0  ;;  %11710 = vmatmul.mubr.msk.f32.gmra.mrb[216].mxu1 %vm868_vm4, %v15495_v45  ;;  %v7011_v45 = vld [vmem:[#allocation2 + $0x4b] sm:$0xff] }
 0x869   : > { %v7183_v55 = vld [vmem:[#allocation2 + $0x2a] sm:$0xff]  ;;  %11712 = vmatprep.mubr.msk.f32.mxu1 %vm11970_vm0, %v11969_v7 }
 0x86a   : > { %v7195_v49 = vadd.f32 %v7183_v55, %v7136_v57  ;;  %7034 = vst.msk [vmem:[#allocation2 + $0x3b] sm:$0xff] %vm7027_vm3, %v7021_v29  ;;  %v7355_v37 = vld [vmem:[#allocation2 + $0x11] sm:$0xff] }
 0x86b   : > { %v6975_v11 = vpop.f32.mrb[112].mxu1  ;;  %v7151_v17 = vpop.f32.mrb[132].mxu0 }
 0x86c   : > { %7207 = vst.msk [vmem:[#allocation2 + $0x2a] sm:$0xff] %vm7027_vm3, %v7195_v49  ;;  %v7022_v34 = vadd.f32 %v7010_v19, %v6975_v11  ;;  %v11271_v40 = vpop.f32.mrb[113].mxu1  ;;  %v11326_v4 = vpop.f32.mrb[133].mxu0  ;;  %11713 = vmatmul.mubr.msk.f32.gmra.mrb[218].mxu1 %vm868_vm4, %v15509_v59  ;;  %v7012_v59 = vld [vmem:[#allocation2 + $0x53] sm:$0xff] }
 0x86d   : > { %v7184_v52 = vld [vmem:[#allocation2 + $0x32] sm:$0xff]  ;;  %11715 = vmatprep.mubr.msk.f32.mxu1 %vm11970_vm0, %v11969_v7 }
 0x86e   : > { %v7196_v61 = vadd.f32 %v7184_v52, %v7141_v9  ;;  %7035 = vst.msk [vmem:[#allocation2 + $0x43] sm:$0xff] %vm7027_vm3, %v7022_v34  ;;  %v7356_v19 = vld [vmem:[#allocation2 + $0x19] sm:$0xff] }
 0x86f   : > { %v6980_v50 = vpop.f32.mrb[114].mxu1  ;;  %v7156_v54 = vpop.f32.mrb[134].mxu0 }
 0x870   : > { %7208 = vst.msk [vmem:[#allocation2 + $0x32] sm:$0xff] %vm7027_vm3, %v7196_v61  ;;  %v7023_v1 = vadd.f32 %v7011_v45, %v6980_v50  ;;  %v11274_v28 = vpop.f32.mrb[115].mxu1  ;;  %v11329_v10 = vpop.f32.mrb[135].mxu0  ;;  %11716 = vmatmul.mubr.msk.f32.gmra.mrb[220].mxu1 %vm868_vm4, %v15523_v20  ;;  %v7013_v20 = vld [vmem:[#allocation2 + $0x5b] sm:$0xff] }
 0x871   : > { %v7185_v27 = vld [vmem:[#allocation2 + $0x3a] sm:$0xff]  ;;  %11718 = vmatprep.mubr.msk.f32.mxu1 %vm11970_vm0, %v11969_v7 }
 0x872   : > { %v7197_v6 = vadd.f32 %v7185_v27, %v7146_v53  ;;  %7036 = vst.msk [vmem:[#allocation2 + $0x4b] sm:$0xff] %vm7027_vm3, %v7023_v1  ;;  %v7357_v45 = vld [vmem:[#allocation2 + $0x21] sm:$0xff] }
 0x873   : > { %v6985_v42 = vpop.f32.mrb[116].mxu1  ;;  %v7161_v60 = vpop.f32.mrb[136].mxu0 }
 0x874   : > { %7209 = vst.msk [vmem:[#allocation2 + $0x3a] sm:$0xff] %vm7027_vm3, %v7197_v6  ;;  %v7024_v26 = vadd.f32 %v7012_v59, %v6985_v42  ;;  %v11277_v8 = vpop.f32.mrb[117].mxu1  ;;  %v11332_v5 = vpop.f32.mrb[137].mxu0  ;;  %11719 = vmatmul.mubr.msk.f32.gmra.mrb[222].mxu1 %vm868_vm4, %v15535_v12  ;;  %v7014_v12 = vld [vmem:[#allocation2 + $0x63] sm:$0x1]  ;;  %v7358_v59 = vld [vmem:[#allocation2 + $0x29] sm:$0xff] }
 0x875   : > { %v7186_v33 = vld [vmem:[#allocation2 + $0x42] sm:$0xff]  ;;  %11721 = vmatprep.mubr.msk.f32.mxu1 %vm11970_vm0, %v11969_v7 }
 0x876   : > { %v7198_v3 = vadd.f32 %v7186_v33, %v7151_v17  ;;  %7037 = vst.msk [vmem:[#allocation2 + $0x53] sm:$0xff] %vm7027_vm3, %v7024_v26 }
 0x877   : > { %v6990_v21 = vpop.f32.mrb[118].mxu1  ;;  %v7166_v15 = vpop.f32.mrb[138].mxu0 }
 0x878   : > { %7210 = vst.msk [vmem:[#allocation2 + $0x42] sm:$0xff] %vm7027_vm3, %v7198_v3  ;;  %v7025_v13 = vadd.f32 %v7013_v20, %v6990_v21  ;;  %v11280_v36 = vpop.f32.mrb[119].mxu1  ;;  %v11335_v41 = vpop.f32.mrb[139].mxu0  ;;  %11722 = vmatmul.mubr.msk.f32.gmra.mrb[224].mxu1 %vm868_vm4, %v15546_v48  ;;  %v7359_v20 = vld [vmem:[#allocation2 + $0x31] sm:$0xff] }
 0x879   : > { %v7187_v23 = vld [vmem:[#allocation2 + $0x4a] sm:$0xff]  ;;  %11724 = vmatprep.mubr.msk.f32.mxu1 %vm11970_vm0, %v11969_v7  ;;  %vm7214_vm0 = vcmask 1024  }
 0x87a   : > { %v7199_v25 = vadd.f32 %v7187_v23, %v7156_v54  ;;  %7038 = vst.msk [vmem:[#allocation2 + $0x5b] sm:$0xff] %vm7027_vm3, %v7025_v13 }
 0x87b   : > { %v6995_v58 = vpop.f32.mrb[120].mxu1  ;;  %v7171_v30 = vpop.f32.mrb[140].mxu0 }
 0x87c   : > { %7211 = vst.msk [vmem:[#allocation2 + $0x4a] sm:$0xff] %vm7027_vm3, %v7199_v25  ;;  %v7026_v31 = vadd.f32 %v7014_v12, %v6995_v58  ;;  %v11283_v16 = vpop.f32.mrb[121].mxu1  ;;  %v11338_v35 = vpop.f32.mrb[141].mxu0  ;;  %11725 = vmatmul.mubr.msk.f32.gmra.mrb[226].mxu1 %vm868_vm4, %v15557_v46  ;;  %v7360_v12 = vld [vmem:[#allocation2 + $0x39] sm:$0xff]  ;;  %vm7389_vm4 = vcmask 2048  }
 0x87d   : > { %v7188_v48 = vld [vmem:[#allocation2 + $0x52] sm:$0xff] }
 0x87e   : > { %v7200_v63 = vadd.f32 %v7188_v48, %v7161_v60  ;;  %7040 = vst.msk [vmem:[#allocation2 + $0x63] sm:$0x1] %vm7039_vm8, %v7026_v31 }
 0x87f   : > { %v7000_v57 = vpop.f32.mrb[122].mxu1  ;;  %v7176_v7 = vpop.f32.mrb[142].mxu0 }
 0x880   : > { %7212 = vst.msk [vmem:[#allocation2 + $0x52] sm:$0xff] %vm7027_vm3, %v7200_v63  ;;  %v11286_v39 = vpop.f32.mrb[123].mxu1  ;;  %v11341_v51 = vpop.f32.mrb[143].mxu0  ;;  %v7361_v63 = vld [vmem:[#allocation2 + $0x41] sm:$0xff] }
 0x881   : > { %v7189_v38 = vld [vmem:[#allocation2 + $0x5a] sm:$0xff] }
 0x882   : > { %v7201_v22 = vadd.f32 %v7189_v38, %v7166_v15 }
 0x883   : > { %v7291_v32 = vpop.f32.mrb[124].mxu1  ;;  %v7466_v9 = vpop.f32.mrb[144].mxu0 }
 0x884   : > { %7213 = vst.msk [vmem:[#allocation2 + $0x5a] sm:$0xff] %vm7027_vm3, %v7201_v22  ;;  %v7366_v43 = vadd.f32 %v7354_v62, %v7291_v32  ;;  %v7543_v46 = vadd.f32 %v7530_v18, %v7466_v9  ;;  %v11360_v0 = vpop.f32.mrb[125].mxu1  ;;  %v11415_v2 = vpop.f32.mrb[145].mxu0  ;;  %v7362_v32 = vld [vmem:[#allocation2 + $0x49] sm:$0xff] }
 0x885   : > { %v7190_v44 = vld [vmem:[#allocation2 + $0x62] sm:$0x3] }
 0x886   : > { %v7202_v14 = vadd.f32 %v7190_v44, %v7171_v30  ;;  %7378 = vst.msk [vmem:[#allocation2 + $0x9] sm:$0xff] %vm7027_vm3, %v7366_v43  ;;  %7556 = vst.msk [vmem:[#allocation2 + $0x1] sm:$0xff] %vm7027_vm3, %v7543_v46 }
 0x887   : > { %v7296_v24 = vpop.f32.mrb[126].mxu1  ;;  %v7471_v53 = vpop.f32.mrb[146].mxu0 }
 0x888   : > { %v7367_v29 = vadd.f32 %v7355_v37, %v7296_v24  ;;  %v11363_v56 = vpop.f32.mrb[127].mxu1  ;;  %v11418_v47 = vpop.f32.mrb[147].mxu0  ;;  %7215 = vst.msk [vmem:[#allocation2 + $0x62] sm:$0x3] %vm7214_vm0, %v7202_v14  ;;  %v7363_v14 = vld [vmem:[#allocation2 + $0x51] sm:$0xff] }
 0x88a   : > { %7379 = vst.msk [vmem:[#allocation2 + $0x11] sm:$0xff] %vm7027_vm3, %v7367_v29 }
 0x88b   : > { %v7301_v55 = vpop.f32.mrb[128].mxu1  ;;  %v7476_v49 = vpop.f32.mrb[148].mxu0 }
 0x88c   : > { %v7368_v11 = vadd.f32 %v7356_v19, %v7301_v55  ;;  %v11366_v17 = vpop.f32.mrb[129].mxu1  ;;  %v11421_v34 = vpop.f32.mrb[149].mxu0  ;;  %v7364_v19 = vld [vmem:[#allocation2 + $0x59] sm:$0xff] }
 0x88d   : > { %v7531_v40 = vld [vmem:[#allocation2 + $0x9] sm:$0xff] }
 0x88e   : > { %v7544_v4 = vadd.f32 %v7531_v40, %v7471_v53  ;;  %7380 = vst.msk [vmem:[#allocation2 + $0x19] sm:$0xff] %vm7027_vm3, %v7368_v11 }
 0x88f   : > { %v7306_v52 = vpop.f32.mrb[130].mxu1  ;;  %v7481_v61 = vpop.f32.mrb[150].mxu0 }
 0x890   : > { %7557 = vst.msk [vmem:[#allocation2 + $0x9] sm:$0xff] %vm7027_vm3, %v7544_v4  ;;  %v7369_v50 = vadd.f32 %v7357_v45, %v7306_v52  ;;  %v11369_v54 = vpop.f32.mrb[131].mxu1  ;;  %v11424_v1 = vpop.f32.mrb[151].mxu0  ;;  %v7365_v45 = vld [vmem:[#allocation2 + $0x61] sm:$0x7] }
 0x891   : > { %v7532_v28 = vld [vmem:[#allocation2 + $0x11] sm:$0xff] }
 0x892   : > { %v7545_v10 = vadd.f32 %v7532_v28, %v7476_v49  ;;  %7381 = vst.msk [vmem:[#allocation2 + $0x21] sm:$0xff] %vm7027_vm3, %v7369_v50 }
 0x893   : > { %v7311_v27 = vpop.f32.mrb[132].mxu1  ;;  %v7486_v6 = vpop.f32.mrb[152].mxu0 }
 0x894   : > { %7558 = vst.msk [vmem:[#allocation2 + $0x11] sm:$0xff] %vm7027_vm3, %v7545_v10  ;;  %v7370_v42 = vadd.f32 %v7358_v59, %v7311_v27  ;;  %v11372_v60 = vpop.f32.mrb[133].mxu1  ;;  %v11427_v26 = vpop.f32.mrb[153].mxu0 }
 0x895   : > { %v7533_v8 = vld [vmem:[#allocation2 + $0x19] sm:$0xff] }
 0x896   : > { %v7546_v5 = vadd.f32 %v7533_v8, %v7481_v61  ;;  %7382 = vst.msk [vmem:[#allocation2 + $0x29] sm:$0xff] %vm7027_vm3, %v7370_v42 }
 0x897   : > { %v7316_v33 = vpop.f32.mrb[134].mxu1  ;;  %v7491_v3 = vpop.f32.mrb[154].mxu0 }
 0x898   : > { %7559 = vst.msk [vmem:[#allocation2 + $0x19] sm:$0xff] %vm7027_vm3, %v7546_v5  ;;  %v7371_v21 = vadd.f32 %v7359_v20, %v7316_v33  ;;  %v11375_v15 = vpop.f32.mrb[135].mxu1  ;;  %v11430_v13 = vpop.f32.mrb[155].mxu0  ;;  %v7708_v5 = vld [vmem:[#allocation2] sm:$0xff] }
 0x899   : > { %v7534_v36 = vld [vmem:[#allocation2 + $0x21] sm:$0xff] }
 0x89a   : > { %v7547_v41 = vadd.f32 %v7534_v36, %v7486_v6  ;;  %7383 = vst.msk [vmem:[#allocation2 + $0x31] sm:$0xff] %vm7027_vm3, %v7371_v21 }
 0x89b   : > { %v7321_v23 = vpop.f32.mrb[136].mxu1  ;;  %v7496_v25 = vpop.f32.mrb[156].mxu0 }
 0x89c   : > { %7560 = vst.msk [vmem:[#allocation2 + $0x21] sm:$0xff] %vm7027_vm3, %v7547_v41  ;;  %v7372_v58 = vadd.f32 %v7360_v12, %v7321_v23  ;;  %v11378_v30 = vpop.f32.mrb[137].mxu1  ;;  %v11433_v31 = vpop.f32.mrb[157].mxu0  ;;  %v7709_v41 = vld [vmem:[#allocation2 + $0x8] sm:$0xff] }
 0x89d   : > { %v7535_v16 = vld [vmem:[#allocation2 + $0x29] sm:$0xff] }
 0x89e   : > { %v7548_v35 = vadd.f32 %v7535_v16, %v7491_v3  ;;  %7384 = vst.msk [vmem:[#allocation2 + $0x39] sm:$0xff] %vm7027_vm3, %v7372_v58 }
 0x89f   : > { %v7326_v48 = vpop.f32.mrb[138].mxu1  ;;  %v7501_v57 = vpop.f32.mrb[158].mxu0 }
 0x8a0   : > { %7561 = vst.msk [vmem:[#allocation2 + $0x29] sm:$0xff] %vm7027_vm3, %v7548_v35  ;;  %v7373_v7 = vadd.f32 %v7361_v63, %v7326_v48  ;;  %v11381_v39 = vpop.f32.mrb[139].mxu1  ;;  %v11436_v51 = vpop.f32.mrb[159].mxu0  ;;  %v7710_v48 = vld [vmem:[#allocation2 + $0x10] sm:$0xff] }
 0x8a1   : > { %v7536_v38 = vld [vmem:[#allocation2 + $0x31] sm:$0xff] }
 0x8a2   : > { %v7549_v18 = vadd.f32 %v7536_v38, %v7496_v25  ;;  %7385 = vst.msk [vmem:[#allocation2 + $0x41] sm:$0xff] %vm7027_vm3, %v7373_v7 }
 0x8a3   : > { %v7331_v22 = vpop.f32.mrb[140].mxu1  ;;  %v7506_v62 = vpop.f32.mrb[160].mxu0 }
 0x8a4   : > { %7562 = vst.msk [vmem:[#allocation2 + $0x31] sm:$0xff] %vm7027_vm3, %v7549_v18  ;;  %v7374_v9 = vadd.f32 %v7362_v32, %v7331_v22  ;;  %v11384_v43 = vpop.f32.mrb[141].mxu1  ;;  %v11439_v46 = vpop.f32.mrb[161].mxu0 }
 0x8a5   : > { %v7537_v0 = vld [vmem:[#allocation2 + $0x39] sm:$0xff] }
 0x8a6   : > { %v7550_v2 = vadd.f32 %v7537_v0, %v7501_v57  ;;  %7386 = vst.msk [vmem:[#allocation2 + $0x49] sm:$0xff] %vm7027_vm3, %v7374_v9 }
 0x8a7   : > { %v7336_v44 = vpop.f32.mrb[142].mxu1  ;;  %v7511_v24 = vpop.f32.mrb[162].mxu0 }
 0x8a8   : > { %7563 = vst.msk [vmem:[#allocation2 + $0x39] sm:$0xff] %vm7027_vm3, %v7550_v2  ;;  %v7375_v37 = vadd.f32 %v7363_v14, %v7336_v44  ;;  %v11387_v53 = vpop.f32.mrb[143].mxu1  ;;  %v11442_v29 = vpop.f32.mrb[163].mxu0 }
 0x8a9   : > { %v7538_v56 = vld [vmem:[#allocation2 + $0x41] sm:$0xff] }
 0x8aa   : > { %v7551_v47 = vadd.f32 %v7538_v56, %v7506_v62  ;;  %7387 = vst.msk [vmem:[#allocation2 + $0x51] sm:$0xff] %vm7027_vm3, %v7375_v37  ;;  %v7711_v62 = vld [vmem:[#allocation2 + $0x18] sm:$0xff]  ;;  %v7712_v53 = vld [vmem:[#allocation2 + $0x20] sm:$0xff] }
 0x8ab   : > { %v7341_v55 = vpop.f32.mrb[144].mxu1  ;;  %v7516_v49 = vpop.f32.mrb[164].mxu0 }
 0x8ac   : > { %7564 = vst.msk [vmem:[#allocation2 + $0x41] sm:$0xff] %vm7027_vm3, %v7551_v47  ;;  %v7376_v11 = vadd.f32 %v7364_v19, %v7341_v55  ;;  %v11390_v17 = vpop.f32.mrb[145].mxu1  ;;  %v11445_v34 = vpop.f32.mrb[165].mxu0 }
 0x8ad   : > { %v7539_v40 = vld [vmem:[#allocation2 + $0x49] sm:$0xff] }
 0x8ae   : > { %v7552_v4 = vadd.f32 %v7539_v40, %v7511_v24  ;;  %7388 = vst.msk [vmem:[#allocation2 + $0x59] sm:$0xff] %vm7027_vm3, %v7376_v11  ;;  %v7713_v40 = vld [vmem:[#allocation2 + $0x28] sm:$0xff] }
 0x8af   : > { %v7346_v52 = vpop.f32.mrb[146].mxu1  ;;  %v7521_v61 = vpop.f32.mrb[166].mxu0 }
 0x8b0   : > { %7565 = vst.msk [vmem:[#allocation2 + $0x49] sm:$0xff] %vm7027_vm3, %v7552_v4  ;;  %v7377_v50 = vadd.f32 %v7365_v45, %v7346_v52  ;;  %v11393_v54 = vpop.f32.mrb[147].mxu1  ;;  %v11448_v1 = vpop.f32.mrb[167].mxu0 }
 0x8b1   : > { %v7540_v28 = vld [vmem:[#allocation2 + $0x51] sm:$0xff] }
 0x8b2   : > { %v7553_v10 = vadd.f32 %v7540_v28, %v7516_v49  ;;  %7390 = vst.msk [vmem:[#allocation2 + $0x61] sm:$0x7] %vm7389_vm4, %v7377_v50 }
 0x8b3   : > { %v7351_v27 = vpop.f32.mrb[148].mxu1  ;;  %v7526_v59 = vpop.f32.mrb[168].mxu0 }
 0x8b4   : > { %7566 = vst.msk [vmem:[#allocation2 + $0x51] sm:$0xff] %vm7027_vm3, %v7553_v10  ;;  %v11396_v6 = vpop.f32.mrb[149].mxu1  ;;  %v11451_v42 = vpop.f32.mrb[169].mxu0  ;;  %v7714_v27 = vld [vmem:[#allocation2 + $0x30] sm:$0xff] }
 0x8b5   : > { %v7541_v60 = vld [vmem:[#allocation2 + $0x59] sm:$0xff] }
 0x8b6   : > { %v7554_v26 = vadd.f32 %v7541_v60, %v7521_v61 }
 0x8b7   : > { %v7644_v8 = vpop.f32.mrb[150].mxu1  ;;  %v7823_v33 = vpop.f32.mrb[170].mxu0 }
 0x8b8   : > { %7567 = vst.msk [vmem:[#allocation2 + $0x59] sm:$0xff] %vm7027_vm3, %v7554_v26  ;;  %v7721_v20 = vadd.f32 %v7708_v5, %v7644_v8  ;;  %v11470_v3 = vpop.f32.mrb[151].mxu1  ;;  %v11525_v21 = vpop.f32.mrb[171].mxu0  ;;  %v7913_v12 = vrot.slane %v7823_v33, 1 }
 0x8b9   : > { %v7542_v15 = vld [vmem:[#allocation2 + $0x61] sm:$0x7]  ;;  %v7715_v3 = vld [vmem:[#allocation2 + $0x38] sm:$0xff] }
 0x8ba   : > { %v7555_v13 = vadd.f32 %v7542_v15, %v7526_v59  ;;  %7734 = vst.msk [vmem:[#allocation2] sm:$0xff] %vm7027_vm3, %v7721_v20 }
 0x8bb   : > { %v7649_v36 = vpop.f32.mrb[152].mxu1  ;;  %v7828_v23 = vpop.f32.mrb[172].mxu0 }
 0x8bc   : > { %7568 = vst.msk [vmem:[#allocation2 + $0x61] sm:$0x7] %vm7389_vm4, %v7555_v13  ;;  %v7722_v25 = vadd.f32 %v7709_v41, %v7649_v36  ;;  %v7914_v58 = vrot.slane %v7828_v23, 1  ;;  %v11473_v30 = vpop.f32.mrb[153].mxu1  ;;  %v11528_v31 = vpop.f32.mrb[173].mxu0 }
 0x8bd   : > { %v7716_v30 = vld [vmem:[#allocation2 + $0x40] sm:$0xff] }
 0x8be   : > { %7735 = vst.msk [vmem:[#allocation2 + $0x8] sm:$0xff] %vm7027_vm3, %v7722_v25  ;;  %v7915_v16 = vsel %vm1927_vm9, %v7913_v12, %v7914_v58 }
 0x8bf   : > { %v7654_v35 = vpop.f32.mrb[154].mxu1  ;;  %v7833_v63 = vpop.f32.mrb[174].mxu0 }
 0x8c0   : > { %v7723_v57 = vadd.f32 %v7710_v48, %v7654_v35  ;;  %v7916_v7 = vrot.slane %v7833_v63, 1  ;;  %v11476_v39 = vpop.f32.mrb[155].mxu1  ;;  %v11531_v51 = vpop.f32.mrb[175].mxu0 }
 0x8c1   : > { %v7887_v38 = vld [vmem:[#allocation2] sm:$0xff] }
 0x8c2   : > { %v7951_v18 = vadd.f32 %v7915_v16, %v7887_v38  ;;  %7736 = vst.msk [vmem:[#allocation2 + $0x10] sm:$0xff] %vm7027_vm3, %v7723_v57  ;;  %v7917_v22 = vsel %vm1927_vm9, %v7914_v58, %v7916_v7  ;;  %v7717_v38 = vld [vmem:[#allocation2 + $0x48] sm:$0xff] }
 0x8c3   : > { %v7659_v32 = vpop.f32.mrb[156].mxu1  ;;  %v7838_v9 = vpop.f32.mrb[176].mxu0 }
 0x8c4   : > { %7964 = vst.msk [vmem:[#allocation2] sm:$0xff] %vm7027_vm3, %v7951_v18  ;;  %v7724_v43 = vadd.f32 %v7711_v62, %v7659_v32  ;;  %v7918_v46 = vrot.slane %v7838_v9, 1  ;;  %v11479_v0 = vpop.f32.mrb[157].mxu1  ;;  %v11534_v2 = vpop.f32.mrb[177].mxu0 }
 0x8c5   : > { %v7888_v44 = vld [vmem:[#allocation2 + $0x8] sm:$0xff] }
 0x8c6   : > { %v7952_v14 = vadd.f32 %v7917_v22, %v7888_v44  ;;  %7737 = vst.msk [vmem:[#allocation2 + $0x18] sm:$0xff] %vm7027_vm3, %v7724_v43  ;;  %v7919_v24 = vsel %vm1927_vm9, %v7916_v7, %v7918_v46  ;;  %v7718_v44 = vld [vmem:[#allocation2 + $0x50] sm:$0xff] }
 0x8c7   : > { %v7664_v37 = vpop.f32.mrb[158].mxu1  ;;  %v7843_v29 = vpop.f32.mrb[178].mxu0 }
 0x8c8   : > { %7965 = vst.msk [vmem:[#allocation2 + $0x8] sm:$0xff] %vm7027_vm3, %v7952_v14  ;;  %v7725_v56 = vadd.f32 %v7712_v53, %v7664_v37  ;;  %v7920_v47 = vrot.slane %v7843_v29, 1  ;;  %v11482_v55 = vpop.f32.mrb[159].mxu1  ;;  %v11537_v19 = vpop.f32.mrb[179].mxu0 }
 0x8c9   : > { %v7889_v49 = vld [vmem:[#allocation2 + $0x10] sm:$0xff] }
 0x8ca   : > { %v7953_v11 = vadd.f32 %v7919_v24, %v7889_v49  ;;  %7738 = vst.msk [vmem:[#allocation2 + $0x20] sm:$0xff] %vm7027_vm3, %v7725_v56  ;;  %v7921_v17 = vsel %vm1927_vm9, %v7918_v46, %v7920_v47  ;;  %v7719_v49 = vld [vmem:[#allocation2 + $0x58] sm:$0xff] }
 0x8cb   : > { %v7669_v34 = vpop.f32.mrb[160].mxu1  ;;  %v7848_v4 = vpop.f32.mrb[180].mxu0 }
 0x8cc   : > { %7966 = vst.msk [vmem:[#allocation2 + $0x10] sm:$0xff] %vm7027_vm3, %v7953_v11  ;;  %v7726_v52 = vadd.f32 %v7713_v40, %v7669_v34  ;;  %v7922_v45 = vrot.slane %v7848_v4, 1  ;;  %v11485_v61 = vpop.f32.mrb[161].mxu1  ;;  %v11540_v50 = vpop.f32.mrb[181].mxu0 }
 0x8cd   : > { %v7890_v54 = vld [vmem:[#allocation2 + $0x18] sm:$0xff] }
 0x8ce   : > { %v7954_v1 = vadd.f32 %v7921_v17, %v7890_v54  ;;  %7739 = vst.msk [vmem:[#allocation2 + $0x28] sm:$0xff] %vm7027_vm3, %v7726_v52  ;;  %v7923_v28 = vsel %vm1927_vm9, %v7920_v47, %v7922_v45  ;;  %v7720_v54 = vld [vmem:[#allocation2 + $0x60] sm:$0xf] }
 0x8cf   : > { %v7674_v10 = vpop.f32.mrb[162].mxu1  ;;  %v7853_v59 = vpop.f32.mrb[182].mxu0 }
 0x8d0   : > { %7967 = vst.msk [vmem:[#allocation2 + $0x18] sm:$0xff] %vm7027_vm3, %v7954_v1  ;;  %v7727_v6 = vadd.f32 %v7714_v27, %v7674_v10  ;;  %v7924_v42 = vrot.slane %v7853_v59, 1  ;;  %v11488_v60 = vpop.f32.mrb[163].mxu1  ;;  %v11543_v26 = vpop.f32.mrb[183].mxu0 }
 0x8d1   : > { %v7891_v8 = vld [vmem:[#allocation2 + $0x20] sm:$0xff] }
 0x8d2   : > { %v7955_v5 = vadd.f32 %v7923_v28, %v7891_v8  ;;  %7740 = vst.msk [vmem:[#allocation2 + $0x30] sm:$0xff] %vm7027_vm3, %v7727_v6  ;;  %v7925_v33 = vsel %vm1927_vm9, %v7922_v45, %v7924_v42 }
 0x8d3   : > { %v7679_v20 = vpop.f32.mrb[164].mxu1  ;;  %v7858_v21 = vpop.f32.mrb[184].mxu0 }
 0x8d4   : > { %7968 = vst.msk [vmem:[#allocation2 + $0x20] sm:$0xff] %vm7027_vm3, %v7955_v5  ;;  %v7728_v15 = vadd.f32 %v7715_v3, %v7679_v20  ;;  %v7926_v13 = vrot.slane %v7858_v21, 1  ;;  %v11491_v36 = vpop.f32.mrb[165].mxu1  ;;  %v11546_v41 = vpop.f32.mrb[185].mxu0 }
 0x8d5   : > { %v7892_v23 = vld [vmem:[#allocation2 + $0x28] sm:$0xff] }
 0x8d6   : > { %v7956_v12 = vadd.f32 %v7925_v33, %v7892_v23  ;;  %7741 = vst.msk [vmem:[#allocation2 + $0x38] sm:$0xff] %vm7027_vm3, %v7728_v15  ;;  %v7927_v25 = vsel %vm1927_vm9, %v7924_v42, %v7926_v13 }
 0x8d7   : > { %v7684_v58 = vpop.f32.mrb[166].mxu1  ;;  %v7863_v31 = vpop.f32.mrb[186].mxu0 }
 0x8d8   : > { %7969 = vst.msk [vmem:[#allocation2 + $0x28] sm:$0xff] %vm7027_vm3, %v7956_v12  ;;  %v7729_v16 = vadd.f32 %v7716_v30, %v7684_v58  ;;  %v7928_v35 = vrot.slane %v7863_v31, 1  ;;  %v11494_v48 = vpop.f32.mrb[167].mxu1  ;;  %v11549_v63 = vpop.f32.mrb[187].mxu0 }
 0x8d9   : > { %v7893_v57 = vld [vmem:[#allocation2 + $0x30] sm:$0xff]  ;;  %v8115_v63 = vld [vmem:[#allocation2] sm:$0xff] }
 0x8da   : > { %v7957_v7 = vadd.f32 %v7927_v25, %v7893_v57  ;;  %7742 = vst.msk [vmem:[#allocation2 + $0x40] sm:$0xff] %vm7027_vm3, %v7729_v16  ;;  %v7929_v39 = vsel %vm1927_vm9, %v7926_v13, %v7928_v35 }
 0x8db   : > { %v7689_v51 = vpop.f32.mrb[168].mxu1  ;;  %v7868_v18 = vpop.f32.mrb[188].mxu0 }
 0x8dc   : > { %7970 = vst.msk [vmem:[#allocation2 + $0x30] sm:$0xff] %vm7027_vm3, %v7957_v7  ;;  %v7730_v22 = vadd.f32 %v7717_v38, %v7689_v51  ;;  %v7930_v32 = vrot.slane %v7868_v18, 1  ;;  %v11497_v62 = vpop.f32.mrb[169].mxu1  ;;  %v11552_v9 = vpop.f32.mrb[189].mxu0 }
 0x8dd   : > { %v7894_v43 = vld [vmem:[#allocation2 + $0x38] sm:$0xff]  ;;  %v16155_v9 = vld [vmem:[#allocation3] ss:$0 sm:$0xff] }
 0x8de   : > { %v7958_v46 = vadd.f32 %v7929_v39, %v7894_v43  ;;  %7743 = vst.msk [vmem:[#allocation2 + $0x48] sm:$0xff] %vm7027_vm3, %v7730_v22  ;;  %v7931_v0 = vsel %vm1927_vm9, %v7928_v35, %v7930_v32  ;;  %v8116_v43 = vld [vmem:[#allocation2 + $0x8] sm:$0xff] }
 0x8df   : > { %v7694_v2 = vpop.f32.mrb[170].mxu1  ;;  %v7873_v14 = vpop.f32.mrb[190].mxu0 }
 0x8e0   : > { %7971 = vst.msk [vmem:[#allocation2 + $0x38] sm:$0xff] %vm7027_vm3, %v7958_v46  ;;  %v7731_v24 = vadd.f32 %v7718_v44, %v7694_v2  ;;  %v7932_v37 = vrot.slane %v7873_v14, 1  ;;  %v11500_v53 = vpop.f32.mrb[171].mxu1  ;;  %v11555_v29 = vpop.f32.mrb[191].mxu0 }
 0x8e1   : > { %v7895_v56 = vld [vmem:[#allocation2 + $0x40] sm:$0xff] }
 0x8e2   : > { %v7959_v47 = vadd.f32 %v7931_v0, %v7895_v56  ;;  %7744 = vst.msk [vmem:[#allocation2 + $0x50] sm:$0xff] %vm7027_vm3, %v7731_v24  ;;  %v7933_v55 = vsel %vm1927_vm9, %v7930_v32, %v7932_v37 }
 0x8e3   : > { %v7699_v19 = vpop.f32.mrb[172].mxu1  ;;  %v7878_v11 = vpop.f32.mrb[192].mxu0 }
 0x8e4   : > { %7972 = vst.msk [vmem:[#allocation2 + $0x40] sm:$0xff] %vm7027_vm3, %v7959_v47  ;;  %v7732_v17 = vadd.f32 %v7719_v49, %v7699_v19  ;;  %v7934_v34 = vrot.slane %v7878_v11, 1  ;;  %v11503_v40 = vpop.f32.mrb[173].mxu1  ;;  %v11558_v4 = vpop.f32.mrb[193].mxu0  ;;  %v11947_v11 = vld [vmem:[%s16312_s1 + $0x60] sm:$0xf] }
 0x8e5   : > { %v7896_v52 = vld [vmem:[#allocation2 + $0x48] sm:$0xff] }
 0x8e6   : > { %v7960_v45 = vadd.f32 %v7933_v55, %v7896_v52  ;;  %7745 = vst.msk [vmem:[#allocation2 + $0x58] sm:$0xff] %vm7027_vm3, %v7732_v17  ;;  %v7935_v61 = vsel %vm1927_vm9, %v7932_v37, %v7934_v34  ;;  %v8117_v55 = vld [vmem:[#allocation2 + $0x10] sm:$0xff] }
 0x8e7   : > { %v7704_v50 = vpop.f32.mrb[174].mxu1  ;;  %v7883_v1 = vpop.f32.mrb[194].mxu0 }
 0x8e8   : > { %7973 = vst.msk [vmem:[#allocation2 + $0x48] sm:$0xff] %vm7027_vm3, %v7960_v45  ;;  %v7733_v28 = vadd.f32 %v7720_v54, %v7704_v50  ;;  %v7936_v10 = vrot.slane %v7883_v1, 1  ;;  %v11506_v27 = vpop.f32.mrb[175].mxu1  ;;  %v11561_v59 = vpop.f32.mrb[195].mxu0 }
 0x8e9   : > { %v7897_v6 = vld [vmem:[#allocation2 + $0x50] sm:$0xff] }
 0x8ea   : > { %v7961_v42 = vadd.f32 %v7935_v61, %v7897_v6  ;;  %7747 = vst.msk [vmem:[#allocation2 + $0x60] sm:$0xf] %vm7746_vm10, %v7733_v28  ;;  %v7937_v60 = vsel %vm1927_vm9, %v7934_v34, %v7936_v10 }
 0x8eb   : > { %v8052_v26 = vpop.f32.mrb[176].mxu1  ;;  %v8273_v8 = vpop.f32.mrb[196].mxu0 }
 0x8ec   : > { %7974 = vst.msk [vmem:[#allocation2 + $0x50] sm:$0xff] %vm7027_vm3, %v7961_v42  ;;  %v11580_v5 = vpop.f32.mrb[177].mxu1  ;;  %v11635_v33 = vpop.f32.mrb[197].mxu0 }
 0x8ed   : > { %v7898_v20 = vld [vmem:[#allocation2 + $0x58] sm:$0xff] }
 0x8ee   : > { %v7962_v3 = vadd.f32 %v7937_v60, %v7898_v20 }
 0x8ef   : > { %v8056_v21 = vpop.f32.mrb[178].mxu1  ;;  %v8277_v15 = vpop.f32.mrb[198].mxu0 }
 0x8f0   : > { %7975 = vst.msk [vmem:[#allocation2 + $0x58] sm:$0xff] %vm7027_vm3, %v7962_v3  ;;  %v11583_v13 = vpop.f32.mrb[179].mxu1  ;;  %v11638_v36 = vpop.f32.mrb[199].mxu0  ;;  %v8139_v58 = vrot.slane %v8056_v21, 1  ;;  %v8360_v30 = vrot.slane %v8277_v15, 2  ;;  %v8119_v21 = vld [vmem:[#allocation2 + $0x20] sm:$0xff] }
 0x8f1   : > { %v7899_v41 = vld [vmem:[#allocation2 + $0x60] sm:$0x7] }
 0x8f2   : > { %v7963_v23 = vadd.f32 %v7936_v10, %v7899_v41  ;;  %v8118_v10 = vld [vmem:[#allocation2 + $0x18] sm:$0xff] }
 0x8f3   : > { %v8061_v12 = vpop.f32.mrb[180].mxu1  ;;  %v8282_v25 = vpop.f32.mrb[200].mxu0 }
 0x8f4   : > { %7976 = vst.msk [vmem:[#allocation2 + $0x60] sm:$0x7] %vm7389_vm4, %v7963_v23  ;;  %v8140_v31 = vrot.slane %v8061_v12, 1  ;;  %v8361_v16 = vrot.slane %v8282_v25, 2  ;;  %v11586_v35 = vpop.f32.mrb[181].mxu1  ;;  %v11641_v48 = vpop.f32.mrb[201].mxu0 }
 0x8f5   : > { %v8120_v35 = vld [vmem:[#allocation2 + $0x28] sm:$0xff] }
 0x8f6   : > { %v8141_v57 = vsel %vm1927_vm9, %v8139_v58, %v8140_v31  ;;  %v8362_v7 = vsel %vm2361_vm12, %v8360_v30, %v8361_v16 }
 0x8f7   : > { %v8174_v39 = vadd.f32 %v8141_v57, %v8115_v63  ;;  %v8066_v51 = vpop.f32.mrb[182].mxu1  ;;  %v8287_v38 = vpop.f32.mrb[202].mxu0 }
 0x8f8   : > { %v8142_v18 = vrot.slane %v8066_v51, 1  ;;  %v8363_v22 = vrot.slane %v8287_v38, 2  ;;  %v11589_v32 = vpop.f32.mrb[183].mxu1  ;;  %v11644_v62 = vpop.f32.mrb[203].mxu0 }
 0x8f9   : > { %8186 = vst.msk [vmem:[#allocation2] sm:$0xff] %vm7027_vm3, %v8174_v39 }
 0x8fa   : > { %v8143_v46 = vsel %vm1927_vm9, %v8140_v31, %v8142_v18  ;;  %v8364_v0 = vsel %vm2361_vm12, %v8361_v16, %v8363_v22 }
 0x8fb   : > { %v8175_v2 = vadd.f32 %v8143_v46, %v8116_v43  ;;  %v8071_v44 = vpop.f32.mrb[184].mxu1  ;;  %v8292_v14 = vpop.f32.mrb[204].mxu0  ;;  %v8652_v24 = vld [vmem:[#allocation2 + $0x60] sm:$0xf]  ;;  %v8121_v43 = vld [vmem:[#allocation2 + $0x30] sm:$0xff] }
 0x8fc   : > { %v8144_v37 = vrot.slane %v8071_v44, 1  ;;  %v8365_v53 = vrot.slane %v8292_v14, 2  ;;  %v11592_v29 = vpop.f32.mrb[185].mxu1  ;;  %v11647_v56 = vpop.f32.mrb[205].mxu0  ;;  %v8672_v47 = vadd.f32 %v16155_v9, %v8652_v24 }
 0x8fd   : > { %8187 = vst.msk [vmem:[#allocation2 + $0x8] sm:$0xff] %vm7027_vm3, %v8175_v2 }
 0x8fe   : > { %v8145_v19 = vsel %vm1927_vm9, %v8142_v18, %v8144_v37  ;;  %v8366_v49 = vsel %vm2361_vm12, %v8363_v22, %v8365_v53  ;;  %v8685_v17 = vmul.f32 %v11947_v11, %v8672_v47 }
 0x8ff   : > { %v8176_v34 = vadd.f32 %v8145_v19, %v8117_v55  ;;  %v8076_v40 = vpop.f32.mrb[186].mxu1  ;;  %v8297_v4 = vpop.f32.mrb[206].mxu0  ;;  %v8122_v55 = vld [vmem:[#allocation2 + $0x38] sm:$0xff] }
 0x900   : > { %v8336_v52 = vld [vmem:[#allocation2] sm:$0xff]  ;;  %v8146_v45 = vrot.slane %v8076_v40, 1  ;;  %v8367_v61 = vrot.slane %v8297_v4, 2  ;;  %v11595_v50 = vpop.f32.mrb[187].mxu1  ;;  %v11650_v54 = vpop.f32.mrb[207].mxu0  ;;  %v8698_v1 = vmul.f32 %v11947_v11, %v8685_v17 }
 0x901   : > { %v8395_v28 = vadd.f32 %v8362_v7, %v8336_v52  ;;  %8188 = vst.msk [vmem:[#allocation2 + $0x10] sm:$0xff] %vm7027_vm3, %v8176_v34  ;;  %v8123_v54 = vld [vmem:[#allocation2 + $0x40] sm:$0xff] }
 0x902   : > { %v8147_v27 = vsel %vm1927_vm9, %v8144_v37, %v8146_v45  ;;  %v8368_v59 = vsel %vm2361_vm12, %v8365_v53, %v8367_v61  ;;  %8711 = vst.msk [vmem:[%s16171_s11 + $0x60] sm:$0xf] %vm7746_vm10, %v8698_v1 }
 0x903   : > { %8407 = vst.msk [vmem:[#allocation2] sm:$0xff] %vm7027_vm3, %v8395_v28  ;;  %v8177_v6 = vadd.f32 %v8147_v27, %v8118_v10  ;;  %v8081_v42 = vpop.f32.mrb[188].mxu1  ;;  %v8302_v60 = vpop.f32.mrb[208].mxu0 }
 0x904   : > { %v8337_v26 = vld [vmem:[#allocation2 + $0x8] sm:$0xff]  ;;  %v8148_v8 = vrot.slane %v8081_v42, 1  ;;  %v8369_v5 = vrot.slane %v8302_v60, 2  ;;  %v11598_v33 = vpop.f32.mrb[189].mxu1  ;;  %v11653_v20 = vpop.f32.mrb[209].mxu0 }
 0x905   : > { %v8396_v3 = vadd.f32 %v8364_v0, %v8337_v26  ;;  %8189 = vst.msk [vmem:[#allocation2 + $0x18] sm:$0xff] %vm7027_vm3, %v8177_v6  ;;  %v8124_v33 = vld [vmem:[#allocation2 + $0x48] sm:$0xff] }
 0x906   : > { %v8149_v15 = vsel %vm1927_vm9, %v8146_v45, %v8148_v8  ;;  %v8370_v13 = vsel %vm2361_vm12, %v8367_v61, %v8369_v5 }
 0x907   : > { %8408 = vst.msk [vmem:[#allocation2 + $0x8] sm:$0xff] %vm7027_vm3, %v8396_v3  ;;  %v8178_v36 = vadd.f32 %v8149_v15, %v8119_v21  ;;  %v8086_v41 = vpop.f32.mrb[190].mxu1  ;;  %v8307_v23 = vpop.f32.mrb[210].mxu0 }
 0x908   : > { %v8338_v12 = vld [vmem:[#allocation2 + $0x10] sm:$0xff]  ;;  %v8150_v25 = vrot.slane %v8086_v41, 1  ;;  %v8371_v58 = vrot.slane %v8307_v23, 2  ;;  %v11601_v30 = vpop.f32.mrb[191].mxu1  ;;  %v11656_v31 = vpop.f32.mrb[211].mxu0 }
 0x909   : > { %v8397_v16 = vadd.f32 %v8366_v49, %v8338_v12  ;;  %8190 = vst.msk [vmem:[#allocation2 + $0x20] sm:$0xff] %vm7027_vm3, %v8178_v36  ;;  %v8126_v30 = vld [vmem:[#allocation2 + $0x58] sm:$0x7]  ;;  %v8125_v31 = vld [vmem:[#allocation2 + $0x50] sm:$0xff] }
 0x90a   : > { %v8151_v48 = vsel %vm1927_vm9, %v8148_v8, %v8150_v25  ;;  %v8372_v63 = vsel %vm2361_vm12, %v8369_v5, %v8371_v58 }
 0x90b   : > { %8409 = vst.msk [vmem:[#allocation2 + $0x10] sm:$0xff] %vm7027_vm3, %v8397_v16  ;;  %v8179_v57 = vadd.f32 %v8151_v48, %v8120_v35  ;;  %v8091_v7 = vpop.f32.mrb[192].mxu1  ;;  %v8312_v39 = vpop.f32.mrb[212].mxu0 }
 0x90c   : > { %v8339_v51 = vld [vmem:[#allocation2 + $0x18] sm:$0xff]  ;;  %v8152_v38 = vrot.slane %v8091_v7, 1  ;;  %v8373_v18 = vrot.slane %v8312_v39, 2  ;;  %v11604_v22 = vpop.f32.mrb[193].mxu1  ;;  %v11659_v32 = vpop.f32.mrb[213].mxu0 }
 0x90d   : > { %v8398_v62 = vadd.f32 %v8368_v59, %v8339_v51  ;;  %8191 = vst.msk [vmem:[#allocation2 + $0x28] sm:$0xff] %vm7027_vm3, %v8179_v57 }
 0x90e   : > { %v8153_v46 = vsel %vm1927_vm9, %v8150_v25, %v8152_v38  ;;  %v8374_v0 = vsel %vm2361_vm12, %v8371_v58, %v8373_v18 }
 0x90f   : > { %8410 = vst.msk [vmem:[#allocation2 + $0x18] sm:$0xff] %vm7027_vm3, %v8398_v62  ;;  %v8180_v2 = vadd.f32 %v8153_v46, %v8121_v43  ;;  %v8096_v44 = vpop.f32.mrb[194].mxu1  ;;  %v8317_v14 = vpop.f32.mrb[214].mxu0 }
 0x910   : > { %v8340_v24 = vld [vmem:[#allocation2 + $0x20] sm:$0xff]  ;;  %v8154_v37 = vrot.slane %v8096_v44, 1  ;;  %v8375_v53 = vrot.slane %v8317_v14, 2  ;;  %v11607_v29 = vpop.f32.mrb[195].mxu1  ;;  %v11662_v56 = vpop.f32.mrb[215].mxu0 }
 0x911   : > { %v8399_v47 = vadd.f32 %v8370_v13, %v8340_v24  ;;  %8192 = vst.msk [vmem:[#allocation2 + $0x30] sm:$0xff] %vm7027_vm3, %v8180_v2 }
 0x912   : > { %v8155_v19 = vsel %vm1927_vm9, %v8152_v38, %v8154_v37  ;;  %v8376_v49 = vsel %vm2361_vm12, %v8373_v18, %v8375_v53 }
 0x913   : > { %8411 = vst.msk [vmem:[#allocation2 + $0x20] sm:$0xff] %vm7027_vm3, %v8399_v47  ;;  %v8181_v11 = vadd.f32 %v8155_v19, %v8122_v55  ;;  %v8101_v17 = vpop.f32.mrb[196].mxu1  ;;  %v8322_v34 = vpop.f32.mrb[216].mxu0  ;;  %v8558_v19 = vld [vmem:[#allocation2 + $0x8] sm:$0xff] }
 0x914   : > { %v8341_v40 = vld [vmem:[#allocation2 + $0x28] sm:$0xff]  ;;  %v8156_v4 = vrot.slane %v8101_v17, 1  ;;  %v8377_v52 = vrot.slane %v8322_v34, 2  ;;  %v11610_v45 = vpop.f32.mrb[197].mxu1  ;;  %v11665_v61 = vpop.f32.mrb[217].mxu0 }
 0x915   : > { %v8400_v50 = vadd.f32 %v8372_v63, %v8341_v40  ;;  %8193 = vst.msk [vmem:[#allocation2 + $0x38] sm:$0xff] %vm7027_vm3, %v8181_v11 }
 0x916   : > { %v8157_v1 = vsel %vm1927_vm9, %v8154_v37, %v8156_v4  ;;  %v8378_v28 = vsel %vm2361_vm12, %v8375_v53, %v8377_v52  ;;  %v8557_v37 = vld [vmem:[#allocation2] sm:$0xff] }
 0x917   : > { %8412 = vst.msk [vmem:[#allocation2 + $0x28] sm:$0xff] %vm7027_vm3, %v8400_v50  ;;  %v8182_v10 = vadd.f32 %v8157_v1, %v8123_v54  ;;  %v8106_v27 = vpop.f32.mrb[198].mxu1  ;;  %v8327_v59 = vpop.f32.mrb[218].mxu0 }
 0x918   : > { %v8342_v6 = vld [vmem:[#allocation2 + $0x30] sm:$0xff]  ;;  %v8158_v42 = vrot.slane %v8106_v27, 1  ;;  %v8379_v60 = vrot.slane %v8327_v59, 2  ;;  %v11613_v26 = vpop.f32.mrb[199].mxu1  ;;  %v11668_v8 = vpop.f32.mrb[219].mxu0  ;;  %v11948_v59 = vld [vmem:[%s16312_s1] sm:$0xff] }
 0x919   : > { %v8401_v5 = vadd.f32 %v8374_v0, %v8342_v6  ;;  %8194 = vst.msk [vmem:[#allocation2 + $0x40] sm:$0xff] %vm7027_vm3, %v8182_v10  ;;  %v8560_v10 = vld [vmem:[#allocation2 + $0x18] sm:$0xff] }
 0x91a   : > { %v8159_v20 = vsel %vm1927_vm9, %v8156_v4, %v8158_v42  ;;  %v8380_v3 = vsel %vm2361_vm12, %v8377_v52, %v8379_v60  ;;  %v8559_v4 = vld [vmem:[#allocation2 + $0x10] sm:$0xff] }
 0x91b   : > { %8413 = vst.msk [vmem:[#allocation2 + $0x30] sm:$0xff] %vm7027_vm3, %v8401_v5  ;;  %v8183_v21 = vadd.f32 %v8159_v20, %v8124_v33  ;;  %v8111_v15 = vpop.f32.mrb[200].mxu1  ;;  %v8332_v13 = vpop.f32.mrb[220].mxu0 }
 0x91c   : > { %v8343_v36 = vld [vmem:[#allocation2 + $0x38] sm:$0xff]  ;;  %v8160_v41 = vrot.slane %v8111_v15, 1  ;;  %v8381_v23 = vrot.slane %v8332_v13, 2  ;;  %v11616_v12 = vpop.f32.mrb[201].mxu1  ;;  %v11671_v25 = vpop.f32.mrb[221].mxu0  ;;  %v11949_v15 = vld [vmem:[%s16312_s1 + $0x8] sm:$0xff] }
 0x91d   : > { %v8402_v58 = vadd.f32 %v8376_v49, %v8343_v36  ;;  %8195 = vst.msk [vmem:[#allocation2 + $0x48] sm:$0xff] %vm7027_vm3, %v8183_v21 }
 0x91e   : > { %v8161_v16 = vsel %vm1927_vm9, %v8158_v42, %v8160_v41  ;;  %v8185_v35 = vadd.f32 %v8160_v41, %v8126_v30  ;;  %v8382_v48 = vsel %vm2361_vm12, %v8379_v60, %v8381_v23 }
 0x91f   : > { %8414 = vst.msk [vmem:[#allocation2 + $0x38] sm:$0xff] %vm7027_vm3, %v8402_v58  ;;  %v8184_v63 = vadd.f32 %v8161_v16, %v8125_v31  ;;  %v8494_v57 = vpop.f32.mrb[202].mxu1  ;;  %v8562_v31 = vld [vmem:[#allocation2 + $0x28] sm:$0xff] }
 0x920   : > { %v8344_v7 = vld [vmem:[#allocation2 + $0x40] sm:$0xff]  ;;  %8197 = vst.msk [vmem:[#allocation2 + $0x58] sm:$0x7] %vm7389_vm4, %v8185_v35  ;;  %v11690_v39 = vpop.f32.mrb[203].mxu1  ;;  %v11950_v35 = vld [vmem:[%s16312_s1 + $0x10] sm:$0xff] }
 0x921   : > { %v8403_v51 = vadd.f32 %v8378_v28, %v8344_v7  ;;  %8196 = vst.msk [vmem:[#allocation2 + $0x50] sm:$0xff] %vm7027_vm3, %v8184_v63 }
 0x923   : > { %8415 = vst.msk [vmem:[#allocation2 + $0x40] sm:$0xff] %vm7027_vm3, %v8403_v51  ;;  %v8498_v38 = vpop.f32.mrb[204].mxu1 }
 0x924   : > { %v8345_v18 = vld [vmem:[#allocation2 + $0x48] sm:$0xff]  ;;  %v11693_v22 = vpop.f32.mrb[205].mxu1  ;;  %v8581_v2 = vrot.slane %v8498_v38, 3 }
 0x925   : > { %v8404_v32 = vadd.f32 %v8380_v3, %v8345_v18  ;;  %v8561_v3 = vld [vmem:[#allocation2 + $0x20] sm:$0xff]  ;;  %v8563_v22 = vld [vmem:[#allocation2 + $0x30] sm:$0xff] }
 0x927   : > { %8416 = vst.msk [vmem:[#allocation2 + $0x48] sm:$0xff] %vm7027_vm3, %v8404_v32  ;;  %v8347_v62 = vld [vmem:[#allocation2 + $0x58] sm:$0x3]  ;;  %v8503_v43 = vpop.f32.mrb[206].mxu1 }
 0x928   : > { %v8346_v46 = vld [vmem:[#allocation2 + $0x50] sm:$0xff]  ;;  %v8406_v0 = vadd.f32 %v8381_v23, %v8347_v62  ;;  %v8582_v44 = vrot.slane %v8503_v43, 3  ;;  %v11696_v14 = vpop.f32.mrb[207].mxu1  ;;  %v11951_v62 = vld [vmem:[%s16312_s1 + $0x18] sm:$0xff] }
 0x929   : > { %v8405_v24 = vadd.f32 %v8382_v48, %v8346_v46 }
 0x92a   : > { %8418 = vst.msk [vmem:[#allocation2 + $0x58] sm:$0x3] %vm7214_vm0, %v8406_v0  ;;  %v8583_v53 = vsel %vm2576_vm11, %v8581_v2, %v8582_v44 }
 0x92b   : > { %8417 = vst.msk [vmem:[#allocation2 + $0x50] sm:$0xff] %vm7027_vm3, %v8405_v24  ;;  %v8616_v29 = vadd.f32 %v8583_v53, %v8557_v37  ;;  %v8508_v56 = vpop.f32.mrb[208].mxu1  ;;  %v8564_v53 = vld [vmem:[#allocation2 + $0x38] sm:$0xff] }
 0x92c   : > { %v8584_v47 = vrot.slane %v8508_v56, 3  ;;  %v11699_v55 = vpop.f32.mrb[209].mxu1  ;;  %v11952_v56 = vld [vmem:[%s16312_s1 + $0x20] sm:$0xff] }
 0x92d   : > { %8628 = vst.msk [vmem:[#allocation2] sm:$0xff] %vm7027_vm3, %v8616_v29 }
 0x92e   : > { %v8585_v49 = vsel %vm2576_vm11, %v8582_v44, %v8584_v47 }
 0x92f   : > { %v8617_v11 = vadd.f32 %v8585_v49, %v8558_v19  ;;  %v8513_v17 = vpop.f32.mrb[210].mxu1 }
 0x930   : > { %v8586_v34 = vrot.slane %v8513_v17, 3  ;;  %v11702_v40 = vpop.f32.mrb[211].mxu1 }
 0x931   : > { %8629 = vst.msk [vmem:[#allocation2 + $0x8] sm:$0xff] %vm7027_vm3, %v8617_v11 }
 0x932   : > { %v8587_v52 = vsel %vm2576_vm11, %v8584_v47, %v8586_v34 }
 0x933   : > { %v8618_v45 = vadd.f32 %v8587_v52, %v8559_v4  ;;  %v8518_v61 = vpop.f32.mrb[212].mxu1  ;;  %v8565_v4 = vld [vmem:[#allocation2 + $0x40] sm:$0xff] }
 0x934   : > { %v8640_v50 = vld [vmem:[#allocation2] sm:$0xff]  ;;  %v8588_v54 = vrot.slane %v8518_v61, 3  ;;  %v11705_v1 = vpop.f32.mrb[213].mxu1 }
 0x935   : > { %v8660_v28 = vadd.f32 %v16155_v9, %v8640_v50  ;;  %8630 = vst.msk [vmem:[#allocation2 + $0x10] sm:$0xff] %vm7027_vm3, %v8618_v45  ;;  %v11953_v45 = vld [vmem:[%s16312_s1 + $0x28] sm:$0xff] }
 0x936   : > { %v8589_v27 = vsel %vm2576_vm11, %v8586_v34, %v8588_v54 }
 0x937   : > { %v8673_v6 = vmul.f32 %v11948_v59, %v8660_v28  ;;  %v8619_v42 = vadd.f32 %v8589_v27, %v8560_v10  ;;  %v8523_v60 = vpop.f32.mrb[214].mxu1 }
 0x938   : > { %v8641_v26 = vld [vmem:[#allocation2 + $0x8] sm:$0xff]  ;;  %v8590_v8 = vrot.slane %v8523_v60, 3  ;;  %v11708_v5 = vpop.f32.mrb[215].mxu1  ;;  %v11954_v60 = vld [vmem:[%s16312_s1 + $0x30] sm:$0xff] }
 0x939   : > { %v8686_v33 = vmul.f32 %v11948_v59, %v8673_v6  ;;  %v8661_v20 = vadd.f32 %v16155_v9, %v8641_v26  ;;  %8631 = vst.msk [vmem:[#allocation2 + $0x18] sm:$0xff] %vm7027_vm3, %v8619_v42  ;;  %v8566_v6 = vld [vmem:[#allocation2 + $0x48] sm:$0xff] }
 0x93a   : > { %v8591_v21 = vsel %vm2576_vm11, %v8588_v54, %v8590_v8 }
 0x93b   : > { %8699 = vst.msk [vmem:[%s16171_s11] sm:$0xff] %vm7027_vm3, %v8686_v33  ;;  %v8674_v13 = vmul.f32 %v11949_v15, %v8661_v20  ;;  %v8620_v36 = vadd.f32 %v8591_v21, %v8561_v3  ;;  %v8528_v41 = vpop.f32.mrb[216].mxu1 }
 0x93c   : > { %v8642_v23 = vld [vmem:[#allocation2 + $0x10] sm:$0xff]  ;;  %v8592_v12 = vrot.slane %v8528_v41, 3  ;;  %v11711_v25 = vpop.f32.mrb[217].mxu1 }
 0x93d   : > { %v8687_v58 = vmul.f32 %v11949_v15, %v8674_v13  ;;  %v8662_v30 = vadd.f32 %v16155_v9, %v8642_v23  ;;  %8632 = vst.msk [vmem:[#allocation2 + $0x20] sm:$0xff] %vm7027_vm3, %v8620_v36  ;;  %v8568_v13 = vld [vmem:[#allocation2 + $0x58] sm:$0x1]  ;;  %v8567_v36 = vld [vmem:[#allocation2 + $0x50] sm:$0xff] }
 0x93e   : > { %v8593_v16 = vsel %vm2576_vm11, %v8590_v8, %v8592_v12 }
 0x93f   : > { %8700 = vst.msk [vmem:[%s16171_s11 + $0x8] sm:$0xff] %vm7027_vm3, %v8687_v58  ;;  %v8675_v48 = vmul.f32 %v11950_v35, %v8662_v30  ;;  %v8621_v63 = vadd.f32 %v8593_v16, %v8562_v31  ;;  %v8533_v57 = vpop.f32.mrb[218].mxu1 }
 0x940   : > { %v8643_v7 = vld [vmem:[#allocation2 + $0x18] sm:$0xff]  ;;  %v8594_v39 = vrot.slane %v8533_v57, 3  ;;  %v11714_v51 = vpop.f32.mrb[219].mxu1 }
 0x941   : > { %v8688_v38 = vmul.f32 %v11950_v35, %v8675_v48  ;;  %v8663_v18 = vadd.f32 %v16155_v9, %v8643_v7  ;;  %8633 = vst.msk [vmem:[#allocation2 + $0x28] sm:$0xff] %vm7027_vm3, %v8621_v63  ;;  %v11956_v35 = vld [vmem:[%s16312_s1 + $0x40] sm:$0xff] }
 0x942   : > { %v8595_v32 = vsel %vm2576_vm11, %v8592_v12, %v8594_v39  ;;  %v11955_v12 = vld [vmem:[%s16312_s1 + $0x38] sm:$0xff] }
 0x943   : > { %8701 = vst.msk [vmem:[%s16171_s11 + $0x10] sm:$0xff] %vm7027_vm3, %v8688_v38  ;;  %v8676_v43 = vmul.f32 %v11951_v62, %v8663_v18  ;;  %v8622_v46 = vadd.f32 %v8595_v32, %v8563_v22  ;;  %v8538_v0 = vpop.f32.mrb[220].mxu1 }
 0x944   : > { %v8644_v2 = vld [vmem:[#allocation2 + $0x20] sm:$0xff]  ;;  %v8596_v44 = vrot.slane %v8538_v0, 3  ;;  %v11717_v14 = vpop.f32.mrb[221].mxu1  ;;  %v11959_v0 = vld [vmem:[%s16312_s1 + $0x50] sm:$0xff] }
 0x945   : > { %v8689_v24 = vmul.f32 %v11951_v62, %v8676_v43  ;;  %v8664_v37 = vadd.f32 %v16155_v9, %v8644_v2  ;;  %8634 = vst.msk [vmem:[#allocation2 + $0x30] sm:$0xff] %vm7027_vm3, %v8622_v46  ;;  %v11958_v43 = vld [vmem:[%s16312_s1 + $0x58] sm:$0xff] }
 0x946   : > { %v8597_v29 = vsel %vm2576_vm11, %v8594_v39, %v8596_v44  ;;  %v11957_v39 = vld [vmem:[%s16312_s1 + $0x48] sm:$0xff] }
 0x947   : > { %8702 = vst.msk [vmem:[%s16171_s11 + $0x18] sm:$0xff] %vm7027_vm3, %v8689_v24  ;;  %v8677_v47 = vmul.f32 %v11952_v56, %v8664_v37  ;;  %v8623_v55 = vadd.f32 %v8597_v29, %v8564_v53  ;;  %v8543_v19 = vpop.f32.mrb[222].mxu1 }
 0x948   : > { %v8645_v49 = vld [vmem:[#allocation2 + $0x28] sm:$0xff]  ;;  %v8598_v11 = vrot.slane %v8543_v19, 3  ;;  %v11720_v17 = vpop.f32.mrb[223].mxu1 }
 0x949   : > { %v8690_v34 = vmul.f32 %v11952_v56, %v8677_v47  ;;  %v8665_v40 = vadd.f32 %v16155_v9, %v8645_v49  ;;  %8635 = vst.msk [vmem:[#allocation2 + $0x38] sm:$0xff] %vm7027_vm3, %v8623_v55 }
 0x94a   : > { %v8599_v52 = vsel %vm2576_vm11, %v8596_v44, %v8598_v11 }
 0x94b   : > { %8703 = vst.msk [vmem:[%s16171_s11 + $0x20] sm:$0xff] %vm7027_vm3, %v8690_v34  ;;  %v8678_v61 = vmul.f32 %v11953_v45, %v8665_v40  ;;  %v8624_v50 = vadd.f32 %v8599_v52, %v8565_v4  ;;  %v8548_v54 = vpop.f32.mrb[224].mxu1 }
 0x94c   : > { %v8646_v1 = vld [vmem:[#allocation2 + $0x30] sm:$0xff]  ;;  %v8600_v28 = vrot.slane %v8548_v54, 3  ;;  %v11723_v10 = vpop.f32.mrb[225].mxu1 }
 0x94d   : > { %v8691_v27 = vmul.f32 %v11953_v45, %v8678_v61  ;;  %v8666_v59 = vadd.f32 %v16155_v9, %v8646_v1  ;;  %8636 = vst.msk [vmem:[#allocation2 + $0x40] sm:$0xff] %vm7027_vm3, %v8624_v50 }
 0x94e   : > { %v8601_v42 = vsel %vm2576_vm11, %v8598_v11, %v8600_v28 }
 0x94f   : > { %8704 = vst.msk [vmem:[%s16171_s11 + $0x28] sm:$0xff] %vm7027_vm3, %v8691_v27  ;;  %v8679_v26 = vmul.f32 %v11954_v60, %v8666_v59  ;;  %v8625_v8 = vadd.f32 %v8601_v42, %v8566_v6  ;;  %v8553_v5 = vpop.f32.mrb[226].mxu1 }
 0x950   : > { %v8647_v33 = vld [vmem:[#allocation2 + $0x38] sm:$0xff]  ;;  %v8602_v20 = vrot.slane %v8553_v5, 3  ;;  %v11726_v3 = vpop.f32.mrb[227].mxu1 }
 0x951   : > { %v8692_v21 = vmul.f32 %v11954_v60, %v8679_v26  ;;  %v8667_v15 = vadd.f32 %v16155_v9, %v8647_v33  ;;  %8637 = vst.msk [vmem:[#allocation2 + $0x48] sm:$0xff] %vm7027_vm3, %v8625_v8 }
 0x952   : > { %v8603_v41 = vsel %vm2576_vm11, %v8600_v28, %v8602_v20  ;;  %v8627_v23 = vadd.f32 %v8602_v20, %v8568_v13 }
 0x953   : > { %8705 = vst.msk [vmem:[%s16171_s11 + $0x30] sm:$0xff] %vm7027_vm3, %v8692_v21  ;;  %v8680_v25 = vmul.f32 %v11955_v12, %v8667_v15  ;;  %v8626_v58 = vadd.f32 %v8603_v41, %v8567_v36 }
 0x954   : > { %v8648_v30 = vld [vmem:[#allocation2 + $0x40] sm:$0xff]  ;;  %8639 = vst.msk [vmem:[#allocation2 + $0x58] sm:$0x1] %vm7039_vm8, %v8627_v23 }
 0x955   : > { %v8693_v31 = vmul.f32 %v11955_v12, %v8680_v25  ;;  %v8668_v16 = vadd.f32 %v16155_v9, %v8648_v30  ;;  %8638 = vst.msk [vmem:[#allocation2 + $0x50] sm:$0xff] %vm7027_vm3, %v8626_v58 }
 0x957   : > { %8706 = vst.msk [vmem:[%s16171_s11 + $0x38] sm:$0xff] %vm7027_vm3, %v8693_v31  ;;  %v8681_v48 = vmul.f32 %v11956_v35, %v8668_v16 }
 0x958   : > { %v8649_v63 = vld [vmem:[#allocation2 + $0x48] sm:$0xff] }
 0x959   : > { %v8694_v57 = vmul.f32 %v11956_v35, %v8681_v48  ;;  %v8669_v7 = vadd.f32 %v16155_v9, %v8649_v63 }
 0x95b   : > { %8707 = vst.msk [vmem:[%s16171_s11 + $0x40] sm:$0xff] %vm7027_vm3, %v8694_v57  ;;  %v8682_v51 = vmul.f32 %v11957_v39, %v8669_v7  ;;  %v8651_v38 = vld [vmem:[#allocation2 + $0x58] sm:$0xff] }
 0x95c   : > { %v8650_v18 = vld [vmem:[#allocation2 + $0x50] sm:$0xff]  ;;  %v8671_v22 = vadd.f32 %v16155_v9, %v8651_v38 }
 0x95d   : > { %v8695_v32 = vmul.f32 %v11957_v39, %v8682_v51  ;;  %v8670_v62 = vadd.f32 %v16155_v9, %v8650_v18 }
 0x95e   : > { %v8684_v46 = vmul.f32 %v11958_v43, %v8671_v22 }
 0x95f   : > { %8708 = vst.msk [vmem:[%s16171_s11 + $0x48] sm:$0xff] %vm7027_vm3, %v8695_v32  ;;  %v8683_v2 = vmul.f32 %v11959_v0, %v8670_v62 }
 0x960   : > { %v8697_v44 = vmul.f32 %v11958_v43, %v8684_v46 }
 0x961   : > { %v8696_v14 = vmul.f32 %v11959_v0, %v8683_v2 }
 0x962   : > { %8710 = vst.msk [vmem:[%s16171_s11 + $0x58] sm:$0xff] %vm7027_vm3, %v8697_v44 }
 0x963   : > { %8709 = vst.msk [vmem:[%s16171_s11 + $0x50] sm:$0xff] %vm7027_vm3, %v8696_v14 }
 0x964 PF: > { %s24_s23 = sadd.s32 1, %s11966_s23  }
 0x965   : > { %p21_p4 = scmp.ge.s32.totalorder %s24_s23, 4  }
 0x967   :  { %23 = sbr.rel (!%p21_p4) target bundleno = 3 (0x3), region = 130 }

</bundles_post_ra>
